<compile_context>
chip_gen: v7x
topology: tpu7x:2x2x1
jax: 0.10.0
libtpu: 0.0.40
codegen_flags: <defaults>
</compile_context>

<pallas_src>
import functools

import jax
import jax.numpy as jnp
from jax.experimental import pallas as pl
from jax.experimental.pallas import tpu as pltpu

LEAKY_SLOPE = 0.2
BN_EPS = 1e-5
_K_ORDER = (1, 2, 3, 0)          # ConvTranspose tap order expected by the col2im


def _round_up(x, m):
    return (x + m - 1) // m * m


def _leaky(v):
    return jnp.where(v >= 0, v, LEAKY_SLOPE * v)


# --------------------------------------------------------------------------- #
# In-kernel col2im for ConvTranspose2d(kernel=4, stride=2, padding=1)
# --------------------------------------------------------------------------- #
def _col2im_packed(y, h, w, co):
    """Overlap-add of the per-pixel matmul output, fully inside VMEM.

    y  : (h*w, 16*co) f32, rows = input pixels (iy, ix) row-major, lanes =
         (ky', kx', co) with ky'/kx' in _K_ORDER = [1, 2, 3, 0].
    out: (2*h*w, 2*co) f32, rows = (oy, ix) row-major, lanes = (px, co).
         A row-major reshape to (2*h * 2*w, co) outside the kernel yields the
         true output pixel order (oy, ox) with ox = 2*ix + px.
    """
    hw = h * w
    co2 = 2 * co
    colmod = jax.lax.broadcasted_iota(jnp.int32, (hw, 1), 0) % w
    lane_lo = jax.lax.broadcasted_iota(jnp.int32, (1, co2), 1) < co

    def shift_down(x, s):        # out[r] = x[r - s]   (zero-filled)
        return jnp.concatenate(
            [jnp.zeros((s, x.shape[-1]), x.dtype), x[:hw - s, :]], axis=0)

    def shift_up(x, s):          # out[r] = x[r + s]   (zero-filled)
        return jnp.concatenate(
            [x[s:, :], jnp.zeros((s, x.shape[-1]), x.dtype)], axis=0)

    packed = []
    for a in range(4):                                      # a -> ky = _K_ORDER[a]
        base = y[:, a * 4 * co:a * 4 * co + co2]            # taps kx=1 | kx=2
        shif = y[:, a * 4 * co + co2:a * 4 * co + 4 * co]   # taps kx=3 | kx=0
        dn = jnp.where(colmod >= 1, shift_down(shif, 1), 0.0)       # from ix-1
        up = jnp.where(colmod <= w - 2, shift_up(shif, 1), 0.0)     # from ix+1
        packed.append(base + jnp.where(lane_lo, dn, up))    # lanes (px, co)
    r_even = packed[0] + shift_down(packed[2], w)           # oy=2i  : ky=1 & ky=3
    r_odd = packed[1] + shift_up(packed[3], w)              # oy=2i+1: ky=2 & ky=0
    rows = []
    for i in range(h):                                      # interleave oy parity
        rows.append(r_even[i * w:(i + 1) * w, :])
        rows.append(r_odd[i * w:(i + 1) * w, :])
    return jnp.concatenate(rows, axis=0)


# --------------------------------------------------------------------------- #
# Pallas kernels (one per ConvTranspose stage; fc fused into stage 1)
# --------------------------------------------------------------------------- #
def _stage1_kernel(xc_ref, wfc_ref, bfc_ref, w1_ref, b1_ref,
                   z1_ref, ssum_ref, ssq_ref):
    # fc + LeakyReLU  (fc columns are pre-permuted to pixel-major/channel-minor)
    h0 = jnp.dot(xc_ref[0].astype(jnp.bfloat16), wfc_ref[...],
                 preferred_element_type=jnp.float32)                # (1, 2048)
    h0 = _leaky(h0 + bfc_ref[...])
    # gather the 16 pixels into rows -> conv1 per-pixel matmul input (16, 128)
    x1 = jnp.concatenate([h0[:, p * 128:(p + 1) * 128] for p in range(16)],
                         axis=0)
    y1 = jnp.dot(x1.astype(jnp.bfloat16), w1_ref[...],
                 preferred_element_type=jnp.float32)                # (16, 1024)
    z1 = _leaky(_col2im_packed(y1, 4, 4, 64) + b1_ref[...])         # (32, 128)
    z1_ref[0] = z1
    # per-image BatchNorm partial statistics, lane-dense (1, 128) rows
    ssum_ref[0] = jnp.sum(z1, axis=0, keepdims=True)
    ssq_ref[0] = jnp.sum(z1 * z1, axis=0, keepdims=True)


def _stage2_kernel(z1_ref, sc_ref, sh_ref, w2_ref, b2_ref, z2_ref):
    # BatchNorm normalize/affine + LeakyReLU fused as the matmul pre-stage
    a = _leaky(z1_ref[0] * sc_ref[...] + sh_ref[...])               # (64, 64)
    y2 = jnp.dot(a.astype(jnp.bfloat16), w2_ref[...],
                 preferred_element_type=jnp.float32)                # (64, 512)
    z2_ref[0] = _leaky(_col2im_packed(y2, 8, 8, 32) + b2_ref[...])  # (128, 64)


def _stage3_kernel(z2_ref, w3_ref, b3_ref, o_ref, *, co_pad):
    y3 = jnp.dot(z2_ref[0].astype(jnp.bfloat16), w3_ref[...],
                 preferred_element_type=jnp.float32)                # (256, 16*co_pad)
    s3 = _col2im_packed(y3, 16, 16, co_pad) + b3_ref[...]           # (512, 2*co_pad)
    o_ref[0] = jax.nn.sigmoid(_leaky(s3))


# --------------------------------------------------------------------------- #
# Parameters: synthetic init (torch layouts) + one-time preprocessing
# --------------------------------------------------------------------------- #
def init_params(key, latent_dim, num_classes, out_channels):
    ks = jax.random.split(key, 8)

    def rnd(k, fan_in, shape):
        return jax.random.normal(k, shape, jnp.float32) / jnp.sqrt(float(fan_in))

    in_fc = latent_dim + num_classes
    return {
        # fc weight (in, out); output columns in torch's (c, y, x) view order
        "W_fc": rnd(ks[0], in_fc, (in_fc, 128 * 16)),
        "b_fc": rnd(ks[7], in_fc, (128 * 16,)),
        # ConvTranspose2d weights in torch layout (C_in, C_out, kH, kW)
        "W1": rnd(ks[1], 128 * 16, (128, 64, 4, 4)),
        "b1": rnd(ks[2], 128 * 16, (64,)),
        "g1": jnp.ones((64,), jnp.float32),    # BatchNorm2d gamma (torch default)
        "be1": jnp.zeros((64,), jnp.float32),  # BatchNorm2d beta
        "W2": rnd(ks[3], 64 * 16, (64, 32, 4, 4)),
        "b2": rnd(ks[4], 64 * 16, (32,)),
        "W3": rnd(ks[5], 32 * 16, (32, out_channels, 4, 4)),
        "b3": rnd(ks[6], 32 * 16, (out_channels,)),
    }


def prepare_params(params):
    """One-time weight preprocessing: fc column permutation, (ky',kx',co)
    channel-minor conv matmul layout, channel padding, bf16 casts."""
    in_fc = params["W_fc"].shape[0]
    k_fc = _round_up(in_fc, 8)
    w_fc = params["W_fc"].reshape(in_fc, 128, 4, 4).transpose(0, 2, 3, 1)
    w_fc = w_fc.reshape(in_fc, 2048)
    w_fc = jnp.pad(w_fc, ((0, k_fc - in_fc), (0, 0))).astype(jnp.bfloat16)
    b_fc = params["b_fc"].reshape(128, 4, 4).transpose(1, 2, 0).reshape(1, 2048)

    order = jnp.array(_K_ORDER)

    def convt(w, co_pad=None):
        ci, co = w.shape[0], w.shape[1]
        wt = jnp.transpose(w, (0, 2, 3, 1))                  # (Cin, kH, kW, Cout)
        wt = jnp.take(jnp.take(wt, order, axis=1), order, axis=2)
        if co_pad is not None and co_pad > co:
            wt = jnp.pad(wt, ((0, 0), (0, 0), (0, 0), (0, co_pad - co)))
            co = co_pad
        return wt.reshape(ci, 16 * co).astype(jnp.bfloat16)

    out_ch = params["b3"].shape[0]
    co_pad = _round_up(out_ch, 8)                            # lane-dense conv3 matmul
    b3_pad = jnp.pad(params["b3"], (0, co_pad - out_ch))

    return {
        "W_fc": w_fc, "b_fc": b_fc,
        "Wm1": convt(params["W1"]),
        "b1p": jnp.tile(params["b1"], 2).reshape(1, 128),    # (px, c) lane tiling
        "g1": params["g1"], "be1": params["be1"],
        "Wm2": convt(params["W2"]),
        "b2p": jnp.tile(params["b2"], 2).reshape(1, 64),
        "Wm3": convt(params["W3"], co_pad=co_pad),
        "b3p": jnp.tile(b3_pad, 2).reshape(1, 2 * co_pad),
    }


# --------------------------------------------------------------------------- #
# Forward pass (matches torch ConvCDecoder.forward)
# --------------------------------------------------------------------------- #
def conv_c_decoder_forward(prep, x, y, num_classes, out_channels):
    n = x.shape[0]
    k_fc = prep["W_fc"].shape[0]
    co_pad = prep["Wm3"].shape[1] // 16
    par = pltpu.CompilerParams(dimension_semantics=("parallel",))

    y_oh = jax.nn.one_hot(y, num_classes, dtype=jnp.float32)
    xc = jnp.concatenate([x, y_oh], axis=1)
    xc = jnp.pad(xc, ((0, 0), (0, k_fc - xc.shape[1]))).reshape(n, 1, k_fc)

    # stage 1: fc + LeakyReLU + conv1 (matmul + col2im) + bias + LeakyReLU
    #          + per-image BatchNorm partial statistics
    z1p, ssum, ssq = pl.pallas_call(
        _stage1_kernel,
        out_shape=(jax.ShapeDtypeStruct((n, 32, 128), jnp.float32),
                   jax.ShapeDtypeStruct((n, 1, 128), jnp.float32),
                   jax.ShapeDtypeStruct((n, 1, 128), jnp.float32)),
        grid=(n,),
        in_specs=[
            pl.BlockSpec((1, 1, k_fc), lambda i: (i, 0, 0)),      # latent+label row
            pl.BlockSpec((k_fc, 2048), lambda i: (0, 0)),         # fc weight (resident)
            pl.BlockSpec((1, 2048), lambda i: (0, 0)),            # fc bias
            pl.BlockSpec((128, 1024), lambda i: (0, 0)),          # conv1 weight
            pl.BlockSpec((1, 128), lambda i: (0, 0)),             # conv1 bias (px-tiled)
        ],
        out_specs=(pl.BlockSpec((1, 32, 128), lambda i: (i, 0, 0)),
                   pl.BlockSpec((1, 1, 128), lambda i: (i, 0, 0)),
                   pl.BlockSpec((1, 1, 128), lambda i: (i, 0, 0))),
        compiler_params=par,
    )(xc, prep["W_fc"], prep["b_fc"], prep["Wm1"], prep["b1p"])

    # BatchNorm2d training-mode batch statistics (tiny, outside kernels)
    cnt = float(n * 8 * 8)
    tot = jnp.sum(ssum, axis=(0, 1))
    tot2 = jnp.sum(ssq, axis=(0, 1))
    s = tot[:64] + tot[64:]                       # fold the (px, c) lane halves
    s2 = tot2[:64] + tot2[64:]
    mean = s / cnt
    var = jnp.maximum(s2 / cnt - mean * mean, 0.0)  # biased var (torch normalize)
    inv = jax.lax.rsqrt(var + BN_EPS)
    scale = (prep["g1"] * inv).reshape(1, 64)
    shift = (prep["be1"] - mean * prep["g1"] * inv).reshape(1, 64)
    # TODO(synk): BatchNorm2d running_mean/running_var buffers are not updated.

    z1u = z1p.reshape(n, 64, 64)      # free row-major relabel -> (oy, ox) order

    # stage 2: BN affine + LeakyReLU + conv2 (matmul + col2im) + bias + LeakyReLU
    z2p = pl.pallas_call(
        _stage2_kernel,
        out_shape=jax.ShapeDtypeStruct((n, 128, 64), jnp.float32),
        grid=(n,),
        in_specs=[
            pl.BlockSpec((1, 64, 64), lambda i: (i, 0, 0)),
            pl.BlockSpec((1, 64), lambda i: (0, 0)),              # BN scale
            pl.BlockSpec((1, 64), lambda i: (0, 0)),              # BN shift
            pl.BlockSpec((64, 512), lambda i: (0, 0)),            # conv2 weight
            pl.BlockSpec((1, 64), lambda i: (0, 0)),              # conv2 bias (px-tiled)
        ],
        out_specs=pl.BlockSpec((1, 128, 64), lambda i: (i, 0, 0)),
        compiler_params=par,
    )(z1u, scale, shift, prep["Wm2"], prep["b2p"])

    z2u = z2p.reshape(n, 256, 32)     # free relabel -> (oy, ox) order

    # stage 3: conv3 (matmul + col2im) + bias + LeakyReLU + sigmoid
    o_pk = pl.pallas_call(
        functools.partial(_stage3_kernel, co_pad=co_pad),
        out_shape=jax.ShapeDtypeStruct((n, 512, 2 * co_pad), jnp.float32),
        grid=(n,),
        in_specs=[
            pl.BlockSpec((1, 256, 32), lambda i: (i, 0, 0)),
            pl.BlockSpec((32, 16 * co_pad), lambda i: (0, 0)),    # conv3 weight
            pl.BlockSpec((1, 2 * co_pad), lambda i: (0, 0)),      # conv3 bias (px-tiled)
        ],
        out_specs=pl.BlockSpec((1, 512, 2 * co_pad), lambda i: (i, 0, 0)),
        compiler_params=par,
    )(z2u, prep["Wm3"], prep["b3p"])

    out_nhwc = o_pk.reshape(n, 1024, co_pad)[:, :, :out_channels]
    out_nhwc = out_nhwc.reshape(n, 32, 32, out_channels)
    return out_nhwc.transpose(0, 3, 1, 2)         # NCHW only at the model exit


if __name__ == "__main__":
    latent_dim = 16
    num_classes = 10
    image_shape = [3, 32, 32]   # output spatial 4 -> 8 -> 16 -> 32
    batch = 2

    root = jax.random.PRNGKey(0)
    kp, kx, ky = jax.random.split(root, 3)
    params = init_params(kp, latent_dim, num_classes, image_shape[0])
    prep = prepare_params(params)   # hoisted one-time weight prep

    x = jax.random.normal(kx, (batch, latent_dim), jnp.float32)
    y = jax.random.randint(ky, (batch,), 0, num_classes)

    fwd = jax.jit(lambda p, xv, yv: conv_c_decoder_forward(
        p, xv, yv, num_classes, image_shape[0]))
    out = jax.block_until_ready(fwd(prep, x, y))

    assert out.shape == (batch, image_shape[0], image_shape[1], image_shape[2]), out.shape
    assert out.dtype == jnp.float32
    assert bool(jnp.all(jnp.isfinite(out)))
    assert bool(jnp.all((out >= 0.0) & (out <= 1.0)))  # sigmoid output range
    print("KERNEL_OK")
</pallas_src>

<mosaic_0001>
module attributes {stable_mosaic.version = 11 : i64} {
  func.func @_stage1_kernel(%arg0: i32, %arg1: memref<1x1x32xf32, #tpu.memory_space<vmem>>, %arg2: memref<32x2048xbf16, #tpu.memory_space<vmem>>, %arg3: memref<1x2048xf32, #tpu.memory_space<vmem>>, %arg4: memref<128x1024xbf16, #tpu.memory_space<vmem>>, %arg5: memref<1x128xf32, #tpu.memory_space<vmem>>, %arg6: memref<1x32x128xf32, #tpu.memory_space<vmem>>, %arg7: memref<1x1x128xf32, #tpu.memory_space<vmem>>, %arg8: memref<1x1x128xf32, #tpu.memory_space<vmem>>) attributes {dimension_semantics = [#tpu.dimension_semantics<parallel>], iteration_bounds = array<i64: 2>, scalar_prefetch = 0 : i64, scratch_operands = 0 : i64, tpu.core_type = #tpu.core_type<tc>, window_params = [{transform_indices = @transform_0, window_bounds = array<i64: 1, 1, 32>}, {pipeline_mode = #tpu.pipeline_mode<synchronous>, transform_indices = @transform_1, window_bounds = array<i64: 32, 2048>}, {pipeline_mode = #tpu.pipeline_mode<synchronous>, transform_indices = @transform_2, window_bounds = array<i64: 1, 2048>}, {pipeline_mode = #tpu.pipeline_mode<synchronous>, transform_indices = @transform_3, window_bounds = array<i64: 128, 1024>}, {pipeline_mode = #tpu.pipeline_mode<synchronous>, transform_indices = @transform_4, window_bounds = array<i64: 1, 128>}, {transform_indices = @transform_5, window_bounds = array<i64: 1, 32, 128>}, {transform_indices = @transform_6, window_bounds = array<i64: 1, 1, 128>}, {transform_indices = @transform_7, window_bounds = array<i64: 1, 1, 128>}]} {
    %c0 = arith.constant 0 : index
    %c0_0 = arith.constant 0 : index
    %c0_1 = arith.constant 0 : index
    %0 = vector.load %arg1[%c0, %c0_0, %c0_1] : memref<1x1x32xf32, #tpu.memory_space<vmem>>, vector<1x1x32xf32>
    %1 = vector.shape_cast %0 : vector<1x1x32xf32> to vector<1x32xf32>
    %2 = arith.truncf %1 : vector<1x32xf32> to vector<1x32xbf16>
    %c0_2 = arith.constant 0 : index
    %c0_3 = arith.constant 0 : index
    %3 = vector.load %arg2[%c0_2, %c0_3] : memref<32x2048xbf16, #tpu.memory_space<vmem>>, vector<32x2048xbf16>
    %cst = arith.constant dense<0.000000e+00> : vector<1x2048xf32>
    %4 = tpu.matmul %2, %3, %cst {dimension_numbers = #tpu.dot_dimension_numbers<[1], [0], [0], [1], [0, 0, 1, 1], [], []>} : vector<1x32xbf16>, vector<32x2048xbf16>, vector<1x2048xf32> -> vector<1x2048xf32>
    %c0_4 = arith.constant 0 : index
    %c0_5 = arith.constant 0 : index
    %5 = vector.load %arg3[%c0_4, %c0_5] : memref<1x2048xf32, #tpu.memory_space<vmem>>, vector<1x2048xf32>
    %6 = arith.addf %4, %5 : vector<1x2048xf32>
    %cst_6 = arith.constant 0.000000e+00 : f32
    %7 = vector.broadcast %cst_6 : f32 to vector<1x2048xf32>
    %8 = arith.cmpf oge, %6, %7 : vector<1x2048xf32>
    %cst_7 = arith.constant 2.000000e-01 : f32
    %9 = vector.broadcast %cst_7 : f32 to vector<1x2048xf32>
    %10 = arith.mulf %9, %6 : vector<1x2048xf32>
    %11 = arith.select %8, %6, %10 : vector<1x2048xi1>, vector<1x2048xf32>
    %12 = vector.extract_strided_slice %11 {offsets = [0, 0], sizes = [1, 128], strides = [1, 1]} : vector<1x2048xf32> to vector<1x128xf32>
    %13 = vector.extract_strided_slice %11 {offsets = [0, 128], sizes = [1, 128], strides = [1, 1]} : vector<1x2048xf32> to vector<1x128xf32>
    %14 = vector.extract_strided_slice %11 {offsets = [0, 256], sizes = [1, 128], strides = [1, 1]} : vector<1x2048xf32> to vector<1x128xf32>
    %15 = vector.extract_strided_slice %11 {offsets = [0, 384], sizes = [1, 128], strides = [1, 1]} : vector<1x2048xf32> to vector<1x128xf32>
    %16 = vector.extract_strided_slice %11 {offsets = [0, 512], sizes = [1, 128], strides = [1, 1]} : vector<1x2048xf32> to vector<1x128xf32>
    %17 = vector.extract_strided_slice %11 {offsets = [0, 640], sizes = [1, 128], strides = [1, 1]} : vector<1x2048xf32> to vector<1x128xf32>
    %18 = vector.extract_strided_slice %11 {offsets = [0, 768], sizes = [1, 128], strides = [1, 1]} : vector<1x2048xf32> to vector<1x128xf32>
    %19 = vector.extract_strided_slice %11 {offsets = [0, 896], sizes = [1, 128], strides = [1, 1]} : vector<1x2048xf32> to vector<1x128xf32>
    %20 = vector.extract_strided_slice %11 {offsets = [0, 1024], sizes = [1, 128], strides = [1, 1]} : vector<1x2048xf32> to vector<1x128xf32>
    %21 = vector.extract_strided_slice %11 {offsets = [0, 1152], sizes = [1, 128], strides = [1, 1]} : vector<1x2048xf32> to vector<1x128xf32>
    %22 = vector.extract_strided_slice %11 {offsets = [0, 1280], sizes = [1, 128], strides = [1, 1]} : vector<1x2048xf32> to vector<1x128xf32>
    %23 = vector.extract_strided_slice %11 {offsets = [0, 1408], sizes = [1, 128], strides = [1, 1]} : vector<1x2048xf32> to vector<1x128xf32>
    %24 = vector.extract_strided_slice %11 {offsets = [0, 1536], sizes = [1, 128], strides = [1, 1]} : vector<1x2048xf32> to vector<1x128xf32>
    %25 = vector.extract_strided_slice %11 {offsets = [0, 1664], sizes = [1, 128], strides = [1, 1]} : vector<1x2048xf32> to vector<1x128xf32>
    %26 = vector.extract_strided_slice %11 {offsets = [0, 1792], sizes = [1, 128], strides = [1, 1]} : vector<1x2048xf32> to vector<1x128xf32>
    %27 = vector.extract_strided_slice %11 {offsets = [0, 1920], sizes = [1, 128], strides = [1, 1]} : vector<1x2048xf32> to vector<1x128xf32>
    %28 = tpu.concatenate %12, %13, %14, %15, %16, %17, %18, %19, %20, %21, %22, %23, %24, %25, %26, %27 in 0 : vector<1x128xf32>, vector<1x128xf32>, vector<1x128xf32>, vector<1x128xf32>, vector<1x128xf32>, vector<1x128xf32>, vector<1x128xf32>, vector<1x128xf32>, vector<1x128xf32>, vector<1x128xf32>, vector<1x128xf32>, vector<1x128xf32>, vector<1x128xf32>, vector<1x128xf32>, vector<1x128xf32>, vector<1x128xf32> -> vector<16x128xf32>
    %29 = arith.truncf %28 : vector<16x128xf32> to vector<16x128xbf16>
    %c0_8 = arith.constant 0 : index
    %c0_9 = arith.constant 0 : index
    %30 = vector.load %arg4[%c0_8, %c0_9] : memref<128x1024xbf16, #tpu.memory_space<vmem>>, vector<128x1024xbf16>
    %cst_10 = arith.constant dense<0.000000e+00> : vector<16x1024xf32>
    %31 = tpu.matmul %29, %30, %cst_10 {dimension_numbers = #tpu.dot_dimension_numbers<[1], [0], [0], [1], [0, 0, 1, 1], [], []>} : vector<16x128xbf16>, vector<128x1024xbf16>, vector<16x1024xf32> -> vector<16x1024xf32>
    %32 = tpu.iota {dimensions = array<i32: 0>} : vector<16x1xi32>
    %c4_i32 = arith.constant 4 : i32
    %c0_i32 = arith.constant 0 : i32
    %33 = arith.cmpi eq, %c4_i32, %c0_i32 : i32
    %c1_i32 = arith.constant 1 : i32
    %34 = arith.select %33, %c1_i32, %c4_i32 : i32
    %35 = vector.broadcast %34 : i32 to vector<16x1xi32>
    %36 = arith.remsi %32, %35 : vector<16x1xi32>
    %c0_i32_11 = arith.constant 0 : i32
    %37 = vector.broadcast %c0_i32_11 : i32 to vector<16x1xi32>
    %38 = arith.cmpi ne, %36, %37 : vector<16x1xi32>
    %c0_i32_12 = arith.constant 0 : i32
    %39 = vector.broadcast %c0_i32_12 : i32 to vector<16x1xi32>
    %40 = arith.cmpi slt, %36, %39 : vector<16x1xi32>
    %c0_i32_13 = arith.constant 0 : i32
    %41 = arith.cmpi slt, %34, %c0_i32_13 : i32
    %42 = vector.broadcast %41 : i1 to vector<16x1xi1>
    %43 = vector.broadcast %42 : vector<16x1xi1> to vector<16x1xi1>
    %44 = arith.xori %40, %43 : vector<16x1xi1>
    %45 = arith.andi %44, %38 : vector<16x1xi1>
    %46 = vector.broadcast %34 : i32 to vector<16x1xi32>
    %47 = arith.addi %36, %46 : vector<16x1xi32>
    %48 = arith.select %45, %47, %36 : vector<16x1xi1>, vector<16x1xi32>
    %49 = tpu.iota {dimensions = array<i32: 1>} : vector<1x128xi32>
    %c64_i32 = arith.constant 64 : i32
    %50 = vector.broadcast %c64_i32 : i32 to vector<1x128xi32>
    %51 = arith.cmpi slt, %49, %50 : vector<1x128xi32>
    %52 = vector.extract_strided_slice %31 {offsets = [0, 0], sizes = [16, 128], strides = [1, 1]} : vector<16x1024xf32> to vector<16x128xf32>
    %53 = vector.extract_strided_slice %31 {offsets = [0, 128], sizes = [16, 128], strides = [1, 1]} : vector<16x1024xf32> to vector<16x128xf32>
    %c1_i32_14 = arith.constant 1 : i32
    %54 = vector.broadcast %c1_i32_14 : i32 to vector<16x1xi32>
    %55 = arith.cmpi sge, %48, %54 : vector<16x1xi32>
    %cst_15 = arith.constant 0.000000e+00 : f32
    %56 = vector.broadcast %cst_15 : f32 to vector<1x128xf32>
    %57 = vector.extract_strided_slice %53 {offsets = [0, 0], sizes = [15, 128], strides = [1, 1]} : vector<16x128xf32> to vector<15x128xf32>
    %58 = tpu.concatenate %56, %57 in 0 : vector<1x128xf32>, vector<15x128xf32> -> vector<16x128xf32>
    %cst_16 = arith.constant 0.000000e+00 : f32
    %59 = vector.shape_cast %55 : vector<16x1xi1> to vector<16x1xi1>
    %60 = vector.broadcast %59 : vector<16x1xi1> to vector<16x128xi1>
    %61 = vector.broadcast %cst_16 : f32 to vector<16x128xf32>
    %62 = arith.select %60, %58, %61 : vector<16x128xi1>, vector<16x128xf32>
    %c2_i32 = arith.constant 2 : i32
    %63 = vector.broadcast %c2_i32 : i32 to vector<16x1xi32>
    %64 = arith.cmpi sle, %48, %63 : vector<16x1xi32>
    %65 = vector.extract_strided_slice %53 {offsets = [1, 0], sizes = [15, 128], strides = [1, 1]} : vector<16x128xf32> to vector<15x128xf32>
    %cst_17 = arith.constant 0.000000e+00 : f32
    %66 = vector.broadcast %cst_17 : f32 to vector<1x128xf32>
    %67 = tpu.concatenate %65, %66 in 0 : vector<15x128xf32>, vector<1x128xf32> -> vector<16x128xf32>
    %cst_18 = arith.constant 0.000000e+00 : f32
    %68 = vector.shape_cast %64 : vector<16x1xi1> to vector<16x1xi1>
    %69 = vector.broadcast %68 : vector<16x1xi1> to vector<16x128xi1>
    %70 = vector.broadcast %cst_18 : f32 to vector<16x128xf32>
    %71 = arith.select %69, %67, %70 : vector<16x128xi1>, vector<16x128xf32>
    %72 = vector.shape_cast %51 : vector<1x128xi1> to vector<1x128xi1>
    %73 = vector.broadcast %72 : vector<1x128xi1> to vector<16x128xi1>
    %74 = arith.select %73, %62, %71 : vector<16x128xi1>, vector<16x128xf32>
    %75 = arith.addf %52, %74 : vector<16x128xf32>
    %76 = vector.extract_strided_slice %31 {offsets = [0, 256], sizes = [16, 128], strides = [1, 1]} : vector<16x1024xf32> to vector<16x128xf32>
    %77 = vector.extract_strided_slice %31 {offsets = [0, 384], sizes = [16, 128], strides = [1, 1]} : vector<16x1024xf32> to vector<16x128xf32>
    %c1_i32_19 = arith.constant 1 : i32
    %78 = vector.broadcast %c1_i32_19 : i32 to vector<16x1xi32>
    %79 = arith.cmpi sge, %48, %78 : vector<16x1xi32>
    %cst_20 = arith.constant 0.000000e+00 : f32
    %80 = vector.broadcast %cst_20 : f32 to vector<1x128xf32>
    %81 = vector.extract_strided_slice %77 {offsets = [0, 0], sizes = [15, 128], strides = [1, 1]} : vector<16x128xf32> to vector<15x128xf32>
    %82 = tpu.concatenate %80, %81 in 0 : vector<1x128xf32>, vector<15x128xf32> -> vector<16x128xf32>
    %cst_21 = arith.constant 0.000000e+00 : f32
    %83 = vector.shape_cast %79 : vector<16x1xi1> to vector<16x1xi1>
    %84 = vector.broadcast %83 : vector<16x1xi1> to vector<16x128xi1>
    %85 = vector.broadcast %cst_21 : f32 to vector<16x128xf32>
    %86 = arith.select %84, %82, %85 : vector<16x128xi1>, vector<16x128xf32>
    %c2_i32_22 = arith.constant 2 : i32
    %87 = vector.broadcast %c2_i32_22 : i32 to vector<16x1xi32>
    %88 = arith.cmpi sle, %48, %87 : vector<16x1xi32>
    %89 = vector.extract_strided_slice %77 {offsets = [1, 0], sizes = [15, 128], strides = [1, 1]} : vector<16x128xf32> to vector<15x128xf32>
    %cst_23 = arith.constant 0.000000e+00 : f32
    %90 = vector.broadcast %cst_23 : f32 to vector<1x128xf32>
    %91 = tpu.concatenate %89, %90 in 0 : vector<15x128xf32>, vector<1x128xf32> -> vector<16x128xf32>
    %cst_24 = arith.constant 0.000000e+00 : f32
    %92 = vector.shape_cast %88 : vector<16x1xi1> to vector<16x1xi1>
    %93 = vector.broadcast %92 : vector<16x1xi1> to vector<16x128xi1>
    %94 = vector.broadcast %cst_24 : f32 to vector<16x128xf32>
    %95 = arith.select %93, %91, %94 : vector<16x128xi1>, vector<16x128xf32>
    %96 = vector.shape_cast %51 : vector<1x128xi1> to vector<1x128xi1>
    %97 = vector.broadcast %96 : vector<1x128xi1> to vector<16x128xi1>
    %98 = arith.select %97, %86, %95 : vector<16x128xi1>, vector<16x128xf32>
    %99 = arith.addf %76, %98 : vector<16x128xf32>
    %100 = vector.extract_strided_slice %31 {offsets = [0, 512], sizes = [16, 128], strides = [1, 1]} : vector<16x1024xf32> to vector<16x128xf32>
    %101 = vector.extract_strided_slice %31 {offsets = [0, 640], sizes = [16, 128], strides = [1, 1]} : vector<16x1024xf32> to vector<16x128xf32>
    %c1_i32_25 = arith.constant 1 : i32
    %102 = vector.broadcast %c1_i32_25 : i32 to vector<16x1xi32>
    %103 = arith.cmpi sge, %48, %102 : vector<16x1xi32>
    %cst_26 = arith.constant 0.000000e+00 : f32
    %104 = vector.broadcast %cst_26 : f32 to vector<1x128xf32>
    %105 = vector.extract_strided_slice %101 {offsets = [0, 0], sizes = [15, 128], strides = [1, 1]} : vector<16x128xf32> to vector<15x128xf32>
    %106 = tpu.concatenate %104, %105 in 0 : vector<1x128xf32>, vector<15x128xf32> -> vector<16x128xf32>
    %cst_27 = arith.constant 0.000000e+00 : f32
    %107 = vector.shape_cast %103 : vector<16x1xi1> to vector<16x1xi1>
    %108 = vector.broadcast %107 : vector<16x1xi1> to vector<16x128xi1>
    %109 = vector.broadcast %cst_27 : f32 to vector<16x128xf32>
    %110 = arith.select %108, %106, %109 : vector<16x128xi1>, vector<16x128xf32>
    %c2_i32_28 = arith.constant 2 : i32
    %111 = vector.broadcast %c2_i32_28 : i32 to vector<16x1xi32>
    %112 = arith.cmpi sle, %48, %111 : vector<16x1xi32>
    %113 = vector.extract_strided_slice %101 {offsets = [1, 0], sizes = [15, 128], strides = [1, 1]} : vector<16x128xf32> to vector<15x128xf32>
    %cst_29 = arith.constant 0.000000e+00 : f32
    %114 = vector.broadcast %cst_29 : f32 to vector<1x128xf32>
    %115 = tpu.concatenate %113, %114 in 0 : vector<15x128xf32>, vector<1x128xf32> -> vector<16x128xf32>
    %cst_30 = arith.constant 0.000000e+00 : f32
    %116 = vector.shape_cast %112 : vector<16x1xi1> to vector<16x1xi1>
    %117 = vector.broadcast %116 : vector<16x1xi1> to vector<16x128xi1>
    %118 = vector.broadcast %cst_30 : f32 to vector<16x128xf32>
    %119 = arith.select %117, %115, %118 : vector<16x128xi1>, vector<16x128xf32>
    %120 = vector.shape_cast %51 : vector<1x128xi1> to vector<1x128xi1>
    %121 = vector.broadcast %120 : vector<1x128xi1> to vector<16x128xi1>
    %122 = arith.select %121, %110, %119 : vector<16x128xi1>, vector<16x128xf32>
    %123 = arith.addf %100, %122 : vector<16x128xf32>
    %124 = vector.extract_strided_slice %31 {offsets = [0, 768], sizes = [16, 128], strides = [1, 1]} : vector<16x1024xf32> to vector<16x128xf32>
    %125 = vector.extract_strided_slice %31 {offsets = [0, 896], sizes = [16, 128], strides = [1, 1]} : vector<16x1024xf32> to vector<16x128xf32>
    %c1_i32_31 = arith.constant 1 : i32
    %126 = vector.broadcast %c1_i32_31 : i32 to vector<16x1xi32>
    %127 = arith.cmpi sge, %48, %126 : vector<16x1xi32>
    %cst_32 = arith.constant 0.000000e+00 : f32
    %128 = vector.broadcast %cst_32 : f32 to vector<1x128xf32>
    %129 = vector.extract_strided_slice %125 {offsets = [0, 0], sizes = [15, 128], strides = [1, 1]} : vector<16x128xf32> to vector<15x128xf32>
    %130 = tpu.concatenate %128, %129 in 0 : vector<1x128xf32>, vector<15x128xf32> -> vector<16x128xf32>
    %cst_33 = arith.constant 0.000000e+00 : f32
    %131 = vector.shape_cast %127 : vector<16x1xi1> to vector<16x1xi1>
    %132 = vector.broadcast %131 : vector<16x1xi1> to vector<16x128xi1>
    %133 = vector.broadcast %cst_33 : f32 to vector<16x128xf32>
    %134 = arith.select %132, %130, %133 : vector<16x128xi1>, vector<16x128xf32>
    %c2_i32_34 = arith.constant 2 : i32
    %135 = vector.broadcast %c2_i32_34 : i32 to vector<16x1xi32>
    %136 = arith.cmpi sle, %48, %135 : vector<16x1xi32>
    %137 = vector.extract_strided_slice %125 {offsets = [1, 0], sizes = [15, 128], strides = [1, 1]} : vector<16x128xf32> to vector<15x128xf32>
    %cst_35 = arith.constant 0.000000e+00 : f32
    %138 = vector.broadcast %cst_35 : f32 to vector<1x128xf32>
    %139 = tpu.concatenate %137, %138 in 0 : vector<15x128xf32>, vector<1x128xf32> -> vector<16x128xf32>
    %cst_36 = arith.constant 0.000000e+00 : f32
    %140 = vector.shape_cast %136 : vector<16x1xi1> to vector<16x1xi1>
    %141 = vector.broadcast %140 : vector<16x1xi1> to vector<16x128xi1>
    %142 = vector.broadcast %cst_36 : f32 to vector<16x128xf32>
    %143 = arith.select %141, %139, %142 : vector<16x128xi1>, vector<16x128xf32>
    %144 = vector.shape_cast %51 : vector<1x128xi1> to vector<1x128xi1>
    %145 = vector.broadcast %144 : vector<1x128xi1> to vector<16x128xi1>
    %146 = arith.select %145, %134, %143 : vector<16x128xi1>, vector<16x128xf32>
    %147 = arith.addf %124, %146 : vector<16x128xf32>
    %cst_37 = arith.constant 0.000000e+00 : f32
    %148 = vector.broadcast %cst_37 : f32 to vector<4x128xf32>
    %149 = vector.extract_strided_slice %123 {offsets = [0, 0], sizes = [12, 128], strides = [1, 1]} : vector<16x128xf32> to vector<12x128xf32>
    %150 = tpu.concatenate %148, %149 in 0 : vector<4x128xf32>, vector<12x128xf32> -> vector<16x128xf32>
    %151 = arith.addf %75, %150 : vector<16x128xf32>
    %152 = vector.extract_strided_slice %147 {offsets = [4, 0], sizes = [12, 128], strides = [1, 1]} : vector<16x128xf32> to vector<12x128xf32>
    %cst_38 = arith.constant 0.000000e+00 : f32
    %153 = vector.broadcast %cst_38 : f32 to vector<4x128xf32>
    %154 = tpu.concatenate %152, %153 in 0 : vector<12x128xf32>, vector<4x128xf32> -> vector<16x128xf32>
    %155 = arith.addf %99, %154 : vector<16x128xf32>
    %156 = vector.extract_strided_slice %151 {offsets = [0, 0], sizes = [4, 128], strides = [1, 1]} : vector<16x128xf32> to vector<4x128xf32>
    %157 = vector.extract_strided_slice %155 {offsets = [0, 0], sizes = [4, 128], strides = [1, 1]} : vector<16x128xf32> to vector<4x128xf32>
    %158 = vector.extract_strided_slice %151 {offsets = [4, 0], sizes = [4, 128], strides = [1, 1]} : vector<16x128xf32> to vector<4x128xf32>
    %159 = vector.extract_strided_slice %155 {offsets = [4, 0], sizes = [4, 128], strides = [1, 1]} : vector<16x128xf32> to vector<4x128xf32>
    %160 = vector.extract_strided_slice %151 {offsets = [8, 0], sizes = [4, 128], strides = [1, 1]} : vector<16x128xf32> to vector<4x128xf32>
    %161 = vector.extract_strided_slice %155 {offsets = [8, 0], sizes = [4, 128], strides = [1, 1]} : vector<16x128xf32> to vector<4x128xf32>
    %162 = vector.extract_strided_slice %151 {offsets = [12, 0], sizes = [4, 128], strides = [1, 1]} : vector<16x128xf32> to vector<4x128xf32>
    %163 = vector.extract_strided_slice %155 {offsets = [12, 0], sizes = [4, 128], strides = [1, 1]} : vector<16x128xf32> to vector<4x128xf32>
    %164 = tpu.concatenate %156, %157, %158, %159, %160, %161, %162, %163 in 0 : vector<4x128xf32>, vector<4x128xf32>, vector<4x128xf32>, vector<4x128xf32>, vector<4x128xf32>, vector<4x128xf32>, vector<4x128xf32>, vector<4x128xf32> -> vector<32x128xf32>
    %c0_39 = arith.constant 0 : index
    %c0_40 = arith.constant 0 : index
    %165 = vector.load %arg5[%c0_39, %c0_40] : memref<1x128xf32, #tpu.memory_space<vmem>>, vector<1x128xf32>
    %166 = vector.broadcast %165 : vector<1x128xf32> to vector<32x128xf32>
    %167 = arith.addf %164, %166 : vector<32x128xf32>
    %cst_41 = arith.constant 0.000000e+00 : f32
    %168 = vector.broadcast %cst_41 : f32 to vector<32x128xf32>
    %169 = arith.cmpf oge, %167, %168 : vector<32x128xf32>
    %cst_42 = arith.constant 2.000000e-01 : f32
    %170 = vector.broadcast %cst_42 : f32 to vector<32x128xf32>
    %171 = arith.mulf %170, %167 : vector<32x128xf32>
    %172 = arith.select %169, %167, %171 : vector<32x128xi1>, vector<32x128xf32>
    %c0_43 = arith.constant 0 : index
    %c0_44 = arith.constant 0 : index
    %c0_45 = arith.constant 0 : index
    %173 = vector.load %arg6[%c0_43, %c0_44, %c0_45] : memref<1x32x128xf32, #tpu.memory_space<vmem>>, vector<1x32x128xf32>
    %174 = vector.shape_cast %173 : vector<1x32x128xf32> to vector<32x128xf32>
    %175 = vector.shape_cast %172 : vector<32x128xf32> to vector<1x32x128xf32>
    tpu.vector_store %arg6[%c0_43, %c0_44, %c0_45], %175 {strides = array<i32>} : memref<1x32x128xf32, #tpu.memory_space<vmem>>, vector<1x32x128xf32>,
    %cst_46 = arith.constant dense<0.000000e+00> : vector<128xf32>
    %176 = vector.multi_reduction <add>, %172, %cst_46 [0] : vector<32x128xf32> to vector<128xf32>
    %177 = vector.shape_cast %176 : vector<128xf32> to vector<1x128xf32>
    %c0_47 = arith.constant 0 : index
    %c0_48 = arith.constant 0 : index
    %c0_49 = arith.constant 0 : index
    %178 = vector.load %arg7[%c0_47, %c0_48, %c0_49] : memref<1x1x128xf32, #tpu.memory_space<vmem>>, vector<1x1x128xf32>
    %179 = vector.shape_cast %178 : vector<1x1x128xf32> to vector<1x128xf32>
    %180 = vector.shape_cast %177 : vector<1x128xf32> to vector<1x1x128xf32>
    tpu.vector_store %arg7[%c0_47, %c0_48, %c0_49], %180 {strides = array<i32>} : memref<1x1x128xf32, #tpu.memory_space<vmem>>, vector<1x1x128xf32>,
    %181 = arith.mulf %172, %172 : vector<32x128xf32>
    %cst_50 = arith.constant dense<0.000000e+00> : vector<128xf32>
    %182 = vector.multi_reduction <add>, %181, %cst_50 [0] : vector<32x128xf32> to vector<128xf32>
    %183 = vector.shape_cast %182 : vector<128xf32> to vector<1x128xf32>
    %c0_51 = arith.constant 0 : index
    %c0_52 = arith.constant 0 : index
    %c0_53 = arith.constant 0 : index
    %184 = vector.load %arg8[%c0_51, %c0_52, %c0_53] : memref<1x1x128xf32, #tpu.memory_space<vmem>>, vector<1x1x128xf32>
    %185 = vector.shape_cast %184 : vector<1x1x128xf32> to vector<1x128xf32>
    %186 = vector.shape_cast %183 : vector<1x128xf32> to vector<1x1x128xf32>
    tpu.vector_store %arg8[%c0_51, %c0_52, %c0_53], %186 {strides = array<i32>} : memref<1x1x128xf32, #tpu.memory_space<vmem>>, vector<1x1x128xf32>,
    return
  }
  func.func @transform_0(%arg0: i32) -> (i32, i32, i32) {
    %c0_i32 = arith.constant 0 : i32
    %c0_i32_0 = arith.constant 0 : i32
    %c0_i32_1 = arith.constant 0 : i32
    return %arg0, %c0_i32, %c0_i32_0 : i32, i32, i32
  }
  func.func @transform_1(%arg0: i32) -> (i32, i32) {
    %c0_i32 = arith.constant 0 : i32
    %c0_i32_0 = arith.constant 0 : i32
    %c0_i32_1 = arith.constant 0 : i32
    return %c0_i32, %c0_i32_0 : i32, i32
  }
  func.func @transform_2(%arg0: i32) -> (i32, i32) {
    %c0_i32 = arith.constant 0 : i32
    %c0_i32_0 = arith.constant 0 : i32
    %c0_i32_1 = arith.constant 0 : i32
    return %c0_i32, %c0_i32_0 : i32, i32
  }
  func.func @transform_3(%arg0: i32) -> (i32, i32) {
    %c0_i32 = arith.constant 0 : i32
    %c0_i32_0 = arith.constant 0 : i32
    %c0_i32_1 = arith.constant 0 : i32
    return %c0_i32, %c0_i32_0 : i32, i32
  }
  func.func @transform_4(%arg0: i32) -> (i32, i32) {
    %c0_i32 = arith.constant 0 : i32
    %c0_i32_0 = arith.constant 0 : i32
    %c0_i32_1 = arith.constant 0 : i32
    return %c0_i32, %c0_i32_0 : i32, i32
  }
  func.func @transform_5(%arg0: i32) -> (i32, i32, i32) {
    %c0_i32 = arith.constant 0 : i32
    %c0_i32_0 = arith.constant 0 : i32
    %c0_i32_1 = arith.constant 0 : i32
    return %arg0, %c0_i32, %c0_i32_0 : i32, i32, i32
  }
  func.func @transform_6(%arg0: i32) -> (i32, i32, i32) {
    %c0_i32 = arith.constant 0 : i32
    %c0_i32_0 = arith.constant 0 : i32
    %c0_i32_1 = arith.constant 0 : i32
    return %arg0, %c0_i32, %c0_i32_0 : i32, i32, i32
  }
  func.func @transform_7(%arg0: i32) -> (i32, i32, i32) {
    %c0_i32 = arith.constant 0 : i32
    %c0_i32_0 = arith.constant 0 : i32
    %c0_i32_1 = arith.constant 0 : i32
    return %arg0, %c0_i32, %c0_i32_0 : i32, i32, i32
  }
}

module attributes {stable_mosaic.version = 11 : i64} {
  func.func @_stage2_kernel(%arg0: i32, %arg1: memref<1x64x64xf32, #tpu.memory_space<vmem>>, %arg2: memref<1x64xf32, #tpu.memory_space<vmem>>, %arg3: memref<1x64xf32, #tpu.memory_space<vmem>>, %arg4: memref<64x512xbf16, #tpu.memory_space<vmem>>, %arg5: memref<1x64xf32, #tpu.memory_space<vmem>>, %arg6: memref<1x128x64xf32, #tpu.memory_space<vmem>>) attributes {dimension_semantics = [#tpu.dimension_semantics<parallel>], iteration_bounds = array<i64: 2>, scalar_prefetch = 0 : i64, scratch_operands = 0 : i64, tpu.core_type = #tpu.core_type<tc>, window_params = [{transform_indices = @transform_0, window_bounds = array<i64: 1, 64, 64>}, {pipeline_mode = #tpu.pipeline_mode<synchronous>, transform_indices = @transform_1, window_bounds = array<i64: 1, 64>}, {pipeline_mode = #tpu.pipeline_mode<synchronous>, transform_indices = @transform_2, window_bounds = array<i64: 1, 64>}, {pipeline_mode = #tpu.pipeline_mode<synchronous>, transform_indices = @transform_3, window_bounds = array<i64: 64, 512>}, {pipeline_mode = #tpu.pipeline_mode<synchronous>, transform_indices = @transform_4, window_bounds = array<i64: 1, 64>}, {transform_indices = @transform_5, window_bounds = array<i64: 1, 128, 64>}]} {
    %c0 = arith.constant 0 : index
    %c0_0 = arith.constant 0 : index
    %c0_1 = arith.constant 0 : index
    %0 = vector.load %arg1[%c0, %c0_0, %c0_1] : memref<1x64x64xf32, #tpu.memory_space<vmem>>, vector<1x64x64xf32>
    %1 = vector.shape_cast %0 : vector<1x64x64xf32> to vector<64x64xf32>
    %c0_2 = arith.constant 0 : index
    %c0_3 = arith.constant 0 : index
    %2 = vector.load %arg2[%c0_2, %c0_3] : memref<1x64xf32, #tpu.memory_space<vmem>>, vector<1x64xf32>
    %3 = vector.broadcast %2 : vector<1x64xf32> to vector<64x64xf32>
    %4 = arith.mulf %1, %3 : vector<64x64xf32>
    %c0_4 = arith.constant 0 : index
    %c0_5 = arith.constant 0 : index
    %5 = vector.load %arg3[%c0_4, %c0_5] : memref<1x64xf32, #tpu.memory_space<vmem>>, vector<1x64xf32>
    %6 = vector.broadcast %5 : vector<1x64xf32> to vector<64x64xf32>
    %7 = arith.addf %4, %6 : vector<64x64xf32>
    %cst = arith.constant 0.000000e+00 : f32
    %8 = vector.broadcast %cst : f32 to vector<64x64xf32>
    %9 = arith.cmpf oge, %7, %8 : vector<64x64xf32>
    %cst_6 = arith.constant 2.000000e-01 : f32
    %10 = vector.broadcast %cst_6 : f32 to vector<64x64xf32>
    %11 = arith.mulf %10, %7 : vector<64x64xf32>
    %12 = arith.select %9, %7, %11 : vector<64x64xi1>, vector<64x64xf32>
    %13 = arith.truncf %12 : vector<64x64xf32> to vector<64x64xbf16>
    %c0_7 = arith.constant 0 : index
    %c0_8 = arith.constant 0 : index
    %14 = vector.load %arg4[%c0_7, %c0_8] : memref<64x512xbf16, #tpu.memory_space<vmem>>, vector<64x512xbf16>
    %cst_9 = arith.constant dense<0.000000e+00> : vector<64x512xf32>
    %15 = tpu.matmul %13, %14, %cst_9 {dimension_numbers = #tpu.dot_dimension_numbers<[1], [0], [0], [1], [0, 0, 1, 1], [], []>} : vector<64x64xbf16>, vector<64x512xbf16>, vector<64x512xf32> -> vector<64x512xf32>
    %16 = tpu.iota {dimensions = array<i32: 0>} : vector<64x1xi32>
    %c8_i32 = arith.constant 8 : i32
    %c0_i32 = arith.constant 0 : i32
    %17 = arith.cmpi eq, %c8_i32, %c0_i32 : i32
    %c1_i32 = arith.constant 1 : i32
    %18 = arith.select %17, %c1_i32, %c8_i32 : i32
    %19 = vector.broadcast %18 : i32 to vector<64x1xi32>
    %20 = arith.remsi %16, %19 : vector<64x1xi32>
    %c0_i32_10 = arith.constant 0 : i32
    %21 = vector.broadcast %c0_i32_10 : i32 to vector<64x1xi32>
    %22 = arith.cmpi ne, %20, %21 : vector<64x1xi32>
    %c0_i32_11 = arith.constant 0 : i32
    %23 = vector.broadcast %c0_i32_11 : i32 to vector<64x1xi32>
    %24 = arith.cmpi slt, %20, %23 : vector<64x1xi32>
    %c0_i32_12 = arith.constant 0 : i32
    %25 = arith.cmpi slt, %18, %c0_i32_12 : i32
    %26 = vector.broadcast %25 : i1 to vector<64x1xi1>
    %27 = vector.broadcast %26 : vector<64x1xi1> to vector<64x1xi1>
    %28 = arith.xori %24, %27 : vector<64x1xi1>
    %29 = arith.andi %28, %22 : vector<64x1xi1>
    %30 = vector.broadcast %18 : i32 to vector<64x1xi32>
    %31 = arith.addi %20, %30 : vector<64x1xi32>
    %32 = arith.select %29, %31, %20 : vector<64x1xi1>, vector<64x1xi32>
    %33 = tpu.iota {dimensions = array<i32: 1>} : vector<1x64xi32>
    %c32_i32 = arith.constant 32 : i32
    %34 = vector.broadcast %c32_i32 : i32 to vector<1x64xi32>
    %35 = arith.cmpi slt, %33, %34 : vector<1x64xi32>
    %36 = vector.extract_strided_slice %15 {offsets = [0, 0], sizes = [64, 64], strides = [1, 1]} : vector<64x512xf32> to vector<64x64xf32>
    %37 = vector.extract_strided_slice %15 {offsets = [0, 64], sizes = [64, 64], strides = [1, 1]} : vector<64x512xf32> to vector<64x64xf32>
    %c1_i32_13 = arith.constant 1 : i32
    %38 = vector.broadcast %c1_i32_13 : i32 to vector<64x1xi32>
    %39 = arith.cmpi sge, %32, %38 : vector<64x1xi32>
    %cst_14 = arith.constant 0.000000e+00 : f32
    %40 = vector.broadcast %cst_14 : f32 to vector<1x64xf32>
    %41 = vector.extract_strided_slice %37 {offsets = [0, 0], sizes = [63, 64], strides = [1, 1]} : vector<64x64xf32> to vector<63x64xf32>
    %42 = tpu.concatenate %40, %41 in 0 : vector<1x64xf32>, vector<63x64xf32> -> vector<64x64xf32>
    %cst_15 = arith.constant 0.000000e+00 : f32
    %43 = vector.shape_cast %39 : vector<64x1xi1> to vector<64x1xi1>
    %44 = vector.broadcast %43 : vector<64x1xi1> to vector<64x64xi1>
    %45 = vector.broadcast %cst_15 : f32 to vector<64x64xf32>
    %46 = arith.select %44, %42, %45 : vector<64x64xi1>, vector<64x64xf32>
    %c6_i32 = arith.constant 6 : i32
    %47 = vector.broadcast %c6_i32 : i32 to vector<64x1xi32>
    %48 = arith.cmpi sle, %32, %47 : vector<64x1xi32>
    %49 = vector.extract_strided_slice %37 {offsets = [1, 0], sizes = [63, 64], strides = [1, 1]} : vector<64x64xf32> to vector<63x64xf32>
    %cst_16 = arith.constant 0.000000e+00 : f32
    %50 = vector.broadcast %cst_16 : f32 to vector<1x64xf32>
    %51 = tpu.concatenate %49, %50 in 0 : vector<63x64xf32>, vector<1x64xf32> -> vector<64x64xf32>
    %cst_17 = arith.constant 0.000000e+00 : f32
    %52 = vector.shape_cast %48 : vector<64x1xi1> to vector<64x1xi1>
    %53 = vector.broadcast %52 : vector<64x1xi1> to vector<64x64xi1>
    %54 = vector.broadcast %cst_17 : f32 to vector<64x64xf32>
    %55 = arith.select %53, %51, %54 : vector<64x64xi1>, vector<64x64xf32>
    %56 = vector.shape_cast %35 : vector<1x64xi1> to vector<1x64xi1>
    %57 = vector.broadcast %56 : vector<1x64xi1> to vector<64x64xi1>
    %58 = arith.select %57, %46, %55 : vector<64x64xi1>, vector<64x64xf32>
    %59 = arith.addf %36, %58 : vector<64x64xf32>
    %60 = vector.extract_strided_slice %15 {offsets = [0, 128], sizes = [64, 64], strides = [1, 1]} : vector<64x512xf32> to vector<64x64xf32>
    %61 = vector.extract_strided_slice %15 {offsets = [0, 192], sizes = [64, 64], strides = [1, 1]} : vector<64x512xf32> to vector<64x64xf32>
    %c1_i32_18 = arith.constant 1 : i32
    %62 = vector.broadcast %c1_i32_18 : i32 to vector<64x1xi32>
    %63 = arith.cmpi sge, %32, %62 : vector<64x1xi32>
    %cst_19 = arith.constant 0.000000e+00 : f32
    %64 = vector.broadcast %cst_19 : f32 to vector<1x64xf32>
    %65 = vector.extract_strided_slice %61 {offsets = [0, 0], sizes = [63, 64], strides = [1, 1]} : vector<64x64xf32> to vector<63x64xf32>
    %66 = tpu.concatenate %64, %65 in 0 : vector<1x64xf32>, vector<63x64xf32> -> vector<64x64xf32>
    %cst_20 = arith.constant 0.000000e+00 : f32
    %67 = vector.shape_cast %63 : vector<64x1xi1> to vector<64x1xi1>
    %68 = vector.broadcast %67 : vector<64x1xi1> to vector<64x64xi1>
    %69 = vector.broadcast %cst_20 : f32 to vector<64x64xf32>
    %70 = arith.select %68, %66, %69 : vector<64x64xi1>, vector<64x64xf32>
    %c6_i32_21 = arith.constant 6 : i32
    %71 = vector.broadcast %c6_i32_21 : i32 to vector<64x1xi32>
    %72 = arith.cmpi sle, %32, %71 : vector<64x1xi32>
    %73 = vector.extract_strided_slice %61 {offsets = [1, 0], sizes = [63, 64], strides = [1, 1]} : vector<64x64xf32> to vector<63x64xf32>
    %cst_22 = arith.constant 0.000000e+00 : f32
    %74 = vector.broadcast %cst_22 : f32 to vector<1x64xf32>
    %75 = tpu.concatenate %73, %74 in 0 : vector<63x64xf32>, vector<1x64xf32> -> vector<64x64xf32>
    %cst_23 = arith.constant 0.000000e+00 : f32
    %76 = vector.shape_cast %72 : vector<64x1xi1> to vector<64x1xi1>
    %77 = vector.broadcast %76 : vector<64x1xi1> to vector<64x64xi1>
    %78 = vector.broadcast %cst_23 : f32 to vector<64x64xf32>
    %79 = arith.select %77, %75, %78 : vector<64x64xi1>, vector<64x64xf32>
    %80 = vector.shape_cast %35 : vector<1x64xi1> to vector<1x64xi1>
    %81 = vector.broadcast %80 : vector<1x64xi1> to vector<64x64xi1>
    %82 = arith.select %81, %70, %79 : vector<64x64xi1>, vector<64x64xf32>
    %83 = arith.addf %60, %82 : vector<64x64xf32>
    %84 = vector.extract_strided_slice %15 {offsets = [0, 256], sizes = [64, 64], strides = [1, 1]} : vector<64x512xf32> to vector<64x64xf32>
    %85 = vector.extract_strided_slice %15 {offsets = [0, 320], sizes = [64, 64], strides = [1, 1]} : vector<64x512xf32> to vector<64x64xf32>
    %c1_i32_24 = arith.constant 1 : i32
    %86 = vector.broadcast %c1_i32_24 : i32 to vector<64x1xi32>
    %87 = arith.cmpi sge, %32, %86 : vector<64x1xi32>
    %cst_25 = arith.constant 0.000000e+00 : f32
    %88 = vector.broadcast %cst_25 : f32 to vector<1x64xf32>
    %89 = vector.extract_strided_slice %85 {offsets = [0, 0], sizes = [63, 64], strides = [1, 1]} : vector<64x64xf32> to vector<63x64xf32>
    %90 = tpu.concatenate %88, %89 in 0 : vector<1x64xf32>, vector<63x64xf32> -> vector<64x64xf32>
    %cst_26 = arith.constant 0.000000e+00 : f32
    %91 = vector.shape_cast %87 : vector<64x1xi1> to vector<64x1xi1>
    %92 = vector.broadcast %91 : vector<64x1xi1> to vector<64x64xi1>
    %93 = vector.broadcast %cst_26 : f32 to vector<64x64xf32>
    %94 = arith.select %92, %90, %93 : vector<64x64xi1>, vector<64x64xf32>
    %c6_i32_27 = arith.constant 6 : i32
    %95 = vector.broadcast %c6_i32_27 : i32 to vector<64x1xi32>
    %96 = arith.cmpi sle, %32, %95 : vector<64x1xi32>
    %97 = vector.extract_strided_slice %85 {offsets = [1, 0], sizes = [63, 64], strides = [1, 1]} : vector<64x64xf32> to vector<63x64xf32>
    %cst_28 = arith.constant 0.000000e+00 : f32
    %98 = vector.broadcast %cst_28 : f32 to vector<1x64xf32>
    %99 = tpu.concatenate %97, %98 in 0 : vector<63x64xf32>, vector<1x64xf32> -> vector<64x64xf32>
    %cst_29 = arith.constant 0.000000e+00 : f32
    %100 = vector.shape_cast %96 : vector<64x1xi1> to vector<64x1xi1>
    %101 = vector.broadcast %100 : vector<64x1xi1> to vector<64x64xi1>
    %102 = vector.broadcast %cst_29 : f32 to vector<64x64xf32>
    %103 = arith.select %101, %99, %102 : vector<64x64xi1>, vector<64x64xf32>
    %104 = vector.shape_cast %35 : vector<1x64xi1> to vector<1x64xi1>
    %105 = vector.broadcast %104 : vector<1x64xi1> to vector<64x64xi1>
    %106 = arith.select %105, %94, %103 : vector<64x64xi1>, vector<64x64xf32>
    %107 = arith.addf %84, %106 : vector<64x64xf32>
    %108 = vector.extract_strided_slice %15 {offsets = [0, 384], sizes = [64, 64], strides = [1, 1]} : vector<64x512xf32> to vector<64x64xf32>
    %109 = vector.extract_strided_slice %15 {offsets = [0, 448], sizes = [64, 64], strides = [1, 1]} : vector<64x512xf32> to vector<64x64xf32>
    %c1_i32_30 = arith.constant 1 : i32
    %110 = vector.broadcast %c1_i32_30 : i32 to vector<64x1xi32>
    %111 = arith.cmpi sge, %32, %110 : vector<64x1xi32>
    %cst_31 = arith.constant 0.000000e+00 : f32
    %112 = vector.broadcast %cst_31 : f32 to vector<1x64xf32>
    %113 = vector.extract_strided_slice %109 {offsets = [0, 0], sizes = [63, 64], strides = [1, 1]} : vector<64x64xf32> to vector<63x64xf32>
    %114 = tpu.concatenate %112, %113 in 0 : vector<1x64xf32>, vector<63x64xf32> -> vector<64x64xf32>
    %cst_32 = arith.constant 0.000000e+00 : f32
    %115 = vector.shape_cast %111 : vector<64x1xi1> to vector<64x1xi1>
    %116 = vector.broadcast %115 : vector<64x1xi1> to vector<64x64xi1>
    %117 = vector.broadcast %cst_32 : f32 to vector<64x64xf32>
    %118 = arith.select %116, %114, %117 : vector<64x64xi1>, vector<64x64xf32>
    %c6_i32_33 = arith.constant 6 : i32
    %119 = vector.broadcast %c6_i32_33 : i32 to vector<64x1xi32>
    %120 = arith.cmpi sle, %32, %119 : vector<64x1xi32>
    %121 = vector.extract_strided_slice %109 {offsets = [1, 0], sizes = [63, 64], strides = [1, 1]} : vector<64x64xf32> to vector<63x64xf32>
    %cst_34 = arith.constant 0.000000e+00 : f32
    %122 = vector.broadcast %cst_34 : f32 to vector<1x64xf32>
    %123 = tpu.concatenate %121, %122 in 0 : vector<63x64xf32>, vector<1x64xf32> -> vector<64x64xf32>
    %cst_35 = arith.constant 0.000000e+00 : f32
    %124 = vector.shape_cast %120 : vector<64x1xi1> to vector<64x1xi1>
    %125 = vector.broadcast %124 : vector<64x1xi1> to vector<64x64xi1>
    %126 = vector.broadcast %cst_35 : f32 to vector<64x64xf32>
    %127 = arith.select %125, %123, %126 : vector<64x64xi1>, vector<64x64xf32>
    %128 = vector.shape_cast %35 : vector<1x64xi1> to vector<1x64xi1>
    %129 = vector.broadcast %128 : vector<1x64xi1> to vector<64x64xi1>
    %130 = arith.select %129, %118, %127 : vector<64x64xi1>, vector<64x64xf32>
    %131 = arith.addf %108, %130 : vector<64x64xf32>
    %cst_36 = arith.constant 0.000000e+00 : f32
    %132 = vector.broadcast %cst_36 : f32 to vector<8x64xf32>
    %133 = vector.extract_strided_slice %107 {offsets = [0, 0], sizes = [56, 64], strides = [1, 1]} : vector<64x64xf32> to vector<56x64xf32>
    %134 = tpu.concatenate %132, %133 in 0 : vector<8x64xf32>, vector<56x64xf32> -> vector<64x64xf32>
    %135 = arith.addf %59, %134 : vector<64x64xf32>
    %136 = vector.extract_strided_slice %131 {offsets = [8, 0], sizes = [56, 64], strides = [1, 1]} : vector<64x64xf32> to vector<56x64xf32>
    %cst_37 = arith.constant 0.000000e+00 : f32
    %137 = vector.broadcast %cst_37 : f32 to vector<8x64xf32>
    %138 = tpu.concatenate %136, %137 in 0 : vector<56x64xf32>, vector<8x64xf32> -> vector<64x64xf32>
    %139 = arith.addf %83, %138 : vector<64x64xf32>
    %140 = vector.extract_strided_slice %135 {offsets = [0, 0], sizes = [8, 64], strides = [1, 1]} : vector<64x64xf32> to vector<8x64xf32>
    %141 = vector.extract_strided_slice %139 {offsets = [0, 0], sizes = [8, 64], strides = [1, 1]} : vector<64x64xf32> to vector<8x64xf32>
    %142 = vector.extract_strided_slice %135 {offsets = [8, 0], sizes = [8, 64], strides = [1, 1]} : vector<64x64xf32> to vector<8x64xf32>
    %143 = vector.extract_strided_slice %139 {offsets = [8, 0], sizes = [8, 64], strides = [1, 1]} : vector<64x64xf32> to vector<8x64xf32>
    %144 = vector.extract_strided_slice %135 {offsets = [16, 0], sizes = [8, 64], strides = [1, 1]} : vector<64x64xf32> to vector<8x64xf32>
    %145 = vector.extract_strided_slice %139 {offsets = [16, 0], sizes = [8, 64], strides = [1, 1]} : vector<64x64xf32> to vector<8x64xf32>
    %146 = vector.extract_strided_slice %135 {offsets = [24, 0], sizes = [8, 64], strides = [1, 1]} : vector<64x64xf32> to vector<8x64xf32>
    %147 = vector.extract_strided_slice %139 {offsets = [24, 0], sizes = [8, 64], strides = [1, 1]} : vector<64x64xf32> to vector<8x64xf32>
    %148 = vector.extract_strided_slice %135 {offsets = [32, 0], sizes = [8, 64], strides = [1, 1]} : vector<64x64xf32> to vector<8x64xf32>
    %149 = vector.extract_strided_slice %139 {offsets = [32, 0], sizes = [8, 64], strides = [1, 1]} : vector<64x64xf32> to vector<8x64xf32>
    %150 = vector.extract_strided_slice %135 {offsets = [40, 0], sizes = [8, 64], strides = [1, 1]} : vector<64x64xf32> to vector<8x64xf32>
    %151 = vector.extract_strided_slice %139 {offsets = [40, 0], sizes = [8, 64], strides = [1, 1]} : vector<64x64xf32> to vector<8x64xf32>
    %152 = vector.extract_strided_slice %135 {offsets = [48, 0], sizes = [8, 64], strides = [1, 1]} : vector<64x64xf32> to vector<8x64xf32>
    %153 = vector.extract_strided_slice %139 {offsets = [48, 0], sizes = [8, 64], strides = [1, 1]} : vector<64x64xf32> to vector<8x64xf32>
    %154 = vector.extract_strided_slice %135 {offsets = [56, 0], sizes = [8, 64], strides = [1, 1]} : vector<64x64xf32> to vector<8x64xf32>
    %155 = vector.extract_strided_slice %139 {offsets = [56, 0], sizes = [8, 64], strides = [1, 1]} : vector<64x64xf32> to vector<8x64xf32>
    %156 = tpu.concatenate %140, %141, %142, %143, %144, %145, %146, %147, %148, %149, %150, %151, %152, %153, %154, %155 in 0 : vector<8x64xf32>, vector<8x64xf32>, vector<8x64xf32>, vector<8x64xf32>, vector<8x64xf32>, vector<8x64xf32>, vector<8x64xf32>, vector<8x64xf32>, vector<8x64xf32>, vector<8x64xf32>, vector<8x64xf32>, vector<8x64xf32>, vector<8x64xf32>, vector<8x64xf32>, vector<8x64xf32>, vector<8x64xf32> -> vector<128x64xf32>
    %c0_38 = arith.constant 0 : index
    %c0_39 = arith.constant 0 : index
    %157 = vector.load %arg5[%c0_38, %c0_39] : memref<1x64xf32, #tpu.memory_space<vmem>>, vector<1x64xf32>
    %158 = vector.broadcast %157 : vector<1x64xf32> to vector<128x64xf32>
    %159 = arith.addf %156, %158 : vector<128x64xf32>
    %cst_40 = arith.constant 0.000000e+00 : f32
    %160 = vector.broadcast %cst_40 : f32 to vector<128x64xf32>
    %161 = arith.cmpf oge, %159, %160 : vector<128x64xf32>
    %cst_41 = arith.constant 2.000000e-01 : f32
    %162 = vector.broadcast %cst_41 : f32 to vector<128x64xf32>
    %163 = arith.mulf %162, %159 : vector<128x64xf32>
    %164 = arith.select %161, %159, %163 : vector<128x64xi1>, vector<128x64xf32>
    %c0_42 = arith.constant 0 : index
    %c0_43 = arith.constant 0 : index
    %c0_44 = arith.constant 0 : index
    %165 = vector.load %arg6[%c0_42, %c0_43, %c0_44] : memref<1x128x64xf32, #tpu.memory_space<vmem>>, vector<1x128x64xf32>
    %166 = vector.shape_cast %165 : vector<1x128x64xf32> to vector<128x64xf32>
    %167 = vector.shape_cast %164 : vector<128x64xf32> to vector<1x128x64xf32>
    tpu.vector_store %arg6[%c0_42, %c0_43, %c0_44], %167 {strides = array<i32>} : memref<1x128x64xf32, #tpu.memory_space<vmem>>, vector<1x128x64xf32>,
    return
  }
  func.func @transform_0(%arg0: i32) -> (i32, i32, i32) {
    %c0_i32 = arith.constant 0 : i32
    %c0_i32_0 = arith.constant 0 : i32
    %c0_i32_1 = arith.constant 0 : i32
    return %arg0, %c0_i32, %c0_i32_0 : i32, i32, i32
  }
  func.func @transform_1(%arg0: i32) -> (i32, i32) {
    %c0_i32 = arith.constant 0 : i32
    %c0_i32_0 = arith.constant 0 : i32
    %c0_i32_1 = arith.constant 0 : i32
    return %c0_i32, %c0_i32_0 : i32, i32
  }
  func.func @transform_2(%arg0: i32) -> (i32, i32) {
    %c0_i32 = arith.constant 0 : i32
    %c0_i32_0 = arith.constant 0 : i32
    %c0_i32_1 = arith.constant 0 : i32
    return %c0_i32, %c0_i32_0 : i32, i32
  }
  func.func @transform_3(%arg0: i32) -> (i32, i32) {
    %c0_i32 = arith.constant 0 : i32
    %c0_i32_0 = arith.constant 0 : i32
    %c0_i32_1 = arith.constant 0 : i32
    return %c0_i32, %c0_i32_0 : i32, i32
  }
  func.func @transform_4(%arg0: i32) -> (i32, i32) {
    %c0_i32 = arith.constant 0 : i32
    %c0_i32_0 = arith.constant 0 : i32
    %c0_i32_1 = arith.constant 0 : i32
    return %c0_i32, %c0_i32_0 : i32, i32
  }
  func.func @transform_5(%arg0: i32) -> (i32, i32, i32) {
    %c0_i32 = arith.constant 0 : i32
    %c0_i32_0 = arith.constant 0 : i32
    %c0_i32_1 = arith.constant 0 : i32
    return %arg0, %c0_i32, %c0_i32_0 : i32, i32, i32
  }
}

module attributes {stable_mosaic.version = 11 : i64} {
  func.func @_stage3_kernel(%arg0: i32, %arg1: memref<1x256x32xf32, #tpu.memory_space<vmem>>, %arg2: memref<32x128xbf16, #tpu.memory_space<vmem>>, %arg3: memref<1x16xf32, #tpu.memory_space<vmem>>, %arg4: memref<1x512x16xf32, #tpu.memory_space<vmem>>) attributes {dimension_semantics = [#tpu.dimension_semantics<parallel>], iteration_bounds = array<i64: 2>, scalar_prefetch = 0 : i64, scratch_operands = 0 : i64, tpu.core_type = #tpu.core_type<tc>, window_params = [{transform_indices = @transform_0, window_bounds = array<i64: 1, 256, 32>}, {pipeline_mode = #tpu.pipeline_mode<synchronous>, transform_indices = @transform_1, window_bounds = array<i64: 32, 128>}, {pipeline_mode = #tpu.pipeline_mode<synchronous>, transform_indices = @transform_2, window_bounds = array<i64: 1, 16>}, {transform_indices = @transform_3, window_bounds = array<i64: 1, 512, 16>}]} {
    %c0 = arith.constant 0 : index
    %c0_0 = arith.constant 0 : index
    %c0_1 = arith.constant 0 : index
    %0 = vector.load %arg1[%c0, %c0_0, %c0_1] : memref<1x256x32xf32, #tpu.memory_space<vmem>>, vector<1x256x32xf32>
    %1 = vector.shape_cast %0 : vector<1x256x32xf32> to vector<256x32xf32>
    %2 = arith.truncf %1 : vector<256x32xf32> to vector<256x32xbf16>
    %c0_2 = arith.constant 0 : index
    %c0_3 = arith.constant 0 : index
    %3 = vector.load %arg2[%c0_2, %c0_3] : memref<32x128xbf16, #tpu.memory_space<vmem>>, vector<32x128xbf16>
    %cst = arith.constant dense<0.000000e+00> : vector<256x128xf32>
    %4 = tpu.matmul %2, %3, %cst {dimension_numbers = #tpu.dot_dimension_numbers<[1], [0], [0], [1], [0, 0, 1, 1], [], []>} : vector<256x32xbf16>, vector<32x128xbf16>, vector<256x128xf32> -> vector<256x128xf32>
    %5 = tpu.iota {dimensions = array<i32: 0>} : vector<256x1xi32>
    %c16_i32 = arith.constant 16 : i32
    %c0_i32 = arith.constant 0 : i32
    %6 = arith.cmpi eq, %c16_i32, %c0_i32 : i32
    %c1_i32 = arith.constant 1 : i32
    %7 = arith.select %6, %c1_i32, %c16_i32 : i32
    %8 = vector.broadcast %7 : i32 to vector<256x1xi32>
    %9 = arith.remsi %5, %8 : vector<256x1xi32>
    %c0_i32_4 = arith.constant 0 : i32
    %10 = vector.broadcast %c0_i32_4 : i32 to vector<256x1xi32>
    %11 = arith.cmpi ne, %9, %10 : vector<256x1xi32>
    %c0_i32_5 = arith.constant 0 : i32
    %12 = vector.broadcast %c0_i32_5 : i32 to vector<256x1xi32>
    %13 = arith.cmpi slt, %9, %12 : vector<256x1xi32>
    %c0_i32_6 = arith.constant 0 : i32
    %14 = arith.cmpi slt, %7, %c0_i32_6 : i32
    %15 = vector.broadcast %14 : i1 to vector<256x1xi1>
    %16 = vector.broadcast %15 : vector<256x1xi1> to vector<256x1xi1>
    %17 = arith.xori %13, %16 : vector<256x1xi1>
    %18 = arith.andi %17, %11 : vector<256x1xi1>
    %19 = vector.broadcast %7 : i32 to vector<256x1xi32>
    %20 = arith.addi %9, %19 : vector<256x1xi32>
    %21 = arith.select %18, %20, %9 : vector<256x1xi1>, vector<256x1xi32>
    %22 = tpu.iota {dimensions = array<i32: 1>} : vector<1x16xi32>
    %c8_i32 = arith.constant 8 : i32
    %23 = vector.broadcast %c8_i32 : i32 to vector<1x16xi32>
    %24 = arith.cmpi slt, %22, %23 : vector<1x16xi32>
    %25 = vector.extract_strided_slice %4 {offsets = [0, 0], sizes = [256, 16], strides = [1, 1]} : vector<256x128xf32> to vector<256x16xf32>
    %26 = vector.extract_strided_slice %4 {offsets = [0, 16], sizes = [256, 16], strides = [1, 1]} : vector<256x128xf32> to vector<256x16xf32>
    %c1_i32_7 = arith.constant 1 : i32
    %27 = vector.broadcast %c1_i32_7 : i32 to vector<256x1xi32>
    %28 = arith.cmpi sge, %21, %27 : vector<256x1xi32>
    %cst_8 = arith.constant 0.000000e+00 : f32
    %29 = vector.broadcast %cst_8 : f32 to vector<1x16xf32>
    %30 = vector.extract_strided_slice %26 {offsets = [0, 0], sizes = [255, 16], strides = [1, 1]} : vector<256x16xf32> to vector<255x16xf32>
    %31 = tpu.concatenate %29, %30 in 0 : vector<1x16xf32>, vector<255x16xf32> -> vector<256x16xf32>
    %cst_9 = arith.constant 0.000000e+00 : f32
    %32 = vector.shape_cast %28 : vector<256x1xi1> to vector<256x1xi1>
    %33 = vector.broadcast %32 : vector<256x1xi1> to vector<256x16xi1>
    %34 = vector.broadcast %cst_9 : f32 to vector<256x16xf32>
    %35 = arith.select %33, %31, %34 : vector<256x16xi1>, vector<256x16xf32>
    %c14_i32 = arith.constant 14 : i32
    %36 = vector.broadcast %c14_i32 : i32 to vector<256x1xi32>
    %37 = arith.cmpi sle, %21, %36 : vector<256x1xi32>
    %38 = vector.extract_strided_slice %26 {offsets = [1, 0], sizes = [255, 16], strides = [1, 1]} : vector<256x16xf32> to vector<255x16xf32>
    %cst_10 = arith.constant 0.000000e+00 : f32
    %39 = vector.broadcast %cst_10 : f32 to vector<1x16xf32>
    %40 = tpu.concatenate %38, %39 in 0 : vector<255x16xf32>, vector<1x16xf32> -> vector<256x16xf32>
    %cst_11 = arith.constant 0.000000e+00 : f32
    %41 = vector.shape_cast %37 : vector<256x1xi1> to vector<256x1xi1>
    %42 = vector.broadcast %41 : vector<256x1xi1> to vector<256x16xi1>
    %43 = vector.broadcast %cst_11 : f32 to vector<256x16xf32>
    %44 = arith.select %42, %40, %43 : vector<256x16xi1>, vector<256x16xf32>
    %45 = vector.shape_cast %24 : vector<1x16xi1> to vector<1x16xi1>
    %46 = vector.broadcast %45 : vector<1x16xi1> to vector<256x16xi1>
    %47 = arith.select %46, %35, %44 : vector<256x16xi1>, vector<256x16xf32>
    %48 = arith.addf %25, %47 : vector<256x16xf32>
    %49 = vector.extract_strided_slice %4 {offsets = [0, 32], sizes = [256, 16], strides = [1, 1]} : vector<256x128xf32> to vector<256x16xf32>
    %50 = vector.extract_strided_slice %4 {offsets = [0, 48], sizes = [256, 16], strides = [1, 1]} : vector<256x128xf32> to vector<256x16xf32>
    %c1_i32_12 = arith.constant 1 : i32
    %51 = vector.broadcast %c1_i32_12 : i32 to vector<256x1xi32>
    %52 = arith.cmpi sge, %21, %51 : vector<256x1xi32>
    %cst_13 = arith.constant 0.000000e+00 : f32
    %53 = vector.broadcast %cst_13 : f32 to vector<1x16xf32>
    %54 = vector.extract_strided_slice %50 {offsets = [0, 0], sizes = [255, 16], strides = [1, 1]} : vector<256x16xf32> to vector<255x16xf32>
    %55 = tpu.concatenate %53, %54 in 0 : vector<1x16xf32>, vector<255x16xf32> -> vector<256x16xf32>
    %cst_14 = arith.constant 0.000000e+00 : f32
    %56 = vector.shape_cast %52 : vector<256x1xi1> to vector<256x1xi1>
    %57 = vector.broadcast %56 : vector<256x1xi1> to vector<256x16xi1>
    %58 = vector.broadcast %cst_14 : f32 to vector<256x16xf32>
    %59 = arith.select %57, %55, %58 : vector<256x16xi1>, vector<256x16xf32>
    %c14_i32_15 = arith.constant 14 : i32
    %60 = vector.broadcast %c14_i32_15 : i32 to vector<256x1xi32>
    %61 = arith.cmpi sle, %21, %60 : vector<256x1xi32>
    %62 = vector.extract_strided_slice %50 {offsets = [1, 0], sizes = [255, 16], strides = [1, 1]} : vector<256x16xf32> to vector<255x16xf32>
    %cst_16 = arith.constant 0.000000e+00 : f32
    %63 = vector.broadcast %cst_16 : f32 to vector<1x16xf32>
    %64 = tpu.concatenate %62, %63 in 0 : vector<255x16xf32>, vector<1x16xf32> -> vector<256x16xf32>
    %cst_17 = arith.constant 0.000000e+00 : f32
    %65 = vector.shape_cast %61 : vector<256x1xi1> to vector<256x1xi1>
    %66 = vector.broadcast %65 : vector<256x1xi1> to vector<256x16xi1>
    %67 = vector.broadcast %cst_17 : f32 to vector<256x16xf32>
    %68 = arith.select %66, %64, %67 : vector<256x16xi1>, vector<256x16xf32>
    %69 = vector.shape_cast %24 : vector<1x16xi1> to vector<1x16xi1>
    %70 = vector.broadcast %69 : vector<1x16xi1> to vector<256x16xi1>
    %71 = arith.select %70, %59, %68 : vector<256x16xi1>, vector<256x16xf32>
    %72 = arith.addf %49, %71 : vector<256x16xf32>
    %73 = vector.extract_strided_slice %4 {offsets = [0, 64], sizes = [256, 16], strides = [1, 1]} : vector<256x128xf32> to vector<256x16xf32>
    %74 = vector.extract_strided_slice %4 {offsets = [0, 80], sizes = [256, 16], strides = [1, 1]} : vector<256x128xf32> to vector<256x16xf32>
    %c1_i32_18 = arith.constant 1 : i32
    %75 = vector.broadcast %c1_i32_18 : i32 to vector<256x1xi32>
    %76 = arith.cmpi sge, %21, %75 : vector<256x1xi32>
    %cst_19 = arith.constant 0.000000e+00 : f32
    %77 = vector.broadcast %cst_19 : f32 to vector<1x16xf32>
    %78 = vector.extract_strided_slice %74 {offsets = [0, 0], sizes = [255, 16], strides = [1, 1]} : vector<256x16xf32> to vector<255x16xf32>
    %79 = tpu.concatenate %77, %78 in 0 : vector<1x16xf32>, vector<255x16xf32> -> vector<256x16xf32>
    %cst_20 = arith.constant 0.000000e+00 : f32
    %80 = vector.shape_cast %76 : vector<256x1xi1> to vector<256x1xi1>
    %81 = vector.broadcast %80 : vector<256x1xi1> to vector<256x16xi1>
    %82 = vector.broadcast %cst_20 : f32 to vector<256x16xf32>
    %83 = arith.select %81, %79, %82 : vector<256x16xi1>, vector<256x16xf32>
    %c14_i32_21 = arith.constant 14 : i32
    %84 = vector.broadcast %c14_i32_21 : i32 to vector<256x1xi32>
    %85 = arith.cmpi sle, %21, %84 : vector<256x1xi32>
    %86 = vector.extract_strided_slice %74 {offsets = [1, 0], sizes = [255, 16], strides = [1, 1]} : vector<256x16xf32> to vector<255x16xf32>
    %cst_22 = arith.constant 0.000000e+00 : f32
    %87 = vector.broadcast %cst_22 : f32 to vector<1x16xf32>
    %88 = tpu.concatenate %86, %87 in 0 : vector<255x16xf32>, vector<1x16xf32> -> vector<256x16xf32>
    %cst_23 = arith.constant 0.000000e+00 : f32
    %89 = vector.shape_cast %85 : vector<256x1xi1> to vector<256x1xi1>
    %90 = vector.broadcast %89 : vector<256x1xi1> to vector<256x16xi1>
    %91 = vector.broadcast %cst_23 : f32 to vector<256x16xf32>
    %92 = arith.select %90, %88, %91 : vector<256x16xi1>, vector<256x16xf32>
    %93 = vector.shape_cast %24 : vector<1x16xi1> to vector<1x16xi1>
    %94 = vector.broadcast %93 : vector<1x16xi1> to vector<256x16xi1>
    %95 = arith.select %94, %83, %92 : vector<256x16xi1>, vector<256x16xf32>
    %96 = arith.addf %73, %95 : vector<256x16xf32>
    %97 = vector.extract_strided_slice %4 {offsets = [0, 96], sizes = [256, 16], strides = [1, 1]} : vector<256x128xf32> to vector<256x16xf32>
    %98 = vector.extract_strided_slice %4 {offsets = [0, 112], sizes = [256, 16], strides = [1, 1]} : vector<256x128xf32> to vector<256x16xf32>
    %c1_i32_24 = arith.constant 1 : i32
    %99 = vector.broadcast %c1_i32_24 : i32 to vector<256x1xi32>
    %100 = arith.cmpi sge, %21, %99 : vector<256x1xi32>
    %cst_25 = arith.constant 0.000000e+00 : f32
    %101 = vector.broadcast %cst_25 : f32 to vector<1x16xf32>
    %102 = vector.extract_strided_slice %98 {offsets = [0, 0], sizes = [255, 16], strides = [1, 1]} : vector<256x16xf32> to vector<255x16xf32>
    %103 = tpu.concatenate %101, %102 in 0 : vector<1x16xf32>, vector<255x16xf32> -> vector<256x16xf32>
    %cst_26 = arith.constant 0.000000e+00 : f32
    %104 = vector.shape_cast %100 : vector<256x1xi1> to vector<256x1xi1>
    %105 = vector.broadcast %104 : vector<256x1xi1> to vector<256x16xi1>
    %106 = vector.broadcast %cst_26 : f32 to vector<256x16xf32>
    %107 = arith.select %105, %103, %106 : vector<256x16xi1>, vector<256x16xf32>
    %c14_i32_27 = arith.constant 14 : i32
    %108 = vector.broadcast %c14_i32_27 : i32 to vector<256x1xi32>
    %109 = arith.cmpi sle, %21, %108 : vector<256x1xi32>
    %110 = vector.extract_strided_slice %98 {offsets = [1, 0], sizes = [255, 16], strides = [1, 1]} : vector<256x16xf32> to vector<255x16xf32>
    %cst_28 = arith.constant 0.000000e+00 : f32
    %111 = vector.broadcast %cst_28 : f32 to vector<1x16xf32>
    %112 = tpu.concatenate %110, %111 in 0 : vector<255x16xf32>, vector<1x16xf32> -> vector<256x16xf32>
    %cst_29 = arith.constant 0.000000e+00 : f32
    %113 = vector.shape_cast %109 : vector<256x1xi1> to vector<256x1xi1>
    %114 = vector.broadcast %113 : vector<256x1xi1> to vector<256x16xi1>
    %115 = vector.broadcast %cst_29 : f32 to vector<256x16xf32>
    %116 = arith.select %114, %112, %115 : vector<256x16xi1>, vector<256x16xf32>
    %117 = vector.shape_cast %24 : vector<1x16xi1> to vector<1x16xi1>
    %118 = vector.broadcast %117 : vector<1x16xi1> to vector<256x16xi1>
    %119 = arith.select %118, %107, %116 : vector<256x16xi1>, vector<256x16xf32>
    %120 = arith.addf %97, %119 : vector<256x16xf32>
    %cst_30 = arith.constant 0.000000e+00 : f32
    %121 = vector.broadcast %cst_30 : f32 to vector<16x16xf32>
    %122 = vector.extract_strided_slice %96 {offsets = [0, 0], sizes = [240, 16], strides = [1, 1]} : vector<256x16xf32> to vector<240x16xf32>
    %123 = tpu.concatenate %121, %122 in 0 : vector<16x16xf32>, vector<240x16xf32> -> vector<256x16xf32>
    %124 = arith.addf %48, %123 : vector<256x16xf32>
    %125 = vector.extract_strided_slice %120 {offsets = [16, 0], sizes = [240, 16], strides = [1, 1]} : vector<256x16xf32> to vector<240x16xf32>
    %cst_31 = arith.constant 0.000000e+00 : f32
    %126 = vector.broadcast %cst_31 : f32 to vector<16x16xf32>
    %127 = tpu.concatenate %125, %126 in 0 : vector<240x16xf32>, vector<16x16xf32> -> vector<256x16xf32>
    %128 = arith.addf %72, %127 : vector<256x16xf32>
    %129 = vector.extract_strided_slice %124 {offsets = [0, 0], sizes = [16, 16], strides = [1, 1]} : vector<256x16xf32> to vector<16x16xf32>
    %130 = vector.extract_strided_slice %128 {offsets = [0, 0], sizes = [16, 16], strides = [1, 1]} : vector<256x16xf32> to vector<16x16xf32>
    %131 = vector.extract_strided_slice %124 {offsets = [16, 0], sizes = [16, 16], strides = [1, 1]} : vector<256x16xf32> to vector<16x16xf32>
    %132 = vector.extract_strided_slice %128 {offsets = [16, 0], sizes = [16, 16], strides = [1, 1]} : vector<256x16xf32> to vector<16x16xf32>
    %133 = vector.extract_strided_slice %124 {offsets = [32, 0], sizes = [16, 16], strides = [1, 1]} : vector<256x16xf32> to vector<16x16xf32>
    %134 = vector.extract_strided_slice %128 {offsets = [32, 0], sizes = [16, 16], strides = [1, 1]} : vector<256x16xf32> to vector<16x16xf32>
    %135 = vector.extract_strided_slice %124 {offsets = [48, 0], sizes = [16, 16], strides = [1, 1]} : vector<256x16xf32> to vector<16x16xf32>
    %136 = vector.extract_strided_slice %128 {offsets = [48, 0], sizes = [16, 16], strides = [1, 1]} : vector<256x16xf32> to vector<16x16xf32>
    %137 = vector.extract_strided_slice %124 {offsets = [64, 0], sizes = [16, 16], strides = [1, 1]} : vector<256x16xf32> to vector<16x16xf32>
    %138 = vector.extract_strided_slice %128 {offsets = [64, 0], sizes = [16, 16], strides = [1, 1]} : vector<256x16xf32> to vector<16x16xf32>
    %139 = vector.extract_strided_slice %124 {offsets = [80, 0], sizes = [16, 16], strides = [1, 1]} : vector<256x16xf32> to vector<16x16xf32>
    %140 = vector.extract_strided_slice %128 {offsets = [80, 0], sizes = [16, 16], strides = [1, 1]} : vector<256x16xf32> to vector<16x16xf32>
    %141 = vector.extract_strided_slice %124 {offsets = [96, 0], sizes = [16, 16], strides = [1, 1]} : vector<256x16xf32> to vector<16x16xf32>
    %142 = vector.extract_strided_slice %128 {offsets = [96, 0], sizes = [16, 16], strides = [1, 1]} : vector<256x16xf32> to vector<16x16xf32>
    %143 = vector.extract_strided_slice %124 {offsets = [112, 0], sizes = [16, 16], strides = [1, 1]} : vector<256x16xf32> to vector<16x16xf32>
    %144 = vector.extract_strided_slice %128 {offsets = [112, 0], sizes = [16, 16], strides = [1, 1]} : vector<256x16xf32> to vector<16x16xf32>
    %145 = vector.extract_strided_slice %124 {offsets = [128, 0], sizes = [16, 16], strides = [1, 1]} : vector<256x16xf32> to vector<16x16xf32>
    %146 = vector.extract_strided_slice %128 {offsets = [128, 0], sizes = [16, 16], strides = [1, 1]} : vector<256x16xf32> to vector<16x16xf32>
    %147 = vector.extract_strided_slice %124 {offsets = [144, 0], sizes = [16, 16], strides = [1, 1]} : vector<256x16xf32> to vector<16x16xf32>
    %148 = vector.extract_strided_slice %128 {offsets = [144, 0], sizes = [16, 16], strides = [1, 1]} : vector<256x16xf32> to vector<16x16xf32>
    %149 = vector.extract_strided_slice %124 {offsets = [160, 0], sizes = [16, 16], strides = [1, 1]} : vector<256x16xf32> to vector<16x16xf32>
    %150 = vector.extract_strided_slice %128 {offsets = [160, 0], sizes = [16, 16], strides = [1, 1]} : vector<256x16xf32> to vector<16x16xf32>
    %151 = vector.extract_strided_slice %124 {offsets = [176, 0], sizes = [16, 16], strides = [1, 1]} : vector<256x16xf32> to vector<16x16xf32>
    %152 = vector.extract_strided_slice %128 {offsets = [176, 0], sizes = [16, 16], strides = [1, 1]} : vector<256x16xf32> to vector<16x16xf32>
    %153 = vector.extract_strided_slice %124 {offsets = [192, 0], sizes = [16, 16], strides = [1, 1]} : vector<256x16xf32> to vector<16x16xf32>
    %154 = vector.extract_strided_slice %128 {offsets = [192, 0], sizes = [16, 16], strides = [1, 1]} : vector<256x16xf32> to vector<16x16xf32>
    %155 = vector.extract_strided_slice %124 {offsets = [208, 0], sizes = [16, 16], strides = [1, 1]} : vector<256x16xf32> to vector<16x16xf32>
    %156 = vector.extract_strided_slice %128 {offsets = [208, 0], sizes = [16, 16], strides = [1, 1]} : vector<256x16xf32> to vector<16x16xf32>
    %157 = vector.extract_strided_slice %124 {offsets = [224, 0], sizes = [16, 16], strides = [1, 1]} : vector<256x16xf32> to vector<16x16xf32>
    %158 = vector.extract_strided_slice %128 {offsets = [224, 0], sizes = [16, 16], strides = [1, 1]} : vector<256x16xf32> to vector<16x16xf32>
    %159 = vector.extract_strided_slice %124 {offsets = [240, 0], sizes = [16, 16], strides = [1, 1]} : vector<256x16xf32> to vector<16x16xf32>
    %160 = vector.extract_strided_slice %128 {offsets = [240, 0], sizes = [16, 16], strides = [1, 1]} : vector<256x16xf32> to vector<16x16xf32>
    %161 = tpu.concatenate %129, %130, %131, %132, %133, %134, %135, %136, %137, %138, %139, %140, %141, %142, %143, %144 in 0 : vector<16x16xf32>, vector<16x16xf32>, vector<16x16xf32>, vector<16x16xf32>, vector<16x16xf32>, vector<16x16xf32>, vector<16x16xf32>, vector<16x16xf32>, vector<16x16xf32>, vector<16x16xf32>, vector<16x16xf32>, vector<16x16xf32>, vector<16x16xf32>, vector<16x16xf32>, vector<16x16xf32>, vector<16x16xf32> -> vector<256x16xf32>
    %162 = tpu.concatenate %145, %146, %147, %148, %149, %150, %151, %152, %153, %154, %155, %156, %157, %158, %159, %160 in 0 : vector<16x16xf32>, vector<16x16xf32>, vector<16x16xf32>, vector<16x16xf32>, vector<16x16xf32>, vector<16x16xf32>, vector<16x16xf32>, vector<16x16xf32>, vector<16x16xf32>, vector<16x16xf32>, vector<16x16xf32>, vector<16x16xf32>, vector<16x16xf32>, vector<16x16xf32>, vector<16x16xf32>, vector<16x16xf32> -> vector<256x16xf32>
    %163 = tpu.concatenate %161, %162 in 0 : vector<256x16xf32>, vector<256x16xf32> -> vector<512x16xf32>
    %c0_32 = arith.constant 0 : index
    %c0_33 = arith.constant 0 : index
    %164 = vector.load %arg3[%c0_32, %c0_33] : memref<1x16xf32, #tpu.memory_space<vmem>>, vector<1x16xf32>
    %165 = vector.broadcast %164 : vector<1x16xf32> to vector<512x16xf32>
    %166 = arith.addf %163, %165 : vector<512x16xf32>
    %cst_34 = arith.constant 0.000000e+00 : f32
    %167 = vector.broadcast %cst_34 : f32 to vector<512x16xf32>
    %168 = arith.cmpf oge, %166, %167 : vector<512x16xf32>
    %cst_35 = arith.constant 2.000000e-01 : f32
    %169 = vector.broadcast %cst_35 : f32 to vector<512x16xf32>
    %170 = arith.mulf %169, %166 : vector<512x16xf32>
    %171 = arith.select %168, %166, %170 : vector<512x16xi1>, vector<512x16xf32>
    %172 = arith.negf %171 : vector<512x16xf32>
    %173 = math.exp %172 : vector<512x16xf32>
    %cst_36 = arith.constant 1.000000e+00 : f32
    %174 = vector.broadcast %cst_36 : f32 to vector<512x16xf32>
    %175 = arith.addf %174, %173 : vector<512x16xf32>
    %176 = arith.divf %174, %175 : vector<512x16xf32>
    %c0_37 = arith.constant 0 : index
    %c0_38 = arith.constant 0 : index
    %c0_39 = arith.constant 0 : index
    %177 = vector.load %arg4[%c0_37, %c0_38, %c0_39] : memref<1x512x16xf32, #tpu.memory_space<vmem>>, vector<1x512x16xf32>
    %178 = vector.shape_cast %177 : vector<1x512x16xf32> to vector<512x16xf32>
    %179 = vector.shape_cast %176 : vector<512x16xf32> to vector<1x512x16xf32>
    tpu.vector_store %arg4[%c0_37, %c0_38, %c0_39], %179 {strides = array<i32>} : memref<1x512x16xf32, #tpu.memory_space<vmem>>, vector<1x512x16xf32>,
    return
  }
  func.func @transform_0(%arg0: i32) -> (i32, i32, i32) {
    %c0_i32 = arith.constant 0 : i32
    %c0_i32_0 = arith.constant 0 : i32
    %c0_i32_1 = arith.constant 0 : i32
    return %arg0, %c0_i32, %c0_i32_0 : i32, i32, i32
  }
  func.func @transform_1(%arg0: i32) -> (i32, i32) {
    %c0_i32 = arith.constant 0 : i32
    %c0_i32_0 = arith.constant 0 : i32
    %c0_i32_1 = arith.constant 0 : i32
    return %c0_i32, %c0_i32_0 : i32, i32
  }
  func.func @transform_2(%arg0: i32) -> (i32, i32) {
    %c0_i32 = arith.constant 0 : i32
    %c0_i32_0 = arith.constant 0 : i32
    %c0_i32_1 = arith.constant 0 : i32
    return %c0_i32, %c0_i32_0 : i32, i32
  }
  func.func @transform_3(%arg0: i32) -> (i32, i32, i32) {
    %c0_i32 = arith.constant 0 : i32
    %c0_i32_0 = arith.constant 0 : i32
    %c0_i32_1 = arith.constant 0 : i32
    return %arg0, %c0_i32, %c0_i32_0 : i32, i32, i32
  }
}

</mosaic_0001>

<bundles_post_ra>
// kernel: _lambda_.4
= control target key start
LH: loop header
LB: loop body
LE: loop exit
PB: predicated region body
PF: predicated region fallthrough
CT: control target
= control target key end

     0   :  { %s1493_s18 = smov 0   ;;  %s2411_s0 = inlined_call_operand.vmem [shape: f32[2,64,64], index: 0, kind: input, shape index: {}]   ;;  %s2412_s1 = inlined_call_operand.vmem [shape: f32[1,64], index: 1, kind: input, shape index: {}]   ;;  %s2413_s2 = inlined_call_operand.vmem [shape: f32[1,64], index: 2, kind: input, shape index: {}]   ;;  %s2414_s3 = inlined_call_operand.vmem [shape: bf16[64,512], index: 3, kind: input, shape index: {}]   ;;  %s2415_s4 = inlined_call_operand.vmem [shape: f32[1,64], index: 4, kind: input, shape index: {}]   ;;  %s2416_s5 = inlined_call_operand.vmem [shape: f32[2,128,64], index: 5, kind: output, shape index: {}]  }
   0x1 LB: > { %s1379_s19 = sadd.s32 4294967295, %s1459_s18   ;;  %p1383_p0 = scmp.ge.s32.totalorder %s1459_s18, 1  ;;  %s1459_s18 = sphi %s1493_s18, %s15_s18  }
   0x2   : > { %p187_p1 = scmp.lt.s32.totalorder %s1459_s18, 3 }
   0x4   : > { %p188_p2 = pnand %p1383_p0, %p187_p1 }
   0x6   : > { %191 = sbr.rel (%p188_p2) target bundleno = 487 (0x1e7), region = 40 }
   0xd   : > { %v1429_v0 = vld [vmem:[%s2414_s3 + $0x4] ss:$16 sps:$4 sm:$0xff]   ;;  %p215_p3 = scmp.lt.s32.totalorder %s1379_s19, 1  ;;  %v1431_v1 = vld [vmem:[%s2414_s3 + $0xc] ss:$16 sps:$4 sm:$0xff]   ;;  %v1461_v2 = vmov 0   ;;  %v2419_v63 = vlaneseq }
   0xe   : > { %433 = vmatprep.mubr.bf16.mxu0 %v1461_v2  ;;  %506 = vmatprep.mubr.bf16.mxu1 %v1461_v2  ;;  %v1433_v3 = vld [vmem:[%s2414_s3] ss:$16 sps:$4 sm:$0xff]   ;;  %v1434_v4 = vld [vmem:[%s2414_s3 + $0x8] ss:$16 sps:$4 sm:$0xff]   ;;  %v1435_v5 = vld [vmem:[%s2414_s3 + $0x24] ss:$16 sps:$4 sm:$0xff]  }
   0xf   : > { %401 = vmatprep.subr.bf16.mxu0 %v1429_v0  ;;  %s2532_s19 = smov (!%p215_p3, %s1379_s19), 1  ;;  %474 = vmatprep.subr.bf16.mxu1 %v1431_v1  ;;  %v1437_v6 = vld [vmem:[%s2414_s3 + $0x2c] ss:$16 sps:$4 sm:$0xff]   ;;  %v1439_v7 = vld [vmem:[%s2414_s3 + $0x20] ss:$16 sps:$4 sm:$0xff]   ;;  %vm388_vm2 = vcmask 523264  }
  0x10   : > { %402 = vmatpush1.bf16.msra.mxu0 %v1433_v3  ;;  %475 = vmatpush1.bf16.msra.mxu1 %v1434_v4  ;;  %s1417_s9 = sshll.u32 %s2532_s19, 6  ;;  %v1440_v8 = vld [vmem:[%s2414_s3 + $0x28] ss:$16 sps:$4 sm:$0xff]   ;;  %v1441_v9 = vld [vmem:[%s2414_s3 + $0x44] ss:$16 sps:$4 sm:$0xff]   ;;  %v1588_v0 = vshrl.u32 %v2419_v63, 7 }
  0x11   : > { %403 = vmatprep.subr.bf16.mxu0 %v1435_v5  ;;  %476 = vmatprep.subr.bf16.mxu1 %v1437_v6  ;;  %v1443_v10 = vld [vmem:[%s2414_s3 + $0x4c] ss:$16 sps:$4 sm:$0xff]   ;;  %v1445_v11 = vld [vmem:[%s2414_s3 + $0x40] ss:$16 sps:$4 sm:$0xff]   ;;  %v1446_v12 = vld [vmem:[%s2414_s3 + $0x48] ss:$16 sps:$4 sm:$0xff]   ;;  %s1545_s24 = scalar_lea.vmem %s2411_s0, %s1417_s9 }
  0x12   : > { %v1447_v13 = vld [vmem:[%s2414_s3 + $0x64] ss:$16 sps:$4 sm:$0xff]   ;;  %v1449_v14 = vld [vmem:[%s2414_s3 + $0x6c] ss:$16 sps:$4 sm:$0xff]   ;;  %v1451_v15 = vld [vmem:[%s2414_s3 + $0x60] ss:$16 sps:$4 sm:$0xff]  }
  0x13   : > { %v226_v16 = vld [vmem:[%s1545_s24] sm:$0xff]  ;;  %v227_v17 = vld [vmem:[%s1545_s24 + $0x8] sm:$0xff]  ;;  %v228_v23 = vld [vmem:[%s1545_s24 + $0x10] sm:$0xff]  ;;  %v2418_v4 = vand.u32 7, %v1588_v0  ;;  %vm671_vm9 = vcmask 1040384   ;;  %vm744_vm10 = vcmask 1046528  }
  0x14   : > { %404 = vmatpush1.bf16.msra.mxu0 %v1439_v7  ;;  %477 = vmatpush1.bf16.msra.mxu1 %v1440_v8  ;;  %v1388_v18 = vld [vmem:[%s2412_s1] ss:$0 sm:$0xff]  ;;  %v1452_v20 = vld [vmem:[%s2414_s3 + $0x68] ss:$16 sps:$4 sm:$0xff]   ;;  %v232_v46 = vld [vmem:[%s1545_s24 + $0x30] sm:$0xff]  ;;  %s1462_s12 = smov 64  }
  0x15   : > { %405 = vmatprep.subr.bf16.mxu0 %v1441_v9  ;;  %478 = vmatprep.subr.bf16.mxu1 %v1443_v10  ;;  %v1389_v19 = vld [vmem:[%s2413_s2] ss:$0 sm:$0xff]  ;;  %v241_v21 = vmul.f32 %v1388_v18, %v226_v16  ;;  %v242_v22 = vmul.f32 %v1388_v18, %v227_v17  ;;  %v229_v24 = vld [vmem:[%s1545_s24 + $0x18] sm:$0xff]  ;;  %v243_v25 = vmul.f32 %v1388_v18, %v228_v23  ;;  %v231_v30 = vld [vmem:[%s1545_s24 + $0x28] sm:$0xff]  ;;  %vm1634_vm11 = vcmp.le.s32.totalorder %v2418_v4, 6  ;;  %s1418_s15 = sshll.u32 %s2532_s19, 7 }
  0x16   : > { %v244_v26 = vmul.f32 %v1388_v18, %v229_v24  ;;  %v230_v29 = vld [vmem:[%s1545_s24 + $0x20] sm:$0xff]  ;;  %v246_v36 = vmul.f32 %v1388_v18, %v231_v30  ;;  %v233_v47 = vld [vmem:[%s1545_s24 + $0x38] sm:$0xff]  ;;  %v247_v49 = vmul.f32 %v1388_v18, %v232_v46  ;;  %s2159_s17 = scalar_lea.vmem %s2416_s5, %s1418_s15 }
  0x17   : > { %v256_v27 = vadd.f32 %v1389_v19, %v241_v21  ;;  %v257_v28 = vadd.f32 %v1389_v19, %v242_v22  ;;  %v258_v31 = vadd.f32 %v1389_v19, %v243_v25  ;;  %v245_v35 = vmul.f32 %v1388_v18, %v230_v29 }
  0x18   : > { %406 = vmatpush1.bf16.msra.mxu0 %v1445_v11  ;;  %479 = vmatpush1.bf16.msra.mxu1 %v1446_v12  ;;  %v259_v32 = vadd.f32 %v1389_v19, %v244_v26  ;;  %v261_v45 = vadd.f32 %v1389_v19, %v246_v36  ;;  %v248_v52 = vmul.f32 %v1388_v18, %v233_v47 }
  0x19   : > { %407 = vmatprep.subr.bf16.mxu0 %v1447_v13  ;;  %480 = vmatprep.subr.bf16.mxu1 %v1449_v14  ;;  %vm264_vm0 = vcmp.ge.f32.partialorder %v256_v27, 0.0  ;;  %vm265_vm1 = vcmp.ge.f32.partialorder %v257_v28, 0.0  ;;  %v272_v33 = vmul.f32 0.2, %v256_v27  ;;  %v273_v34 = vmul.f32 0.2, %v257_v28 }
  0x1a   : > { %v274_v39 = vmul.f32 0.2, %v258_v31  ;;  %v275_v40 = vmul.f32 0.2, %v259_v32  ;;  %vm266_vm3 = vcmp.ge.f32.partialorder %v258_v31, 0.0  ;;  %vm267_vm4 = vcmp.ge.f32.partialorder %v259_v32, 0.0 }
  0x1b   : > { %v280_v37 = vsel %vm264_vm0, %v256_v27, %v272_v33  ;;  %v281_v38 = vsel %vm265_vm1, %v257_v28, %v273_v34  ;;  %v260_v42 = vadd.f32 %v1389_v19, %v245_v35  ;;  %v277_v51 = vmul.f32 0.2, %v261_v45 }
  0x1c   : > { %408 = vmatpush1.bf16.msra.mxu0 %v1451_v15  ;;  %481 = vmatpush1.bf16.msra.mxu1 %v1452_v20  ;;  %v288_v41 = vpack.c.bf16 %v281_v38, %v280_v37  ;;  %v282_v43 = vsel %vm266_vm3, %v258_v31, %v274_v39  ;;  %v283_v44 = vsel %vm267_vm4, %v259_v32, %v275_v40  ;;  %vm269_vm6 = vcmp.ge.f32.partialorder %v261_v45, 0.0 }
  0x1d   : > { %v289_v48 = vpack.c.bf16 %v283_v44, %v282_v43  ;;  %v276_v50 = vmul.f32 0.2, %v260_v42  ;;  %vm268_vm5 = vcmp.ge.f32.partialorder %v260_v42, 0.0  ;;  %v262_v53 = vadd.f32 %v1389_v19, %v247_v49 }
  0x1e   : > { %v285_v55 = vsel %vm269_vm6, %v261_v45, %v277_v51  ;;  %v263_v56 = vadd.f32 %v1389_v19, %v248_v52  ;;  %v1639_v31 = vadd.s32 8, %v1588_v0 }
  0x1f   : > { %1406 = vmatmul.mubr.msk.bf16.vlgmr.msra.gmra.mrb[0].mxu0 %vm388_vm2, %v288_v41  ;;  %1410 = vmatmul.mubr.msk.bf16.vlgmr.msra.gmra.mrb[0].mxu1 %vm388_vm2, %v288_v41  ;;  %v284_v54 = vsel %vm268_vm5, %v260_v42, %v276_v50  ;;  %v278_v58 = vmul.f32 0.2, %v262_v53  ;;  %vm270_vm7 = vcmp.ge.f32.partialorder %v262_v53, 0.0 }
  0x20   : > { %443 = vmatprep.mubr.bf16.mxu0 %v1461_v2  ;;  %516 = vmatprep.mubr.bf16.mxu1 %v1461_v2  ;;  %v290_v57 = vpack.c.bf16 %v285_v55, %v284_v54  ;;  %v279_v59 = vmul.f32 0.2, %v263_v56  ;;  %vm271_vm8 = vcmp.ge.f32.partialorder %v263_v56, 0.0  ;;  %v2417_v51 = vand.u32 7, %v1639_v31 }
  0x21   : > { %v286_v60 = vsel %vm270_vm7, %v262_v53, %v278_v58 }
  0x22   : > { %v287_v61 = vsel %vm271_vm8, %v263_v56, %v279_v59  ;;  %vm1725_vm12 = vcmp.le.s32.totalorder %v2417_v51, 6 }
  0x23   : > { %v291_v62 = vpack.c.bf16 %v287_v61, %v286_v60 }
  0x27   : > { %1407 = vmatmul.mubr.msk.bf16.gmra.mrb[4].mxu0 %vm388_vm2, %v289_v48  ;;  %1411 = vmatmul.mubr.msk.bf16.gmra.mrb[4].mxu1 %vm388_vm2, %v289_v48 }
  0x28   : > { %453 = vmatprep.mubr.bf16.mxu0 %v1461_v2  ;;  %526 = vmatprep.mubr.bf16.mxu1 %v1461_v2 }
  0x2f   : > { %1408 = vmatmul.mubr.msk.bf16.gmra.mrb[8].mxu0 %vm388_vm2, %v290_v57  ;;  %1412 = vmatmul.mubr.msk.bf16.gmra.mrb[8].mxu1 %vm388_vm2, %v290_v57 }
  0x30   : > { %536 = vmatprep.mubr.bf16.mxu1 %v1461_v2  ;;  %463 = vmatprep.mubr.bf16.mxu0 %v1461_v2 }
  0x37   : > { %1413 = vmatmul.mubr.msk.bf16.gmra.mrb[12].mxu1 %vm388_vm2, %v291_v62  ;;  %1409 = vmatmul.mubr.msk.bf16.gmra.mrb[12].mxu0 %vm388_vm2, %v291_v62 }
  0xf2   : > { %v1590_v1 = vpop.f32.mrb[0].mxu0  ;;  %v1592_v3 = vpop.f32.mrb[0].mxu1 }
  0xf3   : > { %v1029_v5 = vrot.slane %v1592_v3, 1  ;;  %v1596_v6 = vpop.f32.mrb[1].mxu0  ;;  %v510_v2 = vpop.f32.mrb[1].mxu1  ;;  %v986_v7 = vrot.slane %v1592_v3, 7  ;;  %v672_v8 = vrot.slane %v1590_v1, 7  ;;  %v745_v9 = vrot.slane %v1590_v1, 1 }
  0xf4   : > { %v851_v10 = vrot.slane %v1596_v6, 7  ;;  %v1108_v11 = vrot.slane %v510_v2, 7  ;;  %v1602_v12 = vpop.f32.mrb[2].mxu0  ;;  %v1604_v13 = vpop.f32.mrb[2].mxu1  ;;  %v899_v20 = vrot.slane %v1596_v6, 1 }
  0xf5   : > { %2445 = vst [vmem:[#allocation2_spill] sm:$0xff] %v1604_v13  ;;  %v673_v14 = vrot.slane %v1602_v12, 7  ;;  %v746_v15 = vrot.slane %v1602_v12, 1  ;;  %v987_v16 = vrot.slane %v1604_v13, 7  ;;  %v1030_v17 = vrot.slane %v1604_v13, 1  ;;  %999 = vrot.lane.b32.xlu1 %v986_v7, %s1462_s12  ;;  %v1611_v18 = vpop.f32.mrb[3].mxu1  ;;  %687 = vrot.lane.b32.xlu0 %v672_v8, %s1462_s12 }
  0xf6   : > { %2446 = vst [vmem:[#allocation3_spill] sm:$0xff] %v1611_v18  ;;  %v1614_v19 = vpop.f32.mrb[3].mxu0  ;;  %v1109_v21 = vrot.slane %v1611_v18, 7  ;;  %v1151_v60 = vrot.slane %v1611_v18, 1 }
  0xf7   : > { %2447 = vst [vmem:[#allocation4_spill] sm:$0xff] %v1614_v19  ;;  %v852_v22 = vrot.slane %v1614_v19, 7  ;;  %v900_v23 = vrot.slane %v1614_v19, 1  ;;  %v674_v24 = vsel %vm671_vm9, %v672_v8, %v673_v14  ;;  %v1031_v25 = vsel %vm744_vm10, %v1029_v5, %v1030_v17 }
  0xf8   : > { %v988_v26 = vsel %vm671_vm9, %v986_v7, %v987_v16  ;;  %v1624_v27 = vsel %vm744_vm10, %v745_v9, %v746_v15  ;;  %v1628_v29 = vsel %vm671_vm9, %v1108_v11, %v1109_v21  ;;  %v1051_v43 = vsel %vm1634_vm11, %v1031_v25, 0.0 }
  0xf9   : > { %v853_v28 = vsel %vm671_vm9, %v851_v10, %v852_v22  ;;  %866 = vrot.lane.b32.xlu0 %v851_v10, %s1462_s12  ;;  %v1642_v32 = vsel %vm744_vm10, %v899_v20, %v900_v23  ;;  %v785_v25 = vsel %vm1634_vm11, %v1624_v27, 0.0 }
  0xfa   : > { %868 = vrot.lane.b32.xlu1 %v853_v28, %s1462_s12  ;;  %v1644_v33 = vpop.f32.mrb[4].mxu0  ;;  %v1646_v34 = vpop.f32.mrb[4].mxu1 }
  0xfb   : > { %2450 = vst [vmem:[#allocation5_spill] sm:$0xff] %v1644_v33  ;;  %2451 = vst [vmem:[#allocation6_spill] sm:$0xff] %v1646_v34  ;;  %v675_v35 = vrot.slane %v1644_v33, 7  ;;  %v748_v36 = vrot.slane %v1644_v33, 1  ;;  %v989_v37 = vrot.slane %v1646_v34, 7  ;;  %v1651_v38 = vpop.f32.mrb[5].mxu0 }
  0xfc   : > { %2452 = vst [vmem:[#allocation7_spill] sm:$0xff] %v1651_v38  ;;  %v1653_v39 = vpop.f32.mrb[5].mxu1  ;;  %v1032_v40 = vrot.slane %v1646_v34, 1  ;;  %v854_v41 = vrot.slane %v1651_v38, 7  ;;  %v1660_v44 = vpop.f32.mrb[6].mxu0  ;;  %v902_v46 = vrot.slane %v1651_v38, 1 }
  0xfd   : > { %2453 = vst [vmem:[#allocation8_spill] sm:$0xff] %v1653_v39  ;;  %v1111_v42 = vrot.slane %v1653_v39, 7  ;;  %2454 = vst [vmem:[#allocation9_spill] sm:$0xff] %v1660_v44  ;;  %v1662_v45 = vpop.f32.mrb[6].mxu1  ;;  %689 = vrot.lane.b32.xlu0 %v674_v24, %s1462_s12  ;;  %v677_v47 = vrot.slane %v1660_v44, 7  ;;  %v1668_v48 = vpop.f32.mrb[7].mxu0  ;;  %v676_v56 = vsel %vm671_vm9, %v673_v14, %v675_v35  ;;  %v990_v57 = vsel %vm671_vm9, %v987_v16, %v989_v37 }
  0xfe   : > { %2455 = vst [vmem:[#allocation10_spill] sm:$0xff] %v1662_v45  ;;  %1065 = vrot.lane.b32.xlu1 %v1051_v43, %s1462_s12  ;;  %2456 = vst [vmem:[#allocation11_spill] sm:$0xff] %v1668_v48  ;;  %v991_v49 = vrot.slane %v1662_v45, 7  ;;  %v1671_v50 = vpop.f32.mrb[7].mxu1  ;;  %v1152_v52 = vrot.slane %v1653_v39, 1  ;;  %v750_v53 = vrot.slane %v1660_v44, 1  ;;  %v749_v58 = vsel %vm744_vm10, %v746_v15, %v748_v36 }
  0xff   : > { %2457 = vst [vmem:[#allocation12_spill] sm:$0xff] %v1671_v50  ;;  %v856_v54 = vrot.slane %v1668_v48, 7  ;;  %v1034_v55 = vrot.slane %v1662_v45, 1  ;;  %v1682_v59 = vsel %vm671_vm9, %v1109_v21, %v1111_v42  ;;  %v1686_v61 = vsel %vm671_vm9, %v852_v22, %v854_v41 }
 0x100   : > { %v1689_v62 = vsel %vm671_vm9, %v675_v35, %v677_v47  ;;  %v1692_v5 = vsel %vm744_vm10, %v1030_v17, %v1032_v40  ;;  %v1697_v2 = vsel %vm744_vm10, %v900_v23, %v902_v46  ;;  %v1700_v7 = vsel %vm671_vm9, %v989_v37, %v991_v49 }
 0x101   : > { %1001 = vrot.lane.b32.xlu0 %v988_v26, %s1462_s12  ;;  %v1703_v8 = vsel %vm671_vm9, %v854_v41, %v856_v54  ;;  %v2421_v9 = vrot.slane %v1671_v50, 1  ;;  %v1711_v14 = vsel %vm744_vm10, %v1151_v60, %v1152_v52  ;;  %v1714_v15 = vsel %vm744_vm10, %v1032_v40, %v1034_v55 }
 0x102   : > { %691 = vrot.lane.b32.xlu1 %v676_v56, %s1462_s12  ;;  %v1706_v10 = vpop.f32.mrb[8].mxu0  ;;  %v1708_v11 = vpop.f32.mrb[8].mxu1  ;;  %v1717_v16 = vsel %vm744_vm10, %v748_v36, %v750_v53  ;;  %v904_v22 = vrot.slane %v1668_v48, 1  ;;  %v1113_v23 = vrot.slane %v1671_v50, 7  ;;  %v786_v56 = vsel %vm1725_vm12, %v749_v58, 0.0 }
 0x103   : > { %2458 = vst [vmem:[#allocation13_spill] sm:$0xff] %v1706_v10  ;;  %2459 = vst [vmem:[#allocation14_spill] sm:$0xff] %v1708_v11  ;;  %v1719_v17 = vpop.f32.mrb[9].mxu0  ;;  %v1721_v20 = vpop.f32.mrb[9].mxu1  ;;  %v993_v24 = vrot.slane %v1708_v11, 7  ;;  %v679_v35 = vrot.slane %v1706_v10, 7  ;;  %v1755_v60 = vsel %vm744_vm10, %v1152_v52, %v2421_v9 }
 0x104   : > { %2460 = vst [vmem:[#allocation15_spill] sm:$0xff] %v1719_v17  ;;  %2461 = vst [vmem:[#allocation16_spill] sm:$0xff] %v1721_v20  ;;  %v1735_v26 = vpop.f32.mrb[10].mxu1  ;;  %v1737_v28 = vpop.f32.mrb[10].mxu0  ;;  %v752_v36 = vrot.slane %v1706_v10, 1  ;;  %v1036_v27 = vrot.slane %v1708_v11, 1  ;;  %v1763_v37 = vsel %vm671_vm9, %v1111_v42, %v1113_v23  ;;  %v1769_v11 = vsel %vm744_vm10, %v902_v46, %v904_v22 }
 0x105   : > { %2464 = vst [vmem:[#allocation17_spill] sm:$0xff] %v1737_v28  ;;  %803 = vrot.lane.b32.xlu0 %v785_v25, %s1462_s12  ;;  %v1744_v40 = vpop.f32.mrb[11].mxu1  ;;  %v1746_v41 = vpop.f32.mrb[11].mxu0  ;;  %v858_v43 = vrot.slane %v1719_v17, 7  ;;  %v906_v25 = vrot.slane %v1719_v17, 1  ;;  %v995_v51 = vrot.slane %v1735_v26, 7  ;;  %v1766_v58 = vsel %vm671_vm9, %v991_v49, %v993_v24 }
 0x106   : > { %1003 = vrot.lane.b32.xlu1 %v990_v57, %s1462_s12  ;;  %2465 = vst [vmem:[#allocation18_spill] sm:$0xff] %v1744_v40  ;;  %2466 = vst [vmem:[#allocation19_spill] sm:$0xff] %v1746_v41  ;;  %v1156_v57 = vrot.slane %v1721_v20, 1  ;;  %v681_v4 = vrot.slane %v1737_v28, 7  ;;  %v860_v52 = vrot.slane %v1746_v41, 7  ;;  %v1776_v9 = vsel %vm744_vm10, %v750_v53, %v752_v36 }
 0x107   : > { %v2467_v63 = vrot.slane %v1721_v20, 7  ;;  %v1784_v49 = vsel %vm671_vm9, %v677_v47, %v679_v35  ;;  %v754_v17 = vrot.slane %v1737_v28, 1  ;;  %v1798_v10 = vsel %vm744_vm10, %v1034_v55, %v1036_v27 }
 0x108   : > { %v1795_v53 = vsel %vm671_vm9, %v679_v35, %v681_v4  ;;  %v1804_v47 = vadd.s32 16, %v1588_v0  ;;  %v924_v55 = vsel %vm1725_vm12, %v1697_v2, 0.0  ;;  %v1117_v30 = vrot.slane %v1744_v40, 7 }
 0x109   : > { %1123 = vrot.lane.b32.xlu0 %v1628_v29, %s1462_s12  ;;  %v1781_v42 = vsel %vm671_vm9, %v1113_v23, %v2467_v63  ;;  %v923_v63 = vsel %vm1634_vm11, %v1642_v32, 0.0  ;;  %v1158_v23 = vrot.slane %v1744_v40, 1  ;;  %v908_v32 = vrot.slane %v1746_v41, 1 }
 0x10a   : > { %805 = vrot.lane.b32.xlu1 %v786_v56, %s1462_s12  ;;  %v1786_v46 = vpop.f32.mrb[12].mxu1  ;;  %v1789_v29 = vpop.f32.mrb[12].mxu0  ;;  %v1792_v56 = vsel %vm671_vm9, %v856_v54, %v858_v43  ;;  %v1052_v54 = vsel %vm1725_vm12, %v1692_v5, 0.0  ;;  %v1826_v5 = vsel %vm744_vm10, %v904_v22, %v906_v25  ;;  %v1829_v44 = vsel %vm671_vm9, %v993_v24, %v995_v51 }
 0x10b   : > { %2468 = vst [vmem:[#allocation20_spill] sm:$0xff] %v1786_v46  ;;  %2469 = vst [vmem:[#allocation21_spill] sm:$0xff] %v1789_v29  ;;  %v1807_v28 = vpop.f32.mrb[13].mxu1  ;;  %v1809_v48 = vpop.f32.mrb[13].mxu0  ;;  %v997_v38 = vrot.slane %v1786_v46, 7  ;;  %v1832_v2 = vsel %vm671_vm9, %v858_v43, %v860_v52  ;;  %v2474_v34 = vrot.slane %v1671_v50, 1  ;;  %v1850_v24 = vsel %vm744_vm10, %v752_v36, %v754_v17 }
 0x10c   : > { %2470 = vst [vmem:[#allocation22_spill] sm:$0xff] %v1807_v28  ;;  %2471 = vst [vmem:[#allocation23_spill] sm:$0xff] %v1809_v48  ;;  %v542_v35 = vpop.f32.mrb[14].mxu1  ;;  %v1819_v45 = vpop.f32.mrb[14].mxu0  ;;  %v2475_v22 = vrot.slane %v1735_v26, 1  ;;  %v1040_v43 = vrot.slane %v1786_v46, 1  ;;  %v1856_v13 = vsel %vm744_vm10, %v1156_v57, %v1158_v23 }
 0x10d   : > { %2472 = vst [vmem:[#allocation24_spill] sm:$0xff] %v1819_v45  ;;  %939 = vrot.lane.b32.xlu0 %v923_v63, %s1462_s12  ;;  %v1834_v41 = vpop.f32.mrb[15].mxu1  ;;  %v1836_v40 = vpop.f32.mrb[15].mxu0  ;;  %v756_v63 = vrot.slane %v1789_v29, 1  ;;  %v1119_v33 = vrot.slane %v1807_v28, 7  ;;  %v683_v19 = vrot.slane %v1789_v29, 7 }
 0x10e   : > { %1125 = vrot.lane.b32.xlu1 %v1682_v59, %s1462_s12  ;;  %2473 = vst [vmem:[#allocation25_spill] sm:$0xff] %v1834_v41  ;;  %v1842_v59 = vsel %vm744_vm10, %v2474_v34, %v1156_v57  ;;  %v1847_v39 = vsel %vm744_vm10, %v1036_v27, %v2475_v22  ;;  %v1160_v34 = vrot.slane %v1807_v28, 1  ;;  %v862_v50 = vrot.slane %v1809_v48, 7 }
 0x10f   : > { %v910_v18 = vrot.slane %v1809_v48, 1  ;;  %v1042_v27 = vrot.slane %v542_v35, 1  ;;  %v2476_v36 = vrot.slane %v1721_v20, 7  ;;  %v1871_v57 = vsel %vm671_vm9, %v995_v51, %v997_v38 }
 0x110   : > { %v685_v28 = vrot.slane %v1819_v45, 7  ;;  %v758_v46 = vrot.slane %v1819_v45, 1  ;;  %v1121_v35 = vrot.slane %v1834_v41, 7  ;;  %v864_v48 = vrot.slane %v1836_v40, 7 }
 0x111   : > { %870 = vrot.lane.b32.xlu0 %v1686_v61, %s1462_s12  ;;  %v1868_v22 = vsel %vm671_vm9, %v2476_v36, %v1117_v30  ;;  %v1878_v61 = vsel %vm744_vm10, %v906_v25, %v908_v32  ;;  %v1162_v36 = vrot.slane %v1834_v41, 1  ;;  %v912_v29 = vrot.slane %v1836_v40, 1 }
 0x112   : > { %693 = vrot.lane.b32.xlu1 %v1689_v62, %s1462_s12  ;;  %v1881_v62 = vsel %vm744_vm10, %v754_v17, %v756_v63  ;;  %v1886_v38 = vsel %vm671_vm9, %v1117_v30, %v1119_v33  ;;  %v1889_v51 = vsel %vm671_vm9, %v681_v4, %v683_v19  ;;  %v1892_v45 = vsel %vm671_vm9, %v860_v52, %v862_v50 }
 0x113   : > { %v1895_v20 = vsel %vm671_vm9, %v683_v19, %v685_v28  ;;  %v2477_v25 = vrot.slane %v1735_v26, 1  ;;  %v1903_v41 = vsel %vm744_vm10, %v908_v32, %v910_v18  ;;  %v1908_v4 = vsel %vm744_vm10, %v1158_v23, %v1160_v34 }
 0x114   : > { %v1911_v52 = vsel %vm744_vm10, %v758_v46, 0.0  ;;  %v1914_v19 = vsel %vm744_vm10, %v756_v63, %v758_v46  ;;  %v1917_v28 = vsel %vm671_vm9, %v862_v50, %v864_v48  ;;  %v574_v30 = vand.u32 7, %v1804_v47 }
 0x115   : > { %v1900_v17 = vsel %vm744_vm10, %v2477_v25, %v1040_v43  ;;  %1067 = vrot.lane.b32.xlu0 %v1052_v54, %s1462_s12  ;;  %v1921_v32 = vsel %vm671_vm9, %v1119_v33, %v1121_v35  ;;  %v1924_v54 = vsel %vm744_vm10, %v1040_v43, %v1042_v27  ;;  %v1927_v23 = vsel %vm744_vm10, %v910_v18, %v912_v29 }
 0x116   : > { %941 = vrot.lane.b32.xlu1 %v924_v55, %s1462_s12  ;;  %v1930_v55 = vsel %vm744_vm10, %v1160_v34, %v1162_v36  ;;  %v1933_v46 = vsel %vm744_vm10, %v1162_v36, 0.0  ;;  %v1940_v33 = vsel %vm744_vm10, %v912_v29, 0.0  ;;  %vm1944_vm13 = vcmp.le.s32.totalorder %v574_v30, 6 }
 0x117   : > { %v1172_v48 = vsel %vm1725_vm12, %v1711_v14, 0.0  ;;  %v1053_v50 = vsel %vm1944_vm13, %v1714_v15, 0.0  ;;  %v1173_v21 = vsel %vm1944_vm13, %v1755_v60, 0.0  ;;  %v2492_v15 = vand.u32 7, %v1639_v31 }
 0x119   : > { %1005 = vrot.lane.b32.xlu0 %v1700_v7, %s1462_s12  ;;  %v1957_v7 = vadd.s32 24, %v1588_v0  ;;  %vm2145_vm6 = vcmp.ge.s32.totalorder %v2492_v15, 1  ;;  %v2499_v15 = vld [vmem:[#allocation4_spill] sm:$0xff] }
 0x11a   : > { %872 = vrot.lane.b32.xlu1 %v1703_v8, %s1462_s12  ;;  %v787_v8 = vsel %vm1944_vm13, %v1717_v16, 0.0  ;;  %v925_v16 = vsel %vm1944_vm13, %v1769_v11, 0.0  ;;  %v1995_v11 = vadd.s32 32, %v1588_v0 }
 0x11b   : > { %v581_v14 = vand.u32 7, %v1957_v7 }
 0x11d   : > { %1186 = vrot.lane.b32.xlu0 %v1172_v48, %s1462_s12  ;;  %vm1974_vm14 = vcmp.le.s32.totalorder %v581_v14, 6  ;;  %vm2215_vm10 = vcmp.ge.s32.totalorder %v581_v14, 1 }
 0x11e   : > { %1069 = vrot.lane.b32.xlu1 %v1053_v50, %s1462_s12  ;;  %v788_v60 = vsel %vm1974_vm14, %v1776_v9, 0.0  ;;  %v1054_v9 = vsel %vm1974_vm14, %v1798_v10, 0.0 }
 0x121   : > { %807 = vrot.lane.b32.xlu0 %v787_v8, %s1462_s12 }
 0x122   : > { %1188 = vrot.lane.b32.xlu1 %v1173_v21, %s1462_s12 }
 0x125   : > { %1127 = vrot.lane.b32.xlu0 %v1763_v37, %s1462_s12  ;;  %v926_v37 = vsel %vm1974_vm14, %v1826_v5, 0.0 }
 0x126   : > { %1007 = vrot.lane.b32.xlu1 %v1766_v58, %s1462_s12  ;;  %v588_v58 = vand.u32 7, %v1995_v11 }
 0x128   : > { %vm2012_vm15 = vcmp.le.s32.totalorder %v588_v58, 6 }
 0x129   : > { %943 = vrot.lane.b32.xlu0 %v925_v16, %s1462_s12  ;;  %v789_v29 = vsel %vm2012_vm15, %v1850_v24, 0.0 }
 0x12a   : > { %809 = vrot.lane.b32.xlu1 %v788_v60, %s1462_s12 }
 0x12d   : > { %695 = vrot.lane.b32.xlu0 %v1784_v49, %s1462_s12  ;;  %v1055_v49 = vsel %vm2012_vm15, %v1847_v39, 0.0 }
 0x12e   : > { %1129 = vrot.lane.b32.xlu1 %v1781_v42, %s1462_s12  ;;  %v1174_v42 = vsel %vm1974_vm14, %v1842_v59, 0.0  ;;  %v2067_v59 = vadd.s32 48, %v1588_v0 }
 0x131   : > { %874 = vrot.lane.b32.xlu0 %v1792_v56, %s1462_s12  ;;  %v1175_v56 = vsel %vm2012_vm15, %v1856_v13, 0.0  ;;  %v927_v13 = vsel %vm2012_vm15, %v1878_v61, 0.0  ;;  %vm2270_vm15 = vcmp.ge.s32.totalorder %v588_v58, 1 }
 0x132   : > { %697 = vrot.lane.b32.xlu1 %v1795_v53, %s1462_s12 }
 0x135   : > { %1071 = vrot.lane.b32.xlu0 %v1054_v9, %s1462_s12 }
 0x136   : > { %945 = vrot.lane.b32.xlu1 %v926_v37, %s1462_s12 }
 0x139   : > { %1009 = vrot.lane.b32.xlu0 %v1829_v44, %s1462_s12  ;;  %v2025_v44 = vadd.s32 40, %v1588_v0 }
 0x13a   : > { %876 = vrot.lane.b32.xlu1 %v1832_v2, %s1462_s12  ;;  %v2059_v2 = vadd.s32 56, %v1588_v0 }
 0x13b   : > { %v595_v39 = vand.u32 7, %v2025_v44 }
 0x13c   : > { %v609_v63 = vand.u32 7, %v2059_v2 }
 0x13d   : > { %1190 = vrot.lane.b32.xlu0 %v1174_v42, %s1462_s12  ;;  %vm2042_vm0 = vcmp.le.s32.totalorder %v595_v39, 6 }
 0x13e   : > { %1073 = vrot.lane.b32.xlu1 %v1055_v49, %s1462_s12  ;;  %v790_v5 = vsel %vm2042_vm0, %v1881_v62, 0.0  ;;  %v1056_v24 = vsel %vm2042_vm0, %v1900_v17, 0.0  ;;  %v928_v43 = vsel %vm2042_vm0, %v1903_v41, 0.0  ;;  %vm2079_vm1 = vcmp.le.s32.totalorder %v609_v63, 6 }
 0x13f   : > { %v1176_v34 = vsel %vm2042_vm0, %v1908_v4, 0.0  ;;  %v792_v41 = vsel %vm2079_vm1, %v1911_v52, 0.0  ;;  %v1178_v36 = vsel %vm2079_vm1, %v1933_v46, 0.0  ;;  %v2488_v52 = vlaneseq }
 0x140   : > { %vm2291_vm0 = vcmp.ge.s32.totalorder %v595_v39, 1 }
 0x141   : > { %811 = vrot.lane.b32.xlu0 %v789_v29, %s1462_s12 }
 0x142   : > { %1192 = vrot.lane.b32.xlu1 %v1175_v56, %s1462_s12 }
 0x145   : > { %1131 = vrot.lane.b32.xlu0 %v1868_v22, %s1462_s12 }
 0x146   : > { %1011 = vrot.lane.b32.xlu1 %v1871_v57, %s1462_s12 }
 0x149   : > { %947 = vrot.lane.b32.xlu0 %v927_v13, %s1462_s12 }
 0x14a   : > { %813 = vrot.lane.b32.xlu1 %v790_v5, %s1462_s12 }
 0x14d   : > { %699 = vrot.lane.b32.xlu0 %v1889_v51, %s1462_s12 }
 0x14e   : > { %1133 = vrot.lane.b32.xlu1 %v1886_v38, %s1462_s12  ;;  %v930_v38 = vsel %vm2079_vm1, %v1940_v33, 0.0 }
 0x151   : > { %878 = vrot.lane.b32.xlu0 %v1892_v45, %s1462_s12 }
 0x152   : > { %701 = vrot.lane.b32.xlu1 %v1895_v20, %s1462_s12  ;;  %v602_v20 = vand.u32 7, %v2067_v59 }
 0x154   : > { %vm742_vm3 = vcmp.le.s32.totalorder %v602_v20, 6 }
 0x155   : > { %1075 = vrot.lane.b32.xlu0 %v1056_v24, %s1462_s12  ;;  %v791_v27 = vsel %vm742_vm3, %v1914_v19, 0.0  ;;  %v1057_v22 = vsel %vm742_vm3, %v1924_v54, 0.0  ;;  %v929_v57 = vsel %vm742_vm3, %v1927_v23, 0.0  ;;  %v1177_v35 = vsel %vm742_vm3, %v1930_v55, 0.0 }
 0x156   : > { %949 = vrot.lane.b32.xlu1 %v928_v43, %s1462_s12  ;;  %v2115_v19 = vand.u32 127, %v2488_v52  ;;  %v2489_v54 = vand.u32 7, %v1588_v0  ;;  %v2135_v0 = vld [vmem:[%s2415_s4] ss:$0 sm:$0xff] }
 0x158   : > { %vm2121_vm4 = vcmp.ge.s32.totalorder %v2489_v54, 1  ;;  %vm654_vm5 = vcmp.lt.s32.totalorder %v2115_v19, 32 }
 0x159   : > { %1194 = vrot.lane.b32.xlu0 %v1176_v34, %s1462_s12 }
 0x15a   : > { %817 = vrot.lane.b32.xlu1 %v792_v41, %s1462_s12 }
 0x15d   : > { %815 = vrot.lane.b32.xlu0 %v791_v27, %s1462_s12 }
 0x15e   : > { %880 = vrot.lane.b32.xlu1 %v1917_v28, %s1462_s12 }
 0x161   : > { %1135 = vrot.lane.b32.xlu0 %v1921_v32, %s1462_s12 }
 0x162   : > { %1077 = vrot.lane.b32.xlu1 %v1057_v22, %s1462_s12 }
 0x165   : > { %951 = vrot.lane.b32.xlu0 %v929_v57, %s1462_s12 }
 0x166   : > { %1196 = vrot.lane.b32.xlu1 %v1177_v35, %s1462_s12 }
 0x167   : > { %v1000_v61 = vpop.permute.xlu1 %999  ;;  %v688_v62 = vpop.permute.xlu0 %687 }
 0x168   : > { %v711_v55 = vsel %vm671_vm9, 0.0, %v688_v62  ;;  %v1020_v46 = vsel %vm671_vm9, 0.0, %v1000_v61 }
 0x169   : > { %1198 = vrot.lane.b32.xlu0 %v1178_v36, %s1462_s12  ;;  %v728_v33 = vsel %vm2121_vm4, %v711_v55, 0.0  ;;  %v1021_v8 = vsel %vm2121_vm4, %v1020_v46, 0.0  ;;  %v2497_v55 = vld [vmem:[#allocation3_spill] sm:$0xff] }
 0x16a   : > { %953 = vrot.lane.b32.xlu1 %v930_v38, %s1462_s12 }
 0x16b   : > { %v867_v51 = vpop.permute.xlu0 %866 }
 0x16c   : > { %v869_v25 = vpop.permute.xlu1 %868 }
 0x16d   : > { %v892_v52 = vsel %vm2145_vm6, %v869_v25, 0.0 }
 0x16f   : > { %v690_v17 = vpop.permute.xlu0 %689 }
 0x170   : > { %v1066_v4 = vpop.permute.xlu1 %1065  ;;  %v729_v9 = vsel %vm2145_vm6, %v690_v17, 0.0 }
 0x171   : > { %v1086_v60 = vsel %vm654_vm5, %v1021_v8, %v1066_v4 }
 0x172   : > { %v1093_v31 = vadd.f32 %v1086_v60, %v1592_v3 }
 0x173   : > { %v1002_v28 = vpop.permute.xlu0 %1001 }
 0x174   : > { %v2117_v32 = vpop.permute.xlu1 %691  ;;  %v1022_v17 = vsel %vm2145_vm6, %v1002_v28, 0.0 }
 0x177   : > { %v804_v18 = vpop.permute.xlu0 %803 }
 0x178   : > { %v2130_v48 = vpop.permute.xlu1 %1003  ;;  %v827_v50 = vsel %vm654_vm5, %v728_v33, %v804_v18 }
 0x179   : > { %v835_v21 = vadd.f32 %v827_v50, %v1590_v1  ;;  %v2498_v50 = vld [vmem:[#allocation2_spill] sm:$0xff] }
 0x17b   : > { %v1244_v37 = vadd.f32 %v2135_v0, %v835_v21  ;;  %v1124_v10 = vpop.permute.xlu0 %1123 }
 0x17c   : > { %v806_v42 = vpop.permute.xlu1 %805  ;;  %v1144_v62 = vsel %vm2145_vm6, %v1124_v10, 0.0 }
 0x17d   : > { %v828_v1 = vsel %vm654_vm5, %v729_v9, %v806_v42  ;;  %vm1260_vm7 = vcmp.ge.f32.partialorder %v1244_v37, 0.0  ;;  %v1276_v49 = vmul.f32 0.2, %v1244_v37 }
 0x17e   : > { %v836_v29 = vadd.f32 %v828_v1, %v1602_v12  ;;  %v890_v12 = vsel %vm671_vm9, 0.0, %v867_v51  ;;  %vm2185_vm9 = vcmp.ge.s32.totalorder %v574_v30, 1 }
 0x17f   : > { %v1292_v56 = vsel %vm1260_vm7, %v1244_v37, %v1276_v49  ;;  %v940_v13 = vpop.permute.xlu0 %939  ;;  %v891_v35 = vsel %vm2121_vm4, %v890_v12, 0.0  ;;  %v730_v30 = vsel %vm2185_vm9, %v2117_v32, 0.0  ;;  %v2500_v32 = vld [vmem:[#allocation5_spill] sm:$0xff]  ;;  %v2501_v37 = vld [vmem:[#allocation8_spill] sm:$0xff]  ;;  %v2504_v12 = vld [vmem:[#allocation6_spill] sm:$0xff]  ;;  %vm2335_vm7 = vcmp.ge.s32.totalorder %v602_v20, 1 }
 0x180   : > { %v1222_v53 = vadd.f32 %v1093_v31, %v836_v29  ;;  %v1126_v5 = vpop.permute.xlu1 %1125  ;;  %1308 = vst.msk [vmem:[%s2159_s17] sm:$0xff] %vm388_vm2, %v1292_v56  ;;  %v963_v61 = vsel %vm654_vm5, %v891_v35, %v940_v13 }
 0x181   : > { %v971_v54 = vadd.f32 %v963_v61, %v1596_v6  ;;  %v1145_v28 = vsel %vm2185_vm9, %v1126_v5, 0.0 }
 0x182   : > { %v1246_v24 = vadd.f32 %v2135_v0, %v1222_v53  ;;  %v1023_v53 = vsel %vm2185_vm9, %v2130_v48, 0.0 }
 0x183   : > { %v2166_v45 = vpop.permute.xlu0 %870 }
 0x184   : > { %vm1262_vm8 = vcmp.ge.f32.partialorder %v1246_v24, 0.0  ;;  %v1278_v43 = vmul.f32 0.2, %v1246_v24  ;;  %v694_v34 = vpop.permute.xlu1 %693 }
 0x185   : > { %v731_v14 = vsel %vm2215_vm10, %v694_v34, 0.0  ;;  %v2505_v34 = vld [vmem:[#allocation9_spill] sm:$0xff] }
 0x186   : > { %v1294_v41 = vsel %vm1262_vm8, %v1246_v24, %v1278_v43  ;;  %vm2341_vm8 = vcmp.ge.s32.totalorder %v609_v63, 1 }
 0x187   : > { %1310 = vst.msk [vmem:[%s2159_s17 + $0x10] sm:$0xff] %vm388_vm2, %v1294_v41  ;;  %v1068_v3 = vpop.permute.xlu0 %1067 }
 0x188   : > { %v942_v27 = vpop.permute.xlu1 %941  ;;  %v1087_v23 = vsel %vm654_vm5, %v1022_v17, %v1068_v3 }
 0x189   : > { %v964_v47 = vsel %vm654_vm5, %v892_v52, %v942_v27  ;;  %v1094_v6 = vadd.f32 %v1087_v23, %v2498_v50 }
 0x18a   : > { %v972_v16 = vadd.f32 %v964_v47, %v2499_v15 }
 0x18b   : > { %v2171_v22 = vpop.permute.xlu0 %1005 }
 0x18c   : > { %v2173_v57 = vpop.permute.xlu1 %872 }
 0x18d   : > { %v894_v51 = vsel %vm2215_vm10, %v2173_v57, 0.0 }
 0x18f   : > { %v1187_v36 = vpop.permute.xlu0 %1186 }
 0x190   : > { %v1070_v38 = vpop.permute.xlu1 %1069  ;;  %v1207_v4 = vsel %vm654_vm5, %v1144_v62, %v1187_v36 }
 0x191   : > { %v1214_v46 = vadd.f32 %v1207_v4, %v2497_v55  ;;  %v1088_v24 = vsel %vm654_vm5, %v1023_v53, %v1070_v38  ;;  %v2511_v53 = vld [vmem:[#allocation11_spill] sm:$0xff] }
 0x192   : > { %v1095_v35 = vadd.f32 %v1088_v24, %v2504_v12  ;;  %v2513_v24 = vld [vmem:[#allocation16_spill] sm:$0xff] }
 0x193   : > { %v1229_v33 = vadd.f32 %v1214_v46, %v971_v54  ;;  %v808_v18 = vpop.permute.xlu0 %807 }
 0x194   : > { %v1189_v25 = vpop.permute.xlu1 %1188  ;;  %v829_v8 = vsel %vm654_vm5, %v730_v30, %v808_v18  ;;  %v893_v18 = vsel %vm2185_vm9, %v2166_v45, 0.0  ;;  %v2506_v45 = vld [vmem:[#allocation7_spill] sm:$0xff] }
 0x195   : > { %v1208_v21 = vsel %vm654_vm5, %v1145_v28, %v1189_v25  ;;  %v1245_v60 = vadd.f32 %v2135_v0, %v1229_v33  ;;  %v837_v9 = vadd.f32 %v829_v8, %v2500_v32  ;;  %v2507_v32 = vld [vmem:[#allocation12_spill] sm:$0xff] }
 0x196   : > { %v1215_v10 = vadd.f32 %v1208_v21, %v2501_v37  ;;  %v1024_v21 = vsel %vm2215_vm10, %v2171_v22, 0.0 }
 0x197   : > { %vm1261_vm11 = vcmp.ge.f32.partialorder %v1245_v60, 0.0  ;;  %v1277_v1 = vmul.f32 0.2, %v1245_v60  ;;  %v1223_v31 = vadd.f32 %v1094_v6, %v837_v9  ;;  %v1128_v29 = vpop.permute.xlu0 %1127 }
 0x198   : > { %v1230_v49 = vadd.f32 %v1215_v10, %v972_v16  ;;  %v2219_v56 = vpop.permute.xlu1 %1007  ;;  %v1146_v50 = vsel %vm2215_vm10, %v1128_v29, 0.0 }
 0x199   : > { %v1293_v13 = vsel %vm1261_vm11, %v1245_v60, %v1277_v1  ;;  %v1248_v5 = vadd.f32 %v2135_v0, %v1223_v31 }
 0x19a   : > { %v1247_v7 = vadd.f32 %v2135_v0, %v1230_v49  ;;  %1309 = vst.msk [vmem:[%s2159_s17 + $0x8] sm:$0xff] %vm388_vm2, %v1293_v13  ;;  %v2510_v49 = vld [vmem:[#allocation10_spill] sm:$0xff] }
 0x19b   : > { %vm1264_vm12 = vcmp.ge.f32.partialorder %v1248_v5, 0.0  ;;  %v1280_v43 = vmul.f32 0.2, %v1248_v5  ;;  %v944_v48 = vpop.permute.xlu0 %943 }
 0x19c   : > { %vm1263_vm13 = vcmp.ge.f32.partialorder %v1247_v7, 0.0  ;;  %v1279_v41 = vmul.f32 0.2, %v1247_v7  ;;  %v810_v3 = vpop.permute.xlu1 %809  ;;  %v965_v25 = vsel %vm654_vm5, %v893_v18, %v944_v48 }
 0x19d   : > { %v830_v27 = vsel %vm654_vm5, %v731_v14, %v810_v3  ;;  %v1296_v61 = vsel %vm1264_vm12, %v1248_v5, %v1280_v43  ;;  %v973_v16 = vadd.f32 %v965_v25, %v2506_v45 }
 0x19e   : > { %v1295_v62 = vsel %vm1263_vm13, %v1247_v7, %v1279_v41  ;;  %v838_v36 = vadd.f32 %v830_v27, %v2505_v34  ;;  %1312 = vst.msk [vmem:[%s2159_s17 + $0x20] sm:$0xff] %vm388_vm2, %v1296_v61  ;;  %v2512_v7 = vld [vmem:[#allocation13_spill] sm:$0xff]  ;;  %v1025_v61 = vsel %vm2270_vm15, %v2219_v56, 0.0 }
 0x19f   : > { %1311 = vst.msk [vmem:[%s2159_s17 + $0x18] sm:$0xff] %vm388_vm2, %v1295_v62  ;;  %v696_v4 = vpop.permute.xlu0 %695 }
 0x1a0   : > { %v1224_v38 = vadd.f32 %v1095_v35, %v838_v36  ;;  %v1130_v17 = vpop.permute.xlu1 %1129  ;;  %v732_v57 = vsel %vm2270_vm15, %v696_v4, 0.0 }
 0x1a1   : > { %v1147_v10 = vsel %vm2270_vm15, %v1130_v17, 0.0 }
 0x1a2   : > { %v1250_v52 = vadd.f32 %v2135_v0, %v1224_v38 }
 0x1a3   : > { %v2241_v23 = vpop.permute.xlu0 %874 }
 0x1a4   : > { %vm1266_vm14 = vcmp.ge.f32.partialorder %v1250_v52, 0.0  ;;  %v1282_v54 = vmul.f32 0.2, %v1250_v52  ;;  %v698_v55 = vpop.permute.xlu1 %697 }
 0x1a5   : > { %v733_v39 = vsel %vm2291_vm0, %v698_v55, 0.0  ;;  %v2517_v55 = vld [vmem:[#allocation17_spill] sm:$0xff] }
 0x1a6   : > { %v1298_v46 = vsel %vm1266_vm14, %v1250_v52, %v1282_v54  ;;  %v2516_v54 = vld [vmem:[#allocation14_spill] sm:$0xff] }
 0x1a7   : > { %1314 = vst.msk [vmem:[%s2159_s17 + $0x30] sm:$0xff] %vm388_vm2, %v1298_v46  ;;  %v1072_v47 = vpop.permute.xlu0 %1071 }
 0x1a8   : > { %v946_v30 = vpop.permute.xlu1 %945  ;;  %v1089_v60 = vsel %vm654_vm5, %v1024_v21, %v1072_v47 }
 0x1a9   : > { %v966_v22 = vsel %vm654_vm5, %v894_v51, %v946_v30  ;;  %v1096_v29 = vadd.f32 %v1089_v60, %v2510_v49 }
 0x1aa   : > { %v974_v13 = vadd.f32 %v966_v22, %v2511_v53 }
 0x1ab   : > { %v2245_v28 = vpop.permute.xlu0 %1009 }
 0x1ac   : > { %v2247_v33 = vpop.permute.xlu1 %876 }
 0x1af   : > { %v1191_v6 = vpop.permute.xlu0 %1190 }
 0x1b0   : > { %v1074_v8 = vpop.permute.xlu1 %1073  ;;  %v1209_v15 = vsel %vm654_vm5, %v1146_v50, %v1191_v6 }
 0x1b1   : > { %v1216_v9 = vadd.f32 %v1209_v15, %v2507_v32  ;;  %v1090_v36 = vsel %vm654_vm5, %v1025_v61, %v1074_v8  ;;  %v895_v32 = vsel %vm2270_vm15, %v2241_v23, 0.0 }
 0x1b2   : > { %v1097_v46 = vadd.f32 %v1090_v36, %v2516_v54  ;;  %v2527_v54 = vld [vmem:[#allocation19_spill] sm:$0xff] }
 0x1b3   : > { %v1231_v42 = vadd.f32 %v1216_v9, %v973_v16  ;;  %v812_v1 = vpop.permute.xlu0 %811 }
 0x1b4   : > { %v1193_v31 = vpop.permute.xlu1 %1192  ;;  %v831_v11 = vsel %vm654_vm5, %v732_v57, %v812_v1  ;;  %v1026_v1 = vsel %vm2291_vm0, %v2245_v28, 0.0 }
 0x1b5   : > { %v1210_v58 = vsel %vm654_vm5, %v1147_v10, %v1193_v31  ;;  %v1249_v5 = vadd.f32 %v2135_v0, %v1231_v42  ;;  %v839_v14 = vadd.f32 %v831_v11, %v2512_v7  ;;  %v2518_v31 = vld [vmem:[#allocation15_spill] sm:$0xff]  ;;  %v2524_v7 = vld [vmem:[#allocation21_spill] sm:$0xff] }
 0x1b6   : > { %v1217_v43 = vadd.f32 %v1210_v58, %v2513_v24  ;;  %v896_v24 = vsel %vm2291_vm0, %v2247_v33, 0.0  ;;  %v2525_v33 = vld [vmem:[#allocation24_spill] sm:$0xff] }
 0x1b7   : > { %vm1265_vm1 = vcmp.ge.f32.partialorder %v1249_v5, 0.0  ;;  %v1281_v48 = vmul.f32 0.2, %v1249_v5  ;;  %v1225_v3 = vadd.f32 %v1096_v29, %v839_v14  ;;  %v1132_v12 = vpop.permute.xlu0 %1131  ;;  %v2519_v29 = vld [vmem:[#allocation18_spill] sm:$0xff] }
 0x1b8   : > { %v1232_v27 = vadd.f32 %v1217_v43, %v974_v13  ;;  %v2295_v35 = vpop.permute.xlu1 %1011  ;;  %v1148_v22 = vsel %vm2291_vm0, %v1132_v12, 0.0 }
 0x1b9   : > { %v1297_v62 = vsel %vm1265_vm1, %v1249_v5, %v1281_v48  ;;  %v1252_v34 = vadd.f32 %v2135_v0, %v1225_v3  ;;  %v1027_v48 = vsel %vm2335_vm7, %v2295_v35, 0.0 }
 0x1ba   : > { %v1251_v44 = vadd.f32 %v2135_v0, %v1232_v27  ;;  %1313 = vst.msk [vmem:[%s2159_s17 + $0x28] sm:$0xff] %vm388_vm2, %v1297_v62 }
 0x1bb   : > { %vm1268_vm3 = vcmp.ge.f32.partialorder %v1252_v34, 0.0  ;;  %v1284_v38 = vmul.f32 0.2, %v1252_v34  ;;  %v948_v56 = vpop.permute.xlu0 %947 }
 0x1bc   : > { %vm1267_vm4 = vcmp.ge.f32.partialorder %v1251_v44, 0.0  ;;  %v1283_v17 = vmul.f32 0.2, %v1251_v44  ;;  %v814_v4 = vpop.permute.xlu1 %813  ;;  %v967_v9 = vsel %vm654_vm5, %v895_v32, %v948_v56 }
 0x1bd   : > { %v832_v52 = vsel %vm654_vm5, %v733_v39, %v814_v4  ;;  %v1300_v47 = vsel %vm1268_vm3, %v1252_v34, %v1284_v38  ;;  %v975_v49 = vadd.f32 %v967_v9, %v2518_v31  ;;  %v2526_v39 = vld [vmem:[#allocation20_spill] sm:$0xff] }
 0x1be   : > { %v1299_v30 = vsel %vm1267_vm4, %v1251_v44, %v1283_v17  ;;  %v840_v18 = vadd.f32 %v832_v52, %v2517_v55  ;;  %1316 = vst.msk [vmem:[%s2159_s17 + $0x40] sm:$0xff] %vm388_vm2, %v1300_v47 }
 0x1bf   : > { %1315 = vst.msk [vmem:[%s2159_s17 + $0x38] sm:$0xff] %vm388_vm2, %v1299_v30  ;;  %v700_v6 = vpop.permute.xlu0 %699 }
 0x1c0   : > { %v1226_v25 = vadd.f32 %v1097_v46, %v840_v18  ;;  %v1134_v50 = vpop.permute.xlu1 %1133  ;;  %v734_v28 = vsel %vm2335_vm7, %v700_v6, 0.0 }
 0x1c1   : > { %v1149_v35 = vsel %vm2335_vm7, %v1134_v50, 0.0 }
 0x1c2   : > { %v1254_v8 = vadd.f32 %v2135_v0, %v1226_v25  ;;  %v2528_v25 = vld [vmem:[#allocation22_spill] sm:$0xff] }
 0x1c3   : > { %v879_v15 = vpop.permute.xlu0 %878 }
 0x1c4   : > { %vm1270_vm6 = vcmp.ge.f32.partialorder %v1254_v8, 0.0  ;;  %v1286_v21 = vmul.f32 0.2, %v1254_v8  ;;  %v702_v51 = vpop.permute.xlu1 %701  ;;  %v897_v52 = vsel %vm2335_vm7, %v879_v15, 0.0 }
 0x1c5   : > { %v735_v20 = vsel %vm2341_vm8, %v702_v51, 0.0 }
 0x1c6   : > { %v1302_v45 = vsel %vm1270_vm6, %v1254_v8, %v1286_v21 }
 0x1c7   : > { %1318 = vst.msk [vmem:[%s2159_s17 + $0x50] sm:$0xff] %vm388_vm2, %v1302_v45  ;;  %v1076_v16 = vpop.permute.xlu0 %1075 }
 0x1c8   : > { %v950_v60 = vpop.permute.xlu1 %949  ;;  %v1091_v58 = vsel %vm654_vm5, %v1026_v1, %v1076_v16  ;;  %v2529_v16 = vld [vmem:[#allocation23_spill] sm:$0xff] }
 0x1c9   : > { %v1098_v2 = vadd.f32 %v1091_v58, %v1735_v26  ;;  %v968_v61 = vsel %vm654_vm5, %v896_v24, %v950_v60 }
 0x1ca   : > { %v976_v46 = vadd.f32 %v968_v61, %v2527_v54 }
 0x1cb   : > { %v1195_v10 = vpop.permute.xlu0 %1194 }
 0x1cc   : > { %v818_v57 = vpop.permute.xlu1 %817  ;;  %v1211_v42 = vsel %vm654_vm5, %v1148_v22, %v1195_v10 }
 0x1cd   : > { %v1218_v37 = vadd.f32 %v1211_v42, %v2519_v29  ;;  %v834_v43 = vsel %vm654_vm5, %v735_v20, %v818_v57  ;;  %v2530_v57 = vld [vmem:[#allocation25_spill] sm:$0xff] }
 0x1ce   : > { %v842_v34 = vadd.f32 %v834_v43, %v2525_v33 }
 0x1cf   : > { %v1233_v53 = vadd.f32 %v1218_v37, %v975_v49  ;;  %v816_v13 = vpop.permute.xlu0 %815 }
 0x1d0   : > { %v881_v5 = vpop.permute.xlu1 %880  ;;  %v833_v59 = vsel %vm654_vm5, %v734_v28, %v816_v13 }
 0x1d1   : > { %v1253_v63 = vadd.f32 %v2135_v0, %v1233_v53  ;;  %v841_v14 = vadd.f32 %v833_v59, %v2524_v7  ;;  %v898_v6 = vsel %vm2341_vm8, %v881_v5, 0.0 }
 0x1d3   : > { %vm1269_vm9 = vcmp.ge.f32.partialorder %v1253_v63, 0.0  ;;  %v1285_v3 = vmul.f32 0.2, %v1253_v63  ;;  %v1227_v27 = vadd.f32 %v1098_v2, %v841_v14  ;;  %v1136_v26 = vpop.permute.xlu0 %1135 }
 0x1d4   : > { %v1078_v12 = vpop.permute.xlu1 %1077  ;;  %v1150_v8 = vsel %vm2341_vm8, %v1136_v26, 0.0 }
 0x1d5   : > { %v1092_v62 = vsel %vm654_vm5, %v1027_v48, %v1078_v12  ;;  %v1301_v41 = vsel %vm1269_vm9, %v1253_v63, %v1285_v3  ;;  %v1256_v44 = vadd.f32 %v2135_v0, %v1227_v27 }
 0x1d6   : > { %v1099_v36 = vadd.f32 %v1092_v62, %v2526_v39  ;;  %1317 = vst.msk [vmem:[%s2159_s17 + $0x48] sm:$0xff] %vm388_vm2, %v1301_v41 }
 0x1d7   : > { %vm1272_vm10 = vcmp.ge.f32.partialorder %v1256_v44, 0.0  ;;  %v1288_v38 = vmul.f32 0.2, %v1256_v44  ;;  %v952_v56 = vpop.permute.xlu0 %951 }
 0x1d8   : > { %v1228_v17 = vadd.f32 %v1099_v36, %v842_v34  ;;  %v1197_v4 = vpop.permute.xlu1 %1196  ;;  %v969_v18 = vsel %vm654_vm5, %v897_v52, %v952_v56 }
 0x1d9   : > { %v1212_v47 = vsel %vm654_vm5, %v1149_v35, %v1197_v4  ;;  %v1304_v30 = vsel %vm1272_vm10, %v1256_v44, %v1288_v38  ;;  %v977_v60 = vadd.f32 %v969_v18, %v2529_v16 }
 0x1da   : > { %v1258_v55 = vadd.f32 %v2135_v0, %v1228_v17  ;;  %v1219_v50 = vadd.f32 %v1212_v47, %v2528_v25  ;;  %1320 = vst.msk [vmem:[%s2159_s17 + $0x60] sm:$0xff] %vm388_vm2, %v1304_v30 }
 0x1db   : > { %v1199_v51 = vpop.permute.xlu0 %1198 }
 0x1dc   : > { %vm1274_vm11 = vcmp.ge.f32.partialorder %v1258_v55, 0.0  ;;  %v1290_v21 = vmul.f32 0.2, %v1258_v55  ;;  %v1234_v15 = vadd.f32 %v1219_v50, %v976_v46  ;;  %v954_v45 = vpop.permute.xlu1 %953  ;;  %v1213_v32 = vsel %vm654_vm5, %v1150_v8, %v1199_v51 }
 0x1dd   : > { %v970_v9 = vsel %vm654_vm5, %v898_v6, %v954_v45  ;;  %v1220_v42 = vadd.f32 %v1213_v32, %v2530_v57 }
 0x1de   : > { %v1306_v22 = vsel %vm1274_vm11, %v1258_v55, %v1290_v21  ;;  %v1255_v10 = vadd.f32 %v2135_v0, %v1234_v15  ;;  %v978_v1 = vadd.f32 %v970_v9, %v1836_v40 }
 0x1df   : > { %1322 = vst.msk [vmem:[%s2159_s17 + $0x70] sm:$0xff] %vm388_vm2, %v1306_v22  ;;  %v1235_v49 = vadd.f32 %v1220_v42, %v977_v60 }
 0x1e0   : > { %vm1271_vm12 = vcmp.ge.f32.partialorder %v1255_v10, 0.0  ;;  %v1287_v31 = vmul.f32 0.2, %v1255_v10  ;;  %v1259_v29 = vadd.f32 %v2135_v0, %v978_v1 }
 0x1e1   : > { %v1257_v19 = vadd.f32 %v2135_v0, %v1235_v49 }
 0x1e2   : > { %v1303_v37 = vsel %vm1271_vm12, %v1255_v10, %v1287_v31  ;;  %vm1275_vm5 = vcmp.ge.f32.partialorder %v1259_v29, 0.0  ;;  %v1291_v23 = vmul.f32 0.2, %v1259_v29 }
 0x1e3   : > { %1319 = vst.msk [vmem:[%s2159_s17 + $0x58] sm:$0xff] %vm388_vm2, %v1303_v37  ;;  %vm1273_vm13 = vcmp.ge.f32.partialorder %v1257_v19, 0.0  ;;  %v1289_v11 = vmul.f32 0.2, %v1257_v19 }
 0x1e4   : > { %v1307_v58 = vsel %vm1275_vm5, %v1259_v29, %v1291_v23 }
 0x1e5   : > { %1323 = vst.msk [vmem:[%s2159_s17 + $0x78] sm:$0xff] %vm388_vm2, %v1307_v58  ;;  %v1305_v40 = vsel %vm1273_vm13, %v1257_v19, %v1289_v11 }
 0x1e6   : > { %1321 = vst.msk [vmem:[%s2159_s17 + $0x68] sm:$0xff] %vm388_vm2, %v1305_v40 }
 0x1e7 PF: > { %s15_s18 = sadd.s32 1, %s1459_s18  }
 0x1e8   : > { %p12_p4 = scmp.ge.s32.totalorder %s15_s18, 4  }
 0x1ea   :  { %14 = sbr.rel (!%p12_p4) target bundleno = 1 (0x1), region = 70 }

// kernel: _lambda_.3
= control target key start
LH: loop header
LB: loop body
LE: loop exit
PB: predicated region body
PF: predicated region fallthrough
CT: control target
= control target key end

     0   :  { %13 = vsyncpa [#allocation3], 0  ;;  %s2543_s0 = inlined_call_operand.vmem [shape: f32[2,1,32], index: 0, kind: input, shape index: {}]   ;;  %s2544_s1 = inlined_call_operand.hbm [shape: bf16[32,2048], index: 1, kind: input, shape index: {}]   ;;  %s2545_s2 = inlined_call_operand.vmem [shape: f32[1,2048], index: 2, kind: input, shape index: {}]   ;;  %s2546_s3 = inlined_call_operand.hbm [shape: bf16[128,1024], index: 3, kind: input, shape index: {}]   ;;  %s2547_s4 = inlined_call_operand.vmem [shape: f32[1,128], index: 4, kind: input, shape index: {}]   ;;  %s2548_s5 = inlined_call_operand.vmem [shape: f32[2,32,128], index: 5, kind: output, shape index: {0}]   ;;  %s2549_s6 = inlined_call_operand.vmem [shape: f32[2,1,128], index: 6, kind: output, shape index: {1}]   ;;  %s2550_s7 = inlined_call_operand.vmem [shape: f32[2,1,128], index: 7, kind: output, shape index: {2}]  }
   0x1   :  { %14 = vsyncpa [#allocation5], 0  ;;  %s2214_s24 = smov 0  }
   0x2 LB: > { %s2167_s25 = smov [#allocation2]   ;;  %s2220_s27 = sadd.s32 4294967295, %s2165_s24   ;;  %s2165_s24 = sphi %s2214_s24, %s20_s24  }
   0x3   : > { %s225_s26 = sshll.u32 %s2167_s25, 4  ;;  %p1944_p0 = scmp.ge.s32.totalorder %s2165_s24, 1  ;;  %s226_s26 = int_to_ptr.vmem [resolvable:$true] %s225_s26 }
   0x4   : > { %p213_p1 = scmp.lt.s32.totalorder %s2165_s24, 3  ;;  %p2551_p3 = scmp.eq.s32.totalorder %s2220_s27, 0 }
   0x5   : > { %s2168_s29 = smov [#allocation4]   ;;  %s2095_s11 = scalar_lea.hbm %s2544_s1, 4096 }
   0x6   : > { %p2224_p2 = pnand %p1944_p0, %p213_p1  ;;  %s241_s30 = sshll.u32 %s2168_s29, 4  ;;  %s2237_s30 = int_to_ptr.vmem [resolvable:$true] %s241_s30 }
   0x7   : > { %p2096_p6 = scmp.ne.s32.totalorder %s2544_s1, %s2095_s11  ;;  %p2102_p10 = scmp.lt.u32.totalorder %s2095_s11, %s2544_s1 }
   0x8   : > { %s2553_s28 = scalar_select %p2224_p2, 1, 0 }
   0x9   : > { %p2069_p4 = pneg %p2224_p2 }
   0xb   : > { %p2233_p5 = pnand %p2551_p3, %p2069_p4 }
   0xd   : > { %p2097_p7 = pneg %p2233_p5 }
   0xf   : > { %p2098_p8 = pnand %p2097_p7, %p2096_p6 }
  0x11   : > { %p2099_p9 = pneg %p2098_p8 }
  0x13   : > { %p2104_p11 = pnand %p2102_p10, %p2099_p9 }
  0x15   : > { %2107 = shalt.err (!%p2104_p11)
}
  0x16   : > { %s2108_s16 = scalar_lea.vmem %s226_s26, 4096  ;;  %p2116_p1 = scmp.lt.s32.totalorder %s226_s26, %s226_s26 }
  0x17   : > { %p2109_p12 = scmp.ne.s32.totalorder %s226_s26, %s2108_s16  ;;  %p2117_p4 = scmp.lt.s32.totalorder %s2108_s16, %s2108_s16 }
  0x19   : > { %p2111_p13 = pnand %p2109_p12, %p2097_p7  ;;  %p2118_p3 = por %p2117_p4, %p2116_p1 }
  0x1b   : > { %p2112_p0 = pneg %p2111_p13 }
  0x1d   : > { %p2119_p2 = pnand %p2118_p3, %p2112_p0 }
  0x1f   : > { %2122 = shalt.err (!%p2119_p2)
}
  0x20   : > { %s2169_s17 = smov 1024   ;;  %s2170_s18 = smov 64  }
  0x21   : > { %2072 = dma.hbm_to_vmem [thread:$0]  (!%p2233_p5), %s2544_s1, 4096, %s226_s26, [#allocation3], %s2169_s17, %s2169_s17, %s2170_s18  }
  0x22   : > { %s2123_s23 = scalar_lea.hbm %s2546_s3, 8192 }
  0x23   : > { %p2124_p6 = scmp.ne.s32.totalorder %s2546_s3, %s2123_s23  ;;  %p2130_p8 = scmp.lt.u32.totalorder %s2123_s23, %s2546_s3 }
  0x25   : > { %p2126_p2 = pnand %p2124_p6, %p2097_p7 }
  0x27   : > { %p2127_p3 = pneg %p2126_p2 }
  0x29   : > { %p2132_p9 = pnand %p2130_p8, %p2127_p3 }
  0x2b   : > { %2135 = shalt.err (!%p2132_p9)
}
  0x2c   : > { %s2136_s26 = scalar_lea.vmem %s2237_s30, 8192  ;;  %p2144_p13 = scmp.lt.s32.totalorder %s2237_s30, %s2237_s30 }
  0x2d   : > { %p2137_p10 = scmp.ne.s32.totalorder %s2237_s30, %s2136_s26  ;;  %p2145_p0 = scmp.lt.s32.totalorder %s2136_s26, %s2136_s26 }
  0x2f   : > { %p2139_p11 = pnand %p2137_p10, %p2097_p7  ;;  %p2146_p1 = por %p2145_p0, %p2144_p13 }
  0x31   : > { %p2140_p12 = pneg %p2139_p11 }
  0x33   : > { %p2147_p4 = pnand %p2146_p1, %p2140_p12 }
  0x35   : > { %2150 = shalt.err (!%p2147_p4)
}
  0x36   : > { %s2171_s11 = smov 512   ;;  %s2172_s12 = smov 32  }
  0x37   : > { %2075 = dma.hbm_to_vmem [thread:$0]  (!%p2233_p5), %s2546_s3, 8192, %s2237_s30, [#allocation5], %s2171_s11, %s2171_s11, %s2172_s12  }
  0x38   : > { %p2555_p6 = scmp.ne.s32.totalorder %s2553_s28, 0 }
  0x39   : > { %p2556_p7 = scmp.eq.s32.totalorder (!%p2555_p6), %s2220_s27, 0 }
  0x3a   : > { %266 = sbr.rel (%p2555_p6) target bundleno = 622 (0x26e), region = 40 }
  0x41   : > { %2156 = dma.done.wait (%p2556_p7), [#allocation3], 4096   ;;  %p2557_p2 = pmov %p2556_p7 }
  0x43   : > { %2158 = vsyncadd (%p2557_p2), [#allocation3], 4294963200  ;;  %p2558_p3 = pmov %p2557_p2 }
  0x44   : > { %p2559_p8 = pmov %p2557_p2 }
  0x45   : > { %2160 = dma.done.wait (%p2558_p3), [#allocation5], 8192  }
  0x46   : > { %2162 = vsyncadd (%p2559_p8), [#allocation5], 4294959104  ;;  %p306_p9 = scmp.lt.s32.totalorder %s2220_s27, 1  ;;  %v2173_v0 = vmov 0   ;;  %v323_v1 = vld [vmem:[#allocation2] sm:$0xff]  ;;  %v324_v3 = vld [vmem:[#allocation2 + $0x8] sm:$0xff] }
  0x47   : > { %635 = vmatprep.mubr.bf16.mxu0 %v2173_v0  ;;  %676 = vmatprep.mubr.bf16.mxu1 %v2173_v0  ;;  %v331_v2 = vld [vmem:[#allocation2 + $0x40] sm:$0xff]  ;;  %v332_v5 = vld [vmem:[#allocation2 + $0x48] sm:$0xff]  ;;  %v325_v15 = vld [vmem:[#allocation2 + $0x10] sm:$0xff]  ;;  %vm599_vm0 = vcmask 261120   ;;  %vm1021_vm1 = vcmask 1040384   ;;  %vm1023_vm6 = vcmask 1041408  }
  0x48   : > { %s2569_s27 = smov (!%p306_p9, %s2220_s27), 1  ;;  %v1954_v4 = vcombine.high %v323_v1, %v331_v2  ;;  %v1953_v6 = vcombine.low %v323_v1, %v331_v2  ;;  %v339_v7 = vld [vmem:[#allocation2 + $0x80] sm:$0xff]  ;;  %v1956_v9 = vcombine.high %v324_v3, %v332_v5  ;;  %v1955_v10 = vcombine.low %v324_v3, %v332_v5  ;;  %v340_v12 = vld [vmem:[#allocation2 + $0x88] sm:$0xff]  ;;  %v333_v16 = vld [vmem:[#allocation2 + $0x50] sm:$0xff] }
  0x49   : > { %v347_v8 = vld [vmem:[#allocation2 + $0xc0] sm:$0xff]  ;;  %s308_s8 = scalar_lea.vmem %s2543_s0, %s2569_s27  ;;  %v348_v13 = vld [vmem:[#allocation2 + $0xc8] sm:$0xff]  ;;  %v326_v17 = vld [vmem:[#allocation2 + $0x18] sm:$0xff]  ;;  %v1958_v22 = vcombine.high %v325_v15, %v333_v16  ;;  %v1957_v29 = vcombine.low %v325_v15, %v333_v16  ;;  %vm1025_vm7 = vcmask 1042432   ;;  %vm1027_vm8 = vcmask 1043456   ;;  %s2060_s21 = sshll.u32 %s2569_s27, 5 }
  0x4a   : > { %v1970_v11 = vcombine.high %v339_v7, %v347_v8  ;;  %603 = vmatprep.subr.bf16.mxu0 %v1954_v4  ;;  %v1972_v14 = vcombine.high %v340_v12, %v348_v13  ;;  %644 = vmatprep.subr.bf16.mxu1 %v1956_v9  ;;  %v1969_v18 = vcombine.low %v339_v7, %v347_v8  ;;  %v321_v19 = vld [vmem:[%s308_s8] sm:$0x1]  ;;  %v334_v20 = vld [vmem:[#allocation2 + $0x58] sm:$0xff]  ;;  %v341_v24 = vld [vmem:[#allocation2 + $0x90] sm:$0xff]  ;;  %vm1029_vm9 = vcmask 1044480   ;;  %s313_s25 = scalar_lea.vmem %s2548_s5, %s2060_s21  ;;  %s316_s10 = scalar_lea.vmem %s2549_s6, %s2569_s27 }
  0x4b   : > { %604 = vmatpush1.bf16.msra.mxu0 %v1953_v6  ;;  %645 = vmatpush1.bf16.msra.mxu1 %v1955_v10  ;;  %v1971_v21 = vcombine.low %v340_v12, %v348_v13  ;;  %v1960_v23 = vcombine.high %v326_v17, %v334_v20  ;;  %v349_v25 = vld [vmem:[#allocation2 + $0xd0] sm:$0xff]  ;;  %v2306_v26 = vpack.c.bf16 %v321_v19, %v321_v19  ;;  %v342_v27 = vld [vmem:[#allocation2 + $0x98] sm:$0xff]  ;;  %v327_v33 = vld [vmem:[#allocation2 + $0x20] sm:$0xff]  ;;  %vm1031_vm14 = vcmask 1045504   ;;  %s319_s12 = scalar_lea.vmem %s2550_s7, %s2569_s27 }
  0x4c   : > { %605 = vmatprep.subr.bf16.mxu0 %v1970_v11  ;;  %646 = vmatprep.subr.bf16.mxu1 %v1972_v14  ;;  %v350_v28 = vld [vmem:[#allocation2 + $0xd8] sm:$0xff]  ;;  %v1959_v30 = vcombine.low %v326_v17, %v334_v20  ;;  %v1974_v31 = vcombine.high %v341_v24, %v349_v25  ;;  %v335_v34 = vld [vmem:[#allocation2 + $0x60] sm:$0xff]  ;;  %v328_v35 = vld [vmem:[#allocation2 + $0x28] sm:$0xff]  ;;  %v1973_v37 = vcombine.low %v341_v24, %v349_v25  ;;  %vm1033_vm15 = vcmask 1046528  }
  0x4d   : > { %v1976_v32 = vcombine.high %v342_v27, %v350_v28  ;;  %v336_v36 = vld [vmem:[#allocation2 + $0x68] sm:$0xff]  ;;  %v1975_v38 = vcombine.low %v342_v27, %v350_v28  ;;  %v1962_v39 = vcombine.high %v327_v33, %v335_v34  ;;  %v343_v41 = vld [vmem:[#allocation2 + $0xa0] sm:$0xff]  ;;  %v1961_v45 = vcombine.low %v327_v33, %v335_v34  ;;  %v329_v49 = vld [vmem:[#allocation2 + $0x30] sm:$0xff] }
  0x4e   : > { %v1964_v40 = vcombine.high %v328_v35, %v336_v36  ;;  %v351_v42 = vld [vmem:[#allocation2 + $0xe0] sm:$0xff]  ;;  %v344_v43 = vld [vmem:[#allocation2 + $0xa8] sm:$0xff]  ;;  %v1963_v46 = vcombine.low %v328_v35, %v336_v36  ;;  %v337_v50 = vld [vmem:[#allocation2 + $0x70] sm:$0xff] }
  0x4f   : > { %606 = vmatpush1.bf16.msra.mxu0 %v1969_v18  ;;  %647 = vmatpush1.bf16.msra.mxu1 %v1971_v21  ;;  %v352_v44 = vld [vmem:[#allocation2 + $0xe8] sm:$0xff]  ;;  %v1978_v47 = vcombine.high %v343_v41, %v351_v42  ;;  %v330_v51 = vld [vmem:[#allocation2 + $0x38] sm:$0xff]  ;;  %v1977_v53 = vcombine.low %v343_v41, %v351_v42  ;;  %v1966_v55 = vcombine.high %v329_v49, %v337_v50  ;;  %v345_v57 = vld [vmem:[#allocation2 + $0xb0] sm:$0xff] }
  0x50   : > { %685 = vmatprep.subr.bf16.mxu0 %v1958_v22  ;;  %726 = vmatprep.subr.bf16.mxu1 %v1960_v23  ;;  %v1980_v48 = vcombine.high %v344_v43, %v352_v44  ;;  %v338_v52 = vld [vmem:[#allocation2 + $0x78] sm:$0xff]  ;;  %v1979_v54 = vcombine.low %v344_v43, %v352_v44  ;;  %v353_v58 = vld [vmem:[#allocation2 + $0xf0] sm:$0xff]  ;;  %v1965_v61 = vcombine.low %v329_v49, %v337_v50  ;;  %v1043_v4 = vld [vmem:[#allocation4] sm:$0xff] }
  0x51   : > { %v1968_v56 = vcombine.high %v330_v51, %v338_v52  ;;  %v346_v59 = vld [vmem:[#allocation2 + $0xb8] sm:$0xff]  ;;  %v1967_v62 = vcombine.low %v330_v51, %v338_v52  ;;  %v1982_v63 = vcombine.high %v345_v57, %v353_v58  ;;  %v1981_v2 = vcombine.low %v345_v57, %v353_v58  ;;  %v1047_v5 = vld [vmem:[#allocation4 + $0x20] sm:$0xff]  ;;  %v1044_v6 = vld [vmem:[#allocation4 + $0x8] sm:$0xff] }
  0x52   : > { %1985 = vmatmul.mubr.msk.bf16.vlgmr.msra.gmra.mrb[0].mxu0 %vm599_vm0, %v2306_v26  ;;  %1986 = vmatmul.mubr.msk.bf16.vlgmr.msra.gmra.mrb[0].mxu1 %vm599_vm0, %v2306_v26  ;;  %v354_v60 = vld [vmem:[#allocation2 + $0xf8] sm:$0xff]  ;;  %v1994_v7 = vcombine.high %v1043_v4, %v1047_v5  ;;  %v1048_v8 = vld [vmem:[#allocation4 + $0x28] sm:$0xff]  ;;  %v1993_v9 = vcombine.low %v1043_v4, %v1047_v5  ;;  %v1051_v12 = vld [vmem:[#allocation4 + $0x40] sm:$0xff] }
  0x53   : > { %686 = vmatpush1.bf16.msra.mxu0 %v1957_v29  ;;  %727 = vmatpush1.bf16.msra.mxu1 %v1959_v30  ;;  %v1984_v1 = vcombine.high %v346_v59, %v354_v60  ;;  %v1983_v3 = vcombine.low %v346_v59, %v354_v60  ;;  %v1995_v10 = vcombine.low %v1044_v6, %v1048_v8  ;;  %v1055_v13 = vld [vmem:[#allocation4 + $0x60] sm:$0xff]  ;;  %v1052_v14 = vld [vmem:[#allocation4 + $0x48] sm:$0xff]  ;;  %v2334_v4 = vld [vmem:[#allocation4 + $0x30] sm:$0xff] }
  0x54   : > { %687 = vmatprep.subr.bf16.mxu0 %v1974_v31  ;;  %728 = vmatprep.subr.bf16.mxu1 %v1976_v32  ;;  %v1996_v11 = vcombine.high %v1044_v6, %v1048_v8  ;;  %v2002_v15 = vcombine.high %v1051_v12, %v1055_v13  ;;  %v1056_v16 = vld [vmem:[#allocation4 + $0x68] sm:$0xff]  ;;  %v2001_v17 = vcombine.low %v1051_v12, %v1055_v13  ;;  %v1059_v20 = vld [vmem:[#allocation4 + $0x80] sm:$0xff]  ;;  %v519_v13 = vlaneseq }
  0x55   : > { %717 = vmatprep.mubr.bf16.mxu0 %v2173_v0  ;;  %758 = vmatprep.mubr.bf16.mxu1 %v2173_v0  ;;  %v2003_v18 = vcombine.low %v1052_v14, %v1056_v16  ;;  %v2004_v19 = vcombine.high %v1052_v14, %v1056_v16  ;;  %v1063_v21 = vld [vmem:[#allocation4 + $0xa0] sm:$0xff]  ;;  %v1060_v22 = vld [vmem:[#allocation4 + $0x88] sm:$0xff] }
  0x56   : > { %v2010_v23 = vcombine.high %v1059_v20, %v1063_v21  ;;  %v1064_v24 = vld [vmem:[#allocation4 + $0xa8] sm:$0xff]  ;;  %v2009_v25 = vcombine.low %v1059_v20, %v1063_v21  ;;  %v1067_v28 = vld [vmem:[#allocation4 + $0xc0] sm:$0xff]  ;;  %v2349_v14 = vshrl.u32 %v519_v13, 7 }
  0x57   : > { %688 = vmatpush1.bf16.msra.mxu0 %v1973_v37  ;;  %729 = vmatpush1.bf16.msra.mxu1 %v1975_v38  ;;  %v2012_v27 = vcombine.high %v1060_v22, %v1064_v24  ;;  %v1071_v29 = vld [vmem:[#allocation4 + $0xe0] sm:$0xff]  ;;  %v1068_v31 = vld [vmem:[#allocation4 + $0xc8] sm:$0xff] }
  0x58   : > { %767 = vmatprep.subr.bf16.mxu0 %v1962_v39  ;;  %808 = vmatprep.subr.bf16.mxu1 %v1964_v40  ;;  %v2018_v30 = vcombine.high %v1067_v28, %v1071_v29  ;;  %v1072_v32 = vld [vmem:[#allocation4 + $0xe8] sm:$0xff]  ;;  %v2017_v33 = vcombine.low %v1067_v28, %v1071_v29  ;;  %v1075_v36 = vld [vmem:[#allocation4 + $0x100] sm:$0xff]  ;;  %v537_v28 = vsub.s32 4, %v2349_v14 }
  0x59   : > { %v2019_v34 = vcombine.low %v1068_v31, %v1072_v32  ;;  %v2020_v35 = vcombine.high %v1068_v31, %v1072_v32  ;;  %v1079_v37 = vld [vmem:[#allocation4 + $0x120] sm:$0xff]  ;;  %v1076_v38 = vld [vmem:[#allocation4 + $0x108] sm:$0xff] }
  0x5a   : > { %1987 = vmatmul.mubr.msk.bf16.vlgmr.msra.gmra.mrb[4].mxu0 %vm599_vm0, %v2306_v26  ;;  %1988 = vmatmul.mubr.msk.bf16.vlgmr.msra.gmra.mrb[4].mxu1 %vm599_vm0, %v2306_v26  ;;  %v2026_v39 = vcombine.high %v1075_v36, %v1079_v37  ;;  %v1080_v40 = vld [vmem:[#allocation4 + $0x128] sm:$0xff]  ;;  %v2025_v41 = vcombine.low %v1075_v36, %v1079_v37  ;;  %v1083_v44 = vld [vmem:[#allocation4 + $0x140] sm:$0xff] }
  0x5b   : > { %768 = vmatpush1.bf16.msra.mxu0 %v1961_v45  ;;  %809 = vmatpush1.bf16.msra.mxu1 %v1963_v46  ;;  %v2027_v42 = vcombine.low %v1076_v38, %v1080_v40  ;;  %v2028_v43 = vcombine.high %v1076_v38, %v1080_v40  ;;  %v1087_v45 = vld [vmem:[#allocation4 + $0x160] sm:$0xff]  ;;  %v1084_v46 = vld [vmem:[#allocation4 + $0x148] sm:$0xff] }
  0x5c   : > { %769 = vmatprep.subr.bf16.mxu0 %v1978_v47  ;;  %810 = vmatprep.subr.bf16.mxu1 %v1980_v48  ;;  %v2034_v47 = vcombine.high %v1083_v44, %v1087_v45  ;;  %v1088_v48 = vld [vmem:[#allocation4 + $0x168] sm:$0xff]  ;;  %v2033_v49 = vcombine.low %v1083_v44, %v1087_v45  ;;  %v1091_v52 = vld [vmem:[#allocation4 + $0x180] sm:$0xff] }
  0x5d   : > { %799 = vmatprep.mubr.bf16.mxu0 %v2173_v0  ;;  %840 = vmatprep.mubr.bf16.mxu1 %v2173_v0  ;;  %v2035_v50 = vcombine.low %v1084_v46, %v1088_v48  ;;  %v2036_v51 = vcombine.high %v1084_v46, %v1088_v48  ;;  %v1099_v60 = vld [vmem:[#allocation4 + $0x1c0] sm:$0xff] }
  0x5e   : > { %v355_v16 = vld [vmem:[%s2545_s2] sm:$0xff] }
  0x5f   : > { %770 = vmatpush1.bf16.msra.mxu0 %v1977_v53  ;;  %811 = vmatpush1.bf16.msra.mxu1 %v1979_v54  ;;  %v1095_v53 = vld [vmem:[#allocation4 + $0x1a0] sm:$0xff]  ;;  %v1092_v54 = vld [vmem:[#allocation4 + $0x188] sm:$0xff]  ;;  %v538_v44 = vrot.slane %v355_v16, %v537_v28 }
  0x60   : > { %849 = vmatprep.subr.bf16.mxu0 %v1966_v55  ;;  %890 = vmatprep.subr.bf16.mxu1 %v1968_v56  ;;  %v2042_v55 = vcombine.high %v1091_v52, %v1095_v53  ;;  %v1096_v56 = vld [vmem:[#allocation4 + $0x1a8] sm:$0xff]  ;;  %v2041_v57 = vcombine.low %v1091_v52, %v1095_v53 }
  0x61   : > { %v2043_v58 = vcombine.low %v1092_v54, %v1096_v56  ;;  %v2044_v59 = vcombine.high %v1092_v54, %v1096_v56  ;;  %v2379_v52 = vld [vmem:[%s2545_s2 + $0x8] sm:$0xff] }
  0x62   : > { %1989 = vmatmul.mubr.msk.bf16.vlgmr.msra.gmra.mrb[8].mxu0 %vm599_vm0, %v2306_v26  ;;  %1990 = vmatmul.mubr.msk.bf16.vlgmr.msra.gmra.mrb[8].mxu1 %vm599_vm0, %v2306_v26 }
  0x63   : > { %850 = vmatpush1.bf16.msra.mxu0 %v1965_v61  ;;  %891 = vmatpush1.bf16.msra.mxu1 %v1967_v62  ;;  %v1103_v61 = vld [vmem:[#allocation4 + $0x1e0] sm:$0xff]  ;;  %v1100_v62 = vld [vmem:[#allocation4 + $0x1c8] sm:$0xff] }
  0x64   : > { %851 = vmatprep.subr.bf16.mxu0 %v1982_v63  ;;  %892 = vmatprep.subr.bf16.mxu1 %v1984_v1  ;;  %v2049_v63 = vcombine.low %v1099_v60, %v1103_v61  ;;  %v2050_v1 = vcombine.high %v1099_v60, %v1103_v61 }
  0x65   : > { %881 = vmatprep.mubr.bf16.mxu0 %v2173_v0  ;;  %922 = vmatprep.mubr.bf16.mxu1 %v2173_v0 }
  0x67   : > { %852 = vmatpush1.bf16.msra.mxu0 %v1981_v2  ;;  %893 = vmatpush1.bf16.msra.mxu1 %v1983_v3  ;;  %v1104_v2 = vld [vmem:[#allocation4 + $0x1e8] sm:$0xff]  ;;  %v2332_v3 = vld [vmem:[#allocation4 + $0x10] sm:$0xff] }
  0x68   : > { %1427 = vmatprep.subr.bf16.mxu0 %v1994_v7  ;;  %1470 = vmatprep.subr.bf16.mxu1 %v1996_v11  ;;  %v2051_v5 = vcombine.low %v1100_v62, %v1104_v2  ;;  %v2052_v6 = vcombine.high %v1100_v62, %v1104_v2  ;;  %v1997_v7 = vcombine.low %v2332_v3, %v2334_v4 }
  0x69   : > { %v1998_v8 = vcombine.high %v2332_v3, %v2334_v4 }
  0x6a   : > { %1991 = vmatmul.mubr.msk.bf16.vlgmr.msra.gmra.mrb[12].mxu0 %vm599_vm0, %v2306_v26  ;;  %1992 = vmatmul.mubr.msk.bf16.vlgmr.msra.gmra.mrb[12].mxu1 %vm599_vm0, %v2306_v26  ;;  %v2011_v26 = vcombine.low %v1060_v22, %v1064_v24 }
  0x6b   : > { %1459 = vmatprep.mubr.bf16.mxu0 %v2173_v0  ;;  %1502 = vmatprep.mubr.bf16.mxu1 %v2173_v0 }
  0x6c   : > { %1428 = vmatpush1.bf16.msra.mxu0 %v1993_v9  ;;  %1471 = vmatpush1.bf16.msra.mxu1 %v1995_v10  ;;  %v2340_v9 = vld [vmem:[#allocation4 + $0x18] sm:$0xff] }
  0x6d   : > { %1429 = vmatprep.subr.bf16.mxu0 %v2002_v15  ;;  %1472 = vmatprep.subr.bf16.mxu1 %v2004_v19  ;;  %v2342_v10 = vld [vmem:[#allocation4 + $0x38] sm:$0xff]  ;;  %v521_v15 = vsub.s32 0, %v2349_v14  ;;  %v533_v19 = vsub.s32 3, %v2349_v14 }
  0x6e   : > { %v1999_v11 = vcombine.low %v2340_v9, %v2342_v10  ;;  %v2000_v12 = vcombine.high %v2340_v9, %v2342_v10  ;;  %v1077_v10 = vld [vmem:[#allocation4 + $0x110] sm:$0xff] }
  0x6f   : > { %v522_v20 = vrot.slane %v355_v16, %v521_v15 }
  0x70   : > { %1430 = vmatpush1.bf16.msra.mxu0 %v2001_v17  ;;  %1473 = vmatpush1.bf16.msra.mxu1 %v2003_v18  ;;  %v529_v17 = vsub.s32 2, %v2349_v14  ;;  %v525_v18 = vsub.s32 1, %v2349_v14 }
  0x71   : > { %1431 = vmatprep.subr.bf16.mxu0 %v2010_v23  ;;  %1474 = vmatprep.subr.bf16.mxu1 %v2012_v27  ;;  %v534_v23 = vrot.slane %v355_v16, %v533_v19 }
  0x72   : > { %v530_v21 = vrot.slane %v355_v16, %v529_v17  ;;  %v526_v22 = vrot.slane %v355_v16, %v525_v18 }
  0x74   : > { %1432 = vmatpush1.bf16.msra.mxu0 %v2009_v25  ;;  %1475 = vmatpush1.bf16.msra.mxu1 %v2011_v26 }
  0x75   : > { %1433 = vmatprep.subr.bf16.mxu0 %v2018_v30  ;;  %1476 = vmatprep.subr.bf16.mxu1 %v2020_v35 }
  0x78   : > { %1434 = vmatpush1.bf16.msra.mxu0 %v2017_v33  ;;  %1477 = vmatpush1.bf16.msra.mxu1 %v2019_v34  ;;  %v545_v33 = vsub.s32 6, %v2349_v14  ;;  %v541_v34 = vsub.s32 5, %v2349_v14 }
  0x79   : > { %1435 = vmatprep.subr.bf16.mxu0 %v2026_v39  ;;  %1478 = vmatprep.subr.bf16.mxu1 %v2028_v43  ;;  %v549_v39 = vsub.s32 7, %v2349_v14 }
  0x7a   : > { %v542_v48 = vrot.slane %v355_v16, %v541_v34 }
  0x7c   : > { %1436 = vmatpush1.bf16.msra.mxu0 %v2025_v41  ;;  %1479 = vmatpush1.bf16.msra.mxu1 %v2027_v42 }
  0x7d   : > { %1437 = vmatprep.subr.bf16.mxu0 %v2034_v47  ;;  %1480 = vmatprep.subr.bf16.mxu1 %v2036_v51  ;;  %v546_v47 = vrot.slane %v355_v16, %v545_v33  ;;  %v550_v51 = vrot.slane %v355_v16, %v549_v39 }
  0x80   : > { %1438 = vmatpush1.bf16.msra.mxu0 %v2033_v49  ;;  %1481 = vmatpush1.bf16.msra.mxu1 %v2035_v50 }
  0x81   : > { %1439 = vmatprep.subr.bf16.mxu0 %v2042_v55  ;;  %1482 = vmatprep.subr.bf16.mxu1 %v2044_v59 }
  0x84   : > { %1440 = vmatpush1.bf16.msra.mxu0 %v2041_v57  ;;  %1483 = vmatpush1.bf16.msra.mxu1 %v2043_v58 }
  0x85   : > { %1441 = vmatprep.subr.bf16.mxu0 %v2050_v1  ;;  %1484 = vmatprep.subr.bf16.mxu1 %v2052_v6 }
  0x88   : > { %1442 = vmatpush1.bf16.msra.mxu0 %v2049_v63  ;;  %1485 = vmatpush1.bf16.msra.mxu1 %v2051_v5  ;;  %v554_v5 = vrot.slane %v2379_v52, %v521_v15 }
  0x89   : > { %1513 = vmatprep.subr.bf16.mxu0 %v1998_v8  ;;  %1556 = vmatprep.subr.bf16.mxu1 %v2000_v12 }
 0x125   : > { %v637_v24 = vpop.f32.mrb[0].mxu0  ;;  %v678_v26 = vpop.f32.mrb[0].mxu1 }
 0x126   : > { %v638_v25 = vadd.f32 %v637_v24, %v522_v20  ;;  %v639_v27 = vpop.f32.mrb[1].mxu0  ;;  %v679_v29 = vadd.f32 %v678_v26, %v530_v21  ;;  %v680_v31 = vpop.f32.mrb[1].mxu1  ;;  %v562_v26 = vrot.slane %v2379_v52, %v529_v17 }
 0x127   : > { %v640_v30 = vadd.f32 %v639_v27, %v526_v22  ;;  %v641_v32 = vpop.f32.mrb[2].mxu0  ;;  %v681_v36 = vadd.f32 %v680_v31, %v534_v23  ;;  %v682_v37 = vpop.f32.mrb[2].mxu1 }
 0x128   : > { %v947_v35 = vmul.f32 0.2, %v638_v25  ;;  %v642_v38 = vpop.f32.mrb[3].mxu0  ;;  %vm933_vm2 = vcmp.ge.f32.partialorder %v679_v29, 0.0  ;;  %v949_v40 = vmul.f32 0.2, %v679_v29 }
 0x129   : > { %vm932_vm3 = vcmp.ge.f32.partialorder %v640_v30, 0.0  ;;  %v948_v41 = vmul.f32 0.2, %v640_v30  ;;  %vm931_vm4 = vcmp.ge.f32.partialorder %v638_v25, 0.0  ;;  %vm934_vm5 = vcmp.ge.f32.partialorder %v681_v36, 0.0  ;;  %v683_v43 = vpop.f32.mrb[3].mxu1 }
 0x12a   : > { %v950_v42 = vmul.f32 0.2, %v681_v36  ;;  %v965_v45 = vsel %vm933_vm2, %v679_v29, %v949_v40  ;;  %v963_v53 = vsel %vm931_vm4, %v638_v25, %v947_v35  ;;  %v566_v35 = vrot.slane %v2379_v52, %v533_v19 }
 0x12b   : > { %v964_v46 = vsel %vm932_vm3, %v640_v30, %v948_v41  ;;  %v983_v54 = vrot.slane %v965_v45, 6  ;;  %v558_v30 = vrot.slane %v2379_v52, %v525_v18 }
 0x12c   : > { %v980_v49 = vrot.slane %v964_v46, 7  ;;  %v966_v50 = vsel %vm934_vm5, %v681_v36, %v950_v42 }
 0x12d   : > { %v719_v55 = vpop.f32.mrb[4].mxu0  ;;  %v986_v57 = vrot.slane %v966_v50, 5  ;;  %v760_v59 = vpop.f32.mrb[4].mxu1 }
 0x12e   : > { %v1022_v56 = vsel %vm1021_vm1, %v963_v53, %v980_v49  ;;  %v720_v58 = vadd.f32 %v719_v55, %v538_v44  ;;  %v721_v60 = vpop.f32.mrb[5].mxu0  ;;  %v761_v62 = vadd.f32 %v760_v59, %v546_v47  ;;  %v762_v1 = vpop.f32.mrb[5].mxu1 }
 0x12f   : > { %v1024_v61 = vsel %vm1023_vm6, %v1022_v56, %v983_v54  ;;  %v722_v63 = vadd.f32 %v721_v60, %v542_v48  ;;  %v723_v2 = vpop.f32.mrb[6].mxu0  ;;  %v763_v12 = vadd.f32 %v762_v1, %v550_v51  ;;  %v764_v16 = vpop.f32.mrb[6].mxu1  ;;  %v578_v60 = vrot.slane %v2379_v52, %v545_v33 }
 0x130   : > { %v1026_v6 = vsel %vm1025_vm7, %v1024_v61, %v986_v57  ;;  %vm935_vm10 = vcmp.ge.f32.partialorder %v720_v58, 0.0  ;;  %v951_v8 = vmul.f32 0.2, %v720_v58  ;;  %v724_v20 = vpop.f32.mrb[7].mxu0  ;;  %vm937_vm11 = vcmp.ge.f32.partialorder %v761_v62, 0.0  ;;  %v765_v25 = vpop.f32.mrb[7].mxu1 }
 0x131   : > { %v953_v21 = vmul.f32 0.2, %v761_v62  ;;  %vm936_vm12 = vcmp.ge.f32.partialorder %v722_v63, 0.0  ;;  %v952_v22 = vmul.f32 0.2, %v722_v63  ;;  %vm938_vm13 = vcmp.ge.f32.partialorder %v763_v12, 0.0 }
 0x132   : > { %v967_v23 = vsel %vm935_vm10, %v720_v58, %v951_v8  ;;  %v954_v24 = vmul.f32 0.2, %v763_v12  ;;  %v570_v57 = vrot.slane %v2379_v52, %v537_v28  ;;  %v574_v61 = vrot.slane %v2379_v52, %v541_v34 }
 0x133   : > { %v989_v15 = vrot.slane %v967_v23, 4  ;;  %v969_v27 = vsel %vm937_vm11, %v761_v62, %v953_v21  ;;  %v968_v29 = vsel %vm936_vm12, %v722_v63, %v952_v22  ;;  %v582_v1 = vrot.slane %v2379_v52, %v549_v39 }
 0x134   : > { %v992_v31 = vrot.slane %v968_v29, 3  ;;  %v970_v32 = vsel %vm938_vm13, %v763_v12, %v954_v24  ;;  %v995_v37 = vrot.slane %v969_v27, 2 }
 0x135   : > { %v1028_v36 = vsel %vm1027_vm8, %v1026_v6, %v989_v15  ;;  %v801_v38 = vpop.f32.mrb[8].mxu0  ;;  %v998_v40 = vrot.slane %v970_v32, 1  ;;  %v842_v42 = vpop.f32.mrb[8].mxu1 }
 0x136   : > { %v1030_v17 = vsel %vm1029_vm9, %v1028_v36, %v992_v31  ;;  %v802_v41 = vadd.f32 %v801_v38, %v554_v5  ;;  %v803_v43 = vpop.f32.mrb[9].mxu0  ;;  %v843_v44 = vadd.f32 %v842_v42, %v562_v26  ;;  %v844_v45 = vpop.f32.mrb[9].mxu1 }
 0x137   : > { %v804_v18 = vadd.f32 %v803_v43, %v558_v30  ;;  %v805_v46 = vpop.f32.mrb[10].mxu0  ;;  %v1032_v47 = vsel %vm1031_vm14, %v1030_v17, %v995_v37  ;;  %v845_v19 = vadd.f32 %v844_v45, %v566_v35  ;;  %v846_v49 = vpop.f32.mrb[10].mxu1  ;;  %v1058_v45 = vld [vmem:[#allocation4 + $0x78] sm:$0xff] }
 0x138   : > { %v955_v48 = vmul.f32 0.2, %v802_v41  ;;  %v806_v50 = vpop.f32.mrb[11].mxu0  ;;  %v1034_v51 = vsel %vm1033_vm15, %v1032_v47, %v998_v40  ;;  %vm941_vm0 = vcmp.ge.f32.partialorder %v843_v44, 0.0  ;;  %v957_v53 = vmul.f32 0.2, %v843_v44 }
 0x139   : > { %vm940_vm2 = vcmp.ge.f32.partialorder %v804_v18, 0.0  ;;  %v956_v54 = vmul.f32 0.2, %v804_v18  ;;  %vm939_vm3 = vcmp.ge.f32.partialorder %v802_v41, 0.0  ;;  %vm942_vm4 = vcmp.ge.f32.partialorder %v845_v19, 0.0  ;;  %v847_v56 = vpop.f32.mrb[11].mxu1 }
 0x13a   : > { %v958_v55 = vmul.f32 0.2, %v845_v19  ;;  %v973_v58 = vsel %vm941_vm0, %v843_v44, %v957_v53  ;;  %v971_v2 = vsel %vm939_vm3, %v802_v41, %v955_v48  ;;  %v1053_v41 = vld [vmem:[#allocation4 + $0x50] sm:$0xff] }
 0x13b   : > { %v972_v59 = vsel %vm940_vm2, %v804_v18, %v956_v54  ;;  %v1004_v5 = vrot.slane %v973_v58, 6  ;;  %v1057_v44 = vld [vmem:[#allocation4 + $0x70] sm:$0xff]  ;;  %v1054_v18 = vld [vmem:[#allocation4 + $0x58] sm:$0xff] }
 0x13c   : > { %v1001_v62 = vrot.slane %v972_v59, 7  ;;  %v974_v63 = vsel %vm942_vm4, %v845_v19, %v958_v55  ;;  %v2006_v19 = vcombine.high %v1053_v41, %v1057_v44  ;;  %v2008_v49 = vcombine.high %v1054_v18, %v1058_v45  ;;  %v1061_v50 = vld [vmem:[#allocation4 + $0x90] sm:$0xff]  ;;  %v1062_v54 = vld [vmem:[#allocation4 + $0x98] sm:$0xff] }
 0x13d   : > { %v883_v6 = vpop.f32.mrb[12].mxu0  ;;  %v1007_v8 = vrot.slane %v974_v63, 5  ;;  %v924_v16 = vpop.f32.mrb[12].mxu1  ;;  %v1065_v53 = vld [vmem:[#allocation4 + $0xb0] sm:$0xff]  ;;  %v1066_v55 = vld [vmem:[#allocation4 + $0xb8] sm:$0xff]  ;;  %v2007_v56 = vcombine.low %v1054_v18, %v1058_v45 }
 0x13e   : > { %v1035_v28 = vsel %vm1021_vm1, %v971_v2, %v1001_v62  ;;  %v884_v12 = vadd.f32 %v883_v6, %v570_v57  ;;  %v885_v20 = vpop.f32.mrb[13].mxu0  ;;  %v925_v21 = vadd.f32 %v924_v16, %v578_v60  ;;  %v926_v34 = vpop.f32.mrb[13].mxu1  ;;  %v2014_v57 = vcombine.high %v1061_v50, %v1065_v53  ;;  %v1069_v59 = vld [vmem:[#allocation4 + $0xd0] sm:$0xff]  ;;  %v1074_v62 = vld [vmem:[#allocation4 + $0xf8] sm:$0xff] }
 0x13f   : > { %v1036_v33 = vsel %vm1023_vm6, %v1035_v28, %v1004_v5  ;;  %v886_v22 = vadd.f32 %v885_v20, %v574_v61  ;;  %v887_v23 = vpop.f32.mrb[14].mxu0  ;;  %v927_v39 = vadd.f32 %v926_v34, %v582_v1  ;;  %v928_v52 = vpop.f32.mrb[14].mxu1  ;;  %v2016_v58 = vcombine.high %v1062_v54, %v1066_v55  ;;  %v1073_v60 = vld [vmem:[#allocation4 + $0xf0] sm:$0xff]  ;;  %v1070_v61 = vld [vmem:[#allocation4 + $0xd8] sm:$0xff] }
 0x140   : > { %v1037_v24 = vsel %vm1025_vm7, %v1036_v33, %v1007_v8  ;;  %vm943_vm5 = vcmp.ge.f32.partialorder %v884_v12, 0.0  ;;  %v959_v25 = vmul.f32 0.2, %v884_v12  ;;  %v888_v26 = vpop.f32.mrb[15].mxu0  ;;  %vm945_vm10 = vcmp.ge.f32.partialorder %v925_v21, 0.0  ;;  %v929_v31 = vpop.f32.mrb[15].mxu1 }
 0x141   : > { %v961_v15 = vmul.f32 0.2, %v925_v21  ;;  %vm944_vm11 = vcmp.ge.f32.partialorder %v886_v22, 0.0  ;;  %v960_v27 = vmul.f32 0.2, %v886_v22  ;;  %vm946_vm12 = vcmp.ge.f32.partialorder %v927_v39, 0.0 }
 0x142   : > { %v975_v29 = vsel %vm943_vm5, %v884_v12, %v959_v25  ;;  %v962_v30 = vmul.f32 0.2, %v927_v39  ;;  %v2013_v3 = vcombine.low %v1061_v50, %v1065_v53  ;;  %v2015_v4 = vcombine.low %v1062_v54, %v1066_v55  ;;  %v1078_v63 = vld [vmem:[#allocation4 + $0x118] sm:$0xff]  ;;  %v1085_v28 = vld [vmem:[#allocation4 + $0x150] sm:$0xff] }
 0x143   : > { %v1010_v32 = vrot.slane %v975_v29, 4  ;;  %v977_v35 = vsel %vm945_vm10, %v925_v21, %v961_v15  ;;  %v976_v36 = vsel %vm944_vm11, %v886_v22, %v960_v27  ;;  %v2024_v9 = vcombine.high %v1070_v61, %v1074_v62  ;;  %v1082_v1 = vld [vmem:[#allocation4 + $0x138] sm:$0xff]  ;;  %v1089_v8 = vld [vmem:[#allocation4 + $0x170] sm:$0xff] }
 0x144   : > { %v1013_v37 = vrot.slane %v976_v36, 3  ;;  %v978_v38 = vsel %vm946_vm12, %v927_v39, %v962_v30  ;;  %v1016_v40 = vrot.slane %v977_v35, 2  ;;  %v2021_v2 = vcombine.low %v1069_v59, %v1073_v60  ;;  %v1086_v12 = vld [vmem:[#allocation4 + $0x158] sm:$0xff]  ;;  %v1093_v34 = vld [vmem:[#allocation4 + $0x190] sm:$0xff] }
 0x145   : > { %v1038_v17 = vsel %vm1027_vm8, %v1037_v24, %v1010_v32  ;;  %v1019_v43 = vrot.slane %v978_v38, 1  ;;  %v2023_v5 = vcombine.low %v1070_v61, %v1074_v62  ;;  %v1090_v16 = vld [vmem:[#allocation4 + $0x178] sm:$0xff]  ;;  %v2031_v33 = vcombine.low %v1078_v63, %v1082_v1  ;;  %v1097_v23 = vld [vmem:[#allocation4 + $0x1b0] sm:$0xff] }
 0x146   : > { %v1039_v42 = vsel %vm1029_vm9, %v1038_v17, %v1013_v37  ;;  %v2038_v21 = vcombine.high %v1085_v28, %v1089_v8  ;;  %v2040_v22 = vcombine.high %v1086_v12, %v1090_v16  ;;  %v1094_v24 = vld [vmem:[#allocation4 + $0x198] sm:$0xff]  ;;  %v2037_v39 = vcombine.low %v1085_v28, %v1089_v8  ;;  %v1101_v27 = vld [vmem:[#allocation4 + $0x1d0] sm:$0xff] }
 0x147   : > { %v1040_v46 = vsel %vm1031_vm14, %v1039_v42, %v1016_v40  ;;  %v1098_v25 = vld [vmem:[#allocation4 + $0x1b8] sm:$0xff]  ;;  %v2039_v52 = vcombine.low %v1086_v12, %v1090_v16  ;;  %v2046_v26 = vcombine.high %v1093_v34, %v1097_v23  ;;  %v1105_v29 = vld [vmem:[#allocation4 + $0x1f0] sm:$0xff]  ;;  %v2045_v32 = vcombine.low %v1093_v34, %v1097_v23 }
 0x148   : > { %v1041_v47 = vsel %vm1033_vm15, %v1040_v46, %v1019_v43  ;;  %v2048_v15 = vcombine.high %v1094_v24, %v1098_v25  ;;  %v1102_v30 = vld [vmem:[#allocation4 + $0x1d8] sm:$0xff]  ;;  %v2047_v35 = vcombine.low %v1094_v24, %v1098_v25  ;;  %v2054_v36 = vcombine.high %v1101_v27, %v1105_v29 }
 0x149   : > { %v2417_v48 = vpack.c.bf16 %v1041_v47, %v1034_v51  ;;  %v2005_v51 = vcombine.low %v1053_v41, %v1057_v44  ;;  %v1106_v31 = vld [vmem:[#allocation4 + $0x1f8] sm:$0xff]  ;;  %v2053_v38 = vcombine.low %v1101_v27, %v1105_v29  ;;  %v1601_v40 = vadd.s32 8, %v2349_v14 }
 0x14a   : > { %v2056_v37 = vcombine.high %v1102_v30, %v1106_v31  ;;  %v2055_v17 = vcombine.low %v1102_v30, %v1106_v31  ;;  %v1606_v41 = vand.u32 3, %v2349_v14  ;;  %v2434_v42 = vand.u32 127, %v519_v13 }
 0x14b   : > { %1460 = vmatmul.mubr.bf16.vlgmr.msra.gmra.mrb[16].mxu0 %v2417_v48  ;;  %1503 = vmatmul.mubr.bf16.vlgmr.msra.gmra.mrb[16].mxu1 %v2417_v48  ;;  %v1613_v43 = vand.u32 3, %v1601_v40 }
 0x14c   : > { %1514 = vmatpush1.bf16.msra.mxu0 %v1997_v7  ;;  %1557 = vmatpush1.bf16.msra.mxu1 %v1999_v11  ;;  %v2022_v7 = vcombine.high %v1069_v59, %v1073_v60  ;;  %v1081_v11 = vld [vmem:[#allocation4 + $0x130] sm:$0xff]  ;;  %vm2436_vm6 = vcmp.ge.s32.totalorder %v1606_v41, 1  ;;  %vm1628_vm7 = vcmp.lt.s32.totalorder %v2434_v42, 64  ;;  %vm2445_vm13 = vcmp.le.s32.totalorder %v1606_v41, 2 }
 0x14d   : > { %1515 = vmatprep.subr.bf16.mxu0 %v2006_v19  ;;  %1558 = vmatprep.subr.bf16.mxu1 %v2008_v49  ;;  %v2030_v6 = vcombine.high %v1077_v10, %v1081_v11  ;;  %v2029_v20 = vcombine.low %v1077_v10, %v1081_v11  ;;  %vm2441_vm9 = vcmp.ge.s32.totalorder %v1613_v43, 1  ;;  %vm2449_vm14 = vcmp.le.s32.totalorder %v1613_v43, 2 }
 0x14e   : > { %1545 = vmatprep.mubr.bf16.mxu0 %v2173_v0  ;;  %1588 = vmatprep.mubr.bf16.mxu1 %v2173_v0  ;;  %v2032_v0 = vcombine.high %v1078_v63, %v1082_v1 }
 0x150   : > { %1516 = vmatpush1.bf16.msra.mxu0 %v2005_v51  ;;  %1559 = vmatpush1.bf16.msra.mxu1 %v2007_v56 }
 0x151   : > { %1517 = vmatprep.subr.bf16.mxu0 %v2014_v57  ;;  %1560 = vmatprep.subr.bf16.mxu1 %v2016_v58 }
 0x154   : > { %1518 = vmatpush1.bf16.msra.mxu0 %v2013_v3  ;;  %1561 = vmatpush1.bf16.msra.mxu1 %v2015_v4 }
 0x155   : > { %1519 = vmatprep.subr.bf16.mxu0 %v2022_v7  ;;  %1562 = vmatprep.subr.bf16.mxu1 %v2024_v9 }
 0x158   : > { %1520 = vmatpush1.bf16.msra.mxu0 %v2021_v2  ;;  %1563 = vmatpush1.bf16.msra.mxu1 %v2023_v5 }
 0x159   : > { %1521 = vmatprep.subr.bf16.mxu0 %v2030_v6  ;;  %1564 = vmatprep.subr.bf16.mxu1 %v2032_v0 }
 0x15c   : > { %1522 = vmatpush1.bf16.msra.mxu0 %v2029_v20  ;;  %1565 = vmatpush1.bf16.msra.mxu1 %v2031_v33 }
 0x15d   : > { %1523 = vmatprep.subr.bf16.mxu0 %v2038_v21  ;;  %1566 = vmatprep.subr.bf16.mxu1 %v2040_v22 }
 0x160   : > { %1524 = vmatpush1.bf16.msra.mxu0 %v2037_v39  ;;  %1567 = vmatpush1.bf16.msra.mxu1 %v2039_v52 }
 0x161   : > { %1525 = vmatprep.subr.bf16.mxu0 %v2046_v26  ;;  %1568 = vmatprep.subr.bf16.mxu1 %v2048_v15 }
 0x164   : > { %1526 = vmatpush1.bf16.msra.mxu0 %v2045_v32  ;;  %1569 = vmatpush1.bf16.msra.mxu1 %v2047_v35 }
 0x165   : > { %1527 = vmatprep.subr.bf16.mxu0 %v2054_v36  ;;  %1570 = vmatprep.subr.bf16.mxu1 %v2056_v37 }
 0x168   : > { %1528 = vmatpush1.bf16.msra.mxu0 %v2053_v38  ;;  %1571 = vmatpush1.bf16.msra.mxu1 %v2055_v17 }
 0x16b   : > { %1546 = vmatmul.mubr.bf16.vlgmr.msra.gmra.mrb[20].mxu0 %v2417_v48  ;;  %1589 = vmatmul.mubr.bf16.vlgmr.msra.gmra.mrb[20].mxu1 %v2417_v48 }
 0x21e   : > { %v1461_v44 = vpop.f32.mrb[16].mxu0  ;;  %v1504_v18 = vpop.f32.mrb[16].mxu1 }
 0x21f   : > { %v1463_v45 = vpop.f32.mrb[17].mxu0  ;;  %v1506_v46 = vpop.f32.mrb[17].mxu1 }
 0x220   : > { %v1633_v19 = vrot.slane %v1463_v45, 7  ;;  %v1667_v49 = vrot.slane %v1506_v46, 7  ;;  %v1465_v50 = vpop.f32.mrb[18].mxu0  ;;  %v1508_v48 = vpop.f32.mrb[18].mxu1  ;;  %v1647_v53 = vrot.slane %v1463_v45, 1  ;;  %v1675_v61 = vrot.slane %v1506_v46, 1 }
 0x221   : > { %v1467_v14 = vpop.f32.mrb[19].mxu0  ;;  %v1510_v51 = vpop.f32.mrb[19].mxu1 }
 0x222   : > { %v1638_v56 = vsel %vm1021_vm1, 0.0, %v1633_v19  ;;  %v1672_v57 = vsel %vm1021_vm1, 0.0, %v1667_v49  ;;  %v1634_v58 = vrot.slane %v1467_v14, 7  ;;  %v1648_v59 = vrot.slane %v1467_v14, 1 }
 0x223   : > { %v1643_v60 = vsel %vm2436_vm6, %v1638_v56, 0.0  ;;  %v1668_v62 = vrot.slane %v1510_v51, 7  ;;  %v1676_v3 = vrot.slane %v1510_v51, 1  ;;  %v1673_v4 = vsel %vm2436_vm6, %v1672_v57, 0.0 }
 0x224   : > { %v1635_v7 = vsel %vm1021_vm1, %v1633_v19, %v1634_v58  ;;  %v1649_v9 = vsel %vm1033_vm15, %v1647_v53, %v1648_v59  ;;  %v1652_v10 = vsel %vm1033_vm15, %v1648_v59, 0.0 }
 0x225   : > { %v1644_v11 = vsel %vm2441_vm9, %v1635_v7, 0.0  ;;  %v1657_v63 = vsel %vm2445_vm13, %v1649_v9, 0.0  ;;  %v1658_v1 = vsel %vm2449_vm14, %v1652_v10, 0.0  ;;  %v1669_v2 = vsel %vm1021_vm1, %v1667_v49, %v1668_v62 }
 0x226   : > { %v1661_v5 = vsel %vm1628_vm7, %v1643_v60, %v1657_v63  ;;  %v1662_v6 = vsel %vm1628_vm7, %v1644_v11, %v1658_v1  ;;  %v1674_v0 = vsel %vm2441_vm9, %v1669_v2, 0.0  ;;  %v1677_v28 = vsel %vm1033_vm15, %v1675_v61, %v1676_v3 }
 0x227   : > { %v1663_v8 = vadd.f32 %v1661_v5, %v1461_v44  ;;  %v1664_v12 = vadd.f32 %v1662_v6, %v1465_v50  ;;  %v1680_v16 = vsel %vm1033_vm15, %v1676_v3, 0.0  ;;  %v1681_v20 = vsel %vm2445_vm13, %v1677_v28, 0.0  ;;  %v2057_v28 = vld [vmem:[%s2547_s4] ss:$0 sm:$0xff] }
 0x228   : > { %v1682_v33 = vsel %vm2449_vm14, %v1680_v16, 0.0  ;;  %v1683_v21 = vsel %vm1628_vm7, %v1673_v4, %v1681_v20 }
 0x229   : > { %v1684_v22 = vsel %vm1628_vm7, %v1674_v0, %v1682_v33  ;;  %v1685_v34 = vadd.f32 %v1683_v21, %v1504_v18 }
 0x22a   : > { %v1686_v23 = vadd.f32 %v1684_v22, %v1508_v48 }
 0x23e   : > { %v1547_v24 = vpop.f32.mrb[20].mxu0  ;;  %v1590_v25 = vpop.f32.mrb[20].mxu1 }
 0x23f   : > { %v1549_v39 = vpop.f32.mrb[21].mxu0  ;;  %v1592_v52 = vpop.f32.mrb[21].mxu1 }
 0x240   : > { %v1689_v26 = vrot.slane %v1549_v39, 7  ;;  %v1711_v15 = vrot.slane %v1592_v52, 7  ;;  %v1551_v27 = vpop.f32.mrb[22].mxu0  ;;  %v1594_v29 = vpop.f32.mrb[22].mxu1  ;;  %v1697_v30 = vrot.slane %v1549_v39, 1  ;;  %v1719_v40 = vrot.slane %v1592_v52, 1 }
 0x241   : > { %v1553_v31 = vpop.f32.mrb[23].mxu0  ;;  %v1596_v32 = vpop.f32.mrb[23].mxu1 }
 0x242   : > { %v1694_v35 = vsel %vm1021_vm1, 0.0, %v1689_v26  ;;  %v1716_v36 = vsel %vm1021_vm1, 0.0, %v1711_v15  ;;  %v1690_v37 = vrot.slane %v1553_v31, 7  ;;  %v1698_v38 = vrot.slane %v1553_v31, 1 }
 0x243   : > { %v1695_v17 = vsel %vm2436_vm6, %v1694_v35, 0.0  ;;  %v1712_v41 = vrot.slane %v1596_v32, 7  ;;  %v1720_v43 = vrot.slane %v1596_v32, 1  ;;  %v1717_v44 = vsel %vm2436_vm6, %v1716_v36, 0.0 }
 0x244   : > { %v1691_v18 = vsel %vm1021_vm1, %v1689_v26, %v1690_v37  ;;  %v1699_v45 = vsel %vm1033_vm15, %v1697_v30, %v1698_v38  ;;  %v1702_v46 = vsel %vm1033_vm15, %v1698_v38, 0.0 }
 0x245   : > { %v1696_v19 = vsel %vm2441_vm9, %v1691_v18, 0.0  ;;  %v1703_v49 = vsel %vm2445_vm13, %v1699_v45, 0.0  ;;  %v1704_v50 = vsel %vm2449_vm14, %v1702_v46, 0.0  ;;  %v1713_v48 = vsel %vm1021_vm1, %v1711_v15, %v1712_v41 }
 0x246   : > { %v1705_v47 = vsel %vm1628_vm7, %v1695_v17, %v1703_v49  ;;  %v1706_v53 = vsel %vm1628_vm7, %v1696_v19, %v1704_v50  ;;  %v1718_v14 = vsel %vm2441_vm9, %v1713_v48, 0.0  ;;  %v1721_v51 = vsel %vm1033_vm15, %v1719_v40, %v1720_v43 }
 0x247   : > { %v1707_v56 = vadd.f32 %v1705_v47, %v1547_v24  ;;  %v1708_v57 = vadd.f32 %v1706_v53, %v1551_v27  ;;  %v1724_v58 = vsel %vm1033_vm15, %v1720_v43, 0.0  ;;  %v1725_v59 = vsel %vm2445_vm13, %v1721_v51, 0.0 }
 0x248   : > { %v1726_v60 = vsel %vm2449_vm14, %v1724_v58, 0.0  ;;  %v1727_v61 = vsel %vm1628_vm7, %v1717_v44, %v1725_v59 }
 0x249   : > { %v1733_v62 = vrot.slane %v1707_v56, 4  ;;  %v1734_v3 = vrot.slane %v1708_v57, 4  ;;  %v1728_v13 = vsel %vm1628_vm7, %v1718_v14, %v1726_v60  ;;  %v1729_v4 = vadd.f32 %v1727_v61, %v1590_v25 }
 0x24a   : > { %v1730_v7 = vadd.f32 %v1728_v13, %v1594_v29 }
 0x24b   : > { %v1735_v9 = vsel %vm1027_vm8, %v1733_v62, %v1734_v3  ;;  %v1738_v10 = vsel %vm1027_vm8, 0.0, %v1733_v62  ;;  %v1743_v54 = vrot.slane %v1729_v4, 4 }
 0x24c   : > { %v1739_v11 = vadd.f32 %v1738_v10, %v1663_v8  ;;  %v1740_v63 = vadd.f32 %v1735_v9, %v1664_v12  ;;  %v1744_v55 = vrot.slane %v1730_v7, 4 }
 0x24e   : > { %v1755_v1 = vrot.slane %v1739_v11, 4  ;;  %v1761_v2 = vrot.slane %v1740_v63, 4  ;;  %v1745_v5 = vsel %vm1027_vm8, %v1743_v54, %v1744_v55  ;;  %v1748_v6 = vsel %vm1027_vm8, %v1744_v55, 0.0 }
 0x24f   : > { %v1749_v0 = vadd.f32 %v1745_v5, %v1685_v34  ;;  %v1750_v42 = vadd.f32 %v1748_v6, %v1686_v23 }
 0x251   : > { %v1752_v16 = vrot.slane %v1749_v0, 4  ;;  %v1758_v20 = vrot.slane %v1750_v42, 4  ;;  %v1764_v33 = vsel %vm1027_vm8, %v1755_v1, %v1749_v0  ;;  %v1766_v8 = vsel %vm1027_vm8, %v1761_v2, %v1750_v42 }
 0x252   : > { %v1775_v12 = vadd.f32 %v2057_v28, %v1764_v33  ;;  %v1777_v21 = vadd.f32 %v2057_v28, %v1766_v8 }
 0x253   : > { %v1763_v22 = vsel %vm1027_vm8, %v1739_v11, %v1752_v16  ;;  %v1765_v24 = vsel %vm1027_vm8, %v1740_v63, %v1758_v20 }
 0x254   : > { %v1774_v25 = vadd.f32 %v2057_v28, %v1763_v22  ;;  %v1776_v34 = vadd.f32 %v2057_v28, %v1765_v24  ;;  %vm1779_vm1 = vcmp.ge.f32.partialorder %v1775_v12, 0.0  ;;  %vm1781_vm15 = vcmp.ge.f32.partialorder %v1777_v21, 0.0 }
 0x255   : > { %v1783_v23 = vmul.f32 0.2, %v1775_v12  ;;  %v1785_v39 = vmul.f32 0.2, %v1777_v21 }
 0x256   : > { %vm1778_vm0 = vcmp.ge.f32.partialorder %v1774_v25, 0.0  ;;  %vm1780_vm2 = vcmp.ge.f32.partialorder %v1776_v34, 0.0  ;;  %v1782_v52 = vmul.f32 0.2, %v1774_v25  ;;  %v1784_v26 = vmul.f32 0.2, %v1776_v34 }
 0x257   : > { %v1787_v15 = vsel %vm1779_vm1, %v1775_v12, %v1783_v23  ;;  %v1789_v27 = vsel %vm1781_vm15, %v1777_v21, %v1785_v39 }
 0x258   : > { %v1786_v29 = vsel %vm1778_vm0, %v1774_v25, %v1782_v52  ;;  %v1788_v30 = vsel %vm1780_vm2, %v1776_v34, %v1784_v26  ;;  %1791 = vst [vmem:[%s313_s25 + $0x8] sm:$0xff] %v1787_v15  ;;  %1793 = vst [vmem:[%s313_s25 + $0x18] sm:$0xff] %v1789_v27  ;;  %v1805_v31 = vmul.f32 %v1787_v15, %v1787_v15 }
 0x259   : > { %1790 = vst [vmem:[%s313_s25] sm:$0xff] %v1786_v29  ;;  %1792 = vst [vmem:[%s313_s25 + $0x10] sm:$0xff] %v1788_v30  ;;  %v1794_v32 = vadd.f32 %v1787_v15, %v1786_v29  ;;  %v1804_v35 = vmul.f32 %v1786_v29, %v1786_v29  ;;  %v1806_v37 = vmul.f32 %v1788_v30, %v1788_v30 }
 0x25a   : > { %v1807_v40 = vmul.f32 %v1789_v27, %v1789_v27 }
 0x25b   : > { %v1795_v36 = vadd.f32 %v1794_v32, %v1788_v30  ;;  %v1808_v38 = vadd.f32 %v1805_v31, %v1804_v35 }
 0x25d   : > { %v1796_v17 = vadd.f32 %v1795_v36, %v1789_v27  ;;  %v1809_v41 = vadd.f32 %v1808_v38, %v1806_v37 }
 0x25f   : > { %v1797_v43 = vrot.slane %v1796_v17, 4  ;;  %v1810_v44 = vadd.f32 %v1809_v41, %v1807_v40 }
 0x261   : > { %v1798_v18 = vadd.f32 %v1797_v43, %v1796_v17  ;;  %v1811_v45 = vrot.slane %v1810_v44, 4 }
 0x263   : > { %v1799_v46 = vrot.slane %v1798_v18, 2  ;;  %v1812_v19 = vadd.f32 %v1811_v45, %v1810_v44 }
 0x265   : > { %v1800_v49 = vadd.f32 %v1799_v46, %v1798_v18  ;;  %v1813_v50 = vrot.slane %v1812_v19, 2 }
 0x267   : > { %v1801_v48 = vrot.slane %v1800_v49, 1  ;;  %v1814_v47 = vadd.f32 %v1813_v50, %v1812_v19 }
 0x269   : > { %v1802_v53 = vadd.f32 %v1801_v48, %v1800_v49  ;;  %v1815_v14 = vrot.slane %v1814_v47, 1 }
 0x26b   : > { %1803 = vst [vmem:[%s316_s10] sm:$0x1] %v1802_v53  ;;  %v1816_v51 = vadd.f32 %v1815_v14, %v1814_v47 }
 0x26d   : > { %1817 = vst [vmem:[%s319_s12] sm:$0x1] %v1816_v51 }
 0x26e PF: > { %s20_s24 = sadd.s32 1, %s2165_s24  }
 0x26f   : > { %p17_p5 = scmp.ge.s32.totalorder %s20_s24, 4  }
 0x271   :  { %19 = sbr.rel (!%p17_p5) target bundleno = 2 (0x2), region = 103 }
 0x278   :  { %1863 = vsyncpa [#allocation3], 1 }
 0x279   :  { %1865 = vsyncpa [#allocation3 + $0x1], 1 }
 0x27a   :  { %1866 = vsyncpa [#allocation5], 1 }

// kernel: _lambda_.5
= control target key start
LH: loop header
LB: loop body
LE: loop exit
PB: predicated region body
PF: predicated region fallthrough
CT: control target
= control target key end

     0   :  { %s4473_s12 = smov 0   ;;  %s7127_s0 = inlined_call_operand.vmem [shape: f32[2,256,32], index: 0, kind: input, shape index: {}]   ;;  %s7128_s1 = inlined_call_operand.vmem [shape: bf16[32,128], index: 1, kind: input, shape index: {}]   ;;  %s7129_s2 = inlined_call_operand.vmem [shape: f32[1,16], index: 2, kind: input, shape index: {}]   ;;  %s7130_s3 = inlined_call_operand.vmem [shape: f32[2,512,16], index: 3, kind: output, shape index: {}]  }
   0x1 LB: > { %s4007_s13 = sadd.s32 4294967295, %s4443_s12   ;;  %p4011_p0 = scmp.ge.s32.totalorder %s4443_s12, 1  ;;  %s4443_s12 = sphi %s4473_s12, %s13_s12  }
   0x2   : > { %p137_p1 = scmp.lt.s32.totalorder %s4443_s12, 3 }
   0x4   : > { %p138_p2 = pnand %p4011_p0, %p137_p1 }
   0x6   : > { %141 = sbr.rel (%p138_p2) target bundleno = 1424 (0x590), region = 32 }
   0xd   : > { %v4177_v0 = vld [vmem:[%s7128_s1] sm:$0xff]   ;;  %p161_p3 = scmp.lt.s32.totalorder %s4007_s13, 1  ;;  %v4178_v1 = vld [vmem:[%s7128_s1 + $0x8] sm:$0xff]   ;;  %vm236_vm0 = vcmask 261120   ;;  %vm7288_vm1 = vcmask 1040384   ;;  %vm1219_vm2 = vcmask 1046528  }
   0xe   : > { %4121 = vmatprep.subr.bf16.mxu0 %v4177_v0  ;;  %4157 = vmatprep.subr.bf16.mxu1 %v4177_v0  ;;  %s4445_s22 = smov 112   ;;  %s4446_s23 = smov 80  }
   0xf   : > { %s7853_s13 = smov (!%p161_p3, %s4007_s13), 1  ;;  %4122 = vmatpush3.bf16.msra.mxu0 %v4177_v0  ;;  %4159 = vmatpush3.bf16.msra.mxu1 %v4177_v0  ;;  %s4447_s30 = smov 48  }
  0x10   : > { %4123 = vmatprep.subr.bf16.mxu0 %v4178_v1  ;;  %4158 = vmatprep.subr.bf16.mxu1 %v4178_v1  ;;  %s4101_s18 = sshll.u32 %s7853_s13, 8  ;;  %s4102_s26 = sshll.u32 %s7853_s13, 9 }
  0x11   : > { %s4493_s21 = scalar_lea.vmem %s7127_s0, %s4101_s18  ;;  %s5182_s29 = scalar_lea.vmem %s7130_s3, %s4102_s26 }
  0x12   : > { %v172_v2 = vld [vmem:[%s4493_s21] sm:$0xff]  ;;  %v173_v3 = vld [vmem:[%s4493_s21 + $0x8] sm:$0xff]  ;;  %v174_v4 = vld [vmem:[%s4493_s21 + $0x10] sm:$0xff]  ;;  %s4448_s4 = smov 32   ;;  %s4449_s5 = smov 64  }
  0x13   : > { %4124 = vmatpush3.bf16.msra.mxu0 %v4178_v1  ;;  %4160 = vmatpush3.bf16.msra.mxu1 %v4178_v1  ;;  %v204_v5 = vpack.c.bf16 %v173_v3, %v172_v2  ;;  %v175_v6 = vld [vmem:[%s4493_s21 + $0x18] sm:$0xff]  ;;  %v188_v7 = vld [vmem:[%s4493_s21 + $0x80] sm:$0xff]  ;;  %v189_v8 = vld [vmem:[%s4493_s21 + $0x88] sm:$0xff]  ;;  %s4450_s6 = smov 16   ;;  %s4451_s7 = smov 96  }
  0x14   : > { %v205_v9 = vpack.c.bf16 %v175_v6, %v174_v4  ;;  %v212_v10 = vpack.c.bf16 %v189_v8, %v188_v7  ;;  %v190_v11 = vld [vmem:[%s4493_s21 + $0x90] sm:$0xff]  ;;  %v191_v12 = vld [vmem:[%s4493_s21 + $0x98] sm:$0xff]  ;;  %v176_v13 = vld [vmem:[%s4493_s21 + $0x20] sm:$0xff] }
  0x15   : > { %4125 = vmatprep.mubr.msk.bf16.mxu0 %vm236_vm0, %v204_v5  ;;  %v213_v14 = vpack.c.bf16 %v191_v12, %v190_v11  ;;  %v177_v15 = vld [vmem:[%s4493_s21 + $0x28] sm:$0xff]  ;;  %v192_v17 = vld [vmem:[%s4493_s21 + $0xa0] sm:$0xff]  ;;  %v178_v19 = vld [vmem:[%s4493_s21 + $0x30] sm:$0xff] }
  0x16   : > { %4126 = vmatmul.mubr.msk.bf16.vlgmr.msra.gmra.mrb[0].mxu0 %vm236_vm0, %v205_v9  ;;  %4141 = vmatprep.mubr.msk.bf16.mxu1 %vm236_vm0, %v212_v10  ;;  %v206_v16 = vpack.c.bf16 %v177_v15, %v176_v13  ;;  %v193_v18 = vld [vmem:[%s4493_s21 + $0xa8] sm:$0xff]  ;;  %v179_v20 = vld [vmem:[%s4493_s21 + $0x38] sm:$0xff]  ;;  %v194_v22 = vld [vmem:[%s4493_s21 + $0xb0] sm:$0xff] }
  0x17   : > { %4142 = vmatmul.mubr.msk.bf16.vlgmr.msra.gmra.mrb[0].mxu1 %vm236_vm0, %v213_v14  ;;  %v214_v21 = vpack.c.bf16 %v193_v18, %v192_v17  ;;  %v195_v23 = vld [vmem:[%s4493_s21 + $0xb8] sm:$0xff]  ;;  %v180_v24 = vld [vmem:[%s4493_s21 + $0x40] sm:$0xff]  ;;  %v181_v25 = vld [vmem:[%s4493_s21 + $0x48] sm:$0xff]  ;;  %v207_v26 = vpack.c.bf16 %v179_v20, %v178_v19 }
  0x18   : > { %4129 = vmatprep.mubr.msk.bf16.mxu0 %vm236_vm0, %v206_v16  ;;  %v196_v27 = vld [vmem:[%s4493_s21 + $0xc0] sm:$0xff]  ;;  %v197_v28 = vld [vmem:[%s4493_s21 + $0xc8] sm:$0xff]  ;;  %v215_v29 = vpack.c.bf16 %v195_v23, %v194_v22  ;;  %v208_v30 = vpack.c.bf16 %v181_v25, %v180_v24  ;;  %v182_v32 = vld [vmem:[%s4493_s21 + $0x50] sm:$0xff] }
  0x19   : > { %4145 = vmatprep.mubr.msk.bf16.mxu1 %vm236_vm0, %v214_v21  ;;  %v216_v31 = vpack.c.bf16 %v197_v28, %v196_v27  ;;  %v183_v33 = vld [vmem:[%s4493_s21 + $0x58] sm:$0xff]  ;;  %v184_v34 = vld [vmem:[%s4493_s21 + $0x60] sm:$0xff]  ;;  %v185_v35 = vld [vmem:[%s4493_s21 + $0x68] sm:$0xff] }
  0x1a   : > { %v198_v36 = vld [vmem:[%s4493_s21 + $0xd0] sm:$0xff]  ;;  %v199_v37 = vld [vmem:[%s4493_s21 + $0xd8] sm:$0xff]  ;;  %v200_v38 = vld [vmem:[%s4493_s21 + $0xe0] sm:$0xff]  ;;  %v209_v40 = vpack.c.bf16 %v183_v33, %v182_v32  ;;  %v210_v41 = vpack.c.bf16 %v185_v35, %v184_v34 }
  0x1b   : > { %v201_v39 = vld [vmem:[%s4493_s21 + $0xe8] sm:$0xff]  ;;  %v217_v42 = vpack.c.bf16 %v199_v37, %v198_v36  ;;  %v186_v44 = vld [vmem:[%s4493_s21 + $0x70] sm:$0xff]  ;;  %v187_v45 = vld [vmem:[%s4493_s21 + $0x78] sm:$0xff] }
  0x1c   : > { %v218_v43 = vpack.c.bf16 %v201_v39, %v200_v38  ;;  %v202_v46 = vld [vmem:[%s4493_s21 + $0xf0] sm:$0xff]  ;;  %v203_v47 = vld [vmem:[%s4493_s21 + $0xf8] sm:$0xff]  ;;  %v211_v48 = vpack.c.bf16 %v187_v45, %v186_v44 }
  0x1d   : > { %v219_v49 = vpack.c.bf16 %v203_v47, %v202_v46 }
  0x1e   : > { %4130 = vmatmul.mubr.msk.bf16.gmra.mrb[4].mxu0 %vm236_vm0, %v207_v26 }
  0x1f   : > { %4146 = vmatmul.mubr.msk.bf16.gmra.mrb[4].mxu1 %vm236_vm0, %v215_v29  ;;  %4133 = vmatprep.mubr.msk.bf16.mxu0 %vm236_vm0, %v208_v30 }
  0x20   : > { %4149 = vmatprep.mubr.msk.bf16.mxu1 %vm236_vm0, %v216_v31 }
  0x26   : > { %4134 = vmatmul.mubr.msk.bf16.gmra.mrb[8].mxu0 %vm236_vm0, %v209_v40 }
  0x27   : > { %4137 = vmatprep.mubr.msk.bf16.mxu0 %vm236_vm0, %v210_v41  ;;  %4150 = vmatmul.mubr.msk.bf16.gmra.mrb[8].mxu1 %vm236_vm0, %v217_v42 }
  0x28   : > { %4153 = vmatprep.mubr.msk.bf16.mxu1 %vm236_vm0, %v218_v43 }
  0x2e   : > { %4138 = vmatmul.mubr.msk.bf16.gmra.mrb[12].mxu0 %vm236_vm0, %v211_v48 }
  0x2f   : > { %4154 = vmatmul.mubr.msk.bf16.gmra.mrb[12].mxu1 %vm236_vm0, %v219_v49 }
  0xe9   : > { %v4543_v50 = vpop.f32.mrb[0].mxu0 }
  0xea   : > { %7303 = vst [vmem:[#allocation2_spill] sm:$0xff] %v4543_v50  ;;  %v4545_v51 = vpop.f32.mrb[1].mxu0  ;;  %v4547_v52 = vpop.f32.mrb[0].mxu1  ;;  %v934_v53 = vrot.slane %v4543_v50, 7  ;;  %v1223_v54 = vrot.slane %v4543_v50, 1 }
  0xeb   : > { %7304 = vst [vmem:[#allocation3_spill] sm:$0xff] %v4545_v51  ;;  %7305 = vst [vmem:[#allocation4_spill] sm:$0xff] %v4547_v52  ;;  %v4551_v55 = vpop.f32.mrb[2].mxu0  ;;  %v4554_v56 = vrot.slane %v4545_v51, 7  ;;  %v4556_v57 = vpop.f32.mrb[1].mxu1  ;;  %v966_v58 = vrot.slane %v4547_v52, 7 }
  0xec   : > { %7306 = vst [vmem:[#allocation5_spill] sm:$0xff] %v4551_v55  ;;  %7308 = vst [vmem:[#allocation7_spill] sm:$0xff] %v4556_v57  ;;  %v1255_v59 = vrot.slane %v4547_v52, 1  ;;  %v1220_v60 = vrot.slane %v4545_v51, 1  ;;  %v4561_v61 = vpop.f32.mrb[3].mxu0  ;;  %v4563_v62 = vpop.f32.mrb[2].mxu1 }
  0xed   : > { %7307 = vst [vmem:[#allocation6_spill] sm:$0xff] %v4554_v56  ;;  %7309 = vst [vmem:[#allocation8_spill] sm:$0xff] %v4561_v61  ;;  %v936_v63 = vrot.slane %v4551_v55, 7  ;;  %v1225_v0 = vrot.slane %v4551_v55, 1  ;;  %v7132_v1 = vrot.slane %v4556_v57, 7  ;;  %v7131_v2 = vrot.slane %v4556_v57, 1  ;;  %994 = vrot.lane.b32.xlu0 %v4554_v56, %s4445_s22 }
  0xee   : > { %7310 = vst [vmem:[#allocation9_spill] sm:$0xff] %v4563_v62  ;;  %v4571_v3 = vpop.f32.mrb[3].mxu1  ;;  %v968_v4 = vrot.slane %v4563_v62, 7  ;;  %v1257_v5 = vrot.slane %v4563_v62, 1  ;;  %v7133_v6 = vrot.slane %v4561_v61, 7  ;;  %v1221_v7 = vrot.slane %v4561_v61, 1 }
  0xef   : > { %7311 = vst [vmem:[#allocation10_spill] sm:$0xff] %v4571_v3  ;;  %v4578_v8 = vsel %vm7288_vm1, %v934_v53, %v936_v63  ;;  %v4581_v9 = vsel %vm1219_vm2, %v1223_v54, %v1225_v0  ;;  %v964_v10 = vrot.slane %v4571_v3, 7  ;;  %v1253_v11 = vrot.slane %v4571_v3, 1 }
  0xf0   : > { %7312 = vst [vmem:[#allocation11_spill] sm:$0xff] %v4578_v8  ;;  %7313 = vst [vmem:[#allocation12_spill] sm:$0xff] %v4581_v9  ;;  %1000 = vrot.lane.b32.xlu1 %v4578_v8, %s4445_s22  ;;  %v4588_v12 = vsel %vm7288_vm1, %v966_v58, %v968_v4  ;;  %v4591_v13 = vsel %vm1219_vm2, %v1255_v59, %v1257_v5  ;;  %v4596_v14 = vsel %vm7288_vm1, %v7133_v6, %v934_v53 }
  0xf1   : > { %7314 = vst [vmem:[#allocation13_spill] sm:$0xff] %v4588_v12  ;;  %7315 = vst [vmem:[#allocation14_spill] sm:$0xff] %v4591_v13  ;;  %v4601_v15 = vsel %vm7288_vm1, %v7132_v1, %v964_v10  ;;  %v4604_v16 = vsel %vm7288_vm1, %v964_v10, %v966_v58  ;;  %v4607_v17 = vsel %vm1219_vm2, %v1220_v60, %v1221_v7  ;;  %1606 = vrot.lane.b32.xlu0 %v4554_v56, %s4446_s23  ;;  %v4614_v19 = vpop.f32.mrb[4].mxu0  ;;  %v7146_v60 = vlaneseq }
  0xf2   : > { %7316 = vst [vmem:[#allocation15_spill] sm:$0xff] %v4596_v14  ;;  %7317 = vst [vmem:[#allocation16_spill] sm:$0xff] %v4601_v15  ;;  %v4610_v18 = vsel %vm1219_vm2, %v1221_v7, %v1223_v54  ;;  %v4619_v20 = vsel %vm1219_vm2, %v7131_v2, %v1253_v11  ;;  %v4622_v21 = vsel %vm1219_vm2, %v1253_v11, %v1255_v59  ;;  %v4624_v22 = vpop.f32.mrb[5].mxu0  ;;  %v4626_v23 = vpop.f32.mrb[4].mxu1  ;;  %v942_v24 = vrot.slane %v4614_v19, 7 }
  0xf3   : > { %7318 = vst [vmem:[#allocation17_spill] sm:$0xff] %v4604_v16  ;;  %7319 = vst [vmem:[#allocation18_spill] sm:$0xff] %v4607_v17  ;;  %v1231_v25 = vrot.slane %v4614_v19, 1  ;;  %v4630_v26 = vpop.f32.mrb[5].mxu1  ;;  %v4634_v27 = vpop.f32.mrb[6].mxu0  ;;  %v974_v28 = vrot.slane %v4626_v23, 7 }
  0xf4   : > { %7320 = vst [vmem:[#allocation19_spill] sm:$0xff] %v4614_v19  ;;  %7321 = vst [vmem:[#allocation20_spill] sm:$0xff] %v4619_v20  ;;  %1032 = vrot.lane.b32.xlu1 %v4588_v12, %s4445_s22  ;;  %v938_v29 = vrot.slane %v4624_v22, 7  ;;  %v1227_v30 = vrot.slane %v4624_v22, 1  ;;  %v1263_v31 = vrot.slane %v4626_v23, 1  ;;  %v4640_v32 = vpop.f32.mrb[7].mxu0 }
  0xf5   : > { %7322 = vst [vmem:[#allocation21_spill] sm:$0xff] %v4624_v22  ;;  %7323 = vst [vmem:[#allocation22_spill] sm:$0xff] %v4626_v23  ;;  %v4642_v33 = vpop.f32.mrb[6].mxu1  ;;  %v944_v34 = vrot.slane %v4634_v27, 7  ;;  %v970_v35 = vrot.slane %v4630_v26, 7  ;;  %v1259_v36 = vrot.slane %v4630_v26, 1  ;;  %1450 = vrot.lane.b32.xlu0 %v4581_v9, %s4445_s22 }
  0xf6   : > { %7324 = vst [vmem:[#allocation23_spill] sm:$0xff] %v4630_v26  ;;  %7325 = vst [vmem:[#allocation24_spill] sm:$0xff] %v4634_v27  ;;  %v1233_v37 = vrot.slane %v4634_v27, 1  ;;  %v4650_v38 = vpop.f32.mrb[7].mxu1  ;;  %v976_v39 = vrot.slane %v4642_v33, 7  ;;  %v4654_v40 = vsel %vm7288_vm1, %v936_v63, %v938_v29  ;;  %v4657_v41 = vsel %vm1219_vm2, %v1225_v0, %v1227_v30 }
  0xf7   : > { %7326 = vst [vmem:[#allocation25_spill] sm:$0xff] %v4640_v32  ;;  %7327 = vst [vmem:[#allocation26_spill] sm:$0xff] %v4642_v33  ;;  %v1265_v42 = vrot.slane %v4642_v33, 1  ;;  %v4661_v43 = vsel %vm7288_vm1, %v942_v24, %v944_v34  ;;  %v4664_v44 = vsel %vm7288_vm1, %v968_v4, %v970_v35  ;;  %v4667_v45 = vsel %vm1219_vm2, %v1257_v5, %v1259_v36 }
  0xf8   : > { %7328 = vst [vmem:[#allocation27_spill] sm:$0xff] %v4650_v38  ;;  %7329 = vst [vmem:[#allocation28_spill] sm:$0xff] %v4664_v44  ;;  %1612 = vrot.lane.b32.xlu1 %v4578_v8, %s4446_s23  ;;  %v4672_v46 = vsel %vm7288_vm1, %v974_v28, %v976_v39  ;;  %v4675_v47 = vsel %vm1219_vm2, %v1231_v25, %v1233_v37  ;;  %v940_v49 = vrot.slane %v4640_v32, 7  ;;  %v972_v53 = vrot.slane %v4650_v38, 7 }
  0xf9   : > { %7330 = vst [vmem:[#allocation29_spill] sm:$0xff] %v4675_v47  ;;  %v4678_v48 = vsel %vm1219_vm2, %v1263_v31, %v1265_v42  ;;  %v1229_v54 = vrot.slane %v4640_v32, 1  ;;  %v1261_v58 = vrot.slane %v4650_v38, 1  ;;  %1482 = vrot.lane.b32.xlu0 %v4591_v13, %s4445_s22  ;;  %v4686_v59 = vpop.f32.mrb[8].mxu0 }
  0xfa   : > { %7331 = vst [vmem:[#allocation30_spill] sm:$0xff] %v4678_v48  ;;  %7332 = vst [vmem:[#allocation31_spill] sm:$0xff] %v4686_v59  ;;  %v4688_v63 = vpop.f32.mrb[9].mxu0  ;;  %v4690_v0 = vpop.f32.mrb[8].mxu1  ;;  %v4693_v4 = vsel %vm7288_vm1, %v938_v29, %v940_v49  ;;  %v4696_v5 = vsel %vm7288_vm1, %v970_v35, %v972_v53  ;;  %v4699_v7 = vsel %vm7288_vm1, %v940_v49, %v942_v24 }
  0xfb   : > { %7333 = vst [vmem:[#allocation32_spill] sm:$0xff] %v4688_v63  ;;  %7334 = vst [vmem:[#allocation33_spill] sm:$0xff] %v4690_v0  ;;  %v4702_v10 = vsel %vm7288_vm1, %v972_v53, %v974_v28  ;;  %v4706_v11 = vpop.f32.mrb[10].mxu0  ;;  %v4708_v2 = vpop.f32.mrb[9].mxu1  ;;  %v4711_v1 = vsel %vm1219_vm2, %v1227_v30, %v1229_v54  ;;  %v4714_v29 = vsel %vm1219_vm2, %v1229_v54, %v1231_v25  ;;  %v950_v53 = vrot.slane %v4686_v59, 7 }
  0xfc   : > { %7335 = vst [vmem:[#allocation34_spill] sm:$0xff] %v4699_v7  ;;  %7336 = vst [vmem:[#allocation35_spill] sm:$0xff] %v4702_v10  ;;  %1644 = vrot.lane.b32.xlu1 %v4588_v12, %s4446_s23  ;;  %v4717_v35 = vsel %vm1219_vm2, %v1259_v36, %v1261_v58  ;;  %v4720_v24 = vsel %vm1219_vm2, %v1261_v58, %v1263_v31  ;;  %v4722_v28 = vpop.f32.mrb[11].mxu0  ;;  %v4724_v49 = vpop.f32.mrb[10].mxu1  ;;  %v952_v6 = vrot.slane %v4706_v11, 7  ;;  %v982_v25 = vrot.slane %v4690_v0, 7 }
  0xfd   : > { %7337 = vst [vmem:[#allocation36_spill] sm:$0xff] %v4706_v11  ;;  %7338 = vst [vmem:[#allocation37_spill] sm:$0xff] %v4708_v2  ;;  %1739 = vrot.lane.b32.xlu0 %v4581_v9, %s4446_s23  ;;  %v4730_v30 = vpop.f32.mrb[11].mxu1  ;;  %v984_v36 = vrot.slane %v4724_v49, 7  ;;  %v946_v31 = vrot.slane %v4688_v63, 7  ;;  %v1235_v54 = vrot.slane %v4688_v63, 1 }
  0xfe   : > { %7339 = vst [vmem:[#allocation38_spill] sm:$0xff] %v4711_v1  ;;  %7340 = vst [vmem:[#allocation39_spill] sm:$0xff] %v4717_v35  ;;  %v4737_v58 = vshrl.u32 %v7146_v60, 7  ;;  %v4740_v23 = vsel %vm7288_vm1, %v950_v53, %v952_v6  ;;  %v978_v26 = vrot.slane %v4708_v2, 7  ;;  %v1267_v33 = vrot.slane %v4708_v2, 1 }
  0xff   : > { %7341 = vst [vmem:[#allocation40_spill] sm:$0xff] %v4722_v28  ;;  %7342 = vst [vmem:[#allocation41_spill] sm:$0xff] %v4724_v49  ;;  %v4747_v38 = vsel %vm7288_vm1, %v982_v25, %v984_v36  ;;  %v4750_v62 = vsel %vm7288_vm1, %v944_v34, %v946_v31  ;;  %v4753_v52 = vsel %vm1219_vm2, %v1233_v37, %v1235_v54  ;;  %v1239_v60 = vrot.slane %v4686_v59, 1 }
 0x100   : > { %7343 = vst [vmem:[#allocation42_spill] sm:$0xff] %v4730_v30  ;;  %998 = vrot.lane.b32.xlu1 %v4596_v14, %s4445_s22  ;;  %7344 = vst [vmem:[#allocation43_spill] sm:$0xff] %v4747_v38  ;;  %v4757_v3 = vsel %vm7288_vm1, %v976_v39, %v978_v26  ;;  %v4760_v63 = vsel %vm1219_vm2, %v1265_v42, %v1267_v33  ;;  %v1241_v2 = vrot.slane %v4706_v11, 1  ;;  %v1271_v34 = vrot.slane %v4690_v0, 1 }
 0x101   : > { %7345 = vst [vmem:[#allocation44_spill] sm:$0xff] %v4750_v62  ;;  %7346 = vst [vmem:[#allocation45_spill] sm:$0xff] %v4757_v3  ;;  %1771 = vrot.lane.b32.xlu0 %v4591_v13, %s4446_s23  ;;  %v4765_v19 = vpop.f32.mrb[12].mxu0  ;;  %v1273_v37 = vrot.slane %v4724_v49, 1  ;;  %v448_v59 = vadd.s32 8, %v4737_v58  ;;  %v948_v11 = vrot.slane %v4722_v28, 7 }
 0x102   : > { %7347 = vst [vmem:[#allocation46_spill] sm:$0xff] %v4765_v19  ;;  %v4769_v22 = vpop.f32.mrb[13].mxu0  ;;  %v4772_v39 = vpop.f32.mrb[12].mxu1  ;;  %v4775_v42 = vsel %vm1219_vm2, %v1239_v60, %v1241_v2  ;;  %v980_v50 = vrot.slane %v4730_v30, 7  ;;  %v7352_v0 = vrot.slane %v4561_v61, 7  ;;  %v1237_v13 = vrot.slane %v4722_v28, 1 }
 0x103   : > { %7348 = vst [vmem:[#allocation47_spill] sm:$0xff] %v4769_v22  ;;  %7349 = vst [vmem:[#allocation48_spill] sm:$0xff] %v4772_v39  ;;  %v4781_v27 = vpop.f32.mrb[14].mxu0  ;;  %v4789_v32 = vpop.f32.mrb[13].mxu1  ;;  %v4792_v55 = vsel %vm1219_vm2, %v1271_v34, %v1273_v37  ;;  %v1269_v9 = vrot.slane %v4730_v30, 1  ;;  %v4797_v12 = vsel %vm7288_vm1, %v946_v31, %v948_v11  ;;  %v4803_v61 = vsel %vm7288_vm1, %v948_v11, %v950_v53 }
 0x104   : > { %7350 = vst [vmem:[#allocation49_spill] sm:$0xff] %v4775_v42  ;;  %1028 = vrot.lane.b32.xlu1 %v4601_v15, %s4445_s22  ;;  %7351 = vst [vmem:[#allocation50_spill] sm:$0xff] %v4781_v27  ;;  %v4787_v49 = vsel %vm7288_vm1, %v4554_v56, %v7352_v0  ;;  %v4800_v8 = vsel %vm7288_vm1, %v978_v26, %v980_v50  ;;  %v4806_v0 = vsel %vm7288_vm1, %v980_v50, %v982_v25 }
 0x105   : > { %7353 = vst [vmem:[#allocation51_spill] sm:$0xff] %v4787_v49  ;;  %7354 = vst [vmem:[#allocation52_spill] sm:$0xff] %v4789_v32  ;;  %996 = vrot.lane.b32.xlu0 %v4787_v49, %s4445_s22  ;;  %v4811_v56 = vsel %vm1219_vm2, %v1235_v54, %v1237_v13  ;;  %v4814_v30 = vsel %vm1219_vm2, %v1237_v13, %v1239_v60  ;;  %v4817_v31 = vsel %vm1219_vm2, %v1267_v33, %v1269_v9 }
 0x106   : > { %7355 = vst [vmem:[#allocation53_spill] sm:$0xff] %v4792_v55  ;;  %7356 = vst [vmem:[#allocation54_spill] sm:$0xff] %v4803_v61  ;;  %v4820_v26 = vsel %vm1219_vm2, %v1269_v9, %v1271_v34  ;;  %v490_v11 = vand.u32 15, %v448_v59  ;;  %v464_v53 = vadd.s32 136, %v4737_v58  ;;  %v960_v50 = vrot.slane %v4781_v27, 7 }
 0x107   : > { %7357 = vst [vmem:[#allocation55_spill] sm:$0xff] %v4806_v0  ;;  %7358 = vst [vmem:[#allocation56_spill] sm:$0xff] %v4811_v56  ;;  %v954_v25 = vrot.slane %v4769_v22, 7  ;;  %v1243_v54 = vrot.slane %v4769_v22, 1  ;;  %v986_v13 = vrot.slane %v4789_v32, 7  ;;  %v7193_v33 = vrot.slane %v4789_v32, 1 }
 0x108   : > { %7359 = vst [vmem:[#allocation57_spill] sm:$0xff] %v4817_v31  ;;  %1608 = vrot.lane.b32.xlu1 %v4787_v49, %s4446_s23  ;;  %v1249_v60 = vrot.slane %v4781_v27, 1  ;;  %v7361_v59 = vrot.slane %v4556_v57, 7  ;;  %vm1188_vm3 = vcmp.le.s32.totalorder %v490_v11, 14  ;;  %v466_v11 = vadd.s32 152, %v4737_v58 }
 0x109   : > { %v4832_v9 = vsel %vm7288_vm1, %v952_v6, %v954_v25  ;;  %1030 = vrot.lane.b32.xlu0 %v4604_v16, %s4445_s22  ;;  %v4842_v28 = vsel %vm1219_vm2, %v1241_v2, %v1243_v54  ;;  %v4845_v22 = vsel %vm7288_vm1, %v984_v36, %v986_v13  ;;  %v4850_v27 = vsel %vm1219_vm2, %v1273_v37, %v7193_v33 }
 0x10a   : > { %7360 = vst [vmem:[#allocation58_spill] sm:$0xff] %v4832_v9  ;;  %v4837_v34 = vsel %vm7288_vm1, %v960_v50, %v7361_v59  ;;  %7363 = vst [vmem:[#allocation60_spill] sm:$0xff] %v4845_v22  ;;  %v7364_v6 = vrot.slane %v4556_v57, 1  ;;  %v602_v59 = vand.u32 15, %v464_v53  ;;  %v4862_v2 = vsel %vm1188_vm3, %v4610_v18, 0.0  ;;  %v4888_v53 = vpop.f32.mrb[14].mxu1 }
 0x10b   : > { %7362 = vst [vmem:[#allocation59_spill] sm:$0xff] %v4837_v34  ;;  %7365 = vst [vmem:[#allocation61_spill] sm:$0xff] %v4862_v2  ;;  %v450_v18 = vadd.s32 24, %v4737_v58  ;;  %v990_v33 = vrot.slane %v4772_v39, 7  ;;  %v992_v57 = vrot.slane %v4888_v53, 7 }
 0x10c   : > { %v4855_v49 = vsel %vm1219_vm2, %v1249_v60, %v7364_v6  ;;  %1640 = vrot.lane.b32.xlu1 %v4601_v15, %s4446_s23  ;;  %vm1204_vm4 = vcmp.le.s32.totalorder %v602_v59, 14  ;;  %7367 = vst [vmem:[#allocation63_spill] sm:$0xff] %v4888_v53  ;;  %v4895_v59 = vpop.f32.mrb[15].mxu0 }
 0x10d   : > { %1446 = vrot.lane.b32.xlu0 %v4607_v17, %s4445_s22  ;;  %v4869_v36 = vsel %vm1204_vm4, %v4622_v21, 0.0  ;;  %v958_v21 = vrot.slane %v4765_v19, 7  ;;  %v504_v37 = vand.u32 15, %v450_v18  ;;  %7369 = vst [vmem:[#allocation65_spill] sm:$0xff] %v4895_v59  ;;  %v616_v18 = vand.u32 15, %v466_v11 }
 0x10e   : > { %7366 = vst [vmem:[#allocation62_spill] sm:$0xff] %v4869_v36 }
 0x10f   : > { %v4891_v6 = vsel %vm7288_vm1, %v958_v21, %v960_v50  ;;  %vm1190_vm5 = vcmp.le.s32.totalorder %v504_v37, 14  ;;  %v4905_v50 = vpop.f32.mrb[15].mxu1  ;;  %vm1206_vm6 = vcmp.le.s32.totalorder %v616_v18, 14 }
 0x110   : > { %1448 = vrot.lane.b32.xlu1 %v4862_v2, %s4445_s22  ;;  %7368 = vst [vmem:[#allocation64_spill] sm:$0xff] %v4891_v6  ;;  %7371 = vst [vmem:[#allocation67_spill] sm:$0xff] %v4905_v50 }
 0x111   : > { %1478 = vrot.lane.b32.xlu0 %v4619_v20, %s4445_s22 }
 0x114   : > { %1480 = vrot.lane.b32.xlu1 %v4869_v36, %s4445_s22 }
 0x115   : > { %1610 = vrot.lane.b32.xlu0 %v4596_v14, %s4446_s23 }
 0x118   : > { %1737 = vrot.lane.b32.xlu1 %v4862_v2, %s4446_s23  ;;  %v1245_v2 = vrot.slane %v4895_v59, 1 }
 0x119   : > { %1642 = vrot.lane.b32.xlu0 %v4604_v16, %s4446_s23  ;;  %v4912_v16 = vsel %vm1190_vm5, %v4657_v41, 0.0  ;;  %v1279_v41 = vrot.slane %v4772_v39, 1  ;;  %v7381_v39 = vrot.slane %v4789_v32, 1 }
 0x11a   : > { %7372 = vst [vmem:[#allocation68_spill] sm:$0xff] %v4912_v16 }
 0x11c   : > { %1769 = vrot.lane.b32.xlu1 %v4869_v36, %s4446_s23  ;;  %v1247_v36 = vrot.slane %v4765_v19, 1  ;;  %v4926_v19 = vsel %vm1219_vm2, %v1243_v54, %v1245_v2 }
 0x11d   : > { %1735 = vrot.lane.b32.xlu0 %v4607_v17, %s4446_s23  ;;  %v4903_v17 = vsel %vm7288_vm1, %v990_v33, %v992_v57  ;;  %7376 = vst [vmem:[#allocation72_spill] sm:$0xff] %v4926_v19 }
 0x11e   : > { %7370 = vst [vmem:[#allocation66_spill] sm:$0xff] %v4903_v17  ;;  %v4915_v37 = vsel %vm1219_vm2, %v1247_v36, %v1249_v60  ;;  %v1281_v60 = vrot.slane %v4888_v53, 1 }
 0x11f   : > { %7373 = vst [vmem:[#allocation69_spill] sm:$0xff] %v4915_v37 }
 0x120   : > { %1008 = vrot.lane.b32.xlu1 %v4661_v43, %s4445_s22  ;;  %v4941_v54 = vsel %vm1219_vm2, %v1279_v41, %v1281_v60 }
 0x121   : > { %1767 = vrot.lane.b32.xlu0 %v4619_v20, %s4446_s23  ;;  %v956_v20 = vrot.slane %v4895_v59, 7  ;;  %v4929_v59 = vsel %vm1219_vm2, %v1245_v2, %v1247_v36  ;;  %7378 = vst [vmem:[#allocation74_spill] sm:$0xff] %v4941_v54  ;;  %v4947_v36 = vsel %vm1219_vm2, %v1281_v60, 0.0 }
 0x123   : > { %v4918_v11 = vsel %vm7288_vm1, %v954_v25, %v956_v20  ;;  %v4921_v57 = vsel %vm7288_vm1, %v956_v20, %v958_v21  ;;  %v988_v25 = vrot.slane %v4905_v50, 7  ;;  %v1277_v20 = vrot.slane %v4905_v50, 1 }
 0x124   : > { %1040 = vrot.lane.b32.xlu1 %v4672_v46, %s4445_s22  ;;  %7374 = vst [vmem:[#allocation70_spill] sm:$0xff] %v4918_v11  ;;  %7375 = vst [vmem:[#allocation71_spill] sm:$0xff] %v4921_v57  ;;  %v4938_v21 = vsel %vm1206_vm6, %v4667_v45, 0.0 }
 0x125   : > { %1002 = vrot.lane.b32.xlu0 %v4654_v40, %s4445_s22  ;;  %7377 = vst [vmem:[#allocation73_spill] sm:$0xff] %v4938_v21  ;;  %v4944_v2 = vsel %vm7288_vm1, %v986_v13, %v988_v25  ;;  %v4952_v18 = vsel %vm7288_vm1, %v988_v25, %v990_v33  ;;  %v4957_v45 = vsel %vm1219_vm2, %v7381_v39, %v1277_v20  ;;  %v452_v39 = vadd.s32 40, %v4737_v58 }
 0x126   : > { %7379 = vst [vmem:[#allocation75_spill] sm:$0xff] %v4944_v2  ;;  %7380 = vst [vmem:[#allocation76_spill] sm:$0xff] %v4952_v18  ;;  %v4960_v53 = vsel %vm1219_vm2, %v1277_v20, %v1279_v41  ;;  %v468_v33 = vadd.s32 168, %v4737_v58  ;;  %vm7287_vm2 = vcmask 130048  }
 0x127   : > { %7382 = vst [vmem:[#allocation77_spill] sm:$0xff] %v4957_v45  ;;  %v518_v13 = vand.u32 15, %v452_v39  ;;  %v470_v39 = vadd.s32 184, %v4737_v58 }
 0x128   : > { %1452 = vrot.lane.b32.xlu1 %v4912_v16, %s4445_s22  ;;  %v630_v41 = vand.u32 15, %v468_v33 }
 0x129   : > { %1034 = vrot.lane.b32.xlu0 %v4664_v44, %s4445_s22  ;;  %vm1192_vm7 = vcmp.le.s32.totalorder %v518_v13, 14 }
 0x12a   : > { %v4999_v60 = vsel %vm1192_vm7, %v4714_v29, 0.0  ;;  %vm1208_vm8 = vcmp.le.s32.totalorder %v630_v41, 14  ;;  %v454_v29 = vadd.s32 56, %v4737_v58  ;;  %v644_v41 = vand.u32 15, %v470_v39 }
 0x12b   : > { %7383 = vst [vmem:[#allocation78_spill] sm:$0xff] %v4999_v60  ;;  %v5006_v25 = vsel %vm1208_vm8, %v4720_v24, 0.0 }
 0x12c   : > { %1484 = vrot.lane.b32.xlu1 %v4938_v21, %s4445_s22  ;;  %7384 = vst [vmem:[#allocation79_spill] sm:$0xff] %v5006_v25  ;;  %v532_v20 = vand.u32 15, %v454_v29  ;;  %vm1210_vm10 = vcmp.le.s32.totalorder %v644_v41, 14 }
 0x12d   : > { %1614 = vrot.lane.b32.xlu0 %v4654_v40, %s4446_s23 }
 0x12e   : > { %vm1194_vm9 = vcmp.le.s32.totalorder %v532_v20, 14  ;;  %v5048_v20 = vsel %vm1210_vm10, %v4760_v63, 0.0 }
 0x12f   : > { %v5037_v29 = vsel %vm1194_vm9, %v4753_v52, 0.0  ;;  %7389 = vst [vmem:[#allocation84_spill] sm:$0xff] %v5048_v20 }
 0x130   : > { %1620 = vrot.lane.b32.xlu1 %v4661_v43, %s4446_s23  ;;  %7387 = vst [vmem:[#allocation82_spill] sm:$0xff] %v5037_v29 }
 0x131   : > { %1646 = vrot.lane.b32.xlu0 %v4664_v44, %s4446_s23 }
 0x134   : > { %1652 = vrot.lane.b32.xlu1 %v4672_v46, %s4446_s23 }
 0x135   : > { %1458 = vrot.lane.b32.xlu0 %v4675_v47, %s4445_s22 }
 0x138   : > { %1741 = vrot.lane.b32.xlu1 %v4912_v16, %s4446_s23  ;;  %v7398_v16 = vld [vmem:[#allocation8_spill] sm:$0xff] }
 0x139   : > { %1490 = vrot.lane.b32.xlu0 %v4678_v48, %s4445_s22 }
 0x13c   : > { %1773 = vrot.lane.b32.xlu1 %v4938_v21, %s4446_s23 }
 0x13d   : > { %1747 = vrot.lane.b32.xlu0 %v4675_v47, %s4446_s23 }
 0x140   : > { %1004 = vrot.lane.b32.xlu1 %v4693_v4, %s4445_s22 }
 0x141   : > { %1779 = vrot.lane.b32.xlu0 %v4678_v48, %s4446_s23  ;;  %v483_v48 = vand.u32 15, %v4737_v58 }
 0x143   : > { %vm5088_vm11 = vcmp.ge.s32.totalorder %v483_v48, 1  ;;  %v4034_v48 = vld [vmem:[%s7129_s2] ss:$0 sm:$0xff] }
 0x144   : > { %1036 = vrot.lane.b32.xlu1 %v4696_v5, %s4445_s22 }
 0x145   : > { %1006 = vrot.lane.b32.xlu0 %v4699_v7, %s4445_s22 }
 0x148   : > { %1616 = vrot.lane.b32.xlu1 %v4693_v4, %s4446_s23 }
 0x149   : > { %1038 = vrot.lane.b32.xlu0 %v4702_v10, %s4445_s22 }
 0x14c   : > { %1648 = vrot.lane.b32.xlu1 %v4696_v5, %s4446_s23 }
 0x14d   : > { %1454 = vrot.lane.b32.xlu0 %v4711_v1, %s4445_s22 }
 0x150   : > { %1456 = vrot.lane.b32.xlu1 %v4999_v60, %s4445_s22 }
 0x151   : > { %1486 = vrot.lane.b32.xlu0 %v4717_v35, %s4445_s22 }
 0x154   : > { %1488 = vrot.lane.b32.xlu1 %v5006_v25, %s4445_s22 }
 0x155   : > { %1618 = vrot.lane.b32.xlu0 %v4699_v7, %s4446_s23 }
 0x158   : > { %1745 = vrot.lane.b32.xlu1 %v4999_v60, %s4446_s23 }
 0x159   : > { %1650 = vrot.lane.b32.xlu0 %v4702_v10, %s4446_s23 }
 0x15c   : > { %1777 = vrot.lane.b32.xlu1 %v5006_v25, %s4446_s23 }
 0x15d   : > { %1743 = vrot.lane.b32.xlu0 %v4711_v1, %s4446_s23 }
 0x15f   : > { %v995_v24 = vpop.permute.xlu0 %994 }
 0x160   : > { %1016 = vrot.lane.b32.xlu1 %v4740_v23, %s4445_s22  ;;  %v1090_v47 = vsel %vm7288_vm1, 0.0, %v995_v24 }
 0x161   : > { %1775 = vrot.lane.b32.xlu0 %v4717_v35, %s4446_s23  ;;  %v7394_v35 = vlaneseq }
 0x162   : > { %v5024_v13 = vpop.permute.xlu1 %1000 }
 0x163   : > { %7385 = vst [vmem:[#allocation80_spill] sm:$0xff] %v5024_v13  ;;  %v5028_v33 = vpop.permute.xlu0 %1606  ;;  %v5082_v25 = vand.u32 127, %v7394_v35  ;;  %v1155_v35 = vsel %vm5088_vm11, %v1090_v47, 0.0 }
 0x164   : > { %1048 = vrot.lane.b32.xlu1 %v4747_v38, %s4445_s22 }
 0x165   : > { %1010 = vrot.lane.b32.xlu0 %v4750_v62, %s4445_s22  ;;  %vm865_vm12 = vcmp.lt.s32.totalorder %v5082_v25, 8  ;;  %v7001_v25 = vld [vmem:[%s7129_s2] ss:$0 sm:$0xff] }
 0x166   : > { %v5032_v32 = vpop.permute.xlu1 %1032 }
 0x167   : > { %7386 = vst [vmem:[#allocation81_spill] sm:$0xff] %v5032_v32  ;;  %v5039_v50 = vpop.permute.xlu0 %1450 }
 0x168   : > { %7388 = vst [vmem:[#allocation83_spill] sm:$0xff] %v5039_v50  ;;  %1460 = vrot.lane.b32.xlu1 %v5037_v29, %s4445_s22 }
 0x169   : > { %1042 = vrot.lane.b32.xlu0 %v4757_v3, %s4445_s22 }
 0x16a   : > { %v5043_v13 = vpop.permute.xlu1 %1612 }
 0x16b   : > { %v5050_v39 = vpop.permute.xlu0 %1482 }
 0x16c   : > { %7390 = vst [vmem:[#allocation85_spill] sm:$0xff] %v5050_v39  ;;  %1492 = vrot.lane.b32.xlu1 %v5048_v20, %s4445_s22 }
 0x16d   : > { %1622 = vrot.lane.b32.xlu0 %v4750_v62, %s4446_s23 }
 0x16e   : > { %v5054_v52 = vpop.permute.xlu1 %1644 }
 0x16f   : > { %7391 = vst [vmem:[#allocation86_spill] sm:$0xff] %v5054_v52  ;;  %v5058_v32 = vpop.permute.xlu0 %1739 }
 0x170   : > { %1628 = vrot.lane.b32.xlu1 %v4740_v23, %s4446_s23 }
 0x171   : > { %1654 = vrot.lane.b32.xlu0 %v4757_v3, %s4446_s23 }
 0x172   : > { %v5062_v41 = vpop.permute.xlu1 %998 }
 0x173   : > { %7392 = vst [vmem:[#allocation87_spill] sm:$0xff] %v5062_v41  ;;  %v5066_v63 = vpop.permute.xlu0 %1771 }
 0x174   : > { %1660 = vrot.lane.b32.xlu1 %v4747_v38, %s4446_s23 }
 0x175   : > { %1466 = vrot.lane.b32.xlu0 %v4775_v42, %s4445_s22 }
 0x176   : > { %v5070_v39 = vpop.permute.xlu1 %1028 }
 0x177   : > { %7393 = vst [vmem:[#allocation88_spill] sm:$0xff] %v5070_v39  ;;  %v997_v50 = vpop.permute.xlu0 %996 }
 0x178   : > { %1749 = vrot.lane.b32.xlu1 %v5037_v29, %s4446_s23 }
 0x179   : > { %1498 = vrot.lane.b32.xlu0 %v4792_v55, %s4445_s22 }
 0x17a   : > { %v5077_v41 = vpop.permute.xlu1 %1608 }
 0x17b   : > { %v5084_v21 = vpop.permute.xlu0 %1030 }
 0x17c   : > { %7395 = vst [vmem:[#allocation89_spill] sm:$0xff] %v5084_v21  ;;  %1781 = vrot.lane.b32.xlu1 %v5048_v20, %s4446_s23 }
 0x17d   : > { %1755 = vrot.lane.b32.xlu0 %v4775_v42, %s4446_s23  ;;  %v456_v42 = vadd.s32 72, %v4737_v58 }
 0x17e   : > { %v5093_v1 = vpop.permute.xlu1 %1640 }
 0x17f   : > { %v1447_v21 = vpop.permute.xlu0 %1446 }
 0x180   : > { %1012 = vrot.lane.b32.xlu1 %v4797_v12, %s4445_s22  ;;  %v1542_v24 = vsel %vm865_vm12, %v1155_v35, %v1447_v21 }
 0x181   : > { %v1574_v20 = vadd.f32 %v1542_v24, %v4545_v51  ;;  %1787 = vrot.lane.b32.xlu0 %v4792_v55, %s4446_s23  ;;  %v546_v51 = vand.u32 15, %v456_v42 }
 0x182   : > { %v1449_v29 = vpop.permute.xlu1 %1448 }
 0x183   : > { %v1543_v47 = vsel %vm865_vm12, %v997_v50, %v1449_v29  ;;  %v3247_v60 = vadd.f32 %v4034_v48, %v1574_v20  ;;  %v5114_v52 = vpop.permute.xlu0 %1478  ;;  %vm1196_vm15 = vcmp.le.s32.totalorder %v546_v51, 14 }
 0x184   : > { %v1575_v38 = vadd.f32 %v1543_v47, %v7398_v16  ;;  %7399 = vst [vmem:[#allocation90_spill] sm:$0xff] %v5114_v52  ;;  %1044 = vrot.lane.b32.xlu1 %v4800_v8, %s4445_s22  ;;  %v472_v47 = vadd.s32 200, %v4737_v58 }
 0x185   : > { %vm3311_vm13 = vcmp.ge.f32.partialorder %v3247_v60, 0.0  ;;  %v3375_v21 = vmul.f32 0.2, %v3247_v60  ;;  %1014 = vrot.lane.b32.xlu0 %v4803_v61, %s4445_s22 }
 0x186   : > { %v3248_v35 = vadd.f32 %v4034_v48, %v1575_v38  ;;  %v5118_v24 = vpop.permute.xlu1 %1480 }
 0x187   : > { %7400 = vst [vmem:[#allocation91_spill] sm:$0xff] %v5118_v24  ;;  %v3439_v50 = vsel %vm3311_vm13, %v3247_v60, %v3375_v21  ;;  %v5122_v20 = vpop.permute.xlu0 %1610  ;;  %v658_v60 = vand.u32 15, %v472_v47  ;;  %v5140_v21 = vsel %vm1196_vm15, %v4814_v30, 0.0 }
 0x188   : > { %vm3312_vm14 = vcmp.ge.f32.partialorder %v3248_v35, 0.0  ;;  %v3376_v29 = vmul.f32 0.2, %v3248_v35  ;;  %1624 = vrot.lane.b32.xlu1 %v4797_v12, %s4446_s23  ;;  %v4035_v52 = vmul.f32 -1.442695, %v3439_v50  ;;  %7401 = vst [vmem:[#allocation92_spill] sm:$0xff] %v5140_v21 }
 0x189   : > { %1046 = vrot.lane.b32.xlu0 %v4806_v0, %s4445_s22  ;;  %vm1212_vm0 = vcmp.le.s32.totalorder %v658_v60, 14 }
 0x18a   : > { %v3440_v16 = vsel %vm3312_vm14, %v3248_v35, %v3376_v29  ;;  %v5127_v55 = vpop.permute.xlu1 %1737  ;;  %4179 = vpow2.f32 %v4035_v52  ;;  %v5151_v51 = vsel %vm1212_vm0, %v4820_v26, 0.0 }
 0x18b   : > { %v4036_v38 = vmul.f32 -1.442695, %v3440_v16  ;;  %v5131_v42 = vpop.permute.xlu0 %1642  ;;  %7403 = vst [vmem:[#allocation94_spill] sm:$0xff] %v5151_v51 }
 0x18c   : > { %1656 = vrot.lane.b32.xlu1 %v4800_v8, %s4446_s23 }
 0x18d   : > { %4181 = vpow2.f32 %v4036_v38  ;;  %1462 = vrot.lane.b32.xlu0 %v4811_v56, %s4445_s22 }
 0x18e   : > { %v5135_v48 = vpop.permute.xlu1 %1769 }
 0x18f   : > { %v5142_v35 = vpop.permute.xlu0 %1735 }
 0x190   : > { %1464 = vrot.lane.b32.xlu1 %v5140_v21, %s4445_s22 }
 0x191   : > { %1494 = vrot.lane.b32.xlu0 %v4817_v31, %s4445_s22 }
 0x192   : > { %v5146_v16 = vpop.permute.xlu1 %1008 }
 0x193   : > { %7402 = vst [vmem:[#allocation93_spill] sm:$0xff] %v5146_v16  ;;  %v5153_v52 = vpop.permute.xlu0 %1767 }
 0x194   : > { %7404 = vst [vmem:[#allocation95_spill] sm:$0xff] %v5153_v52  ;;  %1496 = vrot.lane.b32.xlu1 %v5151_v51, %s4445_s22  ;;  %v4180_v30 = vpop.eup %4179  ;;  %v476_v52 = vadd.s32 232, %v4737_v58 }
 0x195   : > { %v3695_v50 = vadd.f32 1.0, %v4180_v30  ;;  %1626 = vrot.lane.b32.xlu0 %v4803_v61, %s4446_s23 }
 0x196   : > { %v5157_v29 = vpop.permute.xlu1 %1040 }
 0x197   : > { %7405 = vst [vmem:[#allocation96_spill] sm:$0xff] %v5157_v29  ;;  %v4182_v47 = vpop.eup %4181  ;;  %4183 = vrcp.f32 %v3695_v50  ;;  %v5161_v60 = vpop.permute.xlu0 %1002  ;;  %v458_v29 = vadd.s32 88, %v4737_v58 }
 0x198   : > { %v3696_v38 = vadd.f32 1.0, %v4182_v47  ;;  %7406 = vst [vmem:[#allocation97_spill] sm:$0xff] %v5161_v60  ;;  %1753 = vrot.lane.b32.xlu1 %v5140_v21, %s4446_s23  ;;  %v478_v21 = vadd.s32 248, %v4737_v58 }
 0x199   : > { %1658 = vrot.lane.b32.xlu0 %v4806_v0, %s4446_s23 }
 0x19a   : > { %4185 = vrcp.f32 %v3696_v38  ;;  %v5165_v26 = vpop.permute.xlu1 %1452  ;;  %v560_v38 = vand.u32 15, %v458_v29 }
 0x19b   : > { %7407 = vst [vmem:[#allocation98_spill] sm:$0xff] %v5165_v26  ;;  %v5169_v30 = vpop.permute.xlu0 %1034 }
 0x19c   : > { %7408 = vst [vmem:[#allocation99_spill] sm:$0xff] %v5169_v30  ;;  %1785 = vrot.lane.b32.xlu1 %v5151_v51, %s4446_s23  ;;  %v474_v30 = vadd.s32 216, %v4737_v58  ;;  %vm1198_vm3 = vcmp.le.s32.totalorder %v560_v38, 14 }
 0x19d   : > { %1751 = vrot.lane.b32.xlu0 %v4811_v56, %s4446_s23  ;;  %v5206_v51 = vsel %vm1198_vm3, %v4842_v28, 0.0 }
 0x19e   : > { %v5175_v50 = vpop.permute.xlu1 %1484  ;;  %v672_v26 = vand.u32 15, %v474_v30  ;;  %7412 = vst [vmem:[#allocation103_spill] sm:$0xff] %v5206_v51 }
 0x19f   : > { %7409 = vst [vmem:[#allocation100_spill] sm:$0xff] %v5175_v50  ;;  %v5184_v47 = vpop.permute.xlu0 %1614 }
 0x1a0   : > { %1024 = vrot.lane.b32.xlu1 %v4891_v6, %s4445_s22  ;;  %vm1214_vm4 = vcmp.le.s32.totalorder %v672_v26, 14 }
 0x1a1   : > { %v4184_v16 = vpop.eup %4183  ;;  %1783 = vrot.lane.b32.xlu0 %v4817_v31, %s4446_s23 }
 0x1a2   : > { %v5189_v50 = vpop.permute.xlu1 %1620  ;;  %3888 = vst.msk [vmem:[%s5182_s29] sm:$0xff] %vm7287_vm2, %v4184_v16 }
 0x1a3   : > { %7410 = vst [vmem:[#allocation101_spill] sm:$0xff] %v5189_v50  ;;  %v5195_v24 = vpop.permute.xlu0 %1646 }
 0x1a4   : > { %v4186_v60 = vpop.eup %4185  ;;  %1056 = vrot.lane.b32.xlu1 %v4903_v17, %s4445_s22 }
 0x1a5   : > { %3889 = vst.msk [vmem:[%s5182_s29 + $0x8] sm:$0xff] %vm7287_vm2, %v4186_v60  ;;  %1018 = vrot.lane.b32.xlu0 %v4832_v9, %s4445_s22  ;;  %v5217_v60 = vsel %vm1214_vm4, %v4850_v27, 0.0 }
 0x1a6   : > { %v5201_v29 = vpop.permute.xlu1 %1652  ;;  %7414 = vst [vmem:[#allocation105_spill] sm:$0xff] %v5217_v60 }
 0x1a7   : > { %7411 = vst [vmem:[#allocation102_spill] sm:$0xff] %v5201_v29  ;;  %v5208_v31 = vpop.permute.xlu0 %1458 }
 0x1a8   : > { %7413 = vst [vmem:[#allocation104_spill] sm:$0xff] %v5208_v31  ;;  %1468 = vrot.lane.b32.xlu1 %v5206_v51, %s4445_s22 }
 0x1a9   : > { %1050 = vrot.lane.b32.xlu0 %v4845_v22, %s4445_s22 }
 0x1aa   : > { %v5212_v16 = vpop.permute.xlu1 %1741 }
 0x1ab   : > { %v5219_v30 = vpop.permute.xlu0 %1490 }
 0x1ac   : > { %7415 = vst [vmem:[#allocation106_spill] sm:$0xff] %v5219_v30  ;;  %1500 = vrot.lane.b32.xlu1 %v5217_v60, %s4445_s22 }
 0x1ad   : > { %1630 = vrot.lane.b32.xlu0 %v4832_v9, %s4446_s23 }
 0x1ae   : > { %v5223_v28 = vpop.permute.xlu1 %1773 }
 0x1af   : > { %v5227_v38 = vpop.permute.xlu0 %1747 }
 0x1b0   : > { %1636 = vrot.lane.b32.xlu1 %v4891_v6, %s4446_s23 }
 0x1b1   : > { %1662 = vrot.lane.b32.xlu0 %v4845_v22, %s4446_s23 }
 0x1b2   : > { %v5231_v26 = vpop.permute.xlu1 %1004 }
 0x1b3   : > { %7416 = vst [vmem:[#allocation107_spill] sm:$0xff] %v5231_v26  ;;  %v5235_v27 = vpop.permute.xlu0 %1779 }
 0x1b4   : > { %1668 = vrot.lane.b32.xlu1 %v4903_v17, %s4446_s23 }
 0x1b5   : > { %1026 = vrot.lane.b32.xlu0 %v4837_v34, %s4445_s22 }
 0x1b6   : > { %v5239_v30 = vpop.permute.xlu1 %1036 }
 0x1b7   : > { %7417 = vst [vmem:[#allocation108_spill] sm:$0xff] %v5239_v30  ;;  %v5243_v31 = vpop.permute.xlu0 %1006  ;;  %v462_v30 = vadd.s32 120, %v4737_v58 }
 0x1b8   : > { %7418 = vst [vmem:[#allocation109_spill] sm:$0xff] %v5243_v31  ;;  %1757 = vrot.lane.b32.xlu1 %v5206_v51, %s4446_s23 }
 0x1b9   : > { %1474 = vrot.lane.b32.xlu0 %v4915_v37, %s4445_s22  ;;  %v588_v51 = vand.u32 15, %v462_v30 }
 0x1ba   : > { %v5247_v56 = vpop.permute.xlu1 %1616 }
 0x1bb   : > { %v5251_v26 = vpop.permute.xlu0 %1038  ;;  %vm1202_vm5 = vcmp.le.s32.totalorder %v588_v51, 14 }
 0x1bc   : > { %7419 = vst [vmem:[#allocation110_spill] sm:$0xff] %v5251_v26  ;;  %1789 = vrot.lane.b32.xlu1 %v5217_v60, %s4446_s23  ;;  %v700_v60 = vand.u32 15, %v478_v21  ;;  %v5278_v30 = vsel %vm1202_vm5, %v4855_v49, 0.0 }
 0x1bd   : > { %1506 = vrot.lane.b32.xlu0 %v4941_v54, %s4445_s22  ;;  %7424 = vst [vmem:[#allocation115_spill] sm:$0xff] %v5278_v30 }
 0x1be   : > { %v5256_v17 = vpop.permute.xlu1 %1648  ;;  %vm1218_vm6 = vcmp.le.s32.totalorder %v700_v60, 14 }
 0x1bf   : > { %v5260_v31 = vpop.permute.xlu0 %1454  ;;  %v5289_v21 = vsel %vm1218_vm6, %v4947_v36, 0.0 }
 0x1c0   : > { %7420 = vst [vmem:[#allocation111_spill] sm:$0xff] %v5260_v31  ;;  %1020 = vrot.lane.b32.xlu1 %v4918_v11, %s4445_s22  ;;  %7425 = vst [vmem:[#allocation116_spill] sm:$0xff] %v5289_v21 }
 0x1c1   : > { %1638 = vrot.lane.b32.xlu0 %v4837_v34, %s4446_s23 }
 0x1c2   : > { %v5265_v22 = vpop.permute.xlu1 %1456 }
 0x1c3   : > { %7421 = vst [vmem:[#allocation112_spill] sm:$0xff] %v5265_v22  ;;  %v5269_v26 = vpop.permute.xlu0 %1486  ;;  %v460_v22 = vadd.s32 104, %v4737_v58 }
 0x1c4   : > { %7422 = vst [vmem:[#allocation113_spill] sm:$0xff] %v5269_v26  ;;  %1052 = vrot.lane.b32.xlu1 %v4944_v2, %s4445_s22 }
 0x1c5   : > { %1763 = vrot.lane.b32.xlu0 %v4915_v37, %s4446_s23 }
 0x1c6   : > { %v5273_v0 = vpop.permute.xlu1 %1488 }
 0x1c7   : > { %7423 = vst [vmem:[#allocation114_spill] sm:$0xff] %v5273_v0  ;;  %v5280_v31 = vpop.permute.xlu0 %1618 }
 0x1c8   : > { %1476 = vrot.lane.b32.xlu1 %v5278_v30, %s4445_s22 }
 0x1c9   : > { %1795 = vrot.lane.b32.xlu0 %v4941_v54, %s4446_s23 }
 0x1ca   : > { %v5284_v26 = vpop.permute.xlu1 %1745 }
 0x1cb   : > { %v5291_v51 = vpop.permute.xlu0 %1650 }
 0x1cc   : > { %1508 = vrot.lane.b32.xlu1 %v5289_v21, %s4445_s22 }
 0x1cd   : > { %1022 = vrot.lane.b32.xlu0 %v4921_v57, %s4445_s22 }
 0x1ce   : > { %v5295_v49 = vpop.permute.xlu1 %1777 }
 0x1cf   : > { %v5299_v0 = vpop.permute.xlu0 %1743 }
 0x1d0   : > { %1632 = vrot.lane.b32.xlu1 %v4918_v11, %s4446_s23 }
 0x1d1   : > { %1054 = vrot.lane.b32.xlu0 %v4952_v18, %s4445_s22 }
 0x1d2   : > { %v5303_v60 = vpop.permute.xlu1 %1016 }
 0x1d3   : > { %7426 = vst [vmem:[#allocation117_spill] sm:$0xff] %v5303_v60  ;;  %v5307_v36 = vpop.permute.xlu0 %1775  ;;  %v574_v60 = vand.u32 15, %v460_v22 }
 0x1d4   : > { %1664 = vrot.lane.b32.xlu1 %v4944_v2, %s4446_s23 }
 0x1d5   : > { %1470 = vrot.lane.b32.xlu0 %v4926_v19, %s4445_s22  ;;  %vm1200_vm7 = vcmp.le.s32.totalorder %v574_v60, 14 }
 0x1d6   : > { %v5312_v54 = vpop.permute.xlu1 %1048  ;;  %v5334_v22 = vsel %vm1200_vm7, %v4929_v59, 0.0 }
 0x1d7   : > { %7427 = vst [vmem:[#allocation118_spill] sm:$0xff] %v5312_v54  ;;  %v5316_v37 = vpop.permute.xlu0 %1010  ;;  %v686_v54 = vand.u32 15, %v476_v52  ;;  %7432 = vst [vmem:[#allocation123_spill] sm:$0xff] %v5334_v22 }
 0x1d8   : > { %7428 = vst [vmem:[#allocation119_spill] sm:$0xff] %v5316_v37  ;;  %1765 = vrot.lane.b32.xlu1 %v5278_v30, %s4446_s23 }
 0x1d9   : > { %1502 = vrot.lane.b32.xlu0 %v4957_v45, %s4445_s22  ;;  %vm1216_vm8 = vcmp.le.s32.totalorder %v686_v54, 14 }
 0x1da   : > { %v5321_v29 = vpop.permute.xlu1 %1460  ;;  %v5345_v52 = vsel %vm1216_vm8, %v4960_v53, 0.0 }
 0x1db   : > { %7429 = vst [vmem:[#allocation120_spill] sm:$0xff] %v5321_v29  ;;  %v5325_v2 = vpop.permute.xlu0 %1042  ;;  %7433 = vst [vmem:[#allocation124_spill] sm:$0xff] %v5345_v52 }
 0x1dc   : > { %7430 = vst [vmem:[#allocation121_spill] sm:$0xff] %v5325_v2  ;;  %1797 = vrot.lane.b32.xlu1 %v5289_v21, %s4446_s23  ;;  %v7436_v21 = vld [vmem:[#allocation6_spill] sm:$0xff] }
 0x1dd   : > { %1634 = vrot.lane.b32.xlu0 %v4921_v57, %s4446_s23 }
 0x1de   : > { %v5329_v50 = vpop.permute.xlu1 %1492 }
 0x1df   : > { %7431 = vst [vmem:[#allocation122_spill] sm:$0xff] %v5329_v50  ;;  %v5336_v37 = vpop.permute.xlu0 %1622 }
 0x1e0   : > { %1472 = vrot.lane.b32.xlu1 %v5334_v22, %s4445_s22 }
 0x1e1   : > { %1666 = vrot.lane.b32.xlu0 %v4952_v18, %s4446_s23  ;;  %v7437_v18 = vld [vmem:[#allocation51_spill] sm:$0xff] }
 0x1e2   : > { %v5340_v2 = vpop.permute.xlu1 %1628 }
 0x1e3   : > { %v5347_v60 = vpop.permute.xlu0 %1654 }
 0x1e4   : > { %1504 = vrot.lane.b32.xlu1 %v5345_v52, %s4445_s22 }
 0x1e5   : > { %1759 = vrot.lane.b32.xlu0 %v4926_v19, %s4446_s23 }
 0x1e6   : > { %v5351_v59 = vpop.permute.xlu1 %1660 }
 0x1e7   : > { %v5355_v50 = vpop.permute.xlu0 %1466 }
 0x1e8   : > { %7434 = vst [vmem:[#allocation125_spill] sm:$0xff] %v5355_v50  ;;  %1761 = vrot.lane.b32.xlu1 %v5334_v22, %s4446_s23 }
 0x1e9   : > { %1791 = vrot.lane.b32.xlu0 %v4957_v45, %s4446_s23  ;;  %v7439_v45 = vld [vmem:[#allocation11_spill] sm:$0xff] }
 0x1ea   : > { %v5359_v54 = vpop.permute.xlu1 %1749 }
 0x1eb   : > { %v5363_v53 = vpop.permute.xlu0 %1498 }
 0x1ec   : > { %7435 = vst [vmem:[#allocation126_spill] sm:$0xff] %v5363_v53  ;;  %1793 = vrot.lane.b32.xlu1 %v5345_v52, %s4446_s23 }
 0x1ed   : > { %2023 = vrot.lane.b32.xlu0 %v7436_v21, %s4447_s30 }
 0x1ee   : > { %v5367_v29 = vpop.permute.xlu1 %1781 }
 0x1ef   : > { %v5371_v50 = vpop.permute.xlu0 %1755 }
 0x1f0   : > { %2025 = vrot.lane.b32.xlu1 %v7437_v18, %s4447_s30 }
 0x1f1   : > { %2027 = vrot.lane.b32.xlu0 %v4596_v14, %s4447_s30 }
 0x1f2   : > { %v5375_v19 = vpop.permute.xlu1 %1012 }
 0x1f3   : > { %7438 = vst [vmem:[#allocation6_spill] sm:$0xff] %v5375_v19  ;;  %v5379_v53 = vpop.permute.xlu0 %1787 }
 0x1f4   : > { %2029 = vrot.lane.b32.xlu1 %v7439_v45, %s4447_s30 }
 0x1f5   : > { %2031 = vrot.lane.b32.xlu0 %v4654_v40, %s4447_s30 }
 0x1f6   : > { %v5383_v52 = vpop.permute.xlu1 %1044 }
 0x1f7   : > { %7440 = vst [vmem:[#allocation51_spill] sm:$0xff] %v5383_v52  ;;  %v5387_v21 = vpop.permute.xlu0 %1014 }
 0x1f8   : > { %7441 = vst [vmem:[#allocation11_spill] sm:$0xff] %v5387_v21  ;;  %2033 = vrot.lane.b32.xlu1 %v4693_v4, %s4447_s30 }
 0x1f9   : > { %2035 = vrot.lane.b32.xlu0 %v4699_v7, %s4447_s30 }
 0x1fa   : > { %v5391_v18 = vpop.permute.xlu1 %1624 }
 0x1fb   : > { %v5395_v19 = vpop.permute.xlu0 %1046 }
 0x1fc   : > { %7442 = vst [vmem:[#allocation127_spill] sm:$0xff] %v5395_v19  ;;  %2037 = vrot.lane.b32.xlu1 %v4661_v43, %s4447_s30 }
 0x1fd   : > { %2039 = vrot.lane.b32.xlu0 %v4750_v62, %s4447_s30 }
 0x1fe   : > { %v5399_v14 = vpop.permute.xlu1 %1656 }
 0x1ff   : > { %v5403_v52 = vpop.permute.xlu0 %1462 }
 0x200   : > { %7443 = vst [vmem:[#allocation128_spill] sm:$0xff] %v5403_v52  ;;  %2041 = vrot.lane.b32.xlu1 %v4797_v12, %s4447_s30 }
 0x201   : > { %2043 = vrot.lane.b32.xlu0 %v4803_v61, %s4447_s30  ;;  %v7448_v61 = vld [vmem:[#allocation17_spill] sm:$0xff] }
 0x202   : > { %v5407_v21 = vpop.permute.xlu1 %1464 }
 0x203   : > { %7444 = vst [vmem:[#allocation129_spill] sm:$0xff] %v5407_v21  ;;  %v5411_v7 = vpop.permute.xlu0 %1494 }
 0x204   : > { %7445 = vst [vmem:[#allocation130_spill] sm:$0xff] %v5411_v7  ;;  %2045 = vrot.lane.b32.xlu1 %v4740_v23, %s4447_s30 }
 0x205   : > { %2047 = vrot.lane.b32.xlu0 %v4832_v9, %s4447_s30 }
 0x206   : > { %v5415_v19 = vpop.permute.xlu1 %1496 }
 0x207   : > { %7446 = vst [vmem:[#allocation131_spill] sm:$0xff] %v5415_v19  ;;  %v5419_v62 = vpop.permute.xlu0 %1626 }
 0x208   : > { %2049 = vrot.lane.b32.xlu1 %v4918_v11, %s4447_s30  ;;  %v7449_v11 = vld [vmem:[#allocation13_spill] sm:$0xff] }
 0x209   : > { %2051 = vrot.lane.b32.xlu0 %v4921_v57, %s4447_s30 }
 0x20a   : > { %v5423_v52 = vpop.permute.xlu1 %1753 }
 0x20b   : > { %v5427_v21 = vpop.permute.xlu0 %1658 }
 0x20c   : > { %2053 = vrot.lane.b32.xlu1 %v4891_v6, %s4447_s30 }
 0x20d   : > { %2055 = vrot.lane.b32.xlu0 %v4837_v34, %s4447_s30 }
 0x20e   : > { %v5431_v7 = vpop.permute.xlu1 %1785 }
 0x20f   : > { %v5435_v19 = vpop.permute.xlu0 %1751 }
 0x210   : > { %2057 = vrot.lane.b32.xlu1 %v4601_v15, %s4447_s30 }
 0x211   : > { %2059 = vrot.lane.b32.xlu0 %v7448_v61, %s4447_s30 }
 0x212   : > { %v5439_v9 = vpop.permute.xlu1 %1024 }
 0x213   : > { %7447 = vst [vmem:[#allocation132_spill] sm:$0xff] %v5439_v9  ;;  %v5443_v57 = vpop.permute.xlu0 %1783  ;;  %v449_v9 = vadd.s32 16, %v4737_v58 }
 0x214   : > { %2061 = vrot.lane.b32.xlu1 %v7449_v11, %s4447_s30 }
 0x215   : > { %2063 = vrot.lane.b32.xlu0 %v4664_v44, %s4447_s30  ;;  %v497_v44 = vand.u32 15, %v449_v9 }
 0x216   : > { %v5447_v6 = vpop.permute.xlu1 %1056 }
 0x217   : > { %7450 = vst [vmem:[#allocation133_spill] sm:$0xff] %v5447_v6  ;;  %v5451_v34 = vpop.permute.xlu0 %1018  ;;  %v1702_v6 = vsel %vm7288_vm1, 0.0, %v5028_v33  ;;  %vm5477_vm9 = vcmp.ge.s32.totalorder %v497_v44, 1  ;;  %v1832_v44 = vsel %vm865_vm12, %v5077_v41, %v5127_v55  ;;  %v1848_v55 = vsel %vm865_vm12, %v5093_v1, %v5135_v48 }
 0x218   : > { %7451 = vst [vmem:[#allocation134_spill] sm:$0xff] %v5451_v34  ;;  %2065 = vrot.lane.b32.xlu1 %v4696_v5, %s4447_s30  ;;  %v465_v34 = vadd.s32 144, %v4737_v58  ;;  %v1834_v48 = vsel %vm865_vm12, %v5043_v13, %v5212_v16 }
 0x219   : > { %2067 = vrot.lane.b32.xlu0 %v4702_v10, %s4447_s30 }
 0x21a   : > { %v5456_v15 = vpop.permute.xlu1 %1468  ;;  %v609_v9 = vand.u32 15, %v465_v34  ;;  %v451_v34 = vadd.s32 32, %v4737_v58 }
 0x21b   : > { %7452 = vst [vmem:[#allocation135_spill] sm:$0xff] %v5456_v15  ;;  %v5460_v61 = vpop.permute.xlu0 %1050  ;;  %v1703_v15 = vsel %vm5088_vm11, %v1702_v6, 0.0 }
 0x21c   : > { %7453 = vst [vmem:[#allocation136_spill] sm:$0xff] %v5460_v61  ;;  %2069 = vrot.lane.b32.xlu1 %v4672_v46, %s4447_s30  ;;  %v1831_v33 = vsel %vm865_vm12, %v1703_v15, %v5142_v35  ;;  %vm5498_vm10 = vcmp.ge.s32.totalorder %v609_v9, 1  ;;  %v511_v41 = vand.u32 15, %v451_v34  ;;  %v467_v9 = vadd.s32 160, %v4737_v58  ;;  %v7680_v61 = vld [vmem:[#allocation98_spill] sm:$0xff] }
 0x21d   : > { %2071 = vrot.lane.b32.xlu0 %v4757_v3, %s4447_s30  ;;  %v1721_v35 = vsel %vm5498_vm10, %v5131_v42, 0.0 }
 0x21e   : > { %v5467_v11 = vpop.permute.xlu1 %1500  ;;  %vm5526_vm13 = vcmp.ge.s32.totalorder %v511_v41, 1  ;;  %v623_v1 = vand.u32 15, %v467_v9 }
 0x21f   : > { %7454 = vst [vmem:[#allocation137_spill] sm:$0xff] %v5467_v11  ;;  %v5473_v10 = vpop.permute.xlu0 %1630  ;;  %v1705_v11 = vsel %vm5477_vm9, %v5122_v20, 0.0  ;;  %v1707_v34 = vsel %vm5526_vm13, %v5184_v47, 0.0  ;;  %v7465_v47 = vld [vmem:[#allocation86_spill] sm:$0xff] }
 0x220   : > { %2073 = vrot.lane.b32.xlu1 %v4800_v8, %s4447_s30  ;;  %v1833_v20 = vsel %vm865_vm12, %v1705_v11, %v5058_v32  ;;  %v453_v32 = vadd.s32 48, %v4737_v58  ;;  %v1849_v11 = vsel %vm865_vm12, %v1721_v35, %v5066_v63  ;;  %v469_v35 = vadd.s32 176, %v4737_v58 }
 0x221   : > { %1895 = vrot.lane.b32.xlu0 %v1831_v33, %s4448_s4  ;;  %v1835_v41 = vsel %vm865_vm12, %v1707_v34, %v5299_v0  ;;  %vm5547_vm14 = vcmp.ge.s32.totalorder %v623_v1, 1  ;;  %v1850_v16 = vsel %vm865_vm12, %v7465_v47, %v5223_v28  ;;  %v1836_v34 = vsel %vm865_vm12, %v5247_v56, %v5284_v26  ;;  %v7688_v0 = vld [vmem:[#allocation107_spill] sm:$0xff] }
 0x222   : > { %v5487_v3 = vpop.permute.xlu1 %1636  ;;  %v525_v63 = vand.u32 15, %v453_v32  ;;  %v1723_v32 = vsel %vm5547_vm14, %v5195_v24, 0.0  ;;  %v637_v1 = vand.u32 15, %v469_v35  ;;  %v1852_v26 = vsel %vm865_vm12, %v5256_v17, %v5295_v49  ;;  %v7477_v49 = vld [vmem:[#allocation101_spill] sm:$0xff] }
 0x223   : > { %v5495_v6 = vpop.permute.xlu0 %1662 }
 0x224   : > { %1897 = vrot.lane.b32.xlu1 %v1832_v44, %s4448_s4  ;;  %vm5561_vm15 = vcmp.ge.s32.totalorder %v525_v63, 1  ;;  %v455_v63 = vadd.s32 64, %v4737_v58  ;;  %vm5582_vm0 = vcmp.ge.s32.totalorder %v637_v1, 1 }
 0x225   : > { %1899 = vrot.lane.b32.xlu0 %v1833_v20, %s4448_s4  ;;  %v1709_v28 = vsel %vm5561_vm15, %v5280_v31, 0.0  ;;  %v7697_v20 = vld [vmem:[#allocation93_spill] sm:$0xff] }
 0x226   : > { %v5508_v33 = vpop.permute.xlu1 %1668  ;;  %v1837_v31 = vsel %vm865_vm12, %v1709_v28, %v5227_v38  ;;  %v539_v47 = vand.u32 15, %v455_v63  ;;  %v457_v38 = vadd.s32 80, %v4737_v58  ;;  %v1838_v28 = vsel %vm865_vm12, %v7477_v49, %v5359_v54 }
 0x227   : > { %v5516_v44 = vpop.permute.xlu0 %1026  ;;  %v7479_v54 = vmov 0  ;;  %v1840_v49 = vsel %vm865_vm12, %v5391_v18, %v5423_v52  ;;  %v1856_v52 = vsel %vm865_vm12, %v5399_v14, %v5431_v7  ;;  %v459_v7 = vadd.s32 96, %v4737_v58 }
 0x228   : > { %7459 = vst [vmem:[#allocation138_spill] sm:$0xff] %v5516_v44  ;;  %1929 = vrot.lane.b32.xlu1 %v1848_v55, %s4448_s4  ;;  %vm5610_vm3 = vcmp.ge.s32.totalorder %v539_v47, 1 }
 0x229   : > { %1931 = vrot.lane.b32.xlu0 %v1849_v11, %s4448_s4 }
 0x22a   : > { %v5523_v42 = vpop.permute.xlu1 %1757 }
 0x22b   : > { %v5537_v55 = vpop.permute.xlu0 %1474 }
 0x22c   : > { %7462 = vst [vmem:[#allocation139_spill] sm:$0xff] %v5537_v55  ;;  %1901 = vrot.lane.b32.xlu1 %v1834_v48, %s4448_s4  ;;  %v1851_v48 = vsel %vm865_vm12, %v1723_v32, %v5307_v36  ;;  %v7470_v36 = vmov 0 }
 0x22d   : > { %1903 = vrot.lane.b32.xlu0 %v1835_v41, %s4448_s4  ;;  %v7471_v36 = vsel %vm5582_vm0, 4294967295, %v7470_v36  ;;  %v1725_v41 = vsel %vm5582_vm0, %v5291_v51, 0.0 }
 0x22e   : > { %v5544_v9 = vpop.permute.xlu1 %1789  ;;  %7472 = vst [vmem:[#allocation141_spill] sm:$0xff] %v7471_v36  ;;  %v1853_v51 = vsel %vm865_vm12, %v1725_v41, %v5235_v27  ;;  %v553_v27 = vand.u32 15, %v457_v38 }
 0x22f   : > { %v5558_v11 = vpop.permute.xlu0 %1506 }
 0x230   : > { %7466 = vst [vmem:[#allocation86_spill] sm:$0xff] %v5558_v11  ;;  %1933 = vrot.lane.b32.xlu1 %v1850_v16, %s4448_s4  ;;  %v471_v16 = vadd.s32 192, %v4737_v58  ;;  %vm5645_vm5 = vcmp.ge.s32.totalorder %v553_v27, 1 }
 0x231   : > { %1935 = vrot.lane.b32.xlu0 %v1851_v48, %s4448_s4 }
 0x232   : > { %v5572_v24 = vpop.permute.xlu1 %1020  ;;  %v651_v17 = vand.u32 15, %v471_v16 }
 0x233   : > { %7469 = vst [vmem:[#allocation140_spill] sm:$0xff] %v5572_v24  ;;  %v5579_v35 = vpop.permute.xlu0 %1638 }
 0x234   : > { %1905 = vrot.lane.b32.xlu1 %v1836_v34, %s4448_s4  ;;  %v1711_v34 = vsel %vm5610_vm3, %v5336_v37, 0.0  ;;  %vm5631_vm4 = vcmp.ge.s32.totalorder %v651_v17, 1  ;;  %v7482_v37 = vld [vmem:[#allocation102_spill] sm:$0xff] }
 0x235   : > { %1907 = vrot.lane.b32.xlu0 %v1837_v31, %s4448_s4  ;;  %v473_v31 = vadd.s32 208, %v4737_v58  ;;  %v1839_v41 = vsel %vm865_vm12, %v1711_v34, %v5435_v19  ;;  %v7480_v54 = vsel %vm5631_vm4, 4294967295, %v7479_v54  ;;  %v1854_v47 = vsel %vm865_vm12, %v7482_v37, %v5367_v29 }
 0x236   : > { %v5593_v56 = vpop.permute.xlu1 %1052  ;;  %7481 = vst [vmem:[#allocation144_spill] sm:$0xff] %v7480_v54  ;;  %v1727_v16 = vsel %vm5631_vm4, %v5347_v60, 0.0  ;;  %v1713_v29 = vsel %vm5645_vm5, %v5419_v62, 0.0  ;;  %v7487_v34 = vmov 0 }
 0x237   : > { %7473 = vst [vmem:[#allocation142_spill] sm:$0xff] %v5593_v56  ;;  %v5600_v32 = vpop.permute.xlu0 %1763  ;;  %v1855_v17 = vsel %vm865_vm12, %v1727_v16, %v5443_v57  ;;  %v1841_v62 = vsel %vm865_vm12, %v1713_v29, %v5371_v50  ;;  %v7519_v56 = vld [vmem:[#allocation103_spill] sm:$0xff] }
 0x238   : > { %1937 = vrot.lane.b32.xlu1 %v1852_v26, %s4448_s4 }
 0x239   : > { %1939 = vrot.lane.b32.xlu0 %v1853_v51, %s4448_s4  ;;  %v665_v51 = vand.u32 15, %v473_v31 }
 0x23a   : > { %v5608_v1 = vpop.permute.xlu1 %1476 }
 0x23b   : > { %7474 = vst [vmem:[#allocation143_spill] sm:$0xff] %v5608_v1  ;;  %v5621_v63 = vpop.permute.xlu0 %1795  ;;  %vm5663_vm6 = vcmp.ge.s32.totalorder %v665_v51, 1  ;;  %v7522_v1 = vld [vmem:[#allocation49_spill] sm:$0xff] }
 0x23c   : > { %1909 = vrot.lane.b32.xlu1 %v1838_v28, %s4448_s4  ;;  %v7488_v34 = vsel %vm5663_vm6, 4294967295, %v7487_v34  ;;  %v1729_v57 = vsel %vm5663_vm6, %v5427_v21, 0.0  ;;  %v1842_v21 = vsel %vm865_vm12, %v5340_v2, %v5523_v42  ;;  %v567_v2 = vand.u32 15, %v459_v7 }
 0x23d   : > { %1911 = vrot.lane.b32.xlu0 %v1839_v41, %s4448_s4  ;;  %7489 = vst [vmem:[#allocation146_spill] sm:$0xff] %v7488_v34  ;;  %v1857_v50 = vsel %vm865_vm12, %v1729_v57, %v5379_v53  ;;  %v1858_v53 = vsel %vm865_vm12, %v5351_v59, %v5544_v9  ;;  %v475_v9 = vadd.s32 224, %v4737_v58  ;;  %v7709_v34 = vld [vmem:[#allocation48_spill] sm:$0xff] }
 0x23e   : > { %v5629_v26 = vpop.permute.xlu1 %1508  ;;  %vm5707_vm7 = vcmp.ge.s32.totalorder %v567_v2, 1 }
 0x23f   : > { %7478 = vst [vmem:[#allocation101_spill] sm:$0xff] %v5629_v26  ;;  %v5642_v38 = vpop.permute.xlu0 %1022 }
 0x240   : > { %7483 = vst [vmem:[#allocation102_spill] sm:$0xff] %v5642_v38  ;;  %1941 = vrot.lane.b32.xlu1 %v1854_v47, %s4448_s4  ;;  %v463_v47 = vadd.s32 128, %v4737_v58 }
 0x241   : > { %1943 = vrot.lane.b32.xlu0 %v1855_v17, %s4448_s4 }
 0x242   : > { %v1633_v60 = vpop.permute.xlu1 %1632  ;;  %v595_v17 = vand.u32 15, %v463_v47  ;;  %v7498_v47 = vld [vmem:[#allocation95_spill] sm:$0xff] }
 0x243   : > { %v5660_v28 = vpop.permute.xlu0 %1054 }
 0x244   : > { %7486 = vst [vmem:[#allocation145_spill] sm:$0xff] %v5660_v28  ;;  %1913 = vrot.lane.b32.xlu1 %v1840_v49, %s4448_s4  ;;  %vm5719_vm8 = vcmp.ge.s32.totalorder %v595_v17, 1  ;;  %v7518_v28 = vld [vmem:[#allocation38_spill] sm:$0xff] }
 0x245   : > { %1915 = vrot.lane.b32.xlu0 %v1841_v62, %s4448_s4 }
 0x246   : > { %v1665_v27 = vpop.permute.xlu1 %1664 }
 0x247   : > { %v5678_v18 = vpop.permute.xlu0 %1470  ;;  %v7713_v36 = vld [vmem:[#allocation102_spill] sm:$0xff] }
 0x248   : > { %7490 = vst [vmem:[#allocation147_spill] sm:$0xff] %v5678_v18  ;;  %1945 = vrot.lane.b32.xlu1 %v1856_v52, %s4448_s4  ;;  %v461_v52 = vadd.s32 112, %v4737_v58 }
 0x249   : > { %1947 = vrot.lane.b32.xlu0 %v1857_v50, %s4448_s4 }
 0x24a   : > { %v1766_v31 = vpop.permute.xlu1 %1765  ;;  %v581_v7 = vand.u32 15, %v461_v52  ;;  %v7504_v52 = vld [vmem:[#allocation43_spill] sm:$0xff] }
 0x24b   : > { %v5689_v41 = vpop.permute.xlu0 %1502  ;;  %v1846_v42 = vsel %vm865_vm12, %v5487_v3, %v1766_v31  ;;  %v1715_v3 = vsel %vm5707_vm7, %v5473_v10, 0.0  ;;  %v679_v10 = vand.u32 15, %v475_v9 }
 0x24c   : > { %7491 = vst [vmem:[#allocation148_spill] sm:$0xff] %v5689_v41  ;;  %1917 = vrot.lane.b32.xlu1 %v1842_v21, %s4448_s4  ;;  %vm5750_vm1 = vcmp.ge.s32.totalorder %v581_v7, 1  ;;  %v7517_v41 = vld [vmem:[#allocation92_spill] sm:$0xff] }
 0x24d   : > { %vm5738_vm2 = vcmp.ge.s32.totalorder %v679_v10, 1  ;;  %v1169_v57 = vsel %vm5750_vm1, %v7713_v36, 0.0 }
 0x24e   : > { %v1798_v14 = vpop.permute.xlu1 %1797  ;;  %v1731_v17 = vsel %vm5738_vm2, %v5495_v6, 0.0 }
 0x24f   : > { %v1635_v37 = vpop.permute.xlu0 %1634  ;;  %v1862_v49 = vsel %vm865_vm12, %v5508_v33, %v1798_v14  ;;  %v1719_v33 = vsel %vm5719_vm8, %v5579_v35, 0.0 }
 0x250   : > { %1949 = vrot.lane.b32.xlu1 %v1858_v53, %s4448_s4  ;;  %v477_v53 = vadd.s32 240, %v4737_v58  ;;  %v1847_v2 = vsel %vm865_vm12, %v1719_v33, %v7498_v47 }
 0x252   : > { %v5699_v16 = vpop.permute.xlu1 %1472 }
 0x253   : > { %7492 = vst [vmem:[#allocation149_spill] sm:$0xff] %v5699_v16  ;;  %v1667_v51 = vpop.permute.xlu0 %1666  ;;  %v7521_v16 = vld [vmem:[#allocation56_spill] sm:$0xff] }
 0x254   : > { %1925 = vrot.lane.b32.xlu1 %v1846_v42, %s4448_s4  ;;  %v7499_v42 = vmov 0 }
 0x255   : > { %v7500_v42 = vsel %vm5738_vm2, 4294967295, %v7499_v42 }
 0x256   : > { %v5705_v29 = vpop.permute.xlu1 %1504  ;;  %7501 = vst [vmem:[#allocation95_spill] sm:$0xff] %v7500_v42 }
 0x257   : > { %7493 = vst [vmem:[#allocation150_spill] sm:$0xff] %v5705_v29  ;;  %v1760_v62 = vpop.permute.xlu0 %1759  ;;  %v7520_v29 = vld [vmem:[#allocation29_spill] sm:$0xff] }
 0x258   : > { %1957 = vrot.lane.b32.xlu1 %v1862_v49, %s4448_s4  ;;  %v1843_v50 = vsel %vm865_vm12, %v1715_v3, %v1760_v62  ;;  %v693_v49 = vand.u32 15, %v477_v53  ;;  %v1717_v62 = vsel %vm5750_vm1, %v1635_v37, 0.0  ;;  %v7510_v53 = vld [vmem:[#allocation55_spill] sm:$0xff] }
 0x259   : > { %1919 = vrot.lane.b32.xlu0 %v1843_v50, %s4448_s4  ;;  %v7505_v50 = vmov 0  ;;  %v1845_v33 = vsel %vm865_vm12, %v1717_v62, %v5600_v32 }
 0x25a   : > { %v1762_v31 = vpop.permute.xlu1 %1761  ;;  %vm5765_vm2 = vcmp.ge.s32.totalorder %v693_v49, 1  ;;  %v7513_v49 = vld [vmem:[#allocation78_spill] sm:$0xff] }
 0x25b   : > { %v1844_v21 = vsel %vm865_vm12, %v1633_v60, %v1762_v31  ;;  %v1792_v14 = vpop.permute.xlu0 %1791  ;;  %v7506_v50 = vsel %vm5765_vm2, 4294967295, %v7505_v50  ;;  %v1733_v37 = vsel %vm5765_vm2, %v1667_v51, 0.0  ;;  %v7509_v51 = vld [vmem:[#allocation61_spill] sm:$0xff]  ;;  %vm7571_vm2 = vcmask 1040384  }
 0x25c   : > { %1921 = vrot.lane.b32.xlu1 %v1844_v21, %s4448_s4  ;;  %v1859_v3 = vsel %vm865_vm12, %v1731_v17, %v1792_v14  ;;  %7507 = vst [vmem:[#allocation43_spill] sm:$0xff] %v7506_v50  ;;  %v7508_v21 = vld [vmem:[#allocation75_spill] sm:$0xff]  ;;  %v1861_v14 = vsel %vm865_vm12, %v1733_v37, %v5621_v63  ;;  %v7512_v63 = vld [vmem:[#allocation60_spill] sm:$0xff]  ;;  %v7515_v37 = vld [vmem:[#allocation82_spill] sm:$0xff] }
 0x25d   : > { %1927 = vrot.lane.b32.xlu0 %v1847_v2, %s4448_s4 }
 0x25e   : > { %v1794_v35 = vpop.permute.xlu1 %1793 }
 0x25f   : > { %v1860_v60 = vsel %vm865_vm12, %v1665_v27, %v1794_v35  ;;  %v5747_v9 = vpop.permute.xlu0 %2023  ;;  %v7511_v35 = vld [vmem:[#allocation68_spill] sm:$0xff] }
 0x260   : > { %1953 = vrot.lane.b32.xlu1 %v1860_v60, %s4448_s4 }
 0x261   : > { %1951 = vrot.lane.b32.xlu0 %v1859_v3, %s4448_s4  ;;  %v7514_v3 = vld [vmem:[#allocation18_spill] sm:$0xff] }
 0x262   : > { %v5759_v27 = vpop.permute.xlu1 %2025 }
 0x263   : > { %v5761_v6 = vpop.permute.xlu0 %2027 }
 0x264   : > { %2077 = vrot.lane.b32.xlu1 %v7504_v52, %s4447_s30 }
 0x265   : > { %1923 = vrot.lane.b32.xlu0 %v1845_v33, %s4448_s4 }
 0x266   : > { %v5775_v31 = vpop.permute.xlu1 %2029 }
 0x267   : > { %v5777_v10 = vpop.permute.xlu0 %2031 }
 0x268   : > { %2081 = vrot.lane.b32.xlu1 %v7508_v21, %s4447_s30 }
 0x269   : > { %1955 = vrot.lane.b32.xlu0 %v1861_v14, %s4448_s4  ;;  %v7516_v14 = vld [vmem:[#allocation12_spill] sm:$0xff] }
 0x26a   : > { %v5785_v7 = vpop.permute.xlu1 %2033 }
 0x26b   : > { %v5787_v32 = vpop.permute.xlu0 %2035 }
 0x26c   : > { %2146 = vrot.lane.b32.xlu1 %v7509_v51, %s4447_s30 }
 0x26d   : > { %2075 = vrot.lane.b32.xlu0 %v7510_v53, %s4447_s30 }
 0x26e   : > { %v5793_v47 = vpop.permute.xlu1 %2037 }
 0x26f   : > { %v5795_v2 = vpop.permute.xlu0 %2039 }
 0x270   : > { %2150 = vrot.lane.b32.xlu1 %v7511_v35, %s4447_s30 }
 0x271   : > { %2079 = vrot.lane.b32.xlu0 %v7512_v63, %s4447_s30 }
 0x272   : > { %v5801_v60 = vpop.permute.xlu1 %2041 }
 0x273   : > { %v5803_v17 = vpop.permute.xlu0 %2043 }
 0x274   : > { %2154 = vrot.lane.b32.xlu1 %v7513_v49, %s4447_s30  ;;  %v7532_v49 = vld [vmem:[#allocation84_spill] sm:$0xff] }
 0x275   : > { %2144 = vrot.lane.b32.xlu0 %v7514_v3, %s4447_s30 }
 0x276   : > { %v5809_v62 = vpop.permute.xlu1 %2045 }
 0x277   : > { %v5811_v33 = vpop.permute.xlu0 %2047 }
 0x278   : > { %2158 = vrot.lane.b32.xlu1 %v7515_v37, %s4447_s30 }
 0x279   : > { %2148 = vrot.lane.b32.xlu0 %v7516_v14, %s4447_s30  ;;  %v7528_v14 = vld [vmem:[#allocation79_spill] sm:$0xff] }
 0x27a   : > { %v5817_v51 = vpop.permute.xlu1 %2049 }
 0x27b   : > { %v5819_v11 = vpop.permute.xlu0 %2051 }
 0x27c   : > { %2162 = vrot.lane.b32.xlu1 %v7517_v41, %s4447_s30 }
 0x27d   : > { %2152 = vrot.lane.b32.xlu0 %v7518_v28, %s4447_s30  ;;  %v7525_v28 = vld [vmem:[#allocation73_spill] sm:$0xff] }
 0x27e   : > { %v5825_v3 = vpop.permute.xlu1 %2053 }
 0x27f   : > { %v5827_v26 = vpop.permute.xlu0 %2055 }
 0x280   : > { %2166 = vrot.lane.b32.xlu1 %v7519_v56, %s4447_s30 }
 0x281   : > { %2156 = vrot.lane.b32.xlu0 %v7520_v29, %s4447_s30  ;;  %v7523_v29 = vld [vmem:[#allocation62_spill] sm:$0xff] }
 0x282   : > { %v5833_v18 = vpop.permute.xlu1 %2057 }
 0x283   : > { %v5835_v24 = vpop.permute.xlu0 %2059 }
 0x284   : > { %2170 = vrot.lane.b32.xlu1 %v5334_v22, %s4447_s30  ;;  %v7524_v22 = vld [vmem:[#allocation72_spill] sm:$0xff] }
 0x285   : > { %2160 = vrot.lane.b32.xlu0 %v7521_v16, %s4447_s30 }
 0x286   : > { %v5841_v55 = vpop.permute.xlu1 %2061 }
 0x287   : > { %v5843_v38 = vpop.permute.xlu0 %2063 }
 0x288   : > { %2174 = vrot.lane.b32.xlu1 %v5278_v30, %s4447_s30  ;;  %v7526_v30 = vld [vmem:[#allocation69_spill] sm:$0xff] }
 0x289   : > { %2164 = vrot.lane.b32.xlu0 %v7522_v1, %s4447_s30 }
 0x28a   : > { %v5849_v44 = vpop.permute.xlu1 %2065 }
 0x28b   : > { %v5851_v50 = vpop.permute.xlu0 %2067 }
 0x28c   : > { %2178 = vrot.lane.b32.xlu1 %v7523_v29, %s4447_s30  ;;  %v7529_v29 = vld [vmem:[#allocation20_spill] sm:$0xff] }
 0x28d   : > { %2168 = vrot.lane.b32.xlu0 %v7524_v22, %s4447_s30 }
 0x28e   : > { %v5857_v16 = vpop.permute.xlu1 %2069 }
 0x28f   : > { %v5859_v56 = vpop.permute.xlu0 %2071 }
 0x290   : > { %2182 = vrot.lane.b32.xlu1 %v7525_v28, %s4447_s30  ;;  %v7533_v28 = vld [vmem:[#allocation14_spill] sm:$0xff] }
 0x291   : > { %2172 = vrot.lane.b32.xlu0 %v7526_v30, %s4447_s30 }
 0x292   : > { %v5865_v1 = vpop.permute.xlu1 %2073 }
 0x293   : > { %v5867_v41 = vpop.permute.xlu0 %1895 }
 0x294   : > { %7527 = vst [vmem:[#allocation75_spill] sm:$0xff] %v5867_v41  ;;  %2186 = vrot.lane.b32.xlu1 %v7528_v14, %s4447_s30  ;;  %v7536_v41 = vld [vmem:[#allocation94_spill] sm:$0xff]  ;;  %v7537_v14 = vld [vmem:[#allocation39_spill] sm:$0xff] }
 0x295   : > { %2176 = vrot.lane.b32.xlu0 %v7529_v29, %s4447_s30 }
 0x296   : > { %v5873_v22 = vpop.permute.xlu1 %1897 }
 0x297   : > { %7530 = vst [vmem:[#allocation61_spill] sm:$0xff] %v5873_v22  ;;  %v5875_v37 = vpop.permute.xlu0 %1899 }
 0x298   : > { %7531 = vst [vmem:[#allocation18_spill] sm:$0xff] %v5875_v37  ;;  %2190 = vrot.lane.b32.xlu1 %v7532_v49, %s4447_s30  ;;  %v7540_v37 = vld [vmem:[#allocation105_spill] sm:$0xff]  ;;  %v7541_v49 = vld [vmem:[#allocation30_spill] sm:$0xff] }
 0x299   : > { %2180 = vrot.lane.b32.xlu0 %v7533_v28, %s4447_s30 }
 0x29a   : > { %v5881_v30 = vpop.permute.xlu1 %1929 }
 0x29b   : > { %7534 = vst [vmem:[#allocation151_spill] sm:$0xff] %v5881_v30  ;;  %v5883_v63 = vpop.permute.xlu0 %1931 }
 0x29c   : > { %7535 = vst [vmem:[#allocation152_spill] sm:$0xff] %v5883_v63  ;;  %2194 = vrot.lane.b32.xlu1 %v7536_v41, %s4447_s30  ;;  %v7544_v63 = vld [vmem:[#allocation124_spill] sm:$0xff]  ;;  %v7545_v41 = vld [vmem:[#allocation57_spill] sm:$0xff] }
 0x29d   : > { %2184 = vrot.lane.b32.xlu0 %v7537_v14, %s4447_s30 }
 0x29e   : > { %v5889_v29 = vpop.permute.xlu1 %1901 }
 0x29f   : > { %7538 = vst [vmem:[#allocation153_spill] sm:$0xff] %v5889_v29  ;;  %v5891_v22 = vpop.permute.xlu0 %1903 }
 0x2a0   : > { %7539 = vst [vmem:[#allocation154_spill] sm:$0xff] %v5891_v22  ;;  %2198 = vrot.lane.b32.xlu1 %v7540_v37, %s4447_s30  ;;  %v7548_v22 = vld [vmem:[#allocation53_spill] sm:$0xff] }
 0x2a1   : > { %2188 = vrot.lane.b32.xlu0 %v7541_v49, %s4447_s30  ;;  %v7550_v49 = vld [vmem:[#allocation77_spill] sm:$0xff] }
 0x2a2   : > { %v5897_v28 = vpop.permute.xlu1 %1933 }
 0x2a3   : > { %7542 = vst [vmem:[#allocation155_spill] sm:$0xff] %v5897_v28  ;;  %v5899_v30 = vpop.permute.xlu0 %1935 }
 0x2a4   : > { %7543 = vst [vmem:[#allocation156_spill] sm:$0xff] %v5899_v30  ;;  %2202 = vrot.lane.b32.xlu1 %v7544_v63, %s4447_s30 }
 0x2a5   : > { %2192 = vrot.lane.b32.xlu0 %v7545_v41, %s4447_s30 }
 0x2a6   : > { %v5905_v14 = vpop.permute.xlu1 %1905 }
 0x2a7   : > { %7546 = vst [vmem:[#allocation157_spill] sm:$0xff] %v5905_v14  ;;  %v5907_v29 = vpop.permute.xlu0 %1907 }
 0x2a8   : > { %7547 = vst [vmem:[#allocation158_spill] sm:$0xff] %v5907_v29 }
 0x2a9   : > { %2196 = vrot.lane.b32.xlu0 %v7548_v22, %s4447_s30 }
 0x2aa   : > { %v5911_v37 = vpop.permute.xlu1 %1937 }
 0x2ab   : > { %7549 = vst [vmem:[#allocation159_spill] sm:$0xff] %v5911_v37  ;;  %v5917_v30 = vpop.permute.xlu0 %1939 }
 0x2ac   : > { %7552 = vst [vmem:[#allocation161_spill] sm:$0xff] %v5917_v30 }
 0x2ad   : > { %2200 = vrot.lane.b32.xlu0 %v7550_v49, %s4447_s30 }
 0x2ae   : > { %v5915_v28 = vpop.permute.xlu1 %1909 }
 0x2af   : > { %7551 = vst [vmem:[#allocation160_spill] sm:$0xff] %v5915_v28  ;;  %v5921_v35 = vpop.permute.xlu0 %1911 }
 0x2b0   : > { %7554 = vst [vmem:[#allocation163_spill] sm:$0xff] %v5921_v35 }
 0x2b2   : > { %v5919_v63 = vpop.permute.xlu1 %1941 }
 0x2b3   : > { %7553 = vst [vmem:[#allocation162_spill] sm:$0xff] %v5919_v63  ;;  %v5927_v29 = vpop.permute.xlu0 %1943 }
 0x2b4   : > { %7557 = vst [vmem:[#allocation166_spill] sm:$0xff] %v5927_v29 }
 0x2b6   : > { %v5923_v41 = vpop.permute.xlu1 %1913 }
 0x2b7   : > { %7555 = vst [vmem:[#allocation164_spill] sm:$0xff] %v5923_v41  ;;  %v5931_v37 = vpop.permute.xlu0 %1915 }
 0x2b8   : > { %7559 = vst [vmem:[#allocation168_spill] sm:$0xff] %v5931_v37 }
 0x2ba   : > { %v5925_v14 = vpop.permute.xlu1 %1945 }
 0x2bb   : > { %7556 = vst [vmem:[#allocation165_spill] sm:$0xff] %v5925_v14  ;;  %v5937_v28 = vpop.permute.xlu0 %1947 }
 0x2bc   : > { %7562 = vst [vmem:[#allocation171_spill] sm:$0xff] %v5937_v28 }
 0x2be   : > { %v5929_v22 = vpop.permute.xlu1 %1917 }
 0x2bf   : > { %7558 = vst [vmem:[#allocation167_spill] sm:$0xff] %v5929_v22 }
 0x2c2   : > { %v5933_v53 = vpop.permute.xlu1 %1949 }
 0x2c3   : > { %7560 = vst [vmem:[#allocation169_spill] sm:$0xff] %v5933_v53 }
 0x2c6   : > { %v5935_v49 = vpop.permute.xlu1 %1925 }
 0x2c7   : > { %7561 = vst [vmem:[#allocation170_spill] sm:$0xff] %v5935_v49 }
 0x2ca   : > { %v5939_v30 = vpop.permute.xlu1 %1957 }
 0x2cb   : > { %7563 = vst [vmem:[#allocation172_spill] sm:$0xff] %v5939_v30  ;;  %v5941_v63 = vpop.permute.xlu0 %1919 }
 0x2cc   : > { %7564 = vst [vmem:[#allocation173_spill] sm:$0xff] %v5941_v63 }
 0x2ce   : > { %v5943_v35 = vpop.permute.xlu1 %1921 }
 0x2cf   : > { %7565 = vst [vmem:[#allocation174_spill] sm:$0xff] %v5943_v35  ;;  %v5945_v41 = vpop.permute.xlu0 %1927 }
 0x2d0   : > { %7566 = vst [vmem:[#allocation175_spill] sm:$0xff] %v5945_v41 }
 0x2d2   : > { %v5947_v14 = vpop.permute.xlu1 %1953 }
 0x2d3   : > { %7567 = vst [vmem:[#allocation176_spill] sm:$0xff] %v5947_v14  ;;  %v5949_v29 = vpop.permute.xlu0 %1951 }
 0x2d4   : > { %7568 = vst [vmem:[#allocation177_spill] sm:$0xff] %v5949_v29 }
 0x2d6   : > { %v5951_v22 = vpop.permute.xlu1 %2077 }
 0x2d7   : > { %v5953_v37 = vpop.permute.xlu0 %1923 }
 0x2d8   : > { %7569 = vst [vmem:[#allocation178_spill] sm:$0xff] %v5953_v37 }
 0x2da   : > { %v5955_v53 = vpop.permute.xlu1 %2081 }
 0x2db   : > { %v5957_v49 = vpop.permute.xlu0 %1955 }
 0x2dc   : > { %7570 = vst [vmem:[#allocation179_spill] sm:$0xff] %v5957_v49  ;;  %v2113_v49 = vsel %vm7571_vm2, 0.0, %v5747_v9 }
 0x2de   : > { %v2147_v28 = vpop.permute.xlu1 %2146 }
 0x2df   : > { %v2235_v30 = vsel %vm865_vm12, %v5759_v27, %v2147_v28  ;;  %v5962_v63 = vpop.permute.xlu0 %2075 }
 0x2e0   : > { %2296 = vrot.lane.b32.xlu1 %v2235_v30, %s4449_s5  ;;  %v2114_v30 = vsel %vm5088_vm11, %v2113_v49, 0.0  ;;  %vm7572_vm11 = vnez %v7500_v42 }
 0x2e2   : > { %v2151_v14 = vpop.permute.xlu1 %2150 }
 0x2e3   : > { %v2237_v29 = vsel %vm865_vm12, %v5775_v31, %v2151_v14  ;;  %v5968_v41 = vpop.permute.xlu0 %2079 }
 0x2e4   : > { %2300 = vrot.lane.b32.xlu1 %v2237_v29, %s4449_s5 }
 0x2e6   : > { %v2155_v37 = vpop.permute.xlu1 %2154 }
 0x2e7   : > { %v2239_v28 = vsel %vm865_vm12, %v5785_v7, %v2155_v37  ;;  %v2145_v27 = vpop.permute.xlu0 %2144  ;;  %v2116_v7 = vsel %vm5477_vm9, %v5761_v6, 0.0 }
 0x2e8   : > { %2304 = vrot.lane.b32.xlu1 %v2239_v28, %s4449_s5  ;;  %v2234_v31 = vsel %vm865_vm12, %v2114_v30, %v2145_v27 }
 0x2e9   : > { %2294 = vrot.lane.b32.xlu0 %v2234_v31, %s4449_s5 }
 0x2ea   : > { %v2159_v29 = vpop.permute.xlu1 %2158 }
 0x2eb   : > { %v2241_v9 = vsel %vm865_vm12, %v5793_v47, %v2159_v29  ;;  %v2149_v37 = vpop.permute.xlu0 %2148  ;;  %v2118_v47 = vsel %vm5526_vm13, %v5777_v10, 0.0 }
 0x2ec   : > { %2308 = vrot.lane.b32.xlu1 %v2241_v9, %s4449_s5  ;;  %v2236_v39 = vsel %vm865_vm12, %v2116_v7, %v2149_v37 }
 0x2ed   : > { %2298 = vrot.lane.b32.xlu0 %v2236_v39, %s4449_s5 }
 0x2ee   : > { %v2163_v49 = vpop.permute.xlu1 %2162 }
 0x2ef   : > { %v2243_v14 = vsel %vm865_vm12, %v5801_v60, %v2163_v49  ;;  %v2153_v28 = vpop.permute.xlu0 %2152  ;;  %v2120_v60 = vsel %vm5561_vm15, %v5787_v32, 0.0 }
 0x2f0   : > { %2312 = vrot.lane.b32.xlu1 %v2243_v14, %s4449_s5  ;;  %v2238_v6 = vsel %vm865_vm12, %v2118_v47, %v2153_v28 }
 0x2f1   : > { %2302 = vrot.lane.b32.xlu0 %v2238_v6, %s4449_s5 }
 0x2f2   : > { %v2167_v30 = vpop.permute.xlu1 %2166 }
 0x2f3   : > { %v2245_v27 = vsel %vm865_vm12, %v5809_v62, %v2167_v30  ;;  %v2157_v31 = vpop.permute.xlu0 %2156  ;;  %v2122_v62 = vsel %vm5610_vm3, %v5795_v2, 0.0 }
 0x2f4   : > { %2316 = vrot.lane.b32.xlu1 %v2245_v27, %s4449_s5  ;;  %v2240_v10 = vsel %vm865_vm12, %v2120_v60, %v2157_v31 }
 0x2f5   : > { %2306 = vrot.lane.b32.xlu0 %v2240_v10, %s4449_s5 }
 0x2f6   : > { %v2171_v29 = vpop.permute.xlu1 %2170 }
 0x2f7   : > { %v2247_v9 = vsel %vm865_vm12, %v5817_v51, %v2171_v29  ;;  %v2161_v7 = vpop.permute.xlu0 %2160  ;;  %v2124_v51 = vsel %vm5645_vm5, %v5803_v17, 0.0 }
 0x2f8   : > { %2320 = vrot.lane.b32.xlu1 %v2247_v9, %s4449_s5  ;;  %v2242_v32 = vsel %vm865_vm12, %v2122_v62, %v2161_v7 }
 0x2f9   : > { %2310 = vrot.lane.b32.xlu0 %v2242_v32, %s4449_s5 }
 0x2fa   : > { %v2175_v37 = vpop.permute.xlu1 %2174 }
 0x2fb   : > { %v2249_v39 = vsel %vm865_vm12, %v5825_v3, %v2175_v37  ;;  %v2165_v49 = vpop.permute.xlu0 %2164  ;;  %v2126_v3 = vsel %vm5707_vm7, %v5811_v33, 0.0 }
 0x2fc   : > { %2324 = vrot.lane.b32.xlu1 %v2249_v39, %s4449_s5  ;;  %v2244_v2 = vsel %vm865_vm12, %v2124_v51, %v2165_v49 }
 0x2fd   : > { %2314 = vrot.lane.b32.xlu0 %v2244_v2, %s4449_s5 }
 0x2fe   : > { %v2179_v14 = vpop.permute.xlu1 %2178 }
 0x2ff   : > { %v2251_v47 = vsel %vm865_vm12, %v5833_v18, %v2179_v14  ;;  %v2169_v28 = vpop.permute.xlu0 %2168  ;;  %v2128_v18 = vsel %vm5750_vm1, %v5819_v11, 0.0 }
 0x300   : > { %2328 = vrot.lane.b32.xlu1 %v2251_v47, %s4449_s5  ;;  %v2246_v17 = vsel %vm865_vm12, %v2126_v3, %v2169_v28  ;;  %v2140_v3 = vsel %vm5663_vm6, %v5962_v63, 0.0 }
 0x301   : > { %2318 = vrot.lane.b32.xlu0 %v2246_v17, %s4449_s5 }
 0x302   : > { %v2183_v6 = vpop.permute.xlu1 %2182 }
 0x303   : > { %v2253_v30 = vsel %vm865_vm12, %v5841_v55, %v2183_v6  ;;  %v2173_v27 = vpop.permute.xlu0 %2172  ;;  %v2130_v55 = vsel %vm5719_vm8, %v5827_v26, 0.0  ;;  %v7577_v6 = vld [vmem:[#allocation64_spill] sm:$0xff] }
 0x304   : > { %2332 = vrot.lane.b32.xlu1 %v2253_v30, %s4449_s5  ;;  %v2248_v33 = vsel %vm865_vm12, %v2128_v18, %v2173_v27  ;;  %v7581_v30 = vld [vmem:[#allocation13_spill] sm:$0xff]  ;;  %v7582_v18 = vld [vmem:[#allocation71_spill] sm:$0xff] }
 0x305   : > { %2322 = vrot.lane.b32.xlu0 %v2248_v33, %s4449_s5  ;;  %v7583_v27 = vld [vmem:[#allocation59_spill] sm:$0xff]  ;;  %v7584_v33 = vld [vmem:[#allocation17_spill] sm:$0xff] }
 0x306   : > { %v2187_v60 = vpop.permute.xlu1 %2186 }
 0x307   : > { %v2255_v31 = vsel %vm865_vm12, %v5849_v44, %v2187_v60  ;;  %v2177_v10 = vpop.permute.xlu0 %2176  ;;  %v2132_v44 = vsel %vm5498_vm10, %v5835_v24, 0.0  ;;  %v7585_v60 = vld [vmem:[#allocation28_spill] sm:$0xff] }
 0x308   : > { %2336 = vrot.lane.b32.xlu1 %v2255_v31, %s4449_s5  ;;  %v2250_v11 = vsel %vm865_vm12, %v2130_v55, %v2177_v10  ;;  %v7588_v55 = vld [vmem:[#allocation66_spill] sm:$0xff] }
 0x309   : > { %2326 = vrot.lane.b32.xlu0 %v2250_v11, %s4449_s5  ;;  %v7591_v11 = vld [vmem:[#allocation60_spill] sm:$0xff] }
 0x30a   : > { %v2191_v29 = vpop.permute.xlu1 %2190 }
 0x30b   : > { %v2257_v9 = vsel %vm865_vm12, %v5857_v16, %v2191_v29  ;;  %v2181_v62 = vpop.permute.xlu0 %2180  ;;  %v2134_v16 = vsel %vm5547_vm14, %v5843_v38, 0.0 }
 0x30c   : > { %2340 = vrot.lane.b32.xlu1 %v2257_v9, %s4449_s5  ;;  %v2252_v26 = vsel %vm865_vm12, %v2132_v44, %v2181_v62  ;;  %v7592_v9 = vld [vmem:[#allocation78_spill] sm:$0xff]  ;;  %v7593_v44 = vld [vmem:[#allocation76_spill] sm:$0xff] }
 0x30d   : > { %2330 = vrot.lane.b32.xlu0 %v2252_v26, %s4449_s5 }
 0x30e   : > { %v2195_v7 = vpop.permute.xlu1 %2194 }
 0x30f   : > { %v2259_v32 = vsel %vm865_vm12, %v5865_v1, %v2195_v7  ;;  %v2185_v37 = vpop.permute.xlu0 %2184  ;;  %v2136_v1 = vsel %vm5582_vm0, %v5851_v50, 0.0  ;;  %v7594_v7 = vld [vmem:[#allocation82_spill] sm:$0xff] }
 0x310   : > { %2344 = vrot.lane.b32.xlu1 %v2259_v32, %s4449_s5  ;;  %v2254_v24 = vsel %vm865_vm12, %v2134_v16, %v2185_v37  ;;  %v7595_v32 = vld [vmem:[#allocation12_spill] sm:$0xff] }
 0x311   : > { %2334 = vrot.lane.b32.xlu0 %v2254_v24, %s4449_s5  ;;  %v7596_v24 = vld [vmem:[#allocation92_spill] sm:$0xff] }
 0x312   : > { %v2199_v39 = vpop.permute.xlu1 %2198 }
 0x313   : > { %v2261_v51 = vsel %vm865_vm12, %v5951_v22, %v2199_v39  ;;  %v2189_v49 = vpop.permute.xlu0 %2188  ;;  %v2138_v22 = vsel %vm5631_vm4, %v5859_v56, 0.0  ;;  %v7597_v39 = vld [vmem:[#allocation38_spill] sm:$0xff] }
 0x314   : > { %2348 = vrot.lane.b32.xlu1 %v2261_v51, %s4449_s5  ;;  %v2256_v38 = vsel %vm865_vm12, %v2136_v1, %v2189_v49  ;;  %v7598_v49 = vld [vmem:[#allocation103_spill] sm:$0xff] }
 0x315   : > { %2338 = vrot.lane.b32.xlu0 %v2256_v38, %s4449_s5  ;;  %v7599_v38 = vld [vmem:[#allocation29_spill] sm:$0xff] }
 0x316   : > { %v2203_v2 = vpop.permute.xlu1 %2202 }
 0x317   : > { %v2263_v14 = vsel %vm865_vm12, %v5955_v53, %v2203_v2  ;;  %v2193_v47 = vpop.permute.xlu0 %2192  ;;  %v2142_v53 = vsel %vm7572_vm11, %v5968_v41, 0.0  ;;  %v7575_v41 = vld [vmem:[#allocation70_spill] sm:$0xff] }
 0x318   : > { %2352 = vrot.lane.b32.xlu1 %v2263_v14, %s4449_s5  ;;  %v2258_v50 = vsel %vm865_vm12, %v2138_v22, %v2193_v47  ;;  %v7600_v22 = vld [vmem:[#allocation123_spill] sm:$0xff]  ;;  %v7601_v47 = vld [vmem:[#allocation56_spill] sm:$0xff] }
 0x319   : > { %2342 = vrot.lane.b32.xlu0 %v2258_v50, %s4449_s5 }
 0x31b   : > { %v2197_v28 = vpop.permute.xlu0 %2196 }
 0x31c   : > { %2416 = vrot.lane.b32.xlu1 %v7439_v45, %s4450_s6  ;;  %v2260_v56 = vsel %vm865_vm12, %v2140_v3, %v2197_v28  ;;  %v7573_v45 = vld [vmem:[#allocation15_spill] sm:$0xff] }
 0x31d   : > { %2346 = vrot.lane.b32.xlu0 %v2260_v56, %s4449_s5  ;;  %v7604_v28 = vld [vmem:[#allocation115_spill] sm:$0xff]  ;;  %v7605_v56 = vld [vmem:[#allocation49_spill] sm:$0xff] }
 0x31f   : > { %v2201_v17 = vpop.permute.xlu0 %2200 }
 0x320   : > { %2420 = vrot.lane.b32.xlu1 %v4693_v4, %s4450_s6  ;;  %v2262_v63 = vsel %vm865_vm12, %v2142_v53, %v2201_v17  ;;  %v7574_v4 = vld [vmem:[#allocation34_spill] sm:$0xff] }
 0x321   : > { %2350 = vrot.lane.b32.xlu0 %v2262_v63, %s4449_s5  ;;  %v7608_v63 = vld [vmem:[#allocation62_spill] sm:$0xff] }
 0x324   : > { %2424 = vrot.lane.b32.xlu1 %v4661_v43, %s4450_s6  ;;  %v7576_v43 = vld [vmem:[#allocation44_spill] sm:$0xff] }
 0x325   : > { %2414 = vrot.lane.b32.xlu0 %v7573_v45, %s4450_s6  ;;  %v7609_v45 = vld [vmem:[#allocation72_spill] sm:$0xff] }
 0x328   : > { %2428 = vrot.lane.b32.xlu1 %v4797_v12, %s4450_s6  ;;  %v7578_v12 = vld [vmem:[#allocation54_spill] sm:$0xff] }
 0x329   : > { %2418 = vrot.lane.b32.xlu0 %v4654_v40, %s4450_s6  ;;  %v7579_v40 = vld [vmem:[#allocation16_spill] sm:$0xff] }
 0x32c   : > { %2432 = vrot.lane.b32.xlu1 %v4740_v23, %s4450_s6  ;;  %v7580_v23 = vld [vmem:[#allocation58_spill] sm:$0xff] }
 0x32d   : > { %2422 = vrot.lane.b32.xlu0 %v7574_v4, %s4450_s6 }
 0x330   : > { %2436 = vrot.lane.b32.xlu1 %v7575_v41, %s4450_s6 }
 0x331   : > { %2426 = vrot.lane.b32.xlu0 %v7576_v43, %s4450_s6  ;;  %v7612_v43 = vld [vmem:[#allocation73_spill] sm:$0xff] }
 0x334   : > { %2440 = vrot.lane.b32.xlu1 %v7577_v6, %s4450_s6  ;;  %v7613_v6 = vld [vmem:[#allocation69_spill] sm:$0xff] }
 0x335   : > { %2430 = vrot.lane.b32.xlu0 %v7578_v12, %s4450_s6 }
 0x338   : > { %2444 = vrot.lane.b32.xlu1 %v7579_v40, %s4450_s6 }
 0x339   : > { %2434 = vrot.lane.b32.xlu0 %v7580_v23, %s4450_s6  ;;  %v7616_v23 = vld [vmem:[#allocation79_spill] sm:$0xff] }
 0x33c   : > { %2448 = vrot.lane.b32.xlu1 %v7581_v30, %s4450_s6  ;;  %v7617_v30 = vld [vmem:[#allocation20_spill] sm:$0xff] }
 0x33d   : > { %2438 = vrot.lane.b32.xlu0 %v7582_v18, %s4450_s6 }
 0x340   : > { %2452 = vrot.lane.b32.xlu1 %v4696_v5, %s4450_s6  ;;  %v7586_v5 = vld [vmem:[#allocation35_spill] sm:$0xff] }
 0x341   : > { %2442 = vrot.lane.b32.xlu0 %v7583_v27, %s4450_s6 }
 0x344   : > { %2456 = vrot.lane.b32.xlu1 %v4672_v46, %s4450_s6  ;;  %v7587_v46 = vld [vmem:[#allocation45_spill] sm:$0xff] }
 0x345   : > { %2446 = vrot.lane.b32.xlu0 %v7584_v33, %s4450_s6  ;;  %v7620_v33 = vld [vmem:[#allocation84_spill] sm:$0xff] }
 0x348   : > { %2460 = vrot.lane.b32.xlu1 %v4800_v8, %s4450_s6  ;;  %v7589_v8 = vld [vmem:[#allocation55_spill] sm:$0xff] }
 0x349   : > { %2450 = vrot.lane.b32.xlu0 %v7585_v60, %s4450_s6  ;;  %v7621_v60 = vld [vmem:[#allocation14_spill] sm:$0xff] }
 0x34c   : > { %2464 = vrot.lane.b32.xlu1 %v7504_v52, %s4450_s6  ;;  %v7590_v52 = vld [vmem:[#allocation68_spill] sm:$0xff] }
 0x34d   : > { %2454 = vrot.lane.b32.xlu0 %v7586_v5, %s4450_s6 }
 0x350   : > { %2468 = vrot.lane.b32.xlu1 %v7508_v21, %s4450_s6 }
 0x351   : > { %2458 = vrot.lane.b32.xlu0 %v7587_v46, %s4450_s6 }
 0x352   : > { %v6166_v31 = vpop.permute.xlu1 %2296 }
 0x354   : > { %2472 = vrot.lane.b32.xlu1 %v7588_v55, %s4450_s6  ;;  %v7624_v55 = vld [vmem:[#allocation94_spill] sm:$0xff] }
 0x355   : > { %2462 = vrot.lane.b32.xlu0 %v7589_v8, %s4450_s6  ;;  %v7625_v8 = vld [vmem:[#allocation39_spill] sm:$0xff] }
 0x356   : > { %v6172_v10 = vpop.permute.xlu1 %2300 }
 0x358   : > { %2536 = vrot.lane.b32.xlu1 %v7590_v52, %s4450_s6 }
 0x359   : > { %2466 = vrot.lane.b32.xlu0 %v7591_v11, %s4450_s6 }
 0x35a   : > { %v6178_v21 = vpop.permute.xlu1 %2304 }
 0x35b   : > { %v6180_v29 = vpop.permute.xlu0 %2294 }
 0x35c   : > { %2540 = vrot.lane.b32.xlu1 %v7592_v9, %s4450_s6  ;;  %v7628_v9 = vld [vmem:[#allocation105_spill] sm:$0xff] }
 0x35d   : > { %2470 = vrot.lane.b32.xlu0 %v7593_v44, %s4450_s6  ;;  %v7629_v44 = vld [vmem:[#allocation30_spill] sm:$0xff] }
 0x35e   : > { %v6186_v62 = vpop.permute.xlu1 %2308 }
 0x35f   : > { %v6188_v26 = vpop.permute.xlu0 %2298 }
 0x360   : > { %2544 = vrot.lane.b32.xlu1 %v7594_v7, %s4450_s6 }
 0x361   : > { %2534 = vrot.lane.b32.xlu0 %v7595_v32, %s4450_s6 }
 0x362   : > { %v6194_v16 = vpop.permute.xlu1 %2312 }
 0x363   : > { %v6196_v37 = vpop.permute.xlu0 %2302 }
 0x364   : > { %2548 = vrot.lane.b32.xlu1 %v7596_v24, %s4450_s6  ;;  %v7632_v24 = vld [vmem:[#allocation124_spill] sm:$0xff] }
 0x365   : > { %2538 = vrot.lane.b32.xlu0 %v7597_v39, %s4450_s6  ;;  %v7633_v39 = vld [vmem:[#allocation57_spill] sm:$0xff] }
 0x366   : > { %v6202_v51 = vpop.permute.xlu1 %2316 }
 0x367   : > { %v6204_v1 = vpop.permute.xlu0 %2306 }
 0x368   : > { %2552 = vrot.lane.b32.xlu1 %v7598_v49, %s4450_s6 }
 0x369   : > { %2542 = vrot.lane.b32.xlu0 %v7599_v38, %s4450_s6 }
 0x36a   : > { %v6210_v2 = vpop.permute.xlu1 %2320 }
 0x36b   : > { %v6212_v14 = vpop.permute.xlu0 %2310 }
 0x36c   : > { %2556 = vrot.lane.b32.xlu1 %v7600_v22, %s4450_s6  ;;  %v7635_v22 = vld [vmem:[#allocation116_spill] sm:$0xff] }
 0x36d   : > { %2546 = vrot.lane.b32.xlu0 %v7601_v47, %s4450_s6  ;;  %v7636_v47 = vld [vmem:[#allocation53_spill] sm:$0xff] }
 0x36e   : > { %v6218_v50 = vpop.permute.xlu1 %2324 }
 0x36f   : > { %7602 = vst [vmem:[#allocation15_spill] sm:$0xff] %v6218_v50  ;;  %v6220_v3 = vpop.permute.xlu0 %2314 }
 0x370   : > { %7603 = vst [vmem:[#allocation34_spill] sm:$0xff] %v6220_v3  ;;  %2560 = vrot.lane.b32.xlu1 %v7604_v28, %s4450_s6 }
 0x371   : > { %2550 = vrot.lane.b32.xlu0 %v7605_v56, %s4450_s6 }
 0x372   : > { %v6226_v53 = vpop.permute.xlu1 %2328 }
 0x373   : > { %7606 = vst [vmem:[#allocation70_spill] sm:$0xff] %v6226_v53  ;;  %v6228_v17 = vpop.permute.xlu0 %2318 }
 0x374   : > { %7607 = vst [vmem:[#allocation44_spill] sm:$0xff] %v6228_v17  ;;  %2564 = vrot.lane.b32.xlu1 %v7608_v63, %s4450_s6  ;;  %v7638_v63 = vld [vmem:[#allocation77_spill] sm:$0xff] }
 0x375   : > { %2554 = vrot.lane.b32.xlu0 %v7609_v45, %s4450_s6 }
 0x376   : > { %v6234_v4 = vpop.permute.xlu1 %2332 }
 0x377   : > { %7610 = vst [vmem:[#allocation64_spill] sm:$0xff] %v6234_v4  ;;  %v6236_v41 = vpop.permute.xlu0 %2322 }
 0x378   : > { %7611 = vst [vmem:[#allocation54_spill] sm:$0xff] %v6236_v41  ;;  %2568 = vrot.lane.b32.xlu1 %v7612_v43, %s4450_s6 }
 0x379   : > { %2558 = vrot.lane.b32.xlu0 %v7613_v6, %s4450_s6  ;;  %v7639_v6 = vld [vmem:[#allocation74_spill] sm:$0xff] }
 0x37a   : > { %v6242_v12 = vpop.permute.xlu1 %2336 }
 0x37b   : > { %7614 = vst [vmem:[#allocation16_spill] sm:$0xff] %v6242_v12  ;;  %v6244_v40 = vpop.permute.xlu0 %2326 }
 0x37c   : > { %7615 = vst [vmem:[#allocation58_spill] sm:$0xff] %v6244_v40  ;;  %2572 = vrot.lane.b32.xlu1 %v7616_v23, %s4450_s6 }
 0x37d   : > { %2562 = vrot.lane.b32.xlu0 %v7617_v30, %s4450_s6 }
 0x37e   : > { %v6250_v18 = vpop.permute.xlu1 %2340 }
 0x37f   : > { %7618 = vst [vmem:[#allocation13_spill] sm:$0xff] %v6250_v18  ;;  %v6252_v27 = vpop.permute.xlu0 %2330 }
 0x380   : > { %7619 = vst [vmem:[#allocation71_spill] sm:$0xff] %v6252_v27  ;;  %2576 = vrot.lane.b32.xlu1 %v7620_v33, %s4450_s6 }
 0x381   : > { %2566 = vrot.lane.b32.xlu0 %v7621_v60, %s4450_s6 }
 0x382   : > { %v6258_v5 = vpop.permute.xlu1 %2344 }
 0x383   : > { %7622 = vst [vmem:[#allocation59_spill] sm:$0xff] %v6258_v5  ;;  %v6260_v46 = vpop.permute.xlu0 %2334 }
 0x384   : > { %7623 = vst [vmem:[#allocation17_spill] sm:$0xff] %v6260_v46  ;;  %2580 = vrot.lane.b32.xlu1 %v7624_v55, %s4450_s6 }
 0x385   : > { %2570 = vrot.lane.b32.xlu0 %v7625_v8, %s4450_s6 }
 0x386   : > { %v6266_v52 = vpop.permute.xlu1 %2348 }
 0x387   : > { %7626 = vst [vmem:[#allocation28_spill] sm:$0xff] %v6266_v52  ;;  %v6268_v11 = vpop.permute.xlu0 %2338 }
 0x388   : > { %7627 = vst [vmem:[#allocation35_spill] sm:$0xff] %v6268_v11  ;;  %2584 = vrot.lane.b32.xlu1 %v7628_v9, %s4450_s6 }
 0x389   : > { %2574 = vrot.lane.b32.xlu0 %v7629_v44, %s4450_s6 }
 0x38a   : > { %v6274_v7 = vpop.permute.xlu1 %2352 }
 0x38b   : > { %7630 = vst [vmem:[#allocation45_spill] sm:$0xff] %v6274_v7  ;;  %v6276_v32 = vpop.permute.xlu0 %2342 }
 0x38c   : > { %7631 = vst [vmem:[#allocation66_spill] sm:$0xff] %v6276_v32  ;;  %2588 = vrot.lane.b32.xlu1 %v7632_v24, %s4450_s6 }
 0x38d   : > { %2578 = vrot.lane.b32.xlu0 %v7633_v39, %s4450_s6 }
 0x38e   : > { %v2417_v49 = vpop.permute.xlu1 %2416 }
 0x38f   : > { %v6282_v38 = vpop.permute.xlu0 %2346 }
 0x390   : > { %7634 = vst [vmem:[#allocation55_spill] sm:$0xff] %v6282_v38  ;;  %2592 = vrot.lane.b32.xlu1 %v7635_v22, %s4450_s6 }
 0x391   : > { %2582 = vrot.lane.b32.xlu0 %v7636_v47, %s4450_s6 }
 0x392   : > { %v2421_v28 = vpop.permute.xlu1 %2420 }
 0x393   : > { %v6288_v56 = vpop.permute.xlu0 %2350 }
 0x394   : > { %7637 = vst [vmem:[#allocation68_spill] sm:$0xff] %v6288_v56 }
 0x395   : > { %2586 = vrot.lane.b32.xlu0 %v7638_v63, %s4450_s6 }
 0x396   : > { %v2425_v45 = vpop.permute.xlu1 %2424 }
 0x397   : > { %v2415_v43 = vpop.permute.xlu0 %2414 }
 0x399   : > { %2590 = vrot.lane.b32.xlu0 %v7639_v6, %s4450_s6 }
 0x39a   : > { %v2429_v23 = vpop.permute.xlu1 %2428 }
 0x39b   : > { %v2419_v30 = vpop.permute.xlu0 %2418 }
 0x39e   : > { %v2433_v33 = vpop.permute.xlu1 %2432 }
 0x39f   : > { %v2423_v60 = vpop.permute.xlu0 %2422 }
 0x3a2   : > { %v2437_v55 = vpop.permute.xlu1 %2436 }
 0x3a3   : > { %v2427_v8 = vpop.permute.xlu0 %2426 }
 0x3a6   : > { %v2441_v9 = vpop.permute.xlu1 %2440 }
 0x3a7   : > { %v2431_v44 = vpop.permute.xlu0 %2430 }
 0x3aa   : > { %v2445_v24 = vpop.permute.xlu1 %2444 }
 0x3ab   : > { %v6294_v39 = vpop.permute.xlu0 %2434 }
 0x3ae   : > { %v6296_v22 = vpop.permute.xlu1 %2448 }
 0x3af   : > { %v6298_v47 = vpop.permute.xlu0 %2438 }
 0x3b2   : > { %v6300_v63 = vpop.permute.xlu1 %2452 }
 0x3b3   : > { %v6302_v35 = vpop.permute.xlu0 %2442 }
 0x3b6   : > { %v6304_v6 = vpop.permute.xlu1 %2456 }
 0x3b7   : > { %v6306_v56 = vpop.permute.xlu0 %2446 }
 0x3ba   : > { %v6308_v38 = vpop.permute.xlu1 %2460 }
 0x3bb   : > { %v6310_v32 = vpop.permute.xlu0 %2450 }
 0x3be   : > { %v6312_v7 = vpop.permute.xlu1 %2464 }
 0x3bf   : > { %v6314_v11 = vpop.permute.xlu0 %2454 }
 0x3c2   : > { %v6316_v52 = vpop.permute.xlu1 %2468 }
 0x3c3   : > { %v6318_v46 = vpop.permute.xlu0 %2458 }
 0x3c6   : > { %v6320_v5 = vpop.permute.xlu1 %2472 }
 0x3c7   : > { %v6322_v18 = vpop.permute.xlu0 %2462 }
 0x3ca   : > { %v2537_v12 = vpop.permute.xlu1 %2536 }
 0x3cb   : > { %v2625_v4 = vsel %vm865_vm12, %v2417_v49, %v2537_v12  ;;  %v6326_v27 = vpop.permute.xlu0 %2466  ;;  %v2504_v12 = vsel %vm5477_vm9, %v2415_v43, 0.0  ;;  %v2508_v43 = vsel %vm5561_vm15, %v2423_v60, 0.0 }
 0x3cc   : > { %2686 = vrot.lane.b32.xlu1 %v2625_v4, %s4451_s7 }
 0x3ce   : > { %v2541_v40 = vpop.permute.xlu1 %2540 }
 0x3cf   : > { %v2627_v41 = vsel %vm865_vm12, %v2421_v28, %v2541_v40  ;;  %v6331_v17 = vpop.permute.xlu0 %2470 }
 0x3d0   : > { %2690 = vrot.lane.b32.xlu1 %v2627_v41, %s4451_s7  ;;  %v2506_v41 = vsel %vm5526_vm13, %v2419_v30, 0.0 }
 0x3d2   : > { %v2545_v53 = vpop.permute.xlu1 %2544 }
 0x3d3   : > { %v2629_v3 = vsel %vm865_vm12, %v2425_v45, %v2545_v53  ;;  %v2535_v49 = vpop.permute.xlu0 %2534 }
 0x3d4   : > { %2694 = vrot.lane.b32.xlu1 %v2629_v3, %s4451_s7  ;;  %v2624_v4 = vsel %vm865_vm12, %v2504_v12, %v2535_v49  ;;  %v2510_v49 = vsel %vm5610_vm3, %v2427_v8, 0.0 }
 0x3d5   : > { %2684 = vrot.lane.b32.xlu0 %v2624_v4, %s4451_s7 }
 0x3d6   : > { %v2549_v40 = vpop.permute.xlu1 %2548 }
 0x3d7   : > { %v2631_v28 = vsel %vm865_vm12, %v2429_v23, %v2549_v40  ;;  %v2539_v50 = vpop.permute.xlu0 %2538 }
 0x3d8   : > { %2698 = vrot.lane.b32.xlu1 %v2631_v28, %s4451_s7  ;;  %v2626_v53 = vsel %vm865_vm12, %v2506_v41, %v2539_v50  ;;  %v2512_v28 = vsel %vm5645_vm5, %v2431_v44, 0.0 }
 0x3d9   : > { %2688 = vrot.lane.b32.xlu0 %v2626_v53, %s4451_s7 }
 0x3da   : > { %v2553_v3 = vpop.permute.xlu1 %2552 }
 0x3db   : > { %v2633_v45 = vsel %vm865_vm12, %v2433_v33, %v2553_v3  ;;  %v2543_v12 = vpop.permute.xlu0 %2542  ;;  %v2514_v3 = vsel %vm5707_vm7, %v6294_v39, 0.0 }
 0x3dc   : > { %2702 = vrot.lane.b32.xlu1 %v2633_v45, %s4451_s7  ;;  %v2628_v23 = vsel %vm865_vm12, %v2508_v43, %v2543_v12 }
 0x3dd   : > { %2692 = vrot.lane.b32.xlu0 %v2628_v23, %s4451_s7 }
 0x3de   : > { %v2557_v30 = vpop.permute.xlu1 %2556 }
 0x3df   : > { %v2635_v50 = vsel %vm865_vm12, %v2437_v55, %v2557_v30  ;;  %v2547_v4 = vpop.permute.xlu0 %2546 }
 0x3e0   : > { %2706 = vrot.lane.b32.xlu1 %v2635_v50, %s4451_s7  ;;  %v2630_v33 = vsel %vm865_vm12, %v2510_v49, %v2547_v4 }
 0x3e1   : > { %2696 = vrot.lane.b32.xlu0 %v2630_v33, %s4451_s7 }
 0x3e2   : > { %v2561_v60 = vpop.permute.xlu1 %2560 }
 0x3e3   : > { %v2637_v40 = vsel %vm865_vm12, %v2441_v9, %v2561_v60  ;;  %v2551_v41 = vpop.permute.xlu0 %2550 }
 0x3e4   : > { %2710 = vrot.lane.b32.xlu1 %v2637_v40, %s4451_s7  ;;  %v2632_v55 = vsel %vm865_vm12, %v2512_v28, %v2551_v41 }
 0x3e5   : > { %2700 = vrot.lane.b32.xlu0 %v2632_v55, %s4451_s7 }
 0x3e6   : > { %v2565_v8 = vpop.permute.xlu1 %2564 }
 0x3e7   : > { %v2639_v53 = vsel %vm865_vm12, %v2445_v24, %v2565_v8  ;;  %v2555_v9 = vpop.permute.xlu0 %2554  ;;  %v2516_v24 = vsel %vm5750_vm1, %v6298_v47, 0.0 }
 0x3e8   : > { %2714 = vrot.lane.b32.xlu1 %v2639_v53, %s4451_s7  ;;  %v2634_v44 = vsel %vm865_vm12, %v2514_v3, %v2555_v9 }
 0x3e9   : > { %2704 = vrot.lane.b32.xlu0 %v2634_v44, %s4451_s7 }
 0x3ea   : > { %v2569_v45 = vpop.permute.xlu1 %2568 }
 0x3eb   : > { %v2641_v43 = vsel %vm865_vm12, %v6296_v22, %v2569_v45  ;;  %v2559_v12 = vpop.permute.xlu0 %2558  ;;  %v2518_v22 = vsel %vm5719_vm8, %v6302_v35, 0.0 }
 0x3ec   : > { %2718 = vrot.lane.b32.xlu1 %v2641_v43, %s4451_s7  ;;  %v2636_v39 = vsel %vm865_vm12, %v2516_v24, %v2559_v12  ;;  %v7640_v24 = vld [vmem:[#allocation8_spill] sm:$0xff] }
 0x3ed   : > { %2708 = vrot.lane.b32.xlu0 %v2636_v39, %s4451_s7  ;;  %v2385_v12 = vadd.f32 %v6166_v31, %v7640_v24  ;;  %v2530_v39 = vsel %vm7572_vm11, %v6326_v27, 0.0 }
 0x3ee   : > { %v2573_v23 = vpop.permute.xlu1 %2572 }
 0x3ef   : > { %v2643_v30 = vsel %vm865_vm12, %v6300_v63, %v2573_v23  ;;  %v2563_v50 = vpop.permute.xlu0 %2562  ;;  %v2520_v63 = vsel %vm5498_vm10, %v6306_v56, 0.0  ;;  %v7641_v23 = vld [vmem:[#allocation5_spill] sm:$0xff] }
 0x3f0   : > { %2722 = vrot.lane.b32.xlu1 %v2643_v30, %s4451_s7  ;;  %v2638_v47 = vsel %vm865_vm12, %v2518_v22, %v2563_v50  ;;  %v2387_v30 = vadd.f32 %v7641_v23, %v6172_v10  ;;  %v7642_v22 = vld [vmem:[#allocation43_spill] sm:$0xff] }
 0x3f1   : > { %2712 = vrot.lane.b32.xlu0 %v2638_v47, %s4451_s7  ;;  %vm7643_vm2 = vnez %v7642_v22  ;;  %v7644_v47 = vld [vmem:[#allocation25_spill] sm:$0xff] }
 0x3f2   : > { %v2577_v49 = vpop.permute.xlu1 %2576  ;;  %v2532_v31 = vsel %vm7643_vm2, %v6331_v17, 0.0  ;;  %v7647_v17 = vld [vmem:[#allocation2_spill] sm:$0xff]  ;;  %v7700_v22 = vld [vmem:[#allocation125_spill] sm:$0xff] }
 0x3f3   : > { %v2645_v4 = vsel %vm865_vm12, %v6304_v6, %v2577_v49  ;;  %v2567_v33 = vpop.permute.xlu0 %2566  ;;  %v2522_v6 = vsel %vm5547_vm14, %v6310_v32, 0.0  ;;  %v2389_v49 = vadd.f32 %v6178_v21, %v7644_v47 }
 0x3f4   : > { %2726 = vrot.lane.b32.xlu1 %v2645_v4, %s4451_s7  ;;  %v2640_v35 = vsel %vm865_vm12, %v2520_v63, %v2567_v33  ;;  %v7645_v4 = vld [vmem:[#allocation3_spill] sm:$0xff]  ;;  %v7646_v63 = vld [vmem:[#allocation24_spill] sm:$0xff] }
 0x3f5   : > { %2716 = vrot.lane.b32.xlu0 %v2640_v35, %s4451_s7  ;;  %v2384_v10 = vadd.f32 %v6180_v29, %v7645_v4  ;;  %v2391_v33 = vadd.f32 %v7646_v63, %v6186_v62  ;;  %v2386_v35 = vadd.f32 %v7647_v17, %v6188_v26 }
 0x3f6   : > { %v2581_v60 = vpop.permute.xlu1 %2580 }
 0x3f7   : > { %v2647_v40 = vsel %vm865_vm12, %v6308_v38, %v2581_v60  ;;  %v2571_v28 = vpop.permute.xlu0 %2570  ;;  %v2524_v38 = vsel %vm5582_vm0, %v6314_v11, 0.0  ;;  %v7648_v60 = vld [vmem:[#allocation40_spill] sm:$0xff] }
 0x3f8   : > { %2730 = vrot.lane.b32.xlu1 %v2647_v40, %s4451_s7  ;;  %v2642_v56 = vsel %vm865_vm12, %v2522_v6, %v2571_v28  ;;  %v2393_v21 = vadd.f32 %v6194_v16, %v7648_v60  ;;  %v7649_v40 = vld [vmem:[#allocation21_spill] sm:$0xff]  ;;  %v7650_v6 = vld [vmem:[#allocation36_spill] sm:$0xff]  ;;  %v7651_v28 = vld [vmem:[#allocation19_spill] sm:$0xff] }
 0x3f9   : > { %2720 = vrot.lane.b32.xlu0 %v2642_v56, %s4451_s7  ;;  %v2388_v29 = vadd.f32 %v6196_v37, %v7649_v40  ;;  %v2395_v62 = vadd.f32 %v7650_v6, %v6202_v51  ;;  %v2390_v26 = vadd.f32 %v7651_v28, %v6204_v1  ;;  %v7652_v56 = vld [vmem:[#allocation65_spill] sm:$0xff] }
 0x3fa   : > { %v2585_v41 = vpop.permute.xlu1 %2584  ;;  %v2397_v16 = vadd.f32 %v6210_v2, %v7652_v56 }
 0x3fb   : > { %v2649_v55 = vsel %vm865_vm12, %v6312_v7, %v2585_v41  ;;  %v2575_v8 = vpop.permute.xlu0 %2574  ;;  %v2526_v7 = vsel %vm5631_vm4, %v6318_v46, 0.0  ;;  %v7653_v41 = vld [vmem:[#allocation32_spill] sm:$0xff] }
 0x3fc   : > { %2734 = vrot.lane.b32.xlu1 %v2649_v55, %s4451_s7  ;;  %v2644_v32 = vsel %vm865_vm12, %v2524_v38, %v2575_v8  ;;  %v2392_v37 = vadd.f32 %v6212_v14, %v7653_v41  ;;  %v7654_v55 = vld [vmem:[#allocation15_spill] sm:$0xff]  ;;  %v7655_v38 = vld [vmem:[#allocation50_spill] sm:$0xff] }
 0x3fd   : > { %2724 = vrot.lane.b32.xlu0 %v2644_v32, %s4451_s7  ;;  %v2399_v51 = vadd.f32 %v7655_v38, %v7654_v55  ;;  %v7656_v8 = vld [vmem:[#allocation34_spill] sm:$0xff]  ;;  %v7657_v32 = vld [vmem:[#allocation31_spill] sm:$0xff] }
 0x3fe   : > { %v2589_v53 = vpop.permute.xlu1 %2588  ;;  %v2394_v1 = vadd.f32 %v7657_v32, %v7656_v8 }
 0x3ff   : > { %v2651_v3 = vsel %vm865_vm12, %v6316_v52, %v2589_v53  ;;  %v2579_v9 = vpop.permute.xlu0 %2578  ;;  %v2528_v52 = vsel %vm5663_vm6, %v6322_v18, 0.0  ;;  %v7658_v53 = vld [vmem:[#allocation10_spill] sm:$0xff] }
 0x400   : > { %2738 = vrot.lane.b32.xlu1 %v2651_v3, %s4451_s7  ;;  %v2646_v11 = vsel %vm865_vm12, %v2526_v7, %v2579_v9  ;;  %v7659_v3 = vld [vmem:[#allocation70_spill] sm:$0xff]  ;;  %v7660_v7 = vld [vmem:[#allocation47_spill] sm:$0xff]  ;;  %v7661_v9 = vld [vmem:[#allocation44_spill] sm:$0xff] }
 0x401   : > { %2728 = vrot.lane.b32.xlu0 %v2646_v11, %s4451_s7  ;;  %v2401_v2 = vadd.f32 %v7659_v3, %v7658_v53  ;;  %v2396_v14 = vadd.f32 %v7661_v9, %v7660_v7  ;;  %v7662_v11 = vld [vmem:[#allocation54_spill] sm:$0xff] }
 0x402   : > { %v2593_v44 = vpop.permute.xlu1 %2592 }
 0x403   : > { %v2653_v45 = vsel %vm865_vm12, %v6320_v5, %v2593_v44  ;;  %v2583_v43 = vpop.permute.xlu0 %2582  ;;  %v7663_v44 = vld [vmem:[#allocation46_spill] sm:$0xff] }
 0x404   : > { %2742 = vrot.lane.b32.xlu1 %v2653_v45, %s4451_s7  ;;  %v2648_v46 = vsel %vm865_vm12, %v2528_v52, %v2583_v43  ;;  %v2398_v45 = vadd.f32 %v7663_v44, %v7662_v11  ;;  %v7664_v52 = vld [vmem:[#allocation7_spill] sm:$0xff]  ;;  %v7665_v43 = vld [vmem:[#allocation58_spill] sm:$0xff] }
 0x405   : > { %2732 = vrot.lane.b32.xlu0 %v2648_v46, %s4451_s7  ;;  %v2400_v46 = vadd.f32 %v7665_v43, %v7664_v52 }
 0x407   : > { %v2587_v5 = vpop.permute.xlu0 %2586 }
 0x408   : > { %2836 = vrot.lane.b32.xlu1 %v2385_v12, %s4449_s5  ;;  %v2650_v18 = vsel %vm865_vm12, %v2530_v39, %v2587_v5  ;;  %v7666_v12 = vld [vmem:[#allocation71_spill] sm:$0xff]  ;;  %v7667_v39 = vld [vmem:[#allocation4_spill] sm:$0xff] }
 0x409   : > { %2736 = vrot.lane.b32.xlu0 %v2650_v18, %s4451_s7  ;;  %v2402_v5 = vadd.f32 %v7667_v39, %v7666_v12 }
 0x40b   : > { %v2591_v50 = vpop.permute.xlu0 %2590 }
 0x40c   : > { %2840 = vrot.lane.b32.xlu1 %v2387_v30, %s4449_s5  ;;  %v2652_v27 = vsel %vm865_vm12, %v2532_v31, %v2591_v50 }
 0x40d   : > { %2740 = vrot.lane.b32.xlu0 %v2652_v27, %s4451_s7 }
 0x410   : > { %2844 = vrot.lane.b32.xlu1 %v2389_v49, %s4449_s5 }
 0x411   : > { %2834 = vrot.lane.b32.xlu0 %v2384_v10, %s4449_s5 }
 0x414   : > { %2848 = vrot.lane.b32.xlu1 %v2391_v33, %s4449_s5 }
 0x415   : > { %2838 = vrot.lane.b32.xlu0 %v2386_v35, %s4449_s5 }
 0x418   : > { %2852 = vrot.lane.b32.xlu1 %v2393_v21, %s4449_s5 }
 0x419   : > { %2842 = vrot.lane.b32.xlu0 %v2388_v29, %s4449_s5 }
 0x41c   : > { %2856 = vrot.lane.b32.xlu1 %v2395_v62, %s4449_s5 }
 0x41d   : > { %2846 = vrot.lane.b32.xlu0 %v2390_v26, %s4449_s5 }
 0x420   : > { %2860 = vrot.lane.b32.xlu1 %v2397_v16, %s4449_s5 }
 0x421   : > { %2850 = vrot.lane.b32.xlu0 %v2392_v37, %s4449_s5 }
 0x424   : > { %2864 = vrot.lane.b32.xlu1 %v2399_v51, %s4449_s5 }
 0x425   : > { %2854 = vrot.lane.b32.xlu0 %v2394_v1, %s4449_s5 }
 0x428   : > { %2868 = vrot.lane.b32.xlu1 %v2401_v2, %s4449_s5 }
 0x429   : > { %2858 = vrot.lane.b32.xlu0 %v2396_v14, %s4449_s5 }
 0x42d   : > { %2862 = vrot.lane.b32.xlu0 %v2398_v45, %s4449_s5 }
 0x431   : > { %2866 = vrot.lane.b32.xlu0 %v2400_v46, %s4449_s5 }
 0x435   : > { %2870 = vrot.lane.b32.xlu0 %v2402_v5, %s4449_s5 }
 0x43e   : > { %v2687_v18 = vpop.permute.xlu1 %2686 }
 0x43f   : > { %v2775_v30 = vadd.f32 %v7641_v23, %v2687_v18  ;;  %v7668_v18 = vld [vmem:[#allocation9_spill] sm:$0xff] }
 0x441   : > { %2989 = vrot.lane.b32.xlu0 %v2775_v30, %s4449_s5 }
 0x442   : > { %v2691_v31 = vpop.permute.xlu1 %2690 }
 0x443   : > { %v2777_v50 = vadd.f32 %v2691_v31, %v7644_v47 }
 0x445   : > { %2993 = vrot.lane.b32.xlu0 %v2777_v50, %s4449_s5 }
 0x446   : > { %v2695_v27 = vpop.permute.xlu1 %2694 }
 0x447   : > { %v2779_v49 = vadd.f32 %v7646_v63, %v2695_v27  ;;  %v2685_v10 = vpop.permute.xlu0 %2684 }
 0x448   : > { %v2774_v33 = vadd.f32 %v7647_v17, %v2685_v10 }
 0x449   : > { %2997 = vrot.lane.b32.xlu0 %v2779_v49, %s4449_s5  ;;  %v7669_v49 = vld [vmem:[#allocation27_spill] sm:$0xff] }
 0x44a   : > { %v2699_v35 = vpop.permute.xlu1 %2698  ;;  %2987 = vrot.lane.b32.xlu1 %v2774_v33, %s4449_s5 }
 0x44b   : > { %v2781_v21 = vadd.f32 %v2699_v35, %v7648_v60  ;;  %v2689_v29 = vpop.permute.xlu0 %2688 }
 0x44c   : > { %v2776_v62 = vadd.f32 %v2689_v29, %v7649_v40  ;;  %v7670_v29 = vld [vmem:[#allocation26_spill] sm:$0xff] }
 0x44d   : > { %3001 = vrot.lane.b32.xlu0 %v2781_v21, %s4449_s5 }
 0x44e   : > { %v2703_v26 = vpop.permute.xlu1 %2702  ;;  %2991 = vrot.lane.b32.xlu1 %v2776_v62, %s4449_s5 }
 0x44f   : > { %v2783_v16 = vadd.f32 %v7650_v6, %v2703_v26  ;;  %v2693_v37 = vpop.permute.xlu0 %2692 }
 0x450   : > { %v2778_v55 = vadd.f32 %v7651_v28, %v2693_v37 }
 0x451   : > { %3005 = vrot.lane.b32.xlu0 %v2783_v16, %s4449_s5 }
 0x452   : > { %v2707_v51 = vpop.permute.xlu1 %2706  ;;  %2995 = vrot.lane.b32.xlu1 %v2778_v55, %s4449_s5  ;;  %v7671_v55 = vld [vmem:[#allocation42_spill] sm:$0xff] }
 0x453   : > { %v2785_v8 = vadd.f32 %v2707_v51, %v7652_v56  ;;  %v2697_v1 = vpop.permute.xlu0 %2696 }
 0x454   : > { %v2780_v3 = vadd.f32 %v2697_v1, %v7653_v41  ;;  %v7672_v1 = vld [vmem:[#allocation23_spill] sm:$0xff] }
 0x455   : > { %3009 = vrot.lane.b32.xlu0 %v2785_v8, %s4449_s5 }
 0x456   : > { %v2711_v2 = vpop.permute.xlu1 %2710  ;;  %2999 = vrot.lane.b32.xlu1 %v2780_v3, %s4449_s5 }
 0x457   : > { %v2787_v9 = vadd.f32 %v7655_v38, %v2711_v2  ;;  %v2701_v14 = vpop.permute.xlu0 %2700 }
 0x458   : > { %v2782_v11 = vadd.f32 %v7657_v32, %v2701_v14 }
 0x459   : > { %3013 = vrot.lane.b32.xlu0 %v2787_v9, %s4449_s5  ;;  %v7673_v9 = vld [vmem:[#allocation41_spill] sm:$0xff] }
 0x45a   : > { %v2715_v45 = vpop.permute.xlu1 %2714  ;;  %3003 = vrot.lane.b32.xlu1 %v2782_v11, %s4449_s5 }
 0x45b   : > { %v2789_v43 = vadd.f32 %v2715_v45, %v7658_v53  ;;  %v2705_v46 = vpop.permute.xlu0 %2704  ;;  %v7674_v45 = vld [vmem:[#allocation22_spill] sm:$0xff] }
 0x45c   : > { %v2784_v12 = vadd.f32 %v2705_v46, %v7660_v7  ;;  %v7675_v46 = vld [vmem:[#allocation87_spill] sm:$0xff] }
 0x45d   : > { %3017 = vrot.lane.b32.xlu0 %v2789_v43, %s4449_s5 }
 0x45e   : > { %v2719_v5 = vpop.permute.xlu1 %2718  ;;  %3007 = vrot.lane.b32.xlu1 %v2784_v12, %s4449_s5  ;;  %v1157_v12 = vsel %vm5477_vm9, %v7675_v46, 0.0 }
 0x45f   : > { %v2791_v30 = vadd.f32 %v7668_v18, %v2719_v5  ;;  %v2709_v31 = vpop.permute.xlu0 %2708 }
 0x460   : > { %v2786_v50 = vadd.f32 %v7663_v44, %v2709_v31 }
 0x461   : > { %3021 = vrot.lane.b32.xlu0 %v2791_v30, %s4449_s5  ;;  %v7676_v30 = vld [vmem:[#allocation67_spill] sm:$0xff] }
 0x462   : > { %v2723_v27 = vpop.permute.xlu1 %2722  ;;  %3011 = vrot.lane.b32.xlu1 %v2786_v50, %s4449_s5  ;;  %v7677_v50 = vld [vmem:[#allocation89_spill] sm:$0xff] }
 0x463   : > { %v2793_v10 = vadd.f32 %v2723_v27, %v7669_v49  ;;  %v2713_v33 = vpop.permute.xlu0 %2712  ;;  %v1173_v27 = vsel %vm5498_vm10, %v7677_v50, 0.0 }
 0x464   : > { %v2788_v35 = vadd.f32 %v2713_v33, %v7664_v52  ;;  %v7678_v33 = vld [vmem:[#allocation37_spill] sm:$0xff] }
 0x465   : > { %3025 = vrot.lane.b32.xlu0 %v2793_v10, %s4449_s5 }
 0x466   : > { %v2727_v21 = vpop.permute.xlu1 %2726  ;;  %3015 = vrot.lane.b32.xlu1 %v2788_v35, %s4449_s5 }
 0x467   : > { %v2795_v62 = vadd.f32 %v7670_v29, %v2727_v21  ;;  %v2717_v26 = vpop.permute.xlu0 %2716  ;;  %v7679_v21 = vld [vmem:[#allocation83_spill] sm:$0xff] }
 0x468   : > { %v2790_v16 = vadd.f32 %v7667_v39, %v2717_v26  ;;  %v7681_v26 = vld [vmem:[#allocation80_spill] sm:$0xff] }
 0x469   : > { %3029 = vrot.lane.b32.xlu0 %v2795_v62, %s4449_s5  ;;  %v1544_v62 = vsel %vm865_vm12, %v1157_v12, %v7679_v21  ;;  %v7690_v21 = vld [vmem:[#allocation33_spill] sm:$0xff] }
 0x46a   : > { %v2731_v37 = vpop.permute.xlu1 %2730  ;;  %3019 = vrot.lane.b32.xlu1 %v2790_v16, %s4449_s5  ;;  %v1545_v16 = vsel %vm865_vm12, %v7681_v26, %v7680_v61  ;;  %v7691_v26 = vld [vmem:[#allocation97_spill] sm:$0xff] }
 0x46b   : > { %v2797_v51 = vadd.f32 %v2731_v37, %v7671_v55  ;;  %v2721_v8 = vpop.permute.xlu0 %2720  ;;  %v1577_v61 = vadd.f32 %v7641_v23, %v1545_v16 }
 0x46c   : > { %v2792_v3 = vadd.f32 %v2721_v8, %v7672_v1  ;;  %v7683_v8 = vld [vmem:[#allocation63_spill] sm:$0xff] }
 0x46d   : > { %3033 = vrot.lane.b32.xlu0 %v2797_v51, %s4449_s5  ;;  %v7682_v51 = vld [vmem:[#allocation109_spill] sm:$0xff] }
 0x46e   : > { %v2735_v2 = vpop.permute.xlu1 %2734  ;;  %3023 = vrot.lane.b32.xlu1 %v2792_v3, %s4449_s5  ;;  %v1161_v15 = vsel %vm5561_vm15, %v7682_v51, 0.0  ;;  %v7693_v51 = vld [vmem:[#allocation81_spill] sm:$0xff] }
 0x46f   : > { %v2799_v14 = vadd.f32 %v7673_v9, %v2735_v2  ;;  %v2725_v11 = vpop.permute.xlu0 %2724  ;;  %v7684_v2 = vld [vmem:[#allocation85_spill] sm:$0xff] }
 0x470   : > { %v2794_v43 = vadd.f32 %v7674_v45, %v2725_v11  ;;  %v7685_v11 = vld [vmem:[#allocation91_spill] sm:$0xff] }
 0x471   : > { %3037 = vrot.lane.b32.xlu0 %v2799_v14, %s4449_s5  ;;  %v1560_v14 = vsel %vm865_vm12, %v1173_v27, %v7684_v2 }
 0x472   : > { %v2739_v5 = vpop.permute.xlu1 %2738  ;;  %3027 = vrot.lane.b32.xlu1 %v2794_v43, %s4449_s5  ;;  %v7686_v43 = vld [vmem:[#allocation88_spill] sm:$0xff] }
 0x473   : > { %v2801_v31 = vadd.f32 %v2739_v5, %v7676_v30  ;;  %v2729_v10 = vpop.permute.xlu0 %2728  ;;  %v1559_v46 = vsel %vm865_vm12, %v7686_v43, %v7685_v11  ;;  %v6599_v5 = vadd.f32 %v7647_v17, %v1544_v62  ;;  %v1159_v62 = vsel %vm5526_vm13, %v7691_v26, 0.0  ;;  %v7694_v43 = vld [vmem:[#allocation104_spill] sm:$0xff] }
 0x474   : > { %v2796_v35 = vadd.f32 %v2729_v10, %v7678_v33  ;;  %v7689_v10 = vld [vmem:[#allocation11_spill] sm:$0xff]  ;;  %v1548_v19 = vsel %vm865_vm12, %v1161_v15, %v7694_v43 }
 0x475   : > { %3041 = vrot.lane.b32.xlu0 %v2801_v31, %s4449_s5  ;;  %v7687_v31 = vld [vmem:[#allocation112_spill] sm:$0xff] }
 0x476   : > { %v2743_v37 = vpop.permute.xlu1 %2742  ;;  %3031 = vrot.lane.b32.xlu1 %v2796_v35, %s4449_s5  ;;  %v1547_v50 = vsel %vm865_vm12, %v7688_v0, %v7687_v31  ;;  %v1165_v35 = vsel %vm5645_vm5, %v7689_v10, 0.0  ;;  %v7696_v31 = vld [vmem:[#allocation120_spill] sm:$0xff] }
 0x477   : > { %v2803_v3 = vadd.f32 %v7683_v8, %v2743_v37  ;;  %v2733_v12 = vpop.permute.xlu0 %2732  ;;  %v7692_v37 = vld [vmem:[#allocation100_spill] sm:$0xff]  ;;  %v1549_v0 = vsel %vm865_vm12, %v7697_v20, %v7696_v31  ;;  %v1579_v43 = vadd.f32 %v1547_v50, %v7644_v47  ;;  %v6654_v50 = vld [vmem:[%s7129_s2] ss:$0 sm:$0xff] }
 0x478   : > { %v2798_v27 = vadd.f32 %v7690_v21, %v2733_v12  ;;  %v1561_v2 = vsel %vm865_vm12, %v7693_v51, %v7692_v37  ;;  %v6622_v12 = vadd.f32 %v7667_v39, %v1560_v14  ;;  %v7698_v10 = vld [vmem:[#allocation64_spill] sm:$0xff]  ;;  %v7699_v51 = vld [vmem:[#allocation119_spill] sm:$0xff] }
 0x479   : > { %3045 = vrot.lane.b32.xlu0 %v2803_v3, %s4449_s5  ;;  %v7695_v3 = vld [vmem:[#allocation111_spill] sm:$0xff]  ;;  %v2403_v26 = vadd.f32 %v7668_v18, %v7698_v10  ;;  %v1163_v15 = vsel %vm5610_vm3, %v7699_v51, 0.0  ;;  %v7701_v31 = vld [vmem:[#allocation128_spill] sm:$0xff]  ;;  %v1581_v10 = vadd.f32 %v7646_v63, %v1549_v0 }
 0x47a   : > { %v2837_v11 = vpop.permute.xlu1 %2836  ;;  %v1546_v16 = vsel %vm865_vm12, %v1159_v62, %v7695_v3  ;;  %3035 = vrot.lane.b32.xlu1 %v2798_v27, %s4449_s5  ;;  %v1552_v62 = vsel %vm865_vm12, %v1165_v35, %v7700_v22  ;;  %v6642_v3 = vadd.f32 %v1559_v46, %v7658_v53  ;;  %v7703_v27 = vld [vmem:[#allocation6_spill] sm:$0xff]  ;;  %v7704_v22 = vld [vmem:[#allocation52_spill] sm:$0xff] }
 0x47b   : > { %v2927_v37 = vadd.f32 %v2837_v11, %v1577_v61  ;;  %v2737_v14 = vpop.permute.xlu0 %2736  ;;  %v1550_v61 = vsel %vm865_vm12, %v1163_v15, %v7701_v31  ;;  %v7702_v11 = vld [vmem:[#allocation129_spill] sm:$0xff]  ;;  %v1578_v51 = vadd.f32 %v1546_v16, %v7649_v40  ;;  %v6662_v15 = vadd.f32 %v7651_v28, %v1548_v19 }
 0x47c   : > { %v1551_v48 = vsel %vm865_vm12, %v7703_v27, %v7702_v11  ;;  %v2800_v35 = vadd.f32 %v2737_v14, %v7704_v22  ;;  %v6665_v31 = vadd.f32 %v7668_v18, %v1561_v2  ;;  %v7705_v11 = vld [vmem:[#allocation16_spill] sm:$0xff]  ;;  %v7707_v14 = vld [vmem:[#allocation117_spill] sm:$0xff]  ;;  %v6676_v54 = vadd.f32 %v1550_v61, %v7653_v41  ;;  %v7711_v61 = vld [vmem:[#allocation143_spill] sm:$0xff] }
 0x47d   : > { %v3252_v20 = vadd.f32 %v6654_v50, %v2927_v37  ;;  %2872 = vrot.lane.b32.xlu0 %v2403_v26, %s4449_s5  ;;  %v2405_v27 = vadd.f32 %v7705_v11, %v7669_v49  ;;  %v7706_v26 = vld [vmem:[#allocation135_spill] sm:$0xff]  ;;  %v1583_v19 = vadd.f32 %v1551_v48, %v7648_v60  ;;  %v6679_v2 = vadd.f32 %v7657_v32, %v1552_v62  ;;  %v7708_v11 = vld [vmem:[#allocation138_spill] sm:$0xff] }
 0x47e   : > { %v2841_v46 = vpop.permute.xlu1 %2840  ;;  %3039 = vrot.lane.b32.xlu1 %v2800_v35, %s4449_s5  ;;  %v1553_v0 = vsel %vm865_vm12, %v7707_v14, %v7706_v26  ;;  %v7710_v26 = vld [vmem:[#allocation134_spill] sm:$0xff]  ;;  %v7712_v14 = vld [vmem:[#allocation132_spill] sm:$0xff] }
 0x47f   : > { %vm3316_vm9 = vcmp.ge.f32.partialorder %v3252_v20, 0.0  ;;  %v3380_v37 = vmul.f32 0.2, %v3252_v20  ;;  %v2929_v42 = vadd.f32 %v2841_v46, %v1579_v43  ;;  %v2741_v16 = vpop.permute.xlu0 %2740  ;;  %v1171_v43 = vsel %vm5719_vm8, %v7708_v11, 0.0 }
 0x480   : > { %v2802_v8 = vadd.f32 %v7709_v34, %v2741_v16  ;;  %v1167_v48 = vsel %vm5707_vm7, %v7710_v26, 0.0  ;;  %v1557_v62 = vsel %vm865_vm12, %v7712_v14, %v7711_v61  ;;  %v1585_v26 = vadd.f32 %v7650_v6, %v1553_v0  ;;  %v7715_v34 = vld [vmem:[#allocation90_spill] sm:$0xff]  ;;  %v7716_v14 = vld [vmem:[#allocation139_spill] sm:$0xff] }
 0x481   : > { %v3444_v46 = vsel %vm3316_vm9, %v3252_v20, %v3380_v37  ;;  %v3256_v35 = vadd.f32 %v6654_v50, %v2929_v42  ;;  %2876 = vrot.lane.b32.xlu0 %v2405_v27, %s4449_s5  ;;  %v7714_v42 = vld [vmem:[#allocation13_spill] sm:$0xff]  ;;  %v6704_v61 = vsel %vm865_vm12, %v1171_v43, %v7715_v34 }
 0x482   : > { %v4040_v20 = vmul.f32 -1.442695, %v3444_v46  ;;  %v2845_v37 = vpop.permute.xlu1 %2844  ;;  %v2407_v16 = vadd.f32 %v7670_v29, %v7714_v42  ;;  %3043 = vrot.lane.b32.xlu1 %v2802_v8, %s4449_s5  ;;  %v1556_v8 = vsel %vm865_vm12, %v1169_v57, %v7716_v14  ;;  %v6719_v42 = vadd.f32 %v7655_v38, %v1557_v62  ;;  %v7720_v57 = vld [vmem:[#allocation147_spill] sm:$0xff]  ;;  %v7721_v14 = vld [vmem:[#allocation17_spill] sm:$0xff] }
 0x483   : > { %vm3320_vm10 = vcmp.ge.f32.partialorder %v3256_v35, 0.0  ;;  %v3384_v27 = vmul.f32 0.2, %v3256_v35  ;;  %v2931_v11 = vadd.f32 %v2845_v37, %v1581_v10  ;;  %v2835_v59 = vpop.permute.xlu0 %2834  ;;  %v7717_v10 = vld [vmem:[#allocation149_spill] sm:$0xff]  ;;  %v7719_v37 = vld [vmem:[#allocation59_spill] sm:$0xff]  ;;  %v6731_v62 = vadd.f32 %v7663_v44, %v1556_v8 }
 0x484   : > { %4187 = vpow2.f32 %v4040_v20  ;;  %v2926_v46 = vadd.f32 %v2835_v59, %v6599_v5  ;;  %v7718_v20 = vld [vmem:[#allocation140_spill] sm:$0xff]  ;;  %v2409_v34 = vadd.f32 %v7719_v37, %v7671_v55  ;;  %v6726_v59 = vsel %vm865_vm12, %v1167_v48, %v7720_v57 }
 0x485   : > { %v3448_v36 = vsel %vm3320_vm10, %v3256_v35, %v3384_v27  ;;  %v3260_v58 = vadd.f32 %v6654_v50, %v2931_v11  ;;  %2880 = vrot.lane.b32.xlu0 %v2407_v16, %s4449_s5  ;;  %v1555_v0 = vsel %vm865_vm12, %v7718_v20, %v7717_v10  ;;  %v4452_v11 = vmov 0.0   ;;  %v7722_v37 = vld [vmem:[#allocation28_spill] sm:$0xff] }
 0x486   : > { %v4044_v43 = vmul.f32 -1.442695, %v3448_v36  ;;  %v2849_v35 = vpop.permute.xlu1 %2848  ;;  %v3251_v16 = vadd.f32 %v6654_v50, %v2926_v46  ;;  %3047 = vrot.lane.b32.xlu1 %v4452_v11, %s4449_s5  ;;  %v2404_v36 = vadd.f32 %v7721_v14, %v7672_v1  ;;  %v1587_v14 = vadd.f32 %v1555_v0, %v7652_v56 }
 0x487   : > { %vm3324_vm1 = vcmp.ge.f32.partialorder %v3260_v58, 0.0  ;;  %v3388_v5 = vmul.f32 0.2, %v3260_v58  ;;  %v2933_v27 = vadd.f32 %v2849_v35, %v1583_v19  ;;  %v2839_v10 = vpop.permute.xlu0 %2838  ;;  %v2411_v35 = vadd.f32 %v7673_v9, %v7722_v37 }
 0x488   : > { %4189 = vpow2.f32 %v4044_v43  ;;  %vm3315_vm13 = vcmp.ge.f32.partialorder %v3251_v16, 0.0  ;;  %v3379_v46 = vmul.f32 0.2, %v3251_v16  ;;  %v2928_v11 = vadd.f32 %v2839_v10, %v1578_v51 }
 0x489   : > { %v3452_v20 = vsel %vm3324_vm1, %v3260_v58, %v3388_v5  ;;  %v3264_v19 = vadd.f32 %v6654_v50, %v2933_v27  ;;  %2884 = vrot.lane.b32.xlu0 %v2409_v34, %s4449_s5  ;;  %v7723_v58 = vld [vmem:[#allocation35_spill] sm:$0xff] }
 0x48a   : > { %v4048_v48 = vmul.f32 -1.442695, %v3452_v20  ;;  %v2853_v57 = vpop.permute.xlu1 %2852  ;;  %v3443_v43 = vsel %vm3315_vm13, %v3251_v16, %v3379_v46  ;;  %2874 = vrot.lane.b32.xlu1 %v2404_v36, %s4449_s5  ;;  %v2406_v5 = vadd.f32 %v7674_v45, %v7723_v58  ;;  %v3255_v34 = vadd.f32 %v6654_v50, %v2928_v11  ;;  %v7724_v20 = vld [vmem:[#allocation45_spill] sm:$0xff] }
 0x48b   : > { %vm3328_vm15 = vcmp.ge.f32.partialorder %v3264_v19, 0.0  ;;  %v3392_v55 = vmul.f32 0.2, %v3264_v19  ;;  %v2935_v8 = vadd.f32 %v2853_v57, %v1585_v26  ;;  %v4039_v27 = vmul.f32 -1.442695, %v3443_v43  ;;  %v2843_v39 = vpop.permute.xlu0 %2842 }
 0x48c   : > { %4191 = vpow2.f32 %v4048_v48  ;;  %v2413_v51 = vadd.f32 %v7724_v20, %v7676_v30  ;;  %v2930_v16 = vadd.f32 %v2843_v39, %v6662_v15  ;;  %vm3319_vm3 = vcmp.ge.f32.partialorder %v3255_v34, 0.0 }
 0x48d   : > { %v3456_v10 = vsel %vm3328_vm15, %v3264_v19, %v3392_v55  ;;  %v3268_v0 = vadd.f32 %v6654_v50, %v2935_v8  ;;  %2888 = vrot.lane.b32.xlu0 %v2411_v35, %s4449_s5  ;;  %4193 = vpow2.f32 %v4039_v27  ;;  %v3383_v46 = vmul.f32 0.2, %v3255_v34  ;;  %v7725_v55 = vld [vmem:[#allocation66_spill] sm:$0xff] }
 0x48e   : > { %v4188_v26 = vpop.eup %4187  ;;  %v4052_v36 = vmul.f32 -1.442695, %v3456_v10  ;;  %v2857_v37 = vpop.permute.xlu1 %2856  ;;  %v3259_v57 = vadd.f32 %v6654_v50, %v2930_v16  ;;  %2878 = vrot.lane.b32.xlu1 %v2406_v5, %s4449_s5  ;;  %v2408_v19 = vadd.f32 %v7725_v55, %v7678_v33  ;;  %v7727_v55 = vld [vmem:[#allocation68_spill] sm:$0xff]  ;;  %vm7728_vm13 = vcmask 130048  }
 0x48f   : > { %v3700_v48 = vadd.f32 1.0, %v4188_v26  ;;  %vm3332_vm5 = vcmp.ge.f32.partialorder %v3268_v0, 0.0  ;;  %v3396_v11 = vmul.f32 0.2, %v3268_v0  ;;  %v3447_v39 = vsel %vm3319_vm3, %v3255_v34, %v3383_v46  ;;  %v2847_v35 = vpop.permute.xlu0 %2846  ;;  %v7726_v26 = vld [vmem:[#allocation55_spill] sm:$0xff]  ;;  %vm7730_vm3 = vmmov %vm7728_vm13 }
 0x490   : > { %4195 = vpow2.f32 %v4052_v36  ;;  %v2937_v15 = vadd.f32 %v2857_v37, %v1587_v14  ;;  %v4043_v43 = vmul.f32 -1.442695, %v3447_v39  ;;  %vm3323_vm7 = vcmp.ge.f32.partialorder %v3259_v57, 0.0 }
 0x491   : > { %4197 = vrcp.f32 %v3700_v48  ;;  %v3460_v8 = vsel %vm3332_vm5, %v3268_v0, %v3396_v11  ;;  %2892 = vrot.lane.b32.xlu0 %v2413_v51, %s4449_s5  ;;  %v3387_v20 = vmul.f32 0.2, %v3259_v57  ;;  %v2932_v5 = vadd.f32 %v2847_v35, %v6676_v54 }
 0x492   : > { %v4190_v58 = vpop.eup %4189  ;;  %v4056_v27 = vmul.f32 -1.442695, %v3460_v8  ;;  %v3272_v10 = vadd.f32 %v6654_v50, %v2937_v15  ;;  %v2861_v16 = vpop.permute.xlu1 %2860  ;;  %v2410_v36 = vadd.f32 %v7690_v21, %v7726_v26  ;;  %4199 = vpow2.f32 %v4043_v43  ;;  %2882 = vrot.lane.b32.xlu1 %v2408_v19, %s4449_s5 }
 0x493   : > { %v3704_v34 = vadd.f32 1.0, %v4190_v58  ;;  %v2939_v14 = vadd.f32 %v2861_v16, %v6719_v42  ;;  %v3451_v0 = vsel %vm3323_vm7, %v3259_v57, %v3387_v20  ;;  %v2851_v46 = vpop.permute.xlu0 %2850  ;;  %v3263_v48 = vadd.f32 %v6654_v50, %v2932_v5 }
 0x494   : > { %4201 = vpow2.f32 %v4056_v27  ;;  %vm3336_vm8 = vcmp.ge.f32.partialorder %v3272_v10, 0.0  ;;  %v3400_v51 = vmul.f32 0.2, %v3272_v10  ;;  %v4047_v37 = vmul.f32 -1.442695, %v3451_v0 }
 0x495   : > { %4203 = vrcp.f32 %v3704_v34  ;;  %v3276_v54 = vadd.f32 %v6654_v50, %v2939_v14  ;;  %v2412_v39 = vadd.f32 %v7727_v55, %v7704_v22  ;;  %v2934_v42 = vadd.f32 %v2851_v46, %v6679_v2 }
 0x496   : > { %v4192_v11 = vpop.eup %4191  ;;  %v3464_v15 = vsel %vm3336_vm8, %v3272_v10, %v3400_v51  ;;  %v2865_v35 = vpop.permute.xlu1 %2864  ;;  %v1586_v57 = vadd.f32 %v6726_v59, %v7660_v7  ;;  %4205 = vpow2.f32 %v4047_v37  ;;  %vm3327_vm9 = vcmp.ge.f32.partialorder %v3263_v48, 0.0  ;;  %2886 = vrot.lane.b32.xlu1 %v2410_v36, %s4449_s5  ;;  %vm7732_vm8 = vmmov %vm7730_vm3 }
 0x497   : > { %v3708_v19 = vadd.f32 1.0, %v4192_v11  ;;  %v4060_v43 = vmul.f32 -1.442695, %v3464_v15  ;;  %v4194_v8 = vpop.eup %4193  ;;  %v3391_v58 = vmul.f32 0.2, %v3263_v48  ;;  %vm3340_vm10 = vcmp.ge.f32.partialorder %v3276_v54, 0.0  ;;  %v2855_v5 = vpop.permute.xlu0 %2854 }
 0x498   : > { %v3404_v27 = vmul.f32 0.2, %v3276_v54  ;;  %v3267_v20 = vadd.f32 %v6654_v50, %v2934_v42  ;;  %v3699_v2 = vadd.f32 1.0, %v4194_v8  ;;  %v2941_v10 = vadd.f32 %v2865_v35, %v6642_v3  ;;  %v7729_v15 = vld [vmem:[#allocation99_spill] sm:$0xff] }
 0x499   : > { %4207 = vrcp.f32 %v3708_v19  ;;  %v2936_v16 = vadd.f32 %v2855_v5, %v1586_v57  ;;  %v3455_v26 = vsel %vm3327_vm9, %v3263_v48, %v3391_v58  ;;  %v1175_v42 = vsel %vm5547_vm14, %v7729_v15, 0.0  ;;  %vm7733_vm9 = vmmov %vm7730_vm3 }
 0x49a   : > { %v4196_v59 = vpop.eup %4195  ;;  %4209 = vpow2.f32 %v4060_v43  ;;  %v3468_v34 = vsel %vm3340_vm10, %v3276_v54, %v3404_v27  ;;  %vm3331_vm1 = vcmp.ge.f32.partialorder %v3267_v20, 0.0  ;;  %v2869_v14 = vpop.permute.xlu1 %2868  ;;  %v4051_v51 = vmul.f32 -1.442695, %v3455_v26  ;;  %2890 = vrot.lane.b32.xlu1 %v2412_v39, %s4449_s5 }
 0x49b   : > { %v4198_v36 = vpop.eup %4197  ;;  %4211 = vrcp.f32 %v3699_v2  ;;  %v3712_v0 = vadd.f32 1.0, %v4196_v59  ;;  %v4064_v46 = vmul.f32 -1.442695, %v3468_v34  ;;  %v3395_v37 = vmul.f32 0.2, %v3267_v20  ;;  %v2859_v48 = vpop.permute.xlu0 %2858 }
 0x49c   : > { %3893 = vst.msk [vmem:[%s5182_s29 + $0x28] sm:$0xff] %vm7728_vm13, %v4198_v36  ;;  %v3280_v11 = vadd.f32 %v6654_v50, %v2941_v10  ;;  %v3271_v3 = vadd.f32 %v6654_v50, %v2936_v16  ;;  %v2943_v55 = vadd.f32 %v2869_v14, %v6665_v31  ;;  %v4200_v54 = vpop.eup %4199  ;;  %v2938_v35 = vadd.f32 %v2859_v48, %v6731_v62 }
 0x49d   : > { %4213 = vrcp.f32 %v3712_v0  ;;  %v1590_v39 = vadd.f32 %v6704_v61, %v7664_v52  ;;  %v3703_v19 = vadd.f32 1.0, %v4200_v54  ;;  %v3459_v43 = vsel %vm3331_vm1, %v3267_v20, %v3395_v37  ;;  %vm7734_vm1 = vmmov %vm7730_vm3 }
 0x49e   : > { %v4202_v57 = vpop.eup %4201  ;;  %4215 = vpow2.f32 %v4051_v51  ;;  %vm3344_vm15 = vcmp.ge.f32.partialorder %v3280_v11, 0.0  ;;  %v4055_v58 = vmul.f32 -1.442695, %v3459_v43  ;;  %v3408_v27 = vmul.f32 0.2, %v3280_v11  ;;  %v7731_v51 = vld [vmem:[#allocation113_spill] sm:$0xff] }
 0x49f   : > { %v4204_v31 = vpop.eup %4203  ;;  %v3716_v8 = vadd.f32 1.0, %v4202_v57  ;;  %4217 = vpow2.f32 %v4064_v46  ;;  %vm3335_vm14 = vcmp.ge.f32.partialorder %v3271_v3, 0.0  ;;  %v3399_v13 = vmul.f32 0.2, %v3271_v3  ;;  %v2863_v5 = vpop.permute.xlu0 %2862 }
 0x4a0   : > { %3897 = vst.msk [vmem:[%s5182_s29 + $0x48] sm:$0xff] %vm7730_vm3, %v4204_v31  ;;  %4219 = vrcp.f32 %v3703_v19  ;;  %v3284_v62 = vadd.f32 %v6654_v50, %v2943_v55  ;;  %v4206_v61 = vpop.eup %4205  ;;  %v3472_v2 = vsel %vm3344_vm15, %v3280_v11, %v3408_v27  ;;  %v3275_v20 = vadd.f32 %v6654_v50, %v2938_v35  ;;  %vm7735_vm15 = vmmov %vm7734_vm1 }
 0x4a1   : > { %4221 = vrcp.f32 %v3716_v8  ;;  %v2940_v10 = vadd.f32 %v2863_v5, %v1590_v39  ;;  %v3707_v16 = vadd.f32 1.0, %v4206_v61  ;;  %v4068_v59 = vmul.f32 -1.442695, %v3472_v2  ;;  %vm7736_vm3 = vmmov %vm7734_vm1 }
 0x4a2   : > { %4223 = vpow2.f32 %v4055_v58  ;;  %v3463_v26 = vsel %vm3335_vm14, %v3271_v3, %v3399_v13  ;;  %vm3348_vm5 = vcmp.ge.f32.partialorder %v3284_v62, 0.0  ;;  %v3412_v36 = vmul.f32 0.2, %v3284_v62 }
 0x4a3   : > { %v4208_v34 = vpop.eup %4207  ;;  %v4059_v14 = vmul.f32 -1.442695, %v3463_v26  ;;  %vm3339_vm7 = vcmp.ge.f32.partialorder %v3275_v20, 0.0  ;;  %v1562_v46 = vsel %vm865_vm12, %v1175_v42, %v7731_v51  ;;  %4225 = vrcp.f32 %v3707_v16  ;;  %v2867_v55 = vpop.permute.xlu0 %2866 }
 0x4a4   : > { %v4210_v0 = vpop.eup %4209  ;;  %3901 = vst.msk [vmem:[%s5182_s29 + $0x68] sm:$0xff] %vm7732_vm8, %v4208_v34  ;;  %v3403_v37 = vmul.f32 0.2, %v3275_v20  ;;  %v3279_v11 = vadd.f32 %v6654_v50, %v2940_v10  ;;  %4227 = vpow2.f32 %v4068_v59  ;;  %v3476_v54 = vsel %vm3348_vm5, %v3284_v62, %v3412_v36  ;;  %vm7737_vm5 = vmmov %vm7734_vm1 }
 0x4a5   : > { %v4212_v48 = vpop.eup %4211  ;;  %v3720_v3 = vadd.f32 1.0, %v4210_v0  ;;  %v2942_v15 = vadd.f32 %v2867_v55, %v6622_v12  ;;  %4229 = vpow2.f32 %v4059_v14  ;;  %v4072_v35 = vmul.f32 -1.442695, %v3476_v54  ;;  %vm7741_vm8 = vmmov %vm7734_vm1 }
 0x4a6   : > { %3892 = vst.msk [vmem:[%s5182_s29 + $0x20] sm:$0xff] %vm7733_vm9, %v4212_v48  ;;  %v3467_v42 = vsel %vm3339_vm7, %v3275_v20, %v3403_v37  ;;  %vm3343_vm10 = vcmp.ge.f32.partialorder %v3279_v11, 0.0  ;;  %v3407_v19 = vmul.f32 0.2, %v3279_v11  ;;  %v1594_v12 = vadd.f32 %v1562_v46, %v7672_v1  ;;  %vm7739_vm7 = vmmov %vm7734_vm1 }
 0x4a7   : > { %v4214_v39 = vpop.eup %4213  ;;  %4231 = vrcp.f32 %v3720_v3  ;;  %v4063_v57 = vmul.f32 -1.442695, %v3467_v42  ;;  %v3283_v43 = vadd.f32 %v6654_v50, %v2942_v15  ;;  %v2871_v8 = vpop.permute.xlu0 %2870  ;;  %v7738_v15 = vld [vmem:[#allocation61_spill] sm:$0xff]  ;;  %vm7742_vm9 = vmmov %vm7734_vm1 }
 0x4a8   : > { %v4216_v31 = vpop.eup %4215  ;;  %3905 = vst.msk [vmem:[%s5182_s29 + $0x88] sm:$0xff] %vm7734_vm1, %v4214_v39  ;;  %4233 = vpow2.f32 %v4072_v35  ;;  %v3471_v13 = vsel %vm3343_vm10, %v3279_v11, %v3407_v19  ;;  %v2944_v20 = vadd.f32 %v2871_v8, %v1594_v12  ;;  %v1992_v35 = vadd.f32 %v7738_v15, %v7640_v24  ;;  %v7740_v8 = vld [vmem:[#allocation153_spill] sm:$0xff]  ;;  %vm7744_vm10 = vmmov %vm7734_vm1  ;;  %v7751_v15 = vld [vmem:[#allocation164_spill] sm:$0xff] }
 0x4a9   : > { %v4218_v58 = vpop.eup %4217  ;;  %v3711_v27 = vadd.f32 1.0, %v4216_v31  ;;  %4235 = vpow2.f32 %v4063_v57  ;;  %vm3347_vm13 = vcmp.ge.f32.partialorder %v3283_v43, 0.0  ;;  %v4067_v61 = vmul.f32 -1.442695, %v3471_v13 }
 0x4aa   : > { %v4220_v62 = vpop.eup %4219  ;;  %v3724_v5 = vadd.f32 1.0, %v4218_v58  ;;  %v3411_v2 = vmul.f32 0.2, %v3283_v43  ;;  %v3287_v26 = vadd.f32 %v6654_v50, %v2944_v20  ;;  %v1994_v58 = vadd.f32 %v7641_v23, %v7740_v8 }
 0x4ab   : > { %v4222_v10 = vpop.eup %4221  ;;  %3896 = vst.msk [vmem:[%s5182_s29 + $0x40] sm:$0xff] %vm7735_vm15, %v4220_v62  ;;  %4237 = vrcp.f32 %v3711_v27  ;;  %vm7749_vm15 = vmmov %vm7734_vm1 }
 0x4ac   : > { %v4224_v16 = vpop.eup %4223  ;;  %3909 = vst.msk [vmem:[%s5182_s29 + $0xa8] sm:$0xff] %vm7736_vm3, %v4222_v10  ;;  %4239 = vrcp.f32 %v3724_v5  ;;  %v3475_v59 = vsel %vm3347_vm13, %v3283_v43, %v3411_v2  ;;  %vm3351_vm14 = vcmp.ge.f32.partialorder %v3287_v26, 0.0  ;;  %v3415_v0 = vmul.f32 0.2, %v3287_v26  ;;  %v7743_v2 = vld [vmem:[#allocation157_spill] sm:$0xff]  ;;  %vm7747_vm13 = vmmov %vm7734_vm1 }
 0x4ad   : > { %v3715_v34 = vadd.f32 1.0, %v4224_v16  ;;  %4241 = vpow2.f32 %v4067_v61  ;;  %v4071_v14 = vmul.f32 -1.442695, %v3475_v59  ;;  %v4226_v36 = vpop.eup %4225  ;;  %v1996_v20 = vadd.f32 %v7743_v2, %v7644_v47  ;;  %v7745_v59 = vld [vmem:[#allocation75_spill] sm:$0xff]  ;;  %vm7750_vm3 = vmmov %vm7734_vm1 }
 0x4ae   : > { %v4228_v51 = vpop.eup %4227  ;;  %3900 = vst.msk [vmem:[%s5182_s29 + $0x60] sm:$0xff] %vm7737_vm5, %v4226_v36  ;;  %v3479_v11 = vsel %vm3351_vm14, %v3287_v26, %v3415_v0  ;;  %v1991_v26 = vadd.f32 %v7745_v59, %v7645_v4  ;;  %v7746_v0 = vld [vmem:[#allocation160_spill] sm:$0xff]  ;;  %vm7753_vm14 = vmmov %vm7734_vm1  ;;  %v7760_v59 = vld [vmem:[#allocation170_spill] sm:$0xff] }
 0x4af   : > { %4243 = vrcp.f32 %v3715_v34  ;;  %v4230_v46 = vpop.eup %4229  ;;  %v3728_v37 = vadd.f32 1.0, %v4228_v51  ;;  %v4075_v3 = vmul.f32 -1.442695, %v3479_v11  ;;  %v1998_v51 = vadd.f32 %v7646_v63, %v7746_v0  ;;  %vm7756_vm5 = vmmov %vm7734_vm1  ;;  %v7762_v0 = vld [vmem:[#allocation151_spill] sm:$0xff] }
 0x4b0   : > { %4245 = vpow2.f32 %v4071_v14  ;;  %v3719_v48 = vadd.f32 1.0, %v4230_v46 }
 0x4b1   : > { %v4232_v55 = vpop.eup %4231  ;;  %4247 = vrcp.f32 %v3728_v37 }
 0x4b2   : > { %v4234_v54 = vpop.eup %4233  ;;  %3913 = vst.msk [vmem:[%s5182_s29 + $0xc8] sm:$0xff] %vm7739_vm7, %v4232_v55  ;;  %4249 = vrcp.f32 %v3719_v48  ;;  %v7748_v48 = vld [vmem:[#allocation18_spill] sm:$0xff]  ;;  %vm7759_vm7 = vmmov %vm7734_vm1 }
 0x4b3   : > { %v4236_v42 = vpop.eup %4235  ;;  %v3732_v39 = vadd.f32 1.0, %v4234_v54  ;;  %v2990_v57 = vpop.permute.xlu0 %2989  ;;  %4251 = vpow2.f32 %v4075_v3  ;;  %v1993_v3 = vadd.f32 %v7647_v17, %v7748_v48  ;;  %v7752_v17 = vld [vmem:[#allocation154_spill] sm:$0xff]  ;;  %v7764_v48 = vld [vmem:[#allocation155_spill] sm:$0xff] }
 0x4b4   : > { %v3723_v19 = vadd.f32 1.0, %v4236_v42  ;;  %v3081_v43 = vadd.f32 %v2990_v57, %v1992_v35  ;;  %v2000_v35 = vadd.f32 %v7751_v15, %v7648_v60 }
 0x4b5   : > { %v4238_v31 = vpop.eup %4237  ;;  %4253 = vrcp.f32 %v3732_v39 }
 0x4b6   : > { %v4240_v12 = vpop.eup %4239  ;;  %3904 = vst.msk [vmem:[%s5182_s29 + $0x80] sm:$0xff] %vm7741_vm8, %v4238_v31  ;;  %4255 = vrcp.f32 %v3723_v19  ;;  %3116 = vrot.lane.b32.xlu0 %v3081_v43, %s4451_s7  ;;  %v1995_v19 = vadd.f32 %v7752_v17, %v7649_v40 }
 0x4b7   : > { %v4242_v24 = vpop.eup %4241  ;;  %3917 = vst.msk [vmem:[%s5182_s29 + $0xe8] sm:$0xff] %vm7742_vm9, %v4240_v12  ;;  %v2994_v27 = vpop.permute.xlu0 %2993  ;;  %v7754_v12 = vld [vmem:[#allocation167_spill] sm:$0xff] }
 0x4b8   : > { %v3727_v13 = vadd.f32 1.0, %v4242_v24  ;;  %v3083_v62 = vadd.f32 %v2994_v27, %v1994_v58  ;;  %v2002_v8 = vadd.f32 %v7650_v6, %v7754_v12  ;;  %v7755_v27 = vld [vmem:[#allocation158_spill] sm:$0xff] }
 0x4b9   : > { %v4244_v5 = vpop.eup %4243 }
 0x4ba   : > { %v4246_v61 = vpop.eup %4245  ;;  %3908 = vst.msk [vmem:[%s5182_s29 + $0xa0] sm:$0xff] %vm7744_vm10, %v4244_v5  ;;  %4257 = vrcp.f32 %v3727_v13  ;;  %3124 = vrot.lane.b32.xlu0 %v3083_v62, %s4451_s7  ;;  %v1997_v13 = vadd.f32 %v7651_v28, %v7755_v27  ;;  %v7757_v5 = vld [vmem:[#allocation174_spill] sm:$0xff] }
 0x4bb   : > { %v3731_v23 = vadd.f32 1.0, %v4246_v61  ;;  %v2998_v10 = vpop.permute.xlu0 %2997  ;;  %v4248_v16 = vpop.eup %4247  ;;  %v2004_v61 = vadd.f32 %v7757_v5, %v7652_v56 }
 0x4bc   : > { %v3085_v34 = vadd.f32 %v2998_v10, %v1996_v20  ;;  %v4250_v14 = vpop.eup %4249  ;;  %3921 = vst.msk [vmem:[%s5182_s29 + $0x108] sm:$0xff] %vm7734_vm1, %v4248_v16  ;;  %v2988_v36 = vpop.permute.xlu1 %2987 }
 0x4bd   : > { %4259 = vrcp.f32 %v3731_v23  ;;  %v4252_v47 = vpop.eup %4251  ;;  %3912 = vst.msk [vmem:[%s5182_s29 + $0xc0] sm:$0xff] %vm7747_vm13, %v4250_v14  ;;  %v3080_v46 = vadd.f32 %v2988_v36, %v1991_v26  ;;  %v7758_v23 = vld [vmem:[#allocation163_spill] sm:$0xff]  ;;  %v2006_v26 = vadd.f32 %v7655_v38, %v7760_v59  ;;  %v7761_v14 = vld [vmem:[#allocation168_spill] sm:$0xff]  ;;  %v7763_v38 = vld [vmem:[#allocation173_spill] sm:$0xff] }
 0x4be   : > { %3132 = vrot.lane.b32.xlu0 %v3085_v34, %s4451_s7  ;;  %v3735_v11 = vadd.f32 1.0, %v4252_v47  ;;  %v1999_v10 = vadd.f32 %v7758_v23, %v7653_v41  ;;  %v2001_v36 = vadd.f32 %v7657_v32, %v7761_v14  ;;  %v2010_v32 = vadd.f32 %v7668_v18, %v7764_v48  ;;  %v7767_v18 = vld [vmem:[#allocation175_spill] sm:$0xff]  ;;  %vm7811_vm13 = vmmov %vm7750_vm3 }
 0x4bf   : > { %v4254_v37 = vpop.eup %4253  ;;  %v3002_v4 = vpop.permute.xlu0 %3001  ;;  %3114 = vrot.lane.b32.xlu1 %v3080_v46, %s4451_s7  ;;  %v2007_v17 = vadd.f32 %v7767_v18, %v7664_v52  ;;  %v7772_v52 = vld [vmem:[#allocation165_spill] sm:$0xff] }
 0x4c0   : > { %v4256_v55 = vpop.eup %4255  ;;  %3925 = vst.msk [vmem:[%s5182_s29 + $0x128] sm:$0xff] %vm7749_vm15, %v4254_v37  ;;  %v3087_v54 = vadd.f32 %v3002_v4, %v1998_v51  ;;  %4261 = vrcp.f32 %v3735_v11  ;;  %v2992_v63 = vpop.permute.xlu1 %2991  ;;  %v2008_v51 = vadd.f32 %v7762_v0, %v7658_v53  ;;  %v2003_v11 = vadd.f32 %v7763_v38, %v7660_v7  ;;  %v7766_v7 = vld [vmem:[#allocation159_spill] sm:$0xff]  ;;  %v7778_v0 = vld [vmem:[#allocation108_spill] sm:$0xff] }
 0x4c1   : > { %3916 = vst.msk [vmem:[%s5182_s29 + $0xe0] sm:$0xff] %vm7750_vm3, %v4256_v55  ;;  %v3082_v42 = vadd.f32 %v2992_v63, %v1993_v3  ;;  %v7765_v63 = vld [vmem:[#allocation178_spill] sm:$0xff] }
 0x4c2   : > { %3140 = vrot.lane.b32.xlu0 %v3087_v54, %s4451_s7  ;;  %v2005_v53 = vadd.f32 %v7663_v44, %v7765_v63 }
 0x4c3   : > { %v3006_v39 = vpop.permute.xlu0 %3005  ;;  %3122 = vrot.lane.b32.xlu1 %v3082_v42, %s4451_s7  ;;  %v2012_v42 = vadd.f32 %v7766_v7, %v7669_v49 }
 0x4c4   : > { %v4258_v57 = vpop.eup %4257  ;;  %v3089_v43 = vadd.f32 %v3006_v39, %v2000_v35  ;;  %v2996_v31 = vpop.permute.xlu1 %2995 }
 0x4c5   : > { %3920 = vst.msk [vmem:[%s5182_s29 + $0x100] sm:$0xff] %vm7753_vm14, %v4258_v57  ;;  %v3084_v60 = vadd.f32 %v2996_v31, %v1995_v19  ;;  %v7768_v31 = vld [vmem:[#allocation162_spill] sm:$0xff]  ;;  %vm7812_vm14 = vmmov %vm7750_vm3 }
 0x4c6   : > { %3148 = vrot.lane.b32.xlu0 %v3089_v43, %s4451_s7  ;;  %v2014_v44 = vadd.f32 %v7670_v29, %v7768_v31 }
 0x4c7   : > { %v4260_v58 = vpop.eup %4259  ;;  %v3010_v24 = vpop.permute.xlu0 %3009  ;;  %3130 = vrot.lane.b32.xlu1 %v3084_v60, %s4451_s7  ;;  %v7769_v60 = vld [vmem:[#allocation152_spill] sm:$0xff] }
 0x4c8   : > { %3924 = vst.msk [vmem:[%s5182_s29 + $0x120] sm:$0xff] %vm7756_vm5, %v4260_v58  ;;  %v3091_v40 = vadd.f32 %v3010_v24, %v2002_v8  ;;  %v3000_v62 = vpop.permute.xlu1 %2999  ;;  %v7770_v58 = vld [vmem:[#allocation4_spill] sm:$0xff]  ;;  %vm7813_vm5 = vmmov %vm7750_vm3 }
 0x4c9   : > { %v3086_v2 = vadd.f32 %v3000_v62, %v1997_v13  ;;  %v2009_v24 = vadd.f32 %v7770_v58, %v7769_v60 }
 0x4ca   : > { %3156 = vrot.lane.b32.xlu0 %v3091_v40, %s4451_s7  ;;  %v4262_v6 = vpop.eup %4261  ;;  %v7771_v40 = vld [vmem:[#allocation42_spill] sm:$0xff] }
 0x4cb   : > { %v3014_v20 = vpop.permute.xlu0 %3013  ;;  %3928 = vst.msk [vmem:[%s5182_s29 + $0x140] sm:$0xff] %vm7759_vm7, %v4262_v6  ;;  %3138 = vrot.lane.b32.xlu1 %v3086_v2, %s4451_s7  ;;  %v2016_v62 = vadd.f32 %v7772_v52, %v7771_v40  ;;  %v7773_v2 = vld [vmem:[#allocation156_spill] sm:$0xff]  ;;  %v7789_v52 = vld [vmem:[#allocation118_spill] sm:$0xff]  ;;  %vm7814_vm7 = vmmov %vm7750_vm3 }
 0x4cc   : > { %v3093_v28 = vadd.f32 %v3014_v20, %v2004_v61  ;;  %v3004_v16 = vpop.permute.xlu1 %3003  ;;  %v2011_v6 = vadd.f32 %v7773_v2, %v7672_v1  ;;  %v7776_v1 = vld [vmem:[#allocation176_spill] sm:$0xff] }
 0x4cd   : > { %v3088_v34 = vadd.f32 %v3004_v16, %v1999_v10  ;;  %v7774_v10 = vld [vmem:[#allocation169_spill] sm:$0xff]  ;;  %v7790_v2 = vld [vmem:[#allocation172_spill] sm:$0xff] }
 0x4ce   : > { %3164 = vrot.lane.b32.xlu0 %v3093_v28, %s4451_s7  ;;  %v2018_v28 = vadd.f32 %v7673_v9, %v7774_v10 }
 0x4cf   : > { %v3018_v56 = vpop.permute.xlu0 %3017  ;;  %3146 = vrot.lane.b32.xlu1 %v3088_v34, %s4451_s7 }
 0x4d0   : > { %v3095_v47 = vadd.f32 %v3018_v56, %v2006_v26  ;;  %v3008_v41 = vpop.permute.xlu1 %3007  ;;  %v7775_v26 = vld [vmem:[#allocation161_spill] sm:$0xff] }
 0x4d1   : > { %v3090_v46 = vadd.f32 %v3008_v41, %v2001_v36  ;;  %v2013_v34 = vadd.f32 %v7674_v45, %v7775_v26  ;;  %v2020_v36 = vadd.f32 %v7776_v1, %v7676_v30  ;;  %v7777_v41 = vld [vmem:[#allocation114_spill] sm:$0xff] }
 0x4d2   : > { %3172 = vrot.lane.b32.xlu0 %v3095_v47, %s4451_s7 }
 0x4d3   : > { %v3022_v37 = vpop.permute.xlu0 %3021  ;;  %3154 = vrot.lane.b32.xlu1 %v3090_v46, %s4451_s7 }
 0x4d4   : > { %v3097_v4 = vadd.f32 %v3022_v37, %v2008_v51  ;;  %v3012_v55 = vpop.permute.xlu1 %3011  ;;  %v1563_v51 = vsel %vm865_vm12, %v7778_v0, %v7777_v41  ;;  %v7779_v37 = vld [vmem:[#allocation166_spill] sm:$0xff] }
 0x4d5   : > { %v3092_v3 = vadd.f32 %v3012_v55, %v2003_v11  ;;  %v2015_v38 = vadd.f32 %v7779_v37, %v7678_v33  ;;  %v1595_v48 = vadd.f32 %v1563_v51, %v7669_v49 }
 0x4d6   : > { %3180 = vrot.lane.b32.xlu0 %v3097_v4, %s4451_s7 }
 0x4d7   : > { %v3026_v54 = vpop.permute.xlu0 %3025  ;;  %3162 = vrot.lane.b32.xlu1 %v3092_v3, %s4451_s7  ;;  %v7781_v3 = vld [vmem:[#allocation96_spill] sm:$0xff] }
 0x4d8   : > { %v3099_v15 = vadd.f32 %v3026_v54, %v2010_v32  ;;  %v3016_v35 = vpop.permute.xlu1 %3015  ;;  %v7780_v32 = vld [vmem:[#allocation122_spill] sm:$0xff] }
 0x4d9   : > { %v3094_v39 = vadd.f32 %v3016_v35, %v2005_v53  ;;  %v1565_v54 = vsel %vm865_vm12, %v7781_v3, %v7780_v32  ;;  %v7782_v53 = vld [vmem:[#allocation171_spill] sm:$0xff]  ;;  %v7799_v3 = vld [vmem:[#allocation121_spill] sm:$0xff] }
 0x4da   : > { %3188 = vrot.lane.b32.xlu0 %v3099_v15, %s4451_s7  ;;  %v2017_v15 = vadd.f32 %v7690_v21, %v7782_v53 }
 0x4db   : > { %v3030_v57 = vpop.permute.xlu0 %3029  ;;  %3170 = vrot.lane.b32.xlu1 %v3094_v39, %s4451_s7  ;;  %v7784_v39 = vld [vmem:[#allocation51_spill] sm:$0xff] }
 0x4dc   : > { %v3101_v19 = vadd.f32 %v3030_v57, %v2012_v42  ;;  %v3020_v43 = vpop.permute.xlu1 %3019  ;;  %v7783_v42 = vld [vmem:[#allocation131_spill] sm:$0xff] }
 0x4dd   : > { %v3096_v12 = vadd.f32 %v3020_v43, %v2007_v17  ;;  %v1567_v57 = vsel %vm865_vm12, %v7784_v39, %v7783_v42  ;;  %v1597_v17 = vadd.f32 %v7670_v29, %v1565_v54  ;;  %v7802_v42 = vld [vmem:[#allocation126_spill] sm:$0xff] }
 0x4de   : > { %3196 = vrot.lane.b32.xlu0 %v3101_v19, %s4451_s7  ;;  %v7785_v19 = vld [vmem:[#allocation110_spill] sm:$0xff] }
 0x4df   : > { %v3034_v8 = vpop.permute.xlu0 %3033  ;;  %3178 = vrot.lane.b32.xlu1 %v3096_v12, %s4451_s7  ;;  %v1177_v31 = vsel %vm5582_vm0, %v7785_v19, 0.0  ;;  %v7787_v12 = vld [vmem:[#allocation177_spill] sm:$0xff] }
 0x4e0   : > { %v3103_v27 = vadd.f32 %v3034_v8, %v2014_v44  ;;  %v3024_v13 = vpop.permute.xlu1 %3023  ;;  %v2019_v8 = vadd.f32 %v7787_v12, %v7704_v22  ;;  %v7804_v19 = vld [vmem:[#allocation133_spill] sm:$0xff] }
 0x4e1   : > { %v3098_v5 = vadd.f32 %v3024_v13, %v2009_v24  ;;  %v7788_v13 = vld [vmem:[#allocation137_spill] sm:$0xff] }
 0x4e2   : > { %3204 = vrot.lane.b32.xlu0 %v3103_v27, %s4451_s7  ;;  %v1599_v27 = vadd.f32 %v1567_v57, %v7771_v40  ;;  %v1569_v29 = vsel %vm865_vm12, %v7789_v52, %v7788_v13  ;;  %v7794_v40 = vld [vmem:[#allocation48_spill] sm:$0xff] }
 0x4e3   : > { %v3038_v61 = vpop.permute.xlu0 %3037  ;;  %3186 = vrot.lane.b32.xlu1 %v3098_v5, %s4451_s7  ;;  %v1601_v41 = vadd.f32 %v7673_v9, %v1569_v29 }
 0x4e4   : > { %v3105_v20 = vadd.f32 %v3038_v61, %v2016_v62  ;;  %v3028_v23 = vpop.permute.xlu1 %3027 }
 0x4e5   : > { %v3100_v16 = vadd.f32 %v3028_v23, %v2011_v6  ;;  %v7791_v6 = vld [vmem:[#allocation63_spill] sm:$0xff] }
 0x4e6   : > { %3212 = vrot.lane.b32.xlu0 %v3105_v20, %s4451_s7  ;;  %v2022_v20 = vadd.f32 %v7791_v6, %v7790_v2  ;;  %v7807_v2 = vld [vmem:[#allocation145_spill] sm:$0xff] }
 0x4e7   : > { %v3042_v59 = vpop.permute.xlu0 %3041  ;;  %3194 = vrot.lane.b32.xlu1 %v3100_v16, %s4451_s7 }
 0x4e8   : > { %v3107_v56 = vadd.f32 %v3042_v59, %v2018_v28  ;;  %v3032_v14 = vpop.permute.xlu1 %3031  ;;  %v7792_v28 = vld [vmem:[#allocation106_spill] sm:$0xff]  ;;  %v7793_v59 = vld [vmem:[#allocation179_spill] sm:$0xff] }
 0x4e9   : > { %v3102_v47 = vadd.f32 %v3032_v14, %v2013_v34  ;;  %v1564_v16 = vsel %vm865_vm12, %v1177_v31, %v7792_v28  ;;  %v2021_v26 = vadd.f32 %v7794_v40, %v7793_v59  ;;  %v7795_v14 = vld [vmem:[#allocation127_spill] sm:$0xff] }
 0x4ea   : > { %3220 = vrot.lane.b32.xlu0 %v3107_v56, %s4451_s7  ;;  %v1596_v32 = vadd.f32 %v7674_v45, %v1564_v16 }
 0x4eb   : > { %v3046_v46 = vpop.permute.xlu0 %3045  ;;  %3202 = vrot.lane.b32.xlu1 %v3102_v47, %s4451_s7 }
 0x4ec   : > { %v3109_v11 = vadd.f32 %v3046_v46, %v2020_v36  ;;  %v3036_v4 = vpop.permute.xlu1 %3035  ;;  %v1181_v36 = vsel %vm5663_vm6, %v7795_v14, 0.0 }
 0x4ed   : > { %v3104_v55 = vadd.f32 %v3036_v4, %v2015_v38  ;;  %v7797_v38 = vld [vmem:[#allocation150_spill] sm:$0xff]  ;;  %v1568_v45 = vsel %vm865_vm12, %v1181_v36, %v7802_v42  ;;  %v7809_v36 = vld [vmem:[#allocation148_spill] sm:$0xff] }
 0x4ee   : > { %3228 = vrot.lane.b32.xlu0 %v3109_v11, %s4451_s7  ;;  %v7798_v11 = vld [vmem:[#allocation142_spill] sm:$0xff]  ;;  %v1600_v52 = vadd.f32 %v7690_v21, %v1568_v45 }
 0x4ef   : > { %v2873_v63 = vpop.permute.xlu0 %2872  ;;  %3210 = vrot.lane.b32.xlu1 %v3104_v55, %s4451_s7  ;;  %v1571_v4 = vsel %vm865_vm12, %v7798_v11, %v7797_v38 }
 0x4f0   : > { %v2945_v35 = vadd.f32 %v2873_v63, %v1595_v48  ;;  %v3040_v7 = vpop.permute.xlu1 %3039  ;;  %v1179_v63 = vsel %vm5631_vm4, %v7799_v3, 0.0 }
 0x4f1   : > { %v3106_v18 = vadd.f32 %v3040_v7, %v2017_v15  ;;  %v7801_v15 = vld [vmem:[#allocation130_spill] sm:$0xff] }
 0x4f2   : > { %v3288_v49 = vadd.f32 %v6654_v50, %v2945_v35  ;;  %v1566_v35 = vsel %vm865_vm12, %v1179_v63, %v7801_v15 }
 0x4f3   : > { %v2877_v44 = vpop.permute.xlu0 %2876  ;;  %3218 = vrot.lane.b32.xlu1 %v3106_v18, %s4451_s7  ;;  %v1603_v18 = vadd.f32 %v1571_v4, %v7676_v30  ;;  %v1598_v13 = vadd.f32 %v1566_v35, %v7678_v33 }
 0x4f4   : > { %vm3352_vm8 = vcmp.ge.f32.partialorder %v3288_v49, 0.0  ;;  %v3416_v60 = vmul.f32 0.2, %v3288_v49  ;;  %v2947_v58 = vadd.f32 %v2877_v44, %v1597_v17  ;;  %v3044_v24 = vpop.permute.xlu1 %3043  ;;  %v7803_v17 = vld [vmem:[#allocation101_spill] sm:$0xff] }
 0x4f5   : > { %v3108_v61 = vadd.f32 %v3044_v24, %v2019_v8  ;;  %v1573_v43 = vsel %vm865_vm12, %v7804_v19, %v7803_v17 }
 0x4f6   : > { %v3480_v62 = vsel %vm3352_vm8, %v3288_v49, %v3416_v60  ;;  %v3292_v5 = vadd.f32 %v6654_v50, %v2947_v58  ;;  %v7805_v58 = vld [vmem:[#allocation136_spill] sm:$0xff]  ;;  %v1605_v16 = vadd.f32 %v7791_v6, %v1573_v43  ;;  %vm7815_vm8 = vmmov %vm7750_vm3 }
 0x4f7   : > { %v4076_v23 = vmul.f32 -1.442695, %v3480_v62  ;;  %v2881_v10 = vpop.permute.xlu0 %2880  ;;  %3226 = vrot.lane.b32.xlu1 %v3108_v61, %s4451_s7 }
 0x4f8   : > { %vm3356_vm0 = vcmp.ge.f32.partialorder %v3292_v5, 0.0  ;;  %v3420_v34 = vmul.f32 0.2, %v3292_v5  ;;  %v2949_v56 = vadd.f32 %v2881_v10, %v1599_v27  ;;  %v3048_v47 = vpop.permute.xlu1 %3047  ;;  %v1183_v27 = vsel %vm7572_vm11, %v7805_v58, 0.0 }
 0x4f9   : > { %4263 = vpow2.f32 %v4076_v23  ;;  %v3110_v46 = vadd.f32 %v3048_v47, %v2021_v26  ;;  %v3111_v37 = vadd.f32 %v3048_v47, %v2022_v20  ;;  %v1185_v23 = vsel %vm7643_vm2, %v7807_v2, 0.0 }
 0x4fa   : > { %v3484_v0 = vsel %vm3356_vm0, %v3292_v5, %v3420_v34  ;;  %v3296_v51 = vadd.f32 %v6654_v50, %v2949_v56  ;;  %v1570_v47 = vsel %vm865_vm12, %v1183_v27, %v7809_v36  ;;  %vm7816_vm0 = vmmov %vm7750_vm3 }
 0x4fb   : > { %v4080_v55 = vmul.f32 -1.442695, %v3484_v0  ;;  %v2885_v48 = vpop.permute.xlu0 %2884  ;;  %3236 = vrot.lane.b32.xlu0 %v3111_v37, %s4451_s7  ;;  %3234 = vrot.lane.b32.xlu1 %v3110_v46, %s4451_s7 }
 0x4fc   : > { %vm3360_vm6 = vcmp.ge.f32.partialorder %v3296_v51, 0.0  ;;  %v3424_v9 = vmul.f32 0.2, %v3296_v51  ;;  %v2951_v53 = vadd.f32 %v2885_v48, %v1601_v41  ;;  %v2875_v7 = vpop.permute.xlu1 %2874 }
 0x4fd   : > { %4265 = vpow2.f32 %v4080_v55  ;;  %v2946_v49 = vadd.f32 %v2875_v7, %v1596_v32  ;;  %v1602_v55 = vadd.f32 %v1570_v47, %v7704_v22  ;;  %v7810_v32 = vld [vmem:[#allocation86_spill] sm:$0xff] }
 0x4fe   : > { %v3488_v39 = vsel %vm3360_vm6, %v3296_v51, %v3424_v9  ;;  %v3300_v57 = vadd.f32 %v6654_v50, %v2951_v53  ;;  %v1572_v3 = vsel %vm865_vm12, %v1185_v23, %v7810_v32  ;;  %vm7817_vm6 = vmmov %vm7816_vm0 }
 0x4ff   : > { %v4084_v31 = vmul.f32 -1.442695, %v3488_v39  ;;  %v2889_v44 = vpop.permute.xlu0 %2888  ;;  %v3291_v8 = vadd.f32 %v6654_v50, %v2946_v49  ;;  %v1604_v7 = vadd.f32 %v7794_v40, %v1572_v3 }
 0x500   : > { %vm3364_vm4 = vcmp.ge.f32.partialorder %v3300_v57, 0.0  ;;  %v3428_v12 = vmul.f32 0.2, %v3300_v57  ;;  %v2953_v60 = vadd.f32 %v2889_v44, %v1603_v18  ;;  %v2879_v30 = vpop.permute.xlu1 %2878 }
 0x501   : > { %4267 = vpow2.f32 %v4084_v31  ;;  %vm3355_vm9 = vcmp.ge.f32.partialorder %v3291_v8, 0.0  ;;  %v3419_v62 = vmul.f32 0.2, %v3291_v8  ;;  %v2948_v28 = vadd.f32 %v2879_v30, %v1598_v13 }
 0x502   : > { %v3492_v29 = vsel %vm3364_vm4, %v3300_v57, %v3428_v12  ;;  %v3304_v5 = vadd.f32 %v6654_v50, %v2953_v60  ;;  %vm7818_vm4 = vmmov %vm7816_vm0 }
 0x503   : > { %v4264_v61 = vpop.eup %4263  ;;  %v4088_v10 = vmul.f32 -1.442695, %v3492_v29  ;;  %v2893_v59 = vpop.permute.xlu0 %2892  ;;  %v3483_v33 = vsel %vm3355_vm9, %v3291_v8, %v3419_v62  ;;  %v3295_v56 = vadd.f32 %v6654_v50, %v2948_v28 }
 0x504   : > { %v3736_v26 = vadd.f32 1.0, %v4264_v61  ;;  %vm3368_vm11 = vcmp.ge.f32.partialorder %v3304_v5, 0.0  ;;  %v3432_v34 = vmul.f32 0.2, %v3304_v5  ;;  %v4079_v21 = vmul.f32 -1.442695, %v3483_v33  ;;  %v2883_v1 = vpop.permute.xlu1 %2882 }
 0x505   : > { %4269 = vpow2.f32 %v4088_v10  ;;  %v2955_v14 = vadd.f32 %v2893_v59, %v1605_v16  ;;  %v2950_v0 = vadd.f32 %v2883_v1, %v1600_v52  ;;  %vm3359_vm2 = vcmp.ge.f32.partialorder %v3295_v56, 0.0 }
 0x506   : > { %4271 = vrcp.f32 %v3736_v26  ;;  %v3496_v41 = vsel %vm3368_vm11, %v3304_v5, %v3432_v34  ;;  %v3423_v46 = vmul.f32 0.2, %v3295_v56  ;;  %vm7819_vm11 = vmmov %vm7816_vm0 }
 0x507   : > { %v4266_v51 = vpop.eup %4265  ;;  %4273 = vpow2.f32 %v4079_v21  ;;  %v4092_v6 = vmul.f32 -1.442695, %v3496_v41  ;;  %v3308_v38 = vadd.f32 %v6654_v50, %v2955_v14  ;;  %v3299_v11 = vadd.f32 %v6654_v50, %v2950_v0 }
 0x508   : > { %v3740_v37 = vadd.f32 1.0, %v4266_v51  ;;  %v3487_v4 = vsel %vm3359_vm2, %v3295_v56, %v3423_v46  ;;  %v2887_v48 = vpop.permute.xlu1 %2886 }
 0x509   : > { %4275 = vpow2.f32 %v4092_v6  ;;  %v4083_v54 = vmul.f32 -1.442695, %v3487_v4  ;;  %vm3372_vm10 = vcmp.ge.f32.partialorder %v3308_v38, 0.0  ;;  %v3436_v63 = vmul.f32 0.2, %v3308_v38 }
 0x50a   : > { %4277 = vrcp.f32 %v3740_v37  ;;  %vm3363_vm1 = vcmp.ge.f32.partialorder %v3299_v11, 0.0  ;;  %v3427_v53 = vmul.f32 0.2, %v3299_v11  ;;  %v2952_v15 = vadd.f32 %v2887_v48, %v1602_v55 }
 0x50b   : > { %v4268_v9 = vpop.eup %4267  ;;  %4279 = vpow2.f32 %v4083_v54  ;;  %v3500_v50 = vsel %vm3372_vm10, %v3308_v38, %v3436_v63  ;;  %vm7820_vm10 = vmmov %vm7816_vm0 }
 0x50c   : > { %v3744_v35 = vadd.f32 1.0, %v4268_v9  ;;  %v4096_v42 = vmul.f32 -1.442695, %v3500_v50  ;;  %v3491_v22 = vsel %vm3363_vm1, %v3299_v11, %v3427_v53  ;;  %v3303_v45 = vadd.f32 %v7001_v25, %v2952_v15  ;;  %v2891_v39 = vpop.permute.xlu1 %2890 }
 0x50d   : > { %v4087_v57 = vmul.f32 -1.442695, %v3491_v22  ;;  %v2954_v49 = vadd.f32 %v2891_v39, %v1604_v7 }
 0x50e   : > { %4281 = vrcp.f32 %v3744_v35  ;;  %vm3367_vm12 = vcmp.ge.f32.partialorder %v3303_v45, 0.0  ;;  %v3431_v17 = vmul.f32 0.2, %v3303_v45 }
 0x50f   : > { %v4270_v18 = vpop.eup %4269  ;;  %4283 = vpow2.f32 %v4096_v42  ;;  %v3307_v43 = vadd.f32 %v7001_v25, %v2954_v49 }
 0x510   : > { %v4272_v19 = vpop.eup %4271  ;;  %v3748_v40 = vadd.f32 1.0, %v4270_v18  ;;  %4285 = vpow2.f32 %v4087_v57  ;;  %v3495_v44 = vsel %vm3367_vm12, %v3303_v45, %v3431_v17 }
 0x511   : > { %v4274_v31 = vpop.eup %4273  ;;  %3929 = vst.msk [vmem:[%s5182_s29 + $0x148] sm:$0xff] %vm7811_vm13, %v4272_v19  ;;  %v4091_v8 = vmul.f32 -1.442695, %v3495_v44  ;;  %vm3371_vm15 = vcmp.ge.f32.partialorder %v3307_v43, 0.0  ;;  %v3435_v58 = vmul.f32 0.2, %v3307_v43 }
 0x512   : > { %4287 = vrcp.f32 %v3748_v40  ;;  %v3739_v12 = vadd.f32 1.0, %v4274_v31 }
 0x513   : > { %v4276_v60 = vpop.eup %4275  ;;  %v3499_v13 = vsel %vm3371_vm15, %v3307_v43, %v3435_v58 }
 0x514   : > { %v4278_v24 = vpop.eup %4277  ;;  %4289 = vrcp.f32 %v3739_v12  ;;  %v3752_v27 = vadd.f32 1.0, %v4276_v60  ;;  %v4095_v52 = vmul.f32 -1.442695, %v3499_v13 }
 0x515   : > { %3933 = vst.msk [vmem:[%s5182_s29 + $0x168] sm:$0xff] %vm7750_vm3, %v4278_v24  ;;  %4291 = vpow2.f32 %v4091_v8  ;;  %v4280_v30 = vpop.eup %4279 }
 0x516   : > { %4293 = vrcp.f32 %v3752_v27  ;;  %v3743_v29 = vadd.f32 1.0, %v4280_v30 }
 0x517   : > { %4295 = vpow2.f32 %v4095_v52 }
 0x518   : > { %v4282_v62 = vpop.eup %4281  ;;  %4297 = vrcp.f32 %v3743_v29 }
 0x519   : > { %v4284_v5 = vpop.eup %4283  ;;  %3937 = vst.msk [vmem:[%s5182_s29 + $0x188] sm:$0xff] %vm7812_vm14, %v4282_v62 }
 0x51a   : > { %v4286_v61 = vpop.eup %4285  ;;  %v3756_v2 = vadd.f32 1.0, %v4284_v5 }
 0x51b   : > { %v3747_v20 = vadd.f32 1.0, %v4286_v61 }
 0x51c   : > { %v4288_v23 = vpop.eup %4287  ;;  %4299 = vrcp.f32 %v3756_v2 }
 0x51d   : > { %3941 = vst.msk [vmem:[%s5182_s29 + $0x1a8] sm:$0xff] %vm7813_vm5, %v4288_v23  ;;  %4301 = vrcp.f32 %v3747_v20 }
 0x51e   : > { %v4290_v10 = vpop.eup %4289 }
 0x51f   : > { %v4292_v28 = vpop.eup %4291  ;;  %3932 = vst.msk [vmem:[%s5182_s29 + $0x160] sm:$0xff] %vm7814_vm7, %v4290_v10 }
 0x520   : > { %v4294_v16 = vpop.eup %4293  ;;  %v3751_v59 = vadd.f32 1.0, %v4292_v28 }
 0x521   : > { %3945 = vst.msk [vmem:[%s5182_s29 + $0x1c8] sm:$0xff] %vm7815_vm8, %v4294_v16  ;;  %v4296_v26 = vpop.eup %4295 }
 0x522   : > { %4303 = vrcp.f32 %v3751_v59  ;;  %v4298_v33 = vpop.eup %4297  ;;  %v3755_v34 = vadd.f32 1.0, %v4296_v26 }
 0x523   : > { %3936 = vst.msk [vmem:[%s5182_s29 + $0x180] sm:$0xff] %vm7816_vm0, %v4298_v33 }
 0x524   : > { %4305 = vrcp.f32 %v3755_v34 }
 0x526   : > { %v4300_v21 = vpop.eup %4299 }
 0x527   : > { %v4302_v56 = vpop.eup %4301  ;;  %3949 = vst.msk [vmem:[%s5182_s29 + $0x1e8] sm:$0xff] %vm7817_vm6, %v4300_v21  ;;  %vm7821_vm6 = vmmov %vm7818_vm4 }
 0x528   : > { %3940 = vst.msk [vmem:[%s5182_s29 + $0x1a0] sm:$0xff] %vm7818_vm4, %v4302_v56  ;;  %v3117_v14 = vpop.permute.xlu0 %3116 }
 0x529   : > { %v3250_v1 = vadd.f32 %v7001_v25, %v3117_v14 }
 0x52b   : > { %vm3314_vm9 = vcmp.ge.f32.partialorder %v3250_v1, 0.0  ;;  %v3378_v36 = vmul.f32 0.2, %v3250_v1 }
 0x52c   : > { %v4304_v47 = vpop.eup %4303  ;;  %v3125_v41 = vpop.permute.xlu0 %3124 }
 0x52d   : > { %3944 = vst.msk [vmem:[%s5182_s29 + $0x1c0] sm:$0xff] %vm7819_vm11, %v4304_v47  ;;  %v3442_v0 = vsel %vm3314_vm9, %v3250_v1, %v3378_v36  ;;  %v3254_v51 = vadd.f32 %v7001_v25, %v3125_v41  ;;  %vm7822_vm11 = vmmov %vm7821_vm6 }
 0x52e   : > { %v4038_v6 = vmul.f32 -1.442695, %v3442_v0  ;;  %v4306_v46 = vpop.eup %4305 }
 0x52f   : > { %vm3318_vm2 = vcmp.ge.f32.partialorder %v3254_v51, 0.0  ;;  %v3382_v37 = vmul.f32 0.2, %v3254_v51  ;;  %3948 = vst.msk [vmem:[%s5182_s29 + $0x1e0] sm:$0xff] %vm7820_vm10, %v4306_v46 }
 0x530   : > { %4307 = vpow2.f32 %v4038_v6  ;;  %v3133_v38 = vpop.permute.xlu0 %3132 }
 0x531   : > { %v3446_v11 = vsel %vm3318_vm2, %v3254_v51, %v3382_v37  ;;  %v3258_v4 = vadd.f32 %v7001_v25, %v3133_v38  ;;  %v3115_v48 = vpop.permute.xlu1 %3114 }
 0x532   : > { %v4042_v55 = vmul.f32 -1.442695, %v3446_v11  ;;  %v3249_v3 = vadd.f32 %v7001_v25, %v3115_v48 }
 0x533   : > { %vm3322_vm1 = vcmp.ge.f32.partialorder %v3258_v4, 0.0  ;;  %v3386_v32 = vmul.f32 0.2, %v3258_v4 }
 0x534   : > { %4309 = vpow2.f32 %v4042_v55  ;;  %v3141_v54 = vpop.permute.xlu0 %3140  ;;  %vm3313_vm12 = vcmp.ge.f32.partialorder %v3249_v3, 0.0  ;;  %v3377_v9 = vmul.f32 0.2, %v3249_v3 }
 0x535   : > { %v3450_v63 = vsel %vm3322_vm1, %v3258_v4, %v3386_v32  ;;  %v3262_v53 = vadd.f32 %v7001_v25, %v3141_v54  ;;  %v3123_v35 = vpop.permute.xlu1 %3122  ;;  %vm7823_vm1 = vmmov %vm7821_vm6 }
 0x536   : > { %v4046_v15 = vmul.f32 -1.442695, %v3450_v63  ;;  %v3441_v50 = vsel %vm3313_vm12, %v3249_v3, %v3377_v9  ;;  %v3253_v42 = vadd.f32 %v7001_v25, %v3123_v35 }
 0x537   : > { %vm3326_vm13 = vcmp.ge.f32.partialorder %v3262_v53, 0.0  ;;  %v3390_v7 = vmul.f32 0.2, %v3262_v53  ;;  %v4037_v22 = vmul.f32 -1.442695, %v3441_v50 }
 0x538   : > { %4311 = vpow2.f32 %v4046_v15  ;;  %v3149_v45 = vpop.permute.xlu0 %3148  ;;  %vm3317_vm15 = vcmp.ge.f32.partialorder %v3253_v42, 0.0  ;;  %v3381_v57 = vmul.f32 0.2, %v3253_v42 }
 0x539   : > { %v3454_v39 = vsel %vm3326_vm13, %v3262_v53, %v3390_v7  ;;  %v3266_v49 = vadd.f32 %v7001_v25, %v3149_v45  ;;  %4313 = vpow2.f32 %v4037_v22  ;;  %v3131_v19 = vpop.permute.xlu1 %3130  ;;  %vm7824_vm13 = vmmov %vm7823_vm1 }
 0x53a   : > { %v4308_v18 = vpop.eup %4307  ;;  %v4050_v17 = vmul.f32 -1.442695, %v3454_v39  ;;  %v3445_v43 = vsel %vm3317_vm15, %v3253_v42, %v3381_v57  ;;  %v3257_v12 = vadd.f32 %v7001_v25, %v3131_v19 }
 0x53b   : > { %v3698_v40 = vadd.f32 1.0, %v4308_v18  ;;  %vm3330_vm3 = vcmp.ge.f32.partialorder %v3266_v49, 0.0  ;;  %v3394_v31 = vmul.f32 0.2, %v3266_v49  ;;  %v4041_v44 = vmul.f32 -1.442695, %v3445_v43 }
 0x53c   : > { %4315 = vpow2.f32 %v4050_v17  ;;  %v3157_v8 = vpop.permute.xlu0 %3156  ;;  %vm3321_vm14 = vcmp.ge.f32.partialorder %v3257_v12, 0.0  ;;  %v3385_v13 = vmul.f32 0.2, %v3257_v12 }
 0x53d   : > { %4317 = vrcp.f32 %v3698_v40  ;;  %v3458_v60 = vsel %vm3330_vm3, %v3266_v49, %v3394_v31  ;;  %v3270_v58 = vadd.f32 %v7001_v25, %v3157_v8  ;;  %v3139_v30 = vpop.permute.xlu1 %3138  ;;  %vm7825_vm3 = vmmov %vm7823_vm1 }
 0x53e   : > { %v4310_v24 = vpop.eup %4309  ;;  %4319 = vpow2.f32 %v4041_v44  ;;  %v4054_v27 = vmul.f32 -1.442695, %v3458_v60  ;;  %v3261_v62 = vadd.f32 %v7001_v25, %v3139_v30  ;;  %v3449_v5 = vsel %vm3321_vm14, %v3257_v12, %v3385_v13 }
 0x53f   : > { %v3702_v52 = vadd.f32 1.0, %v4310_v24  ;;  %vm3334_vm5 = vcmp.ge.f32.partialorder %v3270_v58, 0.0  ;;  %v3398_v29 = vmul.f32 0.2, %v3270_v58  ;;  %v4045_v2 = vmul.f32 -1.442695, %v3449_v5 }
 0x540   : > { %4321 = vpow2.f32 %v4054_v27  ;;  %v3165_v61 = vpop.permute.xlu0 %3164  ;;  %vm3325_vm7 = vcmp.ge.f32.partialorder %v3261_v62, 0.0  ;;  %v3389_v28 = vmul.f32 0.2, %v3261_v62 }
 0x541   : > { %4323 = vrcp.f32 %v3702_v52  ;;  %v3462_v20 = vsel %vm3334_vm5, %v3270_v58, %v3398_v29  ;;  %v3274_v16 = vadd.f32 %v7001_v25, %v3165_v61  ;;  %v3147_v59 = vpop.permute.xlu1 %3146  ;;  %vm7826_vm5 = vmmov %vm7823_vm1 }
 0x542   : > { %v4312_v23 = vpop.eup %4311  ;;  %v4058_v10 = vmul.f32 -1.442695, %v3462_v20  ;;  %4325 = vpow2.f32 %v4045_v2  ;;  %v3265_v33 = vadd.f32 %v7001_v25, %v3147_v59  ;;  %v3453_v21 = vsel %vm3325_vm7, %v3261_v62, %v3389_v28 }
 0x543   : > { %v3706_v26 = vadd.f32 1.0, %v4312_v23  ;;  %v4314_v34 = vpop.eup %4313  ;;  %vm3338_vm8 = vcmp.ge.f32.partialorder %v3274_v16, 0.0  ;;  %v3402_v56 = vmul.f32 0.2, %v3274_v16  ;;  %v4049_v36 = vmul.f32 -1.442695, %v3453_v21 }
 0x544   : > { %4327 = vpow2.f32 %v4058_v10  ;;  %v3173_v14 = vpop.permute.xlu0 %3172  ;;  %v3697_v1 = vadd.f32 1.0, %v4314_v34  ;;  %vm3329_vm0 = vcmp.ge.f32.partialorder %v3265_v33, 0.0  ;;  %v3393_v0 = vmul.f32 0.2, %v3265_v33 }
 0x545   : > { %4329 = vrcp.f32 %v3706_v26  ;;  %v3466_v41 = vsel %vm3338_vm8, %v3274_v16, %v3402_v56  ;;  %v3278_v51 = vadd.f32 %v7001_v25, %v3173_v14  ;;  %v3155_v6 = vpop.permute.xlu1 %3154  ;;  %vm7827_vm8 = vmmov %vm7823_vm1 }
 0x546   : > { %v4316_v47 = vpop.eup %4315  ;;  %4331 = vrcp.f32 %v3697_v1  ;;  %v4062_v38 = vmul.f32 -1.442695, %v3466_v41  ;;  %v3269_v11 = vadd.f32 %v7001_v25, %v3155_v6  ;;  %v3457_v55 = vsel %vm3329_vm0, %v3265_v33, %v3393_v0 }
 0x547   : > { %v4318_v46 = vpop.eup %4317  ;;  %v3710_v37 = vadd.f32 1.0, %v4316_v47  ;;  %4333 = vpow2.f32 %v4049_v36  ;;  %vm3342_vm4 = vcmp.ge.f32.partialorder %v3278_v51, 0.0  ;;  %v3406_v48 = vmul.f32 0.2, %v3278_v51 }
 0x548   : > { %v4320_v4 = vpop.eup %4319  ;;  %3891 = vst.msk [vmem:[%s5182_s29 + $0x18] sm:$0xff] %vm7821_vm6, %v4318_v46  ;;  %v3181_v32 = vpop.permute.xlu0 %3180  ;;  %v4053_v54 = vmul.f32 -1.442695, %v3457_v55  ;;  %vm3333_vm9 = vcmp.ge.f32.partialorder %v3269_v11, 0.0  ;;  %v3397_v53 = vmul.f32 0.2, %v3269_v11  ;;  %vm7828_vm6 = vmmov %vm7823_vm1 }
 0x549   : > { %4335 = vrcp.f32 %v3710_v37  ;;  %v3701_v3 = vadd.f32 1.0, %v4320_v4  ;;  %v3470_v9 = vsel %vm3342_vm4, %v3278_v51, %v3406_v48  ;;  %v3282_v15 = vadd.f32 %v7001_v25, %v3181_v32  ;;  %v3163_v35 = vpop.permute.xlu1 %3162 }
 0x54a   : > { %v4322_v63 = vpop.eup %4321  ;;  %4337 = vpow2.f32 %v4062_v38  ;;  %v4066_v42 = vmul.f32 -1.442695, %v3470_v9  ;;  %v3273_v22 = vadd.f32 %v7001_v25, %v3163_v35  ;;  %v3461_v45 = vsel %vm3333_vm9, %v3269_v11, %v3397_v53  ;;  %vm7829_vm9 = vmmov %vm7823_vm1 }
 0x54b   : > { %v4324_v50 = vpop.eup %4323  ;;  %4339 = vrcp.f32 %v3701_v3  ;;  %v3714_v7 = vadd.f32 1.0, %v4322_v63  ;;  %vm3346_vm2 = vcmp.ge.f32.partialorder %v3282_v15, 0.0  ;;  %v3410_v39 = vmul.f32 0.2, %v3282_v15 }
 0x54c   : > { %3895 = vst.msk [vmem:[%s5182_s29 + $0x38] sm:$0xff] %vm7822_vm11, %v4324_v50  ;;  %4341 = vpow2.f32 %v4053_v54  ;;  %v3189_v57 = vpop.permute.xlu0 %3188  ;;  %v4326_v49 = vpop.eup %4325  ;;  %v4057_v18 = vmul.f32 -1.442695, %v3461_v45  ;;  %vm3337_vm10 = vcmp.ge.f32.partialorder %v3273_v22, 0.0  ;;  %v3401_v17 = vmul.f32 0.2, %v3273_v22 }
 0x54d   : > { %4343 = vrcp.f32 %v3714_v7  ;;  %v3705_v40 = vadd.f32 1.0, %v4326_v49  ;;  %v3474_v43 = vsel %vm3346_vm2, %v3282_v15, %v3410_v39  ;;  %v3286_v31 = vadd.f32 %v7001_v25, %v3189_v57  ;;  %v3171_v44 = vpop.permute.xlu1 %3170 }
 0x54e   : > { %v4328_v19 = vpop.eup %4327  ;;  %4345 = vpow2.f32 %v4066_v42  ;;  %v4070_v60 = vmul.f32 -1.442695, %v3474_v43  ;;  %v3465_v58 = vsel %vm3337_vm10, %v3273_v22, %v3401_v17  ;;  %v3277_v52 = vadd.f32 %v7001_v25, %v3171_v44  ;;  %vm7830_vm10 = vmmov %vm7823_vm1 }
 0x54f   : > { %v4330_v12 = vpop.eup %4329  ;;  %v3718_v8 = vadd.f32 1.0, %v4328_v19  ;;  %4347 = vpow2.f32 %v4057_v18  ;;  %v4061_v24 = vmul.f32 -1.442695, %v3465_v58  ;;  %vm3350_vm12 = vcmp.ge.f32.partialorder %v3286_v31, 0.0 }
 0x550   : > { %3899 = vst.msk [vmem:[%s5182_s29 + $0x58] sm:$0xff] %vm7823_vm1, %v4330_v12  ;;  %4349 = vrcp.f32 %v3705_v40  ;;  %v3414_v27 = vmul.f32 0.2, %v3286_v31  ;;  %v3197_v13 = vpop.permute.xlu0 %3196  ;;  %v4332_v30 = vpop.eup %4331  ;;  %vm3341_vm15 = vcmp.ge.f32.partialorder %v3277_v52, 0.0  ;;  %v3405_v28 = vmul.f32 0.2, %v3277_v52 }
 0x551   : > { %4351 = vrcp.f32 %v3718_v8  ;;  %v3290_v29 = vadd.f32 %v7001_v25, %v3197_v13  ;;  %v4334_v62 = vpop.eup %4333  ;;  %3890 = vst.msk [vmem:[%s5182_s29 + $0x10] sm:$0xff] %vm7824_vm13, %v4332_v30  ;;  %v3179_v61 = vpop.permute.xlu1 %3178 }
 0x552   : > { %4353 = vpow2.f32 %v4070_v60  ;;  %v3478_v5 = vsel %vm3350_vm12, %v3286_v31, %v3414_v27  ;;  %v3709_v20 = vadd.f32 1.0, %v4334_v62  ;;  %v3281_v59 = vadd.f32 %v7001_v25, %v3179_v61  ;;  %vm7831_vm12 = vmmov %vm7825_vm3 }
 0x553   : > { %v4336_v2 = vpop.eup %4335  ;;  %4355 = vpow2.f32 %v4061_v24  ;;  %v4074_v23 = vmul.f32 -1.442695, %v3478_v5  ;;  %vm3354_vm14 = vcmp.ge.f32.partialorder %v3290_v29, 0.0  ;;  %v3418_v16 = vmul.f32 0.2, %v3290_v29 }
 0x554   : > { %v4338_v10 = vpop.eup %4337  ;;  %3903 = vst.msk [vmem:[%s5182_s29 + $0x78] sm:$0xff] %vm7825_vm3, %v4336_v2  ;;  %v3205_v26 = vpop.permute.xlu0 %3204  ;;  %4357 = vrcp.f32 %v3709_v20  ;;  %v3469_v14 = vsel %vm3341_vm15, %v3277_v52, %v3405_v28  ;;  %vm3345_vm7 = vcmp.ge.f32.partialorder %v3281_v59, 0.0  ;;  %v3409_v6 = vmul.f32 0.2, %v3281_v59  ;;  %vm7832_vm15 = vmmov %vm7825_vm3 }
 0x555   : > { %v4340_v33 = vpop.eup %4339  ;;  %v3722_v34 = vadd.f32 1.0, %v4338_v10  ;;  %v3294_v21 = vadd.f32 %v7001_v25, %v3205_v26  ;;  %4359 = vpow2.f32 %v4074_v23  ;;  %v3482_v1 = vsel %vm3354_vm14, %v3290_v29, %v3418_v16  ;;  %v3187_v36 = vpop.permute.xlu1 %3186  ;;  %vm7833_vm14 = vmmov %vm7826_vm5 }
 0x556   : > { %v4342_v56 = vpop.eup %4341  ;;  %3894 = vst.msk [vmem:[%s5182_s29 + $0x30] sm:$0xff] %vm7826_vm5, %v4340_v33  ;;  %v4065_v0 = vmul.f32 -1.442695, %v3469_v14  ;;  %v3285_v37 = vadd.f32 %v7001_v25, %v3187_v36  ;;  %v4078_v55 = vmul.f32 -1.442695, %v3482_v1  ;;  %v3473_v54 = vsel %vm3345_vm7, %v3281_v59, %v3409_v6 }
 0x557   : > { %v4344_v47 = vpop.eup %4343  ;;  %4361 = vrcp.f32 %v3722_v34  ;;  %v3713_v41 = vadd.f32 1.0, %v4342_v56  ;;  %vm3358_vm0 = vcmp.ge.f32.partialorder %v3294_v21, 0.0  ;;  %v3422_v46 = vmul.f32 0.2, %v3294_v21 }
 0x558   : > { %v4346_v51 = vpop.eup %4345  ;;  %3907 = vst.msk [vmem:[%s5182_s29 + $0x98] sm:$0xff] %vm7827_vm8, %v4344_v47  ;;  %v3213_v38 = vpop.permute.xlu0 %3212  ;;  %v4069_v15 = vmul.f32 -1.442695, %v3473_v54  ;;  %vm3349_vm4 = vcmp.ge.f32.partialorder %v3285_v37, 0.0  ;;  %v3413_v7 = vmul.f32 0.2, %v3285_v37  ;;  %vm7834_vm8 = vmmov %vm7826_vm5 }
 0x559   : > { %v4348_v11 = vpop.eup %4347  ;;  %4363 = vrcp.f32 %v3713_v41  ;;  %v3726_v4 = vadd.f32 1.0, %v4346_v51  ;;  %v3298_v48 = vadd.f32 %v7001_v25, %v3213_v38  ;;  %v3486_v63 = vsel %vm3358_vm0, %v3294_v21, %v3422_v46  ;;  %v3195_v9 = vpop.permute.xlu1 %3194 }
 0x55a   : > { %v4350_v32 = vpop.eup %4349  ;;  %v3717_v3 = vadd.f32 1.0, %v4348_v11  ;;  %4365 = vpow2.f32 %v4065_v0  ;;  %v4082_v35 = vmul.f32 -1.442695, %v3486_v63  ;;  %v3289_v57 = vadd.f32 %v7001_v25, %v3195_v9 }
 0x55b   : > { %v4352_v53 = vpop.eup %4351  ;;  %3898 = vst.msk [vmem:[%s5182_s29 + $0x50] sm:$0xff] %vm7828_vm6, %v4350_v32  ;;  %4367 = vrcp.f32 %v3726_v4  ;;  %vm3362_vm11 = vcmp.ge.f32.partialorder %v3298_v48, 0.0  ;;  %v3426_v42 = vmul.f32 0.2, %v3298_v48  ;;  %v3477_v17 = vsel %vm3349_vm4, %v3285_v37, %v3413_v7  ;;  %vm7835_vm6 = vmmov %vm7826_vm5 }
 0x55c   : > { %v4354_v50 = vpop.eup %4353  ;;  %3911 = vst.msk [vmem:[%s5182_s29 + $0xb8] sm:$0xff] %vm7829_vm9, %v4352_v53  ;;  %4369 = vrcp.f32 %v3717_v3  ;;  %v3221_v22 = vpop.permute.xlu0 %3220  ;;  %v4073_v31 = vmul.f32 -1.442695, %v3477_v17  ;;  %vm3353_vm2 = vcmp.ge.f32.partialorder %v3289_v57, 0.0  ;;  %v3417_v8 = vmul.f32 0.2, %v3289_v57  ;;  %vm7836_vm9 = vmmov %vm7826_vm5 }
 0x55d   : > { %v4356_v45 = vpop.eup %4355  ;;  %v3730_v39 = vadd.f32 1.0, %v4354_v50  ;;  %4371 = vpow2.f32 %v4078_v55  ;;  %v3302_v49 = vadd.f32 %v7001_v25, %v3221_v22  ;;  %v3490_v19 = vsel %vm3362_vm11, %v3298_v48, %v3426_v42  ;;  %v3203_v40 = vpop.permute.xlu1 %3202 }
 0x55e   : > { %v3721_v18 = vadd.f32 1.0, %v4356_v45  ;;  %4373 = vpow2.f32 %v4069_v15  ;;  %v4358_v43 = vpop.eup %4357  ;;  %v4086_v44 = vmul.f32 -1.442695, %v3490_v19  ;;  %v3293_v13 = vadd.f32 %v7001_v25, %v3203_v40 }
 0x55f   : > { %4375 = vrcp.f32 %v3730_v39  ;;  %v4360_v12 = vpop.eup %4359  ;;  %3902 = vst.msk [vmem:[%s5182_s29 + $0x70] sm:$0xff] %vm7830_vm10, %v4358_v43  ;;  %vm3366_vm1 = vcmp.ge.f32.partialorder %v3302_v49, 0.0  ;;  %v3430_v60 = vmul.f32 0.2, %v3302_v49  ;;  %v3481_v52 = vsel %vm3353_vm2, %v3289_v57, %v3417_v8  ;;  %vm7837_vm2 = vmmov %vm7826_vm5 }
 0x560   : > { %4377 = vrcp.f32 %v3721_v18  ;;  %v3229_v58 = vpop.permute.xlu0 %3228  ;;  %v3734_v27 = vadd.f32 1.0, %v4360_v12  ;;  %v4077_v61 = vmul.f32 -1.442695, %v3481_v52  ;;  %vm3357_vm13 = vcmp.ge.f32.partialorder %v3293_v13, 0.0 }
 0x561   : > { %v4362_v24 = vpop.eup %4361  ;;  %4379 = vpow2.f32 %v4082_v35  ;;  %v3306_v30 = vadd.f32 %v7001_v25, %v3229_v58  ;;  %v3494_v29 = vsel %vm3366_vm1, %v3302_v49, %v3430_v60  ;;  %v3211_v62 = vpop.permute.xlu1 %3210  ;;  %v3421_v23 = vmul.f32 0.2, %v3293_v13  ;;  %vm7838_vm1 = vmmov %vm7837_vm2 }
 0x562   : > { %3915 = vst.msk [vmem:[%s5182_s29 + $0xd8] sm:$0xff] %vm7831_vm12, %v4362_v24  ;;  %4381 = vpow2.f32 %v4073_v31  ;;  %v4090_v2 = vmul.f32 -1.442695, %v3494_v29  ;;  %v3297_v59 = vadd.f32 %v7001_v25, %v3211_v62  ;;  %vm7839_vm12 = vmmov %vm7838_vm1 }
 0x563   : > { %v4364_v5 = vpop.eup %4363  ;;  %4383 = vrcp.f32 %v3734_v27  ;;  %vm3370_vm3 = vcmp.ge.f32.partialorder %v3306_v30, 0.0  ;;  %v3434_v10 = vmul.f32 0.2, %v3306_v30  ;;  %v3485_v33 = vsel %vm3357_vm13, %v3293_v13, %v3421_v23  ;;  %vm7840_vm13 = vmmov %vm7838_vm1 }
 0x564   : > { %v4366_v20 = vpop.eup %4365  ;;  %3906 = vst.msk [vmem:[%s5182_s29 + $0x90] sm:$0xff] %vm7832_vm15, %v4364_v5  ;;  %4385 = vpow2.f32 %v4086_v44  ;;  %v4081_v14 = vmul.f32 -1.442695, %v3485_v33  ;;  %vm3361_vm7 = vcmp.ge.f32.partialorder %v3297_v59, 0.0  ;;  %v3425_v41 = vmul.f32 0.2, %v3297_v59  ;;  %vm7841_vm15 = vmmov %vm7838_vm1 }
 0x565   : > { %v4368_v28 = vpop.eup %4367  ;;  %v3725_v16 = vadd.f32 1.0, %v4366_v20  ;;  %4387 = vpow2.f32 %v4077_v61  ;;  %v3498_v34 = vsel %vm3370_vm3, %v3306_v30, %v3434_v10  ;;  %v3219_v21 = vpop.permute.xlu1 %3218  ;;  %vm7842_vm3 = vmmov %vm7838_vm1 }
 0x566   : > { %v4370_v26 = vpop.eup %4369  ;;  %3919 = vst.msk [vmem:[%s5182_s29 + $0xf8] sm:$0xff] %vm7833_vm14, %v4368_v28  ;;  %4389 = vpow2.f32 %v4090_v2  ;;  %v4094_v47 = vmul.f32 -1.442695, %v3498_v34  ;;  %v3301_v0 = vadd.f32 %v7001_v25, %v3219_v21  ;;  %v3489_v37 = vsel %vm3361_vm7, %v3297_v59, %v3425_v41  ;;  %vm7843_vm14 = vmmov %vm7838_vm1 }
 0x567   : > { %v4372_v56 = vpop.eup %4371  ;;  %3910 = vst.msk [vmem:[%s5182_s29 + $0xb0] sm:$0xff] %vm7826_vm5, %v4370_v26  ;;  %4391 = vrcp.f32 %v3725_v16  ;;  %v4085_v55 = vmul.f32 -1.442695, %v3489_v37  ;;  %vm7844_vm5 = vmmov %vm7838_vm1 }
 0x568   : > { %v4374_v1 = vpop.eup %4373  ;;  %v3738_v36 = vadd.f32 1.0, %v4372_v56  ;;  %4393 = vpow2.f32 %v4081_v14  ;;  %vm3365_vm0 = vcmp.ge.f32.partialorder %v3301_v0, 0.0  ;;  %v3429_v38 = vmul.f32 0.2, %v3301_v0  ;;  %vm7845_vm7 = vmmov %vm7838_vm1 }
 0x569   : > { %v4376_v51 = vpop.eup %4375  ;;  %v3729_v6 = vadd.f32 1.0, %v4374_v1  ;;  %v3227_v11 = vpop.permute.xlu1 %3226 }
 0x56a   : > { %v4378_v46 = vpop.eup %4377  ;;  %3923 = vst.msk [vmem:[%s5182_s29 + $0x118] sm:$0xff] %vm7834_vm8, %v4376_v51  ;;  %4395 = vrcp.f32 %v3738_v36  ;;  %v3305_v48 = vadd.f32 %v7001_v25, %v3227_v11  ;;  %v3493_v54 = vsel %vm3365_vm0, %v3301_v0, %v3429_v38  ;;  %vm7846_vm8 = vmmov %vm7838_vm1 }
 0x56b   : > { %v4380_v4 = vpop.eup %4379  ;;  %3914 = vst.msk [vmem:[%s5182_s29 + $0xd0] sm:$0xff] %vm7835_vm6, %v4378_v46  ;;  %4397 = vrcp.f32 %v3729_v6  ;;  %v4089_v53 = vmul.f32 -1.442695, %v3493_v54  ;;  %vm7847_vm0 = vmmov %vm7838_vm1 }
 0x56c   : > { %v4382_v32 = vpop.eup %4381  ;;  %v3742_v3 = vadd.f32 1.0, %v4380_v4  ;;  %4399 = vpow2.f32 %v4094_v47  ;;  %vm3369_vm4 = vcmp.ge.f32.partialorder %v3305_v48, 0.0  ;;  %v3433_v35 = vmul.f32 0.2, %v3305_v48  ;;  %vm7848_vm6 = vmmov %vm7847_vm0 }
 0x56d   : > { %v4384_v63 = vpop.eup %4383  ;;  %v3733_v9 = vadd.f32 1.0, %v4382_v32  ;;  %4401 = vpow2.f32 %v4085_v55  ;;  %v3237_v50 = vpop.permute.xlu0 %3236 }
 0x56e   : > { %v4386_v15 = vpop.eup %4385  ;;  %3927 = vst.msk [vmem:[%s5182_s29 + $0x138] sm:$0xff] %vm7836_vm9, %v4384_v63  ;;  %4403 = vrcp.f32 %v3742_v3  ;;  %v3235_v7 = vpop.permute.xlu1 %3234  ;;  %v3310_v45 = vadd.f32 %v7001_v25, %v3237_v50  ;;  %v3497_v18 = vsel %vm3369_vm4, %v3305_v48, %v3433_v35  ;;  %vm7849_vm4 = vmmov %vm7847_vm0 }
 0x56f   : > { %v4388_v42 = vpop.eup %4387  ;;  %4405 = vrcp.f32 %v3733_v9  ;;  %v3746_v22 = vadd.f32 1.0, %v4386_v15  ;;  %v3309_v39 = vadd.f32 %v7001_v25, %v3235_v7  ;;  %v4093_v40 = vmul.f32 -1.442695, %v3497_v18  ;;  %vm7850_vm9 = vmmov %vm7847_vm0 }
 0x570   : > { %v4390_v57 = vpop.eup %4389  ;;  %v3737_v49 = vadd.f32 1.0, %v4388_v42  ;;  %4407 = vpow2.f32 %v4089_v53  ;;  %vm3374_vm11 = vcmp.ge.f32.partialorder %v3310_v45, 0.0  ;;  %v3438_v43 = vmul.f32 0.2, %v3310_v45 }
 0x571   : > { %v4392_v17 = vpop.eup %4391  ;;  %4409 = vrcp.f32 %v3746_v22  ;;  %v3750_v19 = vadd.f32 1.0, %v4390_v57  ;;  %vm3373_vm10 = vcmp.ge.f32.partialorder %v3309_v39, 0.0  ;;  %v3437_v31 = vmul.f32 0.2, %v3309_v39 }
 0x572   : > { %3918 = vst.msk [vmem:[%s5182_s29 + $0xf0] sm:$0xff] %vm7837_vm2, %v4392_v17  ;;  %4411 = vrcp.f32 %v3737_v49  ;;  %v4394_v44 = vpop.eup %4393  ;;  %v3502_v8 = vsel %vm3374_vm11, %v3310_v45, %v3438_v43  ;;  %vm7851_vm11 = vmmov %vm7847_vm0 }
 0x573   : > { %4413 = vrcp.f32 %v3750_v19  ;;  %v3741_v12 = vadd.f32 1.0, %v4394_v44  ;;  %v3501_v60 = vsel %vm3373_vm10, %v3309_v39, %v3437_v31  ;;  %v4098_v24 = vmul.f32 -1.442695, %v3502_v8 }
 0x574   : > { %v4396_v25 = vpop.eup %4395  ;;  %4415 = vpow2.f32 %v4093_v40  ;;  %v4097_v27 = vmul.f32 -1.442695, %v3501_v60 }
 0x575   : > { %v4398_v58 = vpop.eup %4397  ;;  %3931 = vst.msk [vmem:[%s5182_s29 + $0x158] sm:$0xff] %vm7838_vm1, %v4396_v25  ;;  %4417 = vrcp.f32 %v3741_v12 }
 0x576   : > { %v4400_v13 = vpop.eup %4399  ;;  %3922 = vst.msk [vmem:[%s5182_s29 + $0x110] sm:$0xff] %vm7839_vm12, %v4398_v58  ;;  %4419 = vpow2.f32 %v4098_v24 }
 0x577   : > { %v4402_v30 = vpop.eup %4401  ;;  %v3754_v52 = vadd.f32 1.0, %v4400_v13  ;;  %4421 = vpow2.f32 %v4097_v27 }
 0x578   : > { %v4404_v29 = vpop.eup %4403  ;;  %v3745_v62 = vadd.f32 1.0, %v4402_v30 }
 0x579   : > { %v4406_v5 = vpop.eup %4405  ;;  %3935 = vst.msk [vmem:[%s5182_s29 + $0x178] sm:$0xff] %vm7840_vm13, %v4404_v29  ;;  %4423 = vrcp.f32 %v3754_v52 }
 0x57a   : > { %v4408_v61 = vpop.eup %4407  ;;  %3926 = vst.msk [vmem:[%s5182_s29 + $0x130] sm:$0xff] %vm7841_vm15, %v4406_v5  ;;  %4425 = vrcp.f32 %v3745_v62 }
 0x57b   : > { %v4410_v2 = vpop.eup %4409  ;;  %v3749_v20 = vadd.f32 1.0, %v4408_v61 }
 0x57c   : > { %v4412_v23 = vpop.eup %4411  ;;  %3939 = vst.msk [vmem:[%s5182_s29 + $0x198] sm:$0xff] %vm7842_vm3, %v4410_v2 }
 0x57d   : > { %v4414_v10 = vpop.eup %4413  ;;  %3930 = vst.msk [vmem:[%s5182_s29 + $0x150] sm:$0xff] %vm7843_vm14, %v4412_v23  ;;  %4427 = vrcp.f32 %v3749_v20 }
 0x57e   : > { %v4416_v28 = vpop.eup %4415  ;;  %3943 = vst.msk [vmem:[%s5182_s29 + $0x1b8] sm:$0xff] %vm7844_vm5, %v4414_v10 }
 0x57f   : > { %v3753_v16 = vadd.f32 1.0, %v4416_v28  ;;  %v4418_v59 = vpop.eup %4417 }
 0x580   : > { %v4420_v26 = vpop.eup %4419  ;;  %3934 = vst.msk [vmem:[%s5182_s29 + $0x170] sm:$0xff] %vm7845_vm7, %v4418_v59 }
 0x581   : > { %4429 = vrcp.f32 %v3753_v16  ;;  %v4422_v33 = vpop.eup %4421  ;;  %v3758_v34 = vadd.f32 1.0, %v4420_v26 }
 0x582   : > { %v3757_v56 = vadd.f32 1.0, %v4422_v33 }
 0x583   : > { %v4424_v21 = vpop.eup %4423  ;;  %4431 = vrcp.f32 %v3758_v34 }
 0x584   : > { %v4426_v14 = vpop.eup %4425  ;;  %3947 = vst.msk [vmem:[%s5182_s29 + $0x1d8] sm:$0xff] %vm7846_vm8, %v4424_v21  ;;  %4433 = vrcp.f32 %v3757_v56 }
 0x585   : > { %3938 = vst.msk [vmem:[%s5182_s29 + $0x190] sm:$0xff] %vm7847_vm0, %v4426_v14 }
 0x587   : > { %v4428_v1 = vpop.eup %4427 }
 0x588   : > { %3942 = vst.msk [vmem:[%s5182_s29 + $0x1b0] sm:$0xff] %vm7848_vm6, %v4428_v1 }
 0x58b   : > { %v4430_v36 = vpop.eup %4429 }
 0x58c   : > { %3946 = vst.msk [vmem:[%s5182_s29 + $0x1d0] sm:$0xff] %vm7849_vm4, %v4430_v36 }
 0x58d   : > { %v4432_v47 = vpop.eup %4431 }
 0x58e   : > { %v4434_v41 = vpop.eup %4433  ;;  %3951 = vst.msk [vmem:[%s5182_s29 + $0x1f8] sm:$0xff] %vm7850_vm9, %v4432_v47 }
 0x58f   : > { %3950 = vst.msk [vmem:[%s5182_s29 + $0x1f0] sm:$0xff] %vm7851_vm11, %v4434_v41 }
 0x590 PF: > { %s13_s12 = sadd.s32 1, %s4443_s12  }
 0x591   : > { %p10_p4 = scmp.ge.s32.totalorder %s13_s12, 4  }
 0x593   :  { %12 = sbr.rel (!%p10_p4) target bundleno = 1 (0x1), region = 62 }

</bundles_post_ra>
